<compile_context>
chip_gen: v6e
topology: v6e:2x2x1
jax: 0.10.0
libtpu: 0.0.40
codegen_flags: <defaults>
</compile_context>

<pallas_src>
import functools

import jax
import jax.numpy as jnp
from jax.experimental import pallas as pl
from jax.experimental.pallas import tpu as pltpu


# ---------------------------------------------------------------------------
# Pallas kernels
# ---------------------------------------------------------------------------

def _conv3x3_gn_relu_kernel(x_ref, w_ref, g_ref, b_ref, mg_ref, mgT_ref, o_ref,
                            *, H, W, eps):
    """3x3 conv (in-kernel im2col, bf16 MXU) + GroupNorm + ReLU.

    x_ref:   (H+2, W+2, Cin) zero-padded NHWC slab, f32
    w_ref:   (9, Cin, N) per-tap weights, bf16   (tap k = kh*3 + kw)
    g_ref/b_ref: (1, N) GroupNorm affine, f32
    mg_ref:  (N, G) one-hot channel->group matrix, f32
    mgT_ref: (G, N) its transpose, f32
    o_ref:   (H*W, N) f32
    """
    Cin = x_ref.shape[2]
    N = w_ref.shape[2]
    G = mg_ref.shape[1]
    Cg = N // G

    x = x_ref[...]                                         # (H+2, W+2, Cin) f32
    acc = None
    for k in range(9):
        dy, dx = k // 3, k % 3
        xw = x[dy:dy + H, dx:dx + W, :].reshape(H * W, Cin).astype(jnp.bfloat16)
        t = jnp.dot(xw, w_ref[k], preferred_element_type=jnp.float32)   # (HW, N)
        acc = t if acc is None else acc + t

    # GroupNorm: two-pass statistics (per group over spatial x channels-in-group),
    # group sums done via hoisted one-hot matmuls to stay lane friendly.
    cnt = float(H * W * Cg)
    s1 = jnp.sum(acc, axis=0, keepdims=True)                              # (1, N)
    mean_g = jnp.dot(s1, mg_ref[...], preferred_element_type=jnp.float32) / cnt
    mean_c = jnp.dot(mean_g, mgT_ref[...], preferred_element_type=jnp.float32)  # (1, N)
    d = acc - mean_c
    s2 = jnp.sum(d * d, axis=0, keepdims=True)                            # (1, N)
    var_g = jnp.dot(s2, mg_ref[...], preferred_element_type=jnp.float32) / cnt
    inv_c = jnp.dot(jax.lax.rsqrt(var_g + eps), mgT_ref[...],
                    preferred_element_type=jnp.float32)                   # (1, N)

    y = d * inv_c * g_ref[...] + b_ref[...]
    o_ref[...] = jnp.maximum(y, 0.0)


def _up2x_sa_fuse_pad_kernel(xs_ref, cc_ref, s_ref, wsa_ref, o_ref, *, H, W):
    """Fused: bilinear x2 upsample of the coarse map (interp-matrix matmul) and
    SpatialAttention gating  out = (1 + sigmoid(sa(x_skip))) * up2x(C).

    The result is written as the zero-padded (H+2, W+2, Cc) NHWC slab that the
    next 3x3 conv consumes directly (saves one pad + one upsample HBM trip).

    xs_ref:  (H*W, Cx)  fine-resolution skip features (attention source), f32
    cc_ref:  (Hc*Wc, Cc) coarse feature tokens (Hc = H/2, Wc = W/2), f32
    s_ref:   (H*W, Hc*Wc) dense bilinear interpolation matrix, f32
    wsa_ref: (Cx, 1)    1x1 attention conv weight, f32
    o_ref:   (H+2, W+2, Cc) f32
    """
    x = xs_ref[...]                                                       # (HW, Cx)
    m = jnp.mean(x, axis=0, keepdims=True)                                # (1, Cx)
    a = jnp.dot(x + m, wsa_ref[...], preferred_element_type=jnp.float32)  # (HW, 1)
    gate = 1.0 + jax.nn.sigmoid(a)                                        # (HW, 1)

    cup = jnp.dot(s_ref[...], cc_ref[...], preferred_element_type=jnp.float32)  # (HW, Cc)
    res = gate * cup
    Cc = res.shape[1]

    o_ref[...] = jnp.zeros_like(o_ref)                      # zero border (padding)
    o_ref[1:H + 1, 1:W + 1, :] = res.reshape(H, W, Cc)      # interior


def _conv_pred_seg_kernel(x_ref, w_ref, bp_ref, ws_ref, bs_ref, o_ref, *, H, W):
    """conv_pred 3x3 (96->16) + bias + ReLU, fused with the linear segmentation
    head 1x1 (16->1) + bias, commuted ahead of the x4 upsample.

    x_ref:  (H+2, W+2, 96) padded slab, f32
    w_ref:  (9, 96, 16) bf16
    bp_ref: (1, 16) f32     ws_ref: (16, 1) f32     bs_ref: (1, 1) f32
    o_ref:  (H*W, 1) f32 logits
    """
    Cin = x_ref.shape[2]
    x = x_ref[...]
    acc = None
    for k in range(9):
        dy, dx = k // 3, k % 3
        xw = x[dy:dy + H, dx:dx + W, :].reshape(H * W, Cin).astype(jnp.bfloat16)
        t = jnp.dot(xw, w_ref[k], preferred_element_type=jnp.float32)
        acc = t if acc is None else acc + t
    acc = jnp.maximum(acc + bp_ref[...], 0.0)                             # (HW, 16)
    logit = jnp.dot(acc, ws_ref[...], preferred_element_type=jnp.float32) + bs_ref[...]
    o_ref[...] = logit


def _upsample4x_sigmoid_kernel(l_ref, uh_ref, uwt_ref, o_ref):
    """x4 bilinear upsample of the 1-channel logit map as two MXU matmuls + sigmoid.

    l_ref: (H0, W0) logits, uh_ref: (Hf, H0), uwt_ref: (W0, Wf), o_ref: (Hf, Wf).
    """
    t = jnp.dot(l_ref[...], uwt_ref[...], preferred_element_type=jnp.float32)  # (H0, Wf)
    y = jnp.dot(uh_ref[...], t, preferred_element_type=jnp.float32)            # (Hf, Wf)
    o_ref[...] = jax.nn.sigmoid(y)


# ---------------------------------------------------------------------------
# pallas_call wrappers (grid over batch; full-spatial blocks per image because
# GroupNorm / SpatialAttention stats and the interp matmul need the whole image)
# ---------------------------------------------------------------------------

_PAR = pltpu.CompilerParams(dimension_semantics=("parallel",))


def conv3x3_gn_relu(xpad, w_tap, gamma, beta, mmat, mmat_t, *, eps=1e-5):
    B, Hp, Wp, Cin = xpad.shape
    H, W = Hp - 2, Wp - 2
    N = w_tap.shape[2]
    G = mmat.shape[1]
    kernel = functools.partial(_conv3x3_gn_relu_kernel, H=H, W=W, eps=eps)
    return pl.pallas_call(
        kernel,
        out_shape=jax.ShapeDtypeStruct((B, H * W, N), jnp.float32),
        grid=(B,),
        in_specs=[
            pl.BlockSpec((pl.Squeezed(), Hp, Wp, Cin), lambda b: (b, 0, 0, 0)),
            pl.BlockSpec((9, Cin, N), lambda b: (0, 0, 0)),
            pl.BlockSpec((1, N), lambda b: (0, 0)),
            pl.BlockSpec((1, N), lambda b: (0, 0)),
            pl.BlockSpec((N, G), lambda b: (0, 0)),
            pl.BlockSpec((G, N), lambda b: (0, 0)),
        ],
        out_specs=pl.BlockSpec((pl.Squeezed(), H * W, N), lambda b: (b, 0, 0)),
        compiler_params=_PAR,
    )(xpad, w_tap, gamma, beta, mmat, mmat_t)


def up2x_sa_fuse_pad(xskip, ccoarse, s_mat, w_sa, *, H, W):
    B, HW, Cx = xskip.shape
    _, HWc, Cc = ccoarse.shape
    kernel = functools.partial(_up2x_sa_fuse_pad_kernel, H=H, W=W)
    return pl.pallas_call(
        kernel,
        out_shape=jax.ShapeDtypeStruct((B, H + 2, W + 2, Cc), jnp.float32),
        grid=(B,),
        in_specs=[
            pl.BlockSpec((pl.Squeezed(), HW, Cx), lambda b: (b, 0, 0)),
            pl.BlockSpec((pl.Squeezed(), HWc, Cc), lambda b: (b, 0, 0)),
            pl.BlockSpec((HW, HWc), lambda b: (0, 0)),
            pl.BlockSpec((Cx, 1), lambda b: (0, 0)),
        ],
        out_specs=pl.BlockSpec((pl.Squeezed(), H + 2, W + 2, Cc), lambda b: (b, 0, 0, 0)),
        compiler_params=_PAR,
    )(xskip, ccoarse, s_mat, w_sa)


def conv_pred_seg(xpad, w_pred, b_pred, w_seg, b_seg):
    B, Hp, Wp, Cin = xpad.shape
    H, W = Hp - 2, Wp - 2
    N = w_pred.shape[2]
    kernel = functools.partial(_conv_pred_seg_kernel, H=H, W=W)
    return pl.pallas_call(
        kernel,
        out_shape=jax.ShapeDtypeStruct((B, H * W, 1), jnp.float32),
        grid=(B,),
        in_specs=[
            pl.BlockSpec((pl.Squeezed(), Hp, Wp, Cin), lambda b: (b, 0, 0, 0)),
            pl.BlockSpec((9, Cin, N), lambda b: (0, 0, 0)),
            pl.BlockSpec((1, N), lambda b: (0, 0)),
            pl.BlockSpec((N, 1), lambda b: (0, 0)),
            pl.BlockSpec((1, 1), lambda b: (0, 0)),
        ],
        out_specs=pl.BlockSpec((pl.Squeezed(), H * W, 1), lambda b: (b, 0, 0)),
        compiler_params=_PAR,
    )(xpad, w_pred, b_pred, w_seg, b_seg)


def upsample4x_sigmoid(logits, uh, uw_t):
    B, H0, W0 = logits.shape
    Hf, Wf = uh.shape[0], uw_t.shape[1]
    return pl.pallas_call(
        _upsample4x_sigmoid_kernel,
        out_shape=jax.ShapeDtypeStruct((B, Hf, Wf), jnp.float32),
        grid=(B,),
        in_specs=[
            pl.BlockSpec((pl.Squeezed(), H0, W0), lambda b: (b, 0, 0)),
            pl.BlockSpec((Hf, H0), lambda b: (0, 0)),
            pl.BlockSpec((W0, Wf), lambda b: (0, 0)),
        ],
        out_specs=pl.BlockSpec((pl.Squeezed(), Hf, Wf), lambda b: (b, 0, 0)),
        compiler_params=_PAR,
    )(logits, uh, uw_t)


# ---------------------------------------------------------------------------
# Trace-time constants: bilinear interpolation matrices (PyTorch
# align_corners=False semantics) and GroupNorm one-hot group matrices.
# ---------------------------------------------------------------------------

def _interp_matrix(n_in, scale):
    """Dense 1-D bilinear upsample matrix U (n_in*scale, n_in), align_corners=False."""
    n_out = n_in * scale
    dst = jnp.arange(n_out, dtype=jnp.float32)
    src = jnp.maximum((dst + 0.5) / scale - 0.5, 0.0)
    i0 = jnp.minimum(jnp.floor(src).astype(jnp.int32), n_in - 1)
    i1 = jnp.minimum(i0 + 1, n_in - 1)
    w1 = src - i0.astype(jnp.float32)
    U = (jax.nn.one_hot(i0, n_in, dtype=jnp.float32) * (1.0 - w1)[:, None]
         + jax.nn.one_hot(i1, n_in, dtype=jnp.float32) * w1[:, None])
    return U


def _interp_matrix_2d(Hc, Wc, scale):
    """Token-level (row-major flattened) 2-D bilinear matrix S (s^2*Hc*Wc, Hc*Wc)."""
    Uh = _interp_matrix(Hc, scale)          # (Hc*s, Hc)
    Uw = _interp_matrix(Wc, scale)          # (Wc*s, Wc)
    S = jnp.einsum("ph,qw->pqhw", Uh, Uw).reshape(Hc * Wc * scale * scale, Hc * Wc)
    return S


def _group_onehot(N, G):
    cg = N // G
    gid = jnp.arange(N, dtype=jnp.int32) // cg
    M = (gid[:, None] == jnp.arange(G, dtype=jnp.int32)[None, :]).astype(jnp.float32)
    return M, M.T


# ---------------------------------------------------------------------------
# HiFormer1 forward (decoder path after DLF3)
# ---------------------------------------------------------------------------

def hiformer1_forward(xs0, xs1, xs2, p):
    B, H2, W2, _ = xs2.shape
    _, H1, W1, C1 = xs1.shape
    _, H0, W0, C0 = xs0.shape

    m1, m1t = _group_onehot(192, 32)
    m2, m2t = _group_onehot(96, 32)
    S1 = _interp_matrix_2d(H2, W2, 2)       # (H1*W1, H2*W2)
    S2 = _interp_matrix_2d(H1, W1, 2)       # (H0*W0, H1*W1)
    Uh = _interp_matrix(H0, 4)              # (4*H0, H0)
    UwT = _interp_matrix(W0, 4).T           # (W0, 4*W0)

    # ConvUp1: Conv2d(384,192,3,p=1,bias=False) + GroupNorm(32,192) + ReLU
    xpad2 = jnp.pad(xs2, ((0, 0), (1, 1), (1, 1), (0, 0)))
    Cc = conv3x3_gn_relu(xpad2, p["w_up1"], p["gn1_g"], p["gn1_b"], m1, m1t)   # (B, H2*W2, 192)

    # bilinear x2 upsample fused with  C = sa1(xs1) * C + C  (emits padded slab)
    Cpad = up2x_sa_fuse_pad(xs1.reshape(B, H1 * W1, C1), Cc, S1, p["w_sa1"], H=H1, W=W1)

    # ConvUp2: Conv2d(192,96,3,p=1,bias=False) + GroupNorm(32,96) + ReLU
    Cc = conv3x3_gn_relu(Cpad, p["w_up2"], p["gn2_g"], p["gn2_b"], m2, m2t)    # (B, H1*W1, 96)

    # bilinear x2 upsample fused with  C = sa2(xs0) * C + C  (emits padded slab)
    Cpad = up2x_sa_fuse_pad(xs0.reshape(B, H0 * W0, C0), Cc, S2, p["w_sa2"], H=H0, W=W0)

    # conv_pred 3x3 + bias + ReLU, fused with the (linear) segmentation head 1x1;
    # the seg head is commuted ahead of the x4 upsample (exact: bilinear weights sum to 1).
    logits = conv_pred_seg(Cpad, p["w_pred"], p["b_pred"], p["w_seg"], p["b_seg"])  # (B, H0*W0, 1)

    # x4 bilinear upsample of the 1-channel logit map + final Sigmoid, lane-dense.
    out = upsample4x_sigmoid(logits.reshape(B, H0, W0), Uh, UwT)                # (B, 4H0, 4W0)
    return out[..., None]                                                       # (B, Hf, Wf, 1)


# ---------------------------------------------------------------------------
# Deterministic parameter init (torch layouts converted to kernel layouts)
# ---------------------------------------------------------------------------

def _conv3x3_weight(key, cout, cin, scale=0.05):
    w = jax.random.normal(key, (cout, cin, 3, 3), jnp.float32) * scale      # torch OIHW
    w = jnp.transpose(w, (2, 3, 1, 0)).reshape(9, cin, cout)                # (tap, Cin, Cout)
    return w.astype(jnp.bfloat16)


def make_params(key):
    ks = jax.random.split(key, 12)
    return {
        "w_up1": _conv3x3_weight(ks[0], 192, 384),
        "gn1_g": (1.0 + 0.1 * jax.random.normal(ks[1], (1, 192), jnp.float32)),
        "gn1_b": 0.1 * jax.random.normal(ks[2], (1, 192), jnp.float32),
        "w_up2": _conv3x3_weight(ks[3], 96, 192),
        "gn2_g": (1.0 + 0.1 * jax.random.normal(ks[4], (1, 96), jnp.float32)),
        "gn2_b": 0.1 * jax.random.normal(ks[5], (1, 96), jnp.float32),
        "w_sa1": jax.random.normal(ks[6], (192, 1), jnp.float32) * 0.05,    # Conv2d(192,1,1)
        "w_sa2": jax.random.normal(ks[7], (96, 1), jnp.float32) * 0.05,     # Conv2d(96,1,1)
        "w_pred": _conv3x3_weight(ks[8], 16, 96),
        "b_pred": 0.05 * jax.random.normal(ks[9], (1, 16), jnp.float32),
        "w_seg": jax.random.normal(ks[10], (16, 1), jnp.float32) * 0.05,    # Conv2d(16,1,1)
        "b_seg": 0.05 * jax.random.normal(ks[11], (1, 1), jnp.float32),
    }


if __name__ == "__main__":
    key = jax.random.PRNGKey(0)
    k_in = jax.random.split(key, 4)
    B = 2
    # DLF3 multi-scale features (NHWC equivalents of torch NCHW xs[0..2]).
    xs2 = jax.random.normal(k_in[0], (B, 4, 4, 384), jnp.float32)    # deepest level
    xs1 = jax.random.normal(k_in[1], (B, 8, 8, 192), jnp.float32)
    xs0 = jax.random.normal(k_in[2], (B, 16, 16, 96), jnp.float32)   # shallowest level
    params = make_params(k_in[3])

    out = jax.jit(hiformer1_forward)(xs0, xs1, xs2, params)
    out = jax.block_until_ready(out)

    assert out.shape == (B, 64, 64, 1), out.shape
    assert bool(jnp.all(jnp.isfinite(out)))
    assert bool(jnp.all((out > 0.0) & (out < 1.0)))   # sigmoid output range
    print("KERNEL_OK")
</pallas_src>

<mosaic_0001>
module attributes {stable_mosaic.version = 11 : i64} {
  func.func @_conv3x3_gn_relu_kernel(%arg0: i32, %arg1: memref<1x6x6x384xf32, #tpu.memory_space<vmem>>, %arg2: memref<9x384x192xbf16, #tpu.memory_space<vmem>>, %arg3: memref<1x192xf32, #tpu.memory_space<vmem>>, %arg4: memref<1x192xf32, #tpu.memory_space<vmem>>, %arg5: memref<192x32xf32, #tpu.memory_space<vmem>>, %arg6: memref<32x192xf32, #tpu.memory_space<vmem>>, %arg7: memref<1x16x192xf32, #tpu.memory_space<vmem>>) attributes {dimension_semantics = [#tpu.dimension_semantics<parallel>], iteration_bounds = array<i64: 2>, scalar_prefetch = 0 : i64, scratch_operands = 0 : i64, tpu.core_type = #tpu.core_type<tc>, window_params = [{transform_indices = @transform_0, window_bounds = array<i64: 1, 6, 6, 384>}, {pipeline_mode = #tpu.pipeline_mode<synchronous>, transform_indices = @transform_1, window_bounds = array<i64: 9, 384, 192>}, {pipeline_mode = #tpu.pipeline_mode<synchronous>, transform_indices = @transform_2, window_bounds = array<i64: 1, 192>}, {pipeline_mode = #tpu.pipeline_mode<synchronous>, transform_indices = @transform_3, window_bounds = array<i64: 1, 192>}, {pipeline_mode = #tpu.pipeline_mode<synchronous>, transform_indices = @transform_4, window_bounds = array<i64: 192, 32>}, {pipeline_mode = #tpu.pipeline_mode<synchronous>, transform_indices = @transform_5, window_bounds = array<i64: 32, 192>}, {transform_indices = @transform_6, window_bounds = array<i64: 1, 16, 192>}]} {
    %c0 = arith.constant 0 : index
    %c0_0 = arith.constant 0 : index
    %c0_1 = arith.constant 0 : index
    %c0_2 = arith.constant 0 : index
    %0 = vector.load %arg1[%c0, %c0_0, %c0_1, %c0_2] : memref<1x6x6x384xf32, #tpu.memory_space<vmem>>, vector<1x6x6x384xf32>
    %1 = vector.shape_cast %0 : vector<1x6x6x384xf32> to vector<6x6x384xf32>
    %2 = vector.extract_strided_slice %1 {offsets = [0, 0, 0], sizes = [4, 4, 384], strides = [1, 1, 1]} : vector<6x6x384xf32> to vector<4x4x384xf32>
    %3 = vector.shape_cast %2 : vector<4x4x384xf32> to vector<16x384xf32>
    %4 = arith.truncf %3 : vector<16x384xf32> to vector<16x384xbf16>
    %c0_3 = arith.constant 0 : index
    %c0_4 = arith.constant 0 : index
    %c0_5 = arith.constant 0 : index
    %5 = vector.load %arg2[%c0_3, %c0_4, %c0_5] : memref<9x384x192xbf16, #tpu.memory_space<vmem>>, vector<1x384x192xbf16>
    %6 = vector.shape_cast %5 : vector<1x384x192xbf16> to vector<384x192xbf16>
    %cst = arith.constant dense<0.000000e+00> : vector<16x192xf32>
    %7 = tpu.matmul %4, %6, %cst {dimension_numbers = #tpu.dot_dimension_numbers<[1], [0], [0], [1], [0, 0, 1, 1], [], []>} : vector<16x384xbf16>, vector<384x192xbf16>, vector<16x192xf32> -> vector<16x192xf32>
    %8 = vector.extract_strided_slice %1 {offsets = [0, 1, 0], sizes = [4, 4, 384], strides = [1, 1, 1]} : vector<6x6x384xf32> to vector<4x4x384xf32>
    %9 = vector.shape_cast %8 : vector<4x4x384xf32> to vector<16x384xf32>
    %10 = arith.truncf %9 : vector<16x384xf32> to vector<16x384xbf16>
    %c1 = arith.constant 1 : index
    %c0_6 = arith.constant 0 : index
    %c0_7 = arith.constant 0 : index
    %11 = vector.load %arg2[%c1, %c0_6, %c0_7] : memref<9x384x192xbf16, #tpu.memory_space<vmem>>, vector<1x384x192xbf16>
    %12 = vector.shape_cast %11 : vector<1x384x192xbf16> to vector<384x192xbf16>
    %cst_8 = arith.constant dense<0.000000e+00> : vector<16x192xf32>
    %13 = tpu.matmul %10, %12, %cst_8 {dimension_numbers = #tpu.dot_dimension_numbers<[1], [0], [0], [1], [0, 0, 1, 1], [], []>} : vector<16x384xbf16>, vector<384x192xbf16>, vector<16x192xf32> -> vector<16x192xf32>
    %14 = arith.addf %7, %13 : vector<16x192xf32>
    %15 = vector.extract_strided_slice %1 {offsets = [0, 2, 0], sizes = [4, 4, 384], strides = [1, 1, 1]} : vector<6x6x384xf32> to vector<4x4x384xf32>
    %16 = vector.shape_cast %15 : vector<4x4x384xf32> to vector<16x384xf32>
    %17 = arith.truncf %16 : vector<16x384xf32> to vector<16x384xbf16>
    %c2 = arith.constant 2 : index
    %c0_9 = arith.constant 0 : index
    %c0_10 = arith.constant 0 : index
    %18 = vector.load %arg2[%c2, %c0_9, %c0_10] : memref<9x384x192xbf16, #tpu.memory_space<vmem>>, vector<1x384x192xbf16>
    %19 = vector.shape_cast %18 : vector<1x384x192xbf16> to vector<384x192xbf16>
    %cst_11 = arith.constant dense<0.000000e+00> : vector<16x192xf32>
    %20 = tpu.matmul %17, %19, %cst_11 {dimension_numbers = #tpu.dot_dimension_numbers<[1], [0], [0], [1], [0, 0, 1, 1], [], []>} : vector<16x384xbf16>, vector<384x192xbf16>, vector<16x192xf32> -> vector<16x192xf32>
    %21 = arith.addf %14, %20 : vector<16x192xf32>
    %22 = vector.extract_strided_slice %1 {offsets = [1, 0, 0], sizes = [4, 4, 384], strides = [1, 1, 1]} : vector<6x6x384xf32> to vector<4x4x384xf32>
    %23 = vector.shape_cast %22 : vector<4x4x384xf32> to vector<16x384xf32>
    %24 = arith.truncf %23 : vector<16x384xf32> to vector<16x384xbf16>
    %c3 = arith.constant 3 : index
    %c0_12 = arith.constant 0 : index
    %c0_13 = arith.constant 0 : index
    %25 = vector.load %arg2[%c3, %c0_12, %c0_13] : memref<9x384x192xbf16, #tpu.memory_space<vmem>>, vector<1x384x192xbf16>
    %26 = vector.shape_cast %25 : vector<1x384x192xbf16> to vector<384x192xbf16>
    %cst_14 = arith.constant dense<0.000000e+00> : vector<16x192xf32>
    %27 = tpu.matmul %24, %26, %cst_14 {dimension_numbers = #tpu.dot_dimension_numbers<[1], [0], [0], [1], [0, 0, 1, 1], [], []>} : vector<16x384xbf16>, vector<384x192xbf16>, vector<16x192xf32> -> vector<16x192xf32>
    %28 = arith.addf %21, %27 : vector<16x192xf32>
    %29 = vector.extract_strided_slice %1 {offsets = [1, 1, 0], sizes = [4, 4, 384], strides = [1, 1, 1]} : vector<6x6x384xf32> to vector<4x4x384xf32>
    %30 = vector.shape_cast %29 : vector<4x4x384xf32> to vector<16x384xf32>
    %31 = arith.truncf %30 : vector<16x384xf32> to vector<16x384xbf16>
    %c4 = arith.constant 4 : index
    %c0_15 = arith.constant 0 : index
    %c0_16 = arith.constant 0 : index
    %32 = vector.load %arg2[%c4, %c0_15, %c0_16] : memref<9x384x192xbf16, #tpu.memory_space<vmem>>, vector<1x384x192xbf16>
    %33 = vector.shape_cast %32 : vector<1x384x192xbf16> to vector<384x192xbf16>
    %cst_17 = arith.constant dense<0.000000e+00> : vector<16x192xf32>
    %34 = tpu.matmul %31, %33, %cst_17 {dimension_numbers = #tpu.dot_dimension_numbers<[1], [0], [0], [1], [0, 0, 1, 1], [], []>} : vector<16x384xbf16>, vector<384x192xbf16>, vector<16x192xf32> -> vector<16x192xf32>
    %35 = arith.addf %28, %34 : vector<16x192xf32>
    %36 = vector.extract_strided_slice %1 {offsets = [1, 2, 0], sizes = [4, 4, 384], strides = [1, 1, 1]} : vector<6x6x384xf32> to vector<4x4x384xf32>
    %37 = vector.shape_cast %36 : vector<4x4x384xf32> to vector<16x384xf32>
    %38 = arith.truncf %37 : vector<16x384xf32> to vector<16x384xbf16>
    %c5 = arith.constant 5 : index
    %c0_18 = arith.constant 0 : index
    %c0_19 = arith.constant 0 : index
    %39 = vector.load %arg2[%c5, %c0_18, %c0_19] : memref<9x384x192xbf16, #tpu.memory_space<vmem>>, vector<1x384x192xbf16>
    %40 = vector.shape_cast %39 : vector<1x384x192xbf16> to vector<384x192xbf16>
    %cst_20 = arith.constant dense<0.000000e+00> : vector<16x192xf32>
    %41 = tpu.matmul %38, %40, %cst_20 {dimension_numbers = #tpu.dot_dimension_numbers<[1], [0], [0], [1], [0, 0, 1, 1], [], []>} : vector<16x384xbf16>, vector<384x192xbf16>, vector<16x192xf32> -> vector<16x192xf32>
    %42 = arith.addf %35, %41 : vector<16x192xf32>
    %43 = vector.extract_strided_slice %1 {offsets = [2, 0, 0], sizes = [4, 4, 384], strides = [1, 1, 1]} : vector<6x6x384xf32> to vector<4x4x384xf32>
    %44 = vector.shape_cast %43 : vector<4x4x384xf32> to vector<16x384xf32>
    %45 = arith.truncf %44 : vector<16x384xf32> to vector<16x384xbf16>
    %c6 = arith.constant 6 : index
    %c0_21 = arith.constant 0 : index
    %c0_22 = arith.constant 0 : index
    %46 = vector.load %arg2[%c6, %c0_21, %c0_22] : memref<9x384x192xbf16, #tpu.memory_space<vmem>>, vector<1x384x192xbf16>
    %47 = vector.shape_cast %46 : vector<1x384x192xbf16> to vector<384x192xbf16>
    %cst_23 = arith.constant dense<0.000000e+00> : vector<16x192xf32>
    %48 = tpu.matmul %45, %47, %cst_23 {dimension_numbers = #tpu.dot_dimension_numbers<[1], [0], [0], [1], [0, 0, 1, 1], [], []>} : vector<16x384xbf16>, vector<384x192xbf16>, vector<16x192xf32> -> vector<16x192xf32>
    %49 = arith.addf %42, %48 : vector<16x192xf32>
    %50 = vector.extract_strided_slice %1 {offsets = [2, 1, 0], sizes = [4, 4, 384], strides = [1, 1, 1]} : vector<6x6x384xf32> to vector<4x4x384xf32>
    %51 = vector.shape_cast %50 : vector<4x4x384xf32> to vector<16x384xf32>
    %52 = arith.truncf %51 : vector<16x384xf32> to vector<16x384xbf16>
    %c7 = arith.constant 7 : index
    %c0_24 = arith.constant 0 : index
    %c0_25 = arith.constant 0 : index
    %53 = vector.load %arg2[%c7, %c0_24, %c0_25] : memref<9x384x192xbf16, #tpu.memory_space<vmem>>, vector<1x384x192xbf16>
    %54 = vector.shape_cast %53 : vector<1x384x192xbf16> to vector<384x192xbf16>
    %cst_26 = arith.constant dense<0.000000e+00> : vector<16x192xf32>
    %55 = tpu.matmul %52, %54, %cst_26 {dimension_numbers = #tpu.dot_dimension_numbers<[1], [0], [0], [1], [0, 0, 1, 1], [], []>} : vector<16x384xbf16>, vector<384x192xbf16>, vector<16x192xf32> -> vector<16x192xf32>
    %56 = arith.addf %49, %55 : vector<16x192xf32>
    %57 = vector.extract_strided_slice %1 {offsets = [2, 2, 0], sizes = [4, 4, 384], strides = [1, 1, 1]} : vector<6x6x384xf32> to vector<4x4x384xf32>
    %58 = vector.shape_cast %57 : vector<4x4x384xf32> to vector<16x384xf32>
    %59 = arith.truncf %58 : vector<16x384xf32> to vector<16x384xbf16>
    %c8 = arith.constant 8 : index
    %c0_27 = arith.constant 0 : index
    %c0_28 = arith.constant 0 : index
    %60 = vector.load %arg2[%c8, %c0_27, %c0_28] : memref<9x384x192xbf16, #tpu.memory_space<vmem>>, vector<1x384x192xbf16>
    %61 = vector.shape_cast %60 : vector<1x384x192xbf16> to vector<384x192xbf16>
    %cst_29 = arith.constant dense<0.000000e+00> : vector<16x192xf32>
    %62 = tpu.matmul %59, %61, %cst_29 {dimension_numbers = #tpu.dot_dimension_numbers<[1], [0], [0], [1], [0, 0, 1, 1], [], []>} : vector<16x384xbf16>, vector<384x192xbf16>, vector<16x192xf32> -> vector<16x192xf32>
    %63 = arith.addf %56, %62 : vector<16x192xf32>
    %cst_30 = arith.constant dense<0.000000e+00> : vector<192xf32>
    %64 = vector.multi_reduction <add>, %63, %cst_30 [0] : vector<16x192xf32> to vector<192xf32>
    %65 = vector.shape_cast %64 : vector<192xf32> to vector<1x192xf32>
    %c0_31 = arith.constant 0 : index
    %c0_32 = arith.constant 0 : index
    %66 = vector.load %arg5[%c0_31, %c0_32] : memref<192x32xf32, #tpu.memory_space<vmem>>, vector<192x32xf32>
    %cst_33 = arith.constant dense<0.000000e+00> : vector<1x32xf32>
    %67 = tpu.matmul %65, %66, %cst_33 {dimension_numbers = #tpu.dot_dimension_numbers<[1], [0], [0], [1], [0, 0, 1, 1], [], []>} : vector<1x192xf32>, vector<192x32xf32>, vector<1x32xf32> -> vector<1x32xf32>
    %cst_34 = arith.constant 9.600000e+01 : f32
    %68 = vector.broadcast %cst_34 : f32 to vector<1x32xf32>
    %69 = arith.divf %67, %68 : vector<1x32xf32>
    %c0_35 = arith.constant 0 : index
    %c0_36 = arith.constant 0 : index
    %70 = vector.load %arg6[%c0_35, %c0_36] : memref<32x192xf32, #tpu.memory_space<vmem>>, vector<32x192xf32>
    %cst_37 = arith.constant dense<0.000000e+00> : vector<1x192xf32>
    %71 = tpu.matmul %69, %70, %cst_37 {dimension_numbers = #tpu.dot_dimension_numbers<[1], [0], [0], [1], [0, 0, 1, 1], [], []>} : vector<1x32xf32>, vector<32x192xf32>, vector<1x192xf32> -> vector<1x192xf32>
    %72 = vector.broadcast %71 : vector<1x192xf32> to vector<16x192xf32>
    %73 = arith.subf %63, %72 : vector<16x192xf32>
    %74 = arith.mulf %73, %73 : vector<16x192xf32>
    %cst_38 = arith.constant dense<0.000000e+00> : vector<192xf32>
    %75 = vector.multi_reduction <add>, %74, %cst_38 [0] : vector<16x192xf32> to vector<192xf32>
    %76 = vector.shape_cast %75 : vector<192xf32> to vector<1x192xf32>
    %c0_39 = arith.constant 0 : index
    %c0_40 = arith.constant 0 : index
    %77 = vector.load %arg5[%c0_39, %c0_40] : memref<192x32xf32, #tpu.memory_space<vmem>>, vector<192x32xf32>
    %cst_41 = arith.constant dense<0.000000e+00> : vector<1x32xf32>
    %78 = tpu.matmul %76, %77, %cst_41 {dimension_numbers = #tpu.dot_dimension_numbers<[1], [0], [0], [1], [0, 0, 1, 1], [], []>} : vector<1x192xf32>, vector<192x32xf32>, vector<1x32xf32> -> vector<1x32xf32>
    %cst_42 = arith.constant 9.600000e+01 : f32
    %79 = vector.broadcast %cst_42 : f32 to vector<1x32xf32>
    %80 = arith.divf %78, %79 : vector<1x32xf32>
    %cst_43 = arith.constant 9.99999974E-6 : f32
    %81 = vector.broadcast %cst_43 : f32 to vector<1x32xf32>
    %82 = arith.addf %80, %81 : vector<1x32xf32>
    %83 = math.rsqrt %82 : vector<1x32xf32>
    %c0_44 = arith.constant 0 : index
    %c0_45 = arith.constant 0 : index
    %84 = vector.load %arg6[%c0_44, %c0_45] : memref<32x192xf32, #tpu.memory_space<vmem>>, vector<32x192xf32>
    %cst_46 = arith.constant dense<0.000000e+00> : vector<1x192xf32>
    %85 = tpu.matmul %83, %84, %cst_46 {dimension_numbers = #tpu.dot_dimension_numbers<[1], [0], [0], [1], [0, 0, 1, 1], [], []>} : vector<1x32xf32>, vector<32x192xf32>, vector<1x192xf32> -> vector<1x192xf32>
    %86 = vector.broadcast %85 : vector<1x192xf32> to vector<16x192xf32>
    %87 = arith.mulf %73, %86 : vector<16x192xf32>
    %c0_47 = arith.constant 0 : index
    %c0_48 = arith.constant 0 : index
    %88 = vector.load %arg3[%c0_47, %c0_48] : memref<1x192xf32, #tpu.memory_space<vmem>>, vector<1x192xf32>
    %89 = vector.broadcast %88 : vector<1x192xf32> to vector<16x192xf32>
    %90 = arith.mulf %87, %89 : vector<16x192xf32>
    %c0_49 = arith.constant 0 : index
    %c0_50 = arith.constant 0 : index
    %91 = vector.load %arg4[%c0_49, %c0_50] : memref<1x192xf32, #tpu.memory_space<vmem>>, vector<1x192xf32>
    %92 = vector.broadcast %91 : vector<1x192xf32> to vector<16x192xf32>
    %93 = arith.addf %90, %92 : vector<16x192xf32>
    %cst_51 = arith.constant 0.000000e+00 : f32
    %94 = vector.broadcast %cst_51 : f32 to vector<16x192xf32>
    %95 = arith.maximumf %93, %94 : vector<16x192xf32>
    %c0_52 = arith.constant 0 : index
    %c0_53 = arith.constant 0 : index
    %c0_54 = arith.constant 0 : index
    %96 = vector.load %arg7[%c0_52, %c0_53, %c0_54] : memref<1x16x192xf32, #tpu.memory_space<vmem>>, vector<1x16x192xf32>
    %97 = vector.shape_cast %96 : vector<1x16x192xf32> to vector<16x192xf32>
    %98 = vector.shape_cast %95 : vector<16x192xf32> to vector<1x16x192xf32>
    tpu.vector_store %arg7[%c0_52, %c0_53, %c0_54], %98 {strides = array<i32>} : memref<1x16x192xf32, #tpu.memory_space<vmem>>, vector<1x16x192xf32>,
    return
  }
  func.func @transform_0(%arg0: i32) -> (i32, i32, i32, i32) {
    %c0_i32 = arith.constant 0 : i32
    %c0_i32_0 = arith.constant 0 : i32
    %c0_i32_1 = arith.constant 0 : i32
    %c0_i32_2 = arith.constant 0 : i32
    return %arg0, %c0_i32, %c0_i32_0, %c0_i32_1 : i32, i32, i32, i32
  }
  func.func @transform_1(%arg0: i32) -> (i32, i32, i32) {
    %c0_i32 = arith.constant 0 : i32
    %c0_i32_0 = arith.constant 0 : i32
    %c0_i32_1 = arith.constant 0 : i32
    %c0_i32_2 = arith.constant 0 : i32
    return %c0_i32, %c0_i32_0, %c0_i32_1 : i32, i32, i32
  }
  func.func @transform_2(%arg0: i32) -> (i32, i32) {
    %c0_i32 = arith.constant 0 : i32
    %c0_i32_0 = arith.constant 0 : i32
    %c0_i32_1 = arith.constant 0 : i32
    return %c0_i32, %c0_i32_0 : i32, i32
  }
  func.func @transform_3(%arg0: i32) -> (i32, i32) {
    %c0_i32 = arith.constant 0 : i32
    %c0_i32_0 = arith.constant 0 : i32
    %c0_i32_1 = arith.constant 0 : i32
    return %c0_i32, %c0_i32_0 : i32, i32
  }
  func.func @transform_4(%arg0: i32) -> (i32, i32) {
    %c0_i32 = arith.constant 0 : i32
    %c0_i32_0 = arith.constant 0 : i32
    %c0_i32_1 = arith.constant 0 : i32
    return %c0_i32, %c0_i32_0 : i32, i32
  }
  func.func @transform_5(%arg0: i32) -> (i32, i32) {
    %c0_i32 = arith.constant 0 : i32
    %c0_i32_0 = arith.constant 0 : i32
    %c0_i32_1 = arith.constant 0 : i32
    return %c0_i32, %c0_i32_0 : i32, i32
  }
  func.func @transform_6(%arg0: i32) -> (i32, i32, i32) {
    %c0_i32 = arith.constant 0 : i32
    %c0_i32_0 = arith.constant 0 : i32
    %c0_i32_1 = arith.constant 0 : i32
    return %arg0, %c0_i32, %c0_i32_0 : i32, i32, i32
  }
}

module attributes {stable_mosaic.version = 11 : i64} {
  func.func @_up2x_sa_fuse_pad_kernel(%arg0: i32, %arg1: memref<1x64x192xf32, #tpu.memory_space<vmem>>, %arg2: memref<1x16x192xf32, #tpu.memory_space<vmem>>, %arg3: memref<64x16xf32, #tpu.memory_space<vmem>>, %arg4: memref<192x1xf32, #tpu.memory_space<vmem>>, %arg5: memref<1x10x10x192xf32, #tpu.memory_space<vmem>>) attributes {dimension_semantics = [#tpu.dimension_semantics<parallel>], iteration_bounds = array<i64: 2>, scalar_prefetch = 0 : i64, scratch_operands = 0 : i64, tpu.core_type = #tpu.core_type<tc>, window_params = [{transform_indices = @transform_0, window_bounds = array<i64: 1, 64, 192>}, {transform_indices = @transform_1, window_bounds = array<i64: 1, 16, 192>}, {pipeline_mode = #tpu.pipeline_mode<synchronous>, transform_indices = @transform_2, window_bounds = array<i64: 64, 16>}, {pipeline_mode = #tpu.pipeline_mode<synchronous>, transform_indices = @transform_3, window_bounds = array<i64: 192, 1>}, {transform_indices = @transform_4, window_bounds = array<i64: 1, 10, 10, 192>}]} {
    %c0 = arith.constant 0 : index
    %c0_0 = arith.constant 0 : index
    %c0_1 = arith.constant 0 : index
    %0 = vector.load %arg1[%c0, %c0_0, %c0_1] : memref<1x64x192xf32, #tpu.memory_space<vmem>>, vector<1x64x192xf32>
    %1 = vector.shape_cast %0 : vector<1x64x192xf32> to vector<64x192xf32>
    %cst = arith.constant dense<0.000000e+00> : vector<192xf32>
    %2 = vector.multi_reduction <add>, %1, %cst [0] : vector<64x192xf32> to vector<192xf32>
    %3 = vector.shape_cast %2 : vector<192xf32> to vector<1x192xf32>
    %cst_2 = arith.constant 6.400000e+01 : f32
    %4 = vector.broadcast %cst_2 : f32 to vector<1x192xf32>
    %5 = arith.divf %3, %4 : vector<1x192xf32>
    %6 = vector.broadcast %5 : vector<1x192xf32> to vector<64x192xf32>
    %7 = arith.addf %1, %6 : vector<64x192xf32>
    %c0_3 = arith.constant 0 : index
    %c0_4 = arith.constant 0 : index
    %8 = vector.load %arg4[%c0_3, %c0_4] : memref<192x1xf32, #tpu.memory_space<vmem>>, vector<192x1xf32>
    %cst_5 = arith.constant dense<0.000000e+00> : vector<64x1xf32>
    %9 = tpu.matmul %7, %8, %cst_5 {dimension_numbers = #tpu.dot_dimension_numbers<[1], [0], [0], [1], [0, 0, 1, 1], [], []>} : vector<64x192xf32>, vector<192x1xf32>, vector<64x1xf32> -> vector<64x1xf32>
    %10 = arith.negf %9 : vector<64x1xf32>
    %11 = math.exp %10 : vector<64x1xf32>
    %cst_6 = arith.constant 1.000000e+00 : f32
    %12 = vector.broadcast %cst_6 : f32 to vector<64x1xf32>
    %13 = arith.addf %12, %11 : vector<64x1xf32>
    %14 = arith.divf %12, %13 : vector<64x1xf32>
    %cst_7 = arith.constant 1.000000e+00 : f32
    %15 = vector.broadcast %cst_7 : f32 to vector<64x1xf32>
    %16 = arith.addf %15, %14 : vector<64x1xf32>
    %c0_8 = arith.constant 0 : index
    %c0_9 = arith.constant 0 : index
    %17 = vector.load %arg3[%c0_8, %c0_9] : memref<64x16xf32, #tpu.memory_space<vmem>>, vector<64x16xf32>
    %c0_10 = arith.constant 0 : index
    %c0_11 = arith.constant 0 : index
    %c0_12 = arith.constant 0 : index
    %18 = vector.load %arg2[%c0_10, %c0_11, %c0_12] : memref<1x16x192xf32, #tpu.memory_space<vmem>>, vector<1x16x192xf32>
    %19 = vector.shape_cast %18 : vector<1x16x192xf32> to vector<16x192xf32>
    %cst_13 = arith.constant dense<0.000000e+00> : vector<64x192xf32>
    %20 = tpu.matmul %17, %19, %cst_13 {dimension_numbers = #tpu.dot_dimension_numbers<[1], [0], [0], [1], [0, 0, 1, 1], [], []>} : vector<64x16xf32>, vector<16x192xf32>, vector<64x192xf32> -> vector<64x192xf32>
    %21 = vector.broadcast %16 : vector<64x1xf32> to vector<64x192xf32>
    %22 = arith.mulf %21, %20 : vector<64x192xf32>
    %cst_14 = arith.constant 0.000000e+00 : f32
    %23 = vector.broadcast %cst_14 : f32 to vector<10x10x192xf32>
    %c0_15 = arith.constant 0 : index
    %c0_16 = arith.constant 0 : index
    %c0_17 = arith.constant 0 : index
    %c0_18 = arith.constant 0 : index
    %24 = vector.load %arg5[%c0_15, %c0_16, %c0_17, %c0_18] : memref<1x10x10x192xf32, #tpu.memory_space<vmem>>, vector<1x10x10x192xf32>
    %25 = vector.shape_cast %24 : vector<1x10x10x192xf32> to vector<10x10x192xf32>
    %26 = vector.shape_cast %23 : vector<10x10x192xf32> to vector<1x10x10x192xf32>
    tpu.vector_store %arg5[%c0_15, %c0_16, %c0_17, %c0_18], %26 {strides = array<i32>} : memref<1x10x10x192xf32, #tpu.memory_space<vmem>>, vector<1x10x10x192xf32>,
    %27 = vector.shape_cast %22 : vector<64x192xf32> to vector<8x8x192xf32>
    %c0_19 = arith.constant 0 : index
    %c1 = arith.constant 1 : index
    %c1_20 = arith.constant 1 : index
    %c0_21 = arith.constant 0 : index
    %28 = vector.load %arg5[%c0_19, %c1, %c1_20, %c0_21] : memref<1x10x10x192xf32, #tpu.memory_space<vmem>>, vector<1x8x8x192xf32>
    %29 = vector.shape_cast %28 : vector<1x8x8x192xf32> to vector<8x8x192xf32>
    %30 = vector.shape_cast %27 : vector<8x8x192xf32> to vector<1x8x8x192xf32>
    tpu.vector_store %arg5[%c0_19, %c1, %c1_20, %c0_21], %30 {strides = array<i32>} : memref<1x10x10x192xf32, #tpu.memory_space<vmem>>, vector<1x8x8x192xf32>,
    return
  }
  func.func @transform_0(%arg0: i32) -> (i32, i32, i32) {
    %c0_i32 = arith.constant 0 : i32
    %c0_i32_0 = arith.constant 0 : i32
    %c0_i32_1 = arith.constant 0 : i32
    return %arg0, %c0_i32, %c0_i32_0 : i32, i32, i32
  }
  func.func @transform_1(%arg0: i32) -> (i32, i32, i32) {
    %c0_i32 = arith.constant 0 : i32
    %c0_i32_0 = arith.constant 0 : i32
    %c0_i32_1 = arith.constant 0 : i32
    return %arg0, %c0_i32, %c0_i32_0 : i32, i32, i32
  }
  func.func @transform_2(%arg0: i32) -> (i32, i32) {
    %c0_i32 = arith.constant 0 : i32
    %c0_i32_0 = arith.constant 0 : i32
    %c0_i32_1 = arith.constant 0 : i32
    return %c0_i32, %c0_i32_0 : i32, i32
  }
  func.func @transform_3(%arg0: i32) -> (i32, i32) {
    %c0_i32 = arith.constant 0 : i32
    %c0_i32_0 = arith.constant 0 : i32
    %c0_i32_1 = arith.constant 0 : i32
    return %c0_i32, %c0_i32_0 : i32, i32
  }
  func.func @transform_4(%arg0: i32) -> (i32, i32, i32, i32) {
    %c0_i32 = arith.constant 0 : i32
    %c0_i32_0 = arith.constant 0 : i32
    %c0_i32_1 = arith.constant 0 : i32
    %c0_i32_2 = arith.constant 0 : i32
    return %arg0, %c0_i32, %c0_i32_0, %c0_i32_1 : i32, i32, i32, i32
  }
}

module attributes {stable_mosaic.version = 11 : i64} {
  func.func @_conv3x3_gn_relu_kernel(%arg0: i32, %arg1: memref<1x10x10x192xf32, #tpu.memory_space<vmem>>, %arg2: memref<9x192x96xbf16, #tpu.memory_space<vmem>>, %arg3: memref<1x96xf32, #tpu.memory_space<vmem>>, %arg4: memref<1x96xf32, #tpu.memory_space<vmem>>, %arg5: memref<96x32xf32, #tpu.memory_space<vmem>>, %arg6: memref<32x96xf32, #tpu.memory_space<vmem>>, %arg7: memref<1x64x96xf32, #tpu.memory_space<vmem>>) attributes {dimension_semantics = [#tpu.dimension_semantics<parallel>], iteration_bounds = array<i64: 2>, scalar_prefetch = 0 : i64, scratch_operands = 0 : i64, tpu.core_type = #tpu.core_type<tc>, window_params = [{transform_indices = @transform_0, window_bounds = array<i64: 1, 10, 10, 192>}, {pipeline_mode = #tpu.pipeline_mode<synchronous>, transform_indices = @transform_1, window_bounds = array<i64: 9, 192, 96>}, {pipeline_mode = #tpu.pipeline_mode<synchronous>, transform_indices = @transform_2, window_bounds = array<i64: 1, 96>}, {pipeline_mode = #tpu.pipeline_mode<synchronous>, transform_indices = @transform_3, window_bounds = array<i64: 1, 96>}, {pipeline_mode = #tpu.pipeline_mode<synchronous>, transform_indices = @transform_4, window_bounds = array<i64: 96, 32>}, {pipeline_mode = #tpu.pipeline_mode<synchronous>, transform_indices = @transform_5, window_bounds = array<i64: 32, 96>}, {transform_indices = @transform_6, window_bounds = array<i64: 1, 64, 96>}]} {
    %c0 = arith.constant 0 : index
    %c0_0 = arith.constant 0 : index
    %c0_1 = arith.constant 0 : index
    %c0_2 = arith.constant 0 : index
    %0 = vector.load %arg1[%c0, %c0_0, %c0_1, %c0_2] : memref<1x10x10x192xf32, #tpu.memory_space<vmem>>, vector<1x10x10x192xf32>
    %1 = vector.shape_cast %0 : vector<1x10x10x192xf32> to vector<10x10x192xf32>
    %2 = vector.extract_strided_slice %1 {offsets = [0, 0, 0], sizes = [8, 8, 192], strides = [1, 1, 1]} : vector<10x10x192xf32> to vector<8x8x192xf32>
    %3 = vector.shape_cast %2 : vector<8x8x192xf32> to vector<64x192xf32>
    %4 = arith.truncf %3 : vector<64x192xf32> to vector<64x192xbf16>
    %c0_3 = arith.constant 0 : index
    %c0_4 = arith.constant 0 : index
    %c0_5 = arith.constant 0 : index
    %5 = vector.load %arg2[%c0_3, %c0_4, %c0_5] : memref<9x192x96xbf16, #tpu.memory_space<vmem>>, vector<1x192x96xbf16>
    %6 = vector.shape_cast %5 : vector<1x192x96xbf16> to vector<192x96xbf16>
    %cst = arith.constant dense<0.000000e+00> : vector<64x96xf32>
    %7 = tpu.matmul %4, %6, %cst {dimension_numbers = #tpu.dot_dimension_numbers<[1], [0], [0], [1], [0, 0, 1, 1], [], []>} : vector<64x192xbf16>, vector<192x96xbf16>, vector<64x96xf32> -> vector<64x96xf32>
    %8 = vector.extract_strided_slice %1 {offsets = [0, 1, 0], sizes = [8, 8, 192], strides = [1, 1, 1]} : vector<10x10x192xf32> to vector<8x8x192xf32>
    %9 = vector.shape_cast %8 : vector<8x8x192xf32> to vector<64x192xf32>
    %10 = arith.truncf %9 : vector<64x192xf32> to vector<64x192xbf16>
    %c1 = arith.constant 1 : index
    %c0_6 = arith.constant 0 : index
    %c0_7 = arith.constant 0 : index
    %11 = vector.load %arg2[%c1, %c0_6, %c0_7] : memref<9x192x96xbf16, #tpu.memory_space<vmem>>, vector<1x192x96xbf16>
    %12 = vector.shape_cast %11 : vector<1x192x96xbf16> to vector<192x96xbf16>
    %cst_8 = arith.constant dense<0.000000e+00> : vector<64x96xf32>
    %13 = tpu.matmul %10, %12, %cst_8 {dimension_numbers = #tpu.dot_dimension_numbers<[1], [0], [0], [1], [0, 0, 1, 1], [], []>} : vector<64x192xbf16>, vector<192x96xbf16>, vector<64x96xf32> -> vector<64x96xf32>
    %14 = arith.addf %7, %13 : vector<64x96xf32>
    %15 = vector.extract_strided_slice %1 {offsets = [0, 2, 0], sizes = [8, 8, 192], strides = [1, 1, 1]} : vector<10x10x192xf32> to vector<8x8x192xf32>
    %16 = vector.shape_cast %15 : vector<8x8x192xf32> to vector<64x192xf32>
    %17 = arith.truncf %16 : vector<64x192xf32> to vector<64x192xbf16>
    %c2 = arith.constant 2 : index
    %c0_9 = arith.constant 0 : index
    %c0_10 = arith.constant 0 : index
    %18 = vector.load %arg2[%c2, %c0_9, %c0_10] : memref<9x192x96xbf16, #tpu.memory_space<vmem>>, vector<1x192x96xbf16>
    %19 = vector.shape_cast %18 : vector<1x192x96xbf16> to vector<192x96xbf16>
    %cst_11 = arith.constant dense<0.000000e+00> : vector<64x96xf32>
    %20 = tpu.matmul %17, %19, %cst_11 {dimension_numbers = #tpu.dot_dimension_numbers<[1], [0], [0], [1], [0, 0, 1, 1], [], []>} : vector<64x192xbf16>, vector<192x96xbf16>, vector<64x96xf32> -> vector<64x96xf32>
    %21 = arith.addf %14, %20 : vector<64x96xf32>
    %22 = vector.extract_strided_slice %1 {offsets = [1, 0, 0], sizes = [8, 8, 192], strides = [1, 1, 1]} : vector<10x10x192xf32> to vector<8x8x192xf32>
    %23 = vector.shape_cast %22 : vector<8x8x192xf32> to vector<64x192xf32>
    %24 = arith.truncf %23 : vector<64x192xf32> to vector<64x192xbf16>
    %c3 = arith.constant 3 : index
    %c0_12 = arith.constant 0 : index
    %c0_13 = arith.constant 0 : index
    %25 = vector.load %arg2[%c3, %c0_12, %c0_13] : memref<9x192x96xbf16, #tpu.memory_space<vmem>>, vector<1x192x96xbf16>
    %26 = vector.shape_cast %25 : vector<1x192x96xbf16> to vector<192x96xbf16>
    %cst_14 = arith.constant dense<0.000000e+00> : vector<64x96xf32>
    %27 = tpu.matmul %24, %26, %cst_14 {dimension_numbers = #tpu.dot_dimension_numbers<[1], [0], [0], [1], [0, 0, 1, 1], [], []>} : vector<64x192xbf16>, vector<192x96xbf16>, vector<64x96xf32> -> vector<64x96xf32>
    %28 = arith.addf %21, %27 : vector<64x96xf32>
    %29 = vector.extract_strided_slice %1 {offsets = [1, 1, 0], sizes = [8, 8, 192], strides = [1, 1, 1]} : vector<10x10x192xf32> to vector<8x8x192xf32>
    %30 = vector.shape_cast %29 : vector<8x8x192xf32> to vector<64x192xf32>
    %31 = arith.truncf %30 : vector<64x192xf32> to vector<64x192xbf16>
    %c4 = arith.constant 4 : index
    %c0_15 = arith.constant 0 : index
    %c0_16 = arith.constant 0 : index
    %32 = vector.load %arg2[%c4, %c0_15, %c0_16] : memref<9x192x96xbf16, #tpu.memory_space<vmem>>, vector<1x192x96xbf16>
    %33 = vector.shape_cast %32 : vector<1x192x96xbf16> to vector<192x96xbf16>
    %cst_17 = arith.constant dense<0.000000e+00> : vector<64x96xf32>
    %34 = tpu.matmul %31, %33, %cst_17 {dimension_numbers = #tpu.dot_dimension_numbers<[1], [0], [0], [1], [0, 0, 1, 1], [], []>} : vector<64x192xbf16>, vector<192x96xbf16>, vector<64x96xf32> -> vector<64x96xf32>
    %35 = arith.addf %28, %34 : vector<64x96xf32>
    %36 = vector.extract_strided_slice %1 {offsets = [1, 2, 0], sizes = [8, 8, 192], strides = [1, 1, 1]} : vector<10x10x192xf32> to vector<8x8x192xf32>
    %37 = vector.shape_cast %36 : vector<8x8x192xf32> to vector<64x192xf32>
    %38 = arith.truncf %37 : vector<64x192xf32> to vector<64x192xbf16>
    %c5 = arith.constant 5 : index
    %c0_18 = arith.constant 0 : index
    %c0_19 = arith.constant 0 : index
    %39 = vector.load %arg2[%c5, %c0_18, %c0_19] : memref<9x192x96xbf16, #tpu.memory_space<vmem>>, vector<1x192x96xbf16>
    %40 = vector.shape_cast %39 : vector<1x192x96xbf16> to vector<192x96xbf16>
    %cst_20 = arith.constant dense<0.000000e+00> : vector<64x96xf32>
    %41 = tpu.matmul %38, %40, %cst_20 {dimension_numbers = #tpu.dot_dimension_numbers<[1], [0], [0], [1], [0, 0, 1, 1], [], []>} : vector<64x192xbf16>, vector<192x96xbf16>, vector<64x96xf32> -> vector<64x96xf32>
    %42 = arith.addf %35, %41 : vector<64x96xf32>
    %43 = vector.extract_strided_slice %1 {offsets = [2, 0, 0], sizes = [8, 8, 192], strides = [1, 1, 1]} : vector<10x10x192xf32> to vector<8x8x192xf32>
    %44 = vector.shape_cast %43 : vector<8x8x192xf32> to vector<64x192xf32>
    %45 = arith.truncf %44 : vector<64x192xf32> to vector<64x192xbf16>
    %c6 = arith.constant 6 : index
    %c0_21 = arith.constant 0 : index
    %c0_22 = arith.constant 0 : index
    %46 = vector.load %arg2[%c6, %c0_21, %c0_22] : memref<9x192x96xbf16, #tpu.memory_space<vmem>>, vector<1x192x96xbf16>
    %47 = vector.shape_cast %46 : vector<1x192x96xbf16> to vector<192x96xbf16>
    %cst_23 = arith.constant dense<0.000000e+00> : vector<64x96xf32>
    %48 = tpu.matmul %45, %47, %cst_23 {dimension_numbers = #tpu.dot_dimension_numbers<[1], [0], [0], [1], [0, 0, 1, 1], [], []>} : vector<64x192xbf16>, vector<192x96xbf16>, vector<64x96xf32> -> vector<64x96xf32>
    %49 = arith.addf %42, %48 : vector<64x96xf32>
    %50 = vector.extract_strided_slice %1 {offsets = [2, 1, 0], sizes = [8, 8, 192], strides = [1, 1, 1]} : vector<10x10x192xf32> to vector<8x8x192xf32>
    %51 = vector.shape_cast %50 : vector<8x8x192xf32> to vector<64x192xf32>
    %52 = arith.truncf %51 : vector<64x192xf32> to vector<64x192xbf16>
    %c7 = arith.constant 7 : index
    %c0_24 = arith.constant 0 : index
    %c0_25 = arith.constant 0 : index
    %53 = vector.load %arg2[%c7, %c0_24, %c0_25] : memref<9x192x96xbf16, #tpu.memory_space<vmem>>, vector<1x192x96xbf16>
    %54 = vector.shape_cast %53 : vector<1x192x96xbf16> to vector<192x96xbf16>
    %cst_26 = arith.constant dense<0.000000e+00> : vector<64x96xf32>
    %55 = tpu.matmul %52, %54, %cst_26 {dimension_numbers = #tpu.dot_dimension_numbers<[1], [0], [0], [1], [0, 0, 1, 1], [], []>} : vector<64x192xbf16>, vector<192x96xbf16>, vector<64x96xf32> -> vector<64x96xf32>
    %56 = arith.addf %49, %55 : vector<64x96xf32>
    %57 = vector.extract_strided_slice %1 {offsets = [2, 2, 0], sizes = [8, 8, 192], strides = [1, 1, 1]} : vector<10x10x192xf32> to vector<8x8x192xf32>
    %58 = vector.shape_cast %57 : vector<8x8x192xf32> to vector<64x192xf32>
    %59 = arith.truncf %58 : vector<64x192xf32> to vector<64x192xbf16>
    %c8 = arith.constant 8 : index
    %c0_27 = arith.constant 0 : index
    %c0_28 = arith.constant 0 : index
    %60 = vector.load %arg2[%c8, %c0_27, %c0_28] : memref<9x192x96xbf16, #tpu.memory_space<vmem>>, vector<1x192x96xbf16>
    %61 = vector.shape_cast %60 : vector<1x192x96xbf16> to vector<192x96xbf16>
    %cst_29 = arith.constant dense<0.000000e+00> : vector<64x96xf32>
    %62 = tpu.matmul %59, %61, %cst_29 {dimension_numbers = #tpu.dot_dimension_numbers<[1], [0], [0], [1], [0, 0, 1, 1], [], []>} : vector<64x192xbf16>, vector<192x96xbf16>, vector<64x96xf32> -> vector<64x96xf32>
    %63 = arith.addf %56, %62 : vector<64x96xf32>
    %cst_30 = arith.constant dense<0.000000e+00> : vector<96xf32>
    %64 = vector.multi_reduction <add>, %63, %cst_30 [0] : vector<64x96xf32> to vector<96xf32>
    %65 = vector.shape_cast %64 : vector<96xf32> to vector<1x96xf32>
    %c0_31 = arith.constant 0 : index
    %c0_32 = arith.constant 0 : index
    %66 = vector.load %arg5[%c0_31, %c0_32] : memref<96x32xf32, #tpu.memory_space<vmem>>, vector<96x32xf32>
    %cst_33 = arith.constant dense<0.000000e+00> : vector<1x32xf32>
    %67 = tpu.matmul %65, %66, %cst_33 {dimension_numbers = #tpu.dot_dimension_numbers<[1], [0], [0], [1], [0, 0, 1, 1], [], []>} : vector<1x96xf32>, vector<96x32xf32>, vector<1x32xf32> -> vector<1x32xf32>
    %cst_34 = arith.constant 1.920000e+02 : f32
    %68 = vector.broadcast %cst_34 : f32 to vector<1x32xf32>
    %69 = arith.divf %67, %68 : vector<1x32xf32>
    %c0_35 = arith.constant 0 : index
    %c0_36 = arith.constant 0 : index
    %70 = vector.load %arg6[%c0_35, %c0_36] : memref<32x96xf32, #tpu.memory_space<vmem>>, vector<32x96xf32>
    %cst_37 = arith.constant dense<0.000000e+00> : vector<1x96xf32>
    %71 = tpu.matmul %69, %70, %cst_37 {dimension_numbers = #tpu.dot_dimension_numbers<[1], [0], [0], [1], [0, 0, 1, 1], [], []>} : vector<1x32xf32>, vector<32x96xf32>, vector<1x96xf32> -> vector<1x96xf32>
    %72 = vector.broadcast %71 : vector<1x96xf32> to vector<64x96xf32>
    %73 = arith.subf %63, %72 : vector<64x96xf32>
    %74 = arith.mulf %73, %73 : vector<64x96xf32>
    %cst_38 = arith.constant dense<0.000000e+00> : vector<96xf32>
    %75 = vector.multi_reduction <add>, %74, %cst_38 [0] : vector<64x96xf32> to vector<96xf32>
    %76 = vector.shape_cast %75 : vector<96xf32> to vector<1x96xf32>
    %c0_39 = arith.constant 0 : index
    %c0_40 = arith.constant 0 : index
    %77 = vector.load %arg5[%c0_39, %c0_40] : memref<96x32xf32, #tpu.memory_space<vmem>>, vector<96x32xf32>
    %cst_41 = arith.constant dense<0.000000e+00> : vector<1x32xf32>
    %78 = tpu.matmul %76, %77, %cst_41 {dimension_numbers = #tpu.dot_dimension_numbers<[1], [0], [0], [1], [0, 0, 1, 1], [], []>} : vector<1x96xf32>, vector<96x32xf32>, vector<1x32xf32> -> vector<1x32xf32>
    %cst_42 = arith.constant 1.920000e+02 : f32
    %79 = vector.broadcast %cst_42 : f32 to vector<1x32xf32>
    %80 = arith.divf %78, %79 : vector<1x32xf32>
    %cst_43 = arith.constant 9.99999974E-6 : f32
    %81 = vector.broadcast %cst_43 : f32 to vector<1x32xf32>
    %82 = arith.addf %80, %81 : vector<1x32xf32>
    %83 = math.rsqrt %82 : vector<1x32xf32>
    %c0_44 = arith.constant 0 : index
    %c0_45 = arith.constant 0 : index
    %84 = vector.load %arg6[%c0_44, %c0_45] : memref<32x96xf32, #tpu.memory_space<vmem>>, vector<32x96xf32>
    %cst_46 = arith.constant dense<0.000000e+00> : vector<1x96xf32>
    %85 = tpu.matmul %83, %84, %cst_46 {dimension_numbers = #tpu.dot_dimension_numbers<[1], [0], [0], [1], [0, 0, 1, 1], [], []>} : vector<1x32xf32>, vector<32x96xf32>, vector<1x96xf32> -> vector<1x96xf32>
    %86 = vector.broadcast %85 : vector<1x96xf32> to vector<64x96xf32>
    %87 = arith.mulf %73, %86 : vector<64x96xf32>
    %c0_47 = arith.constant 0 : index
    %c0_48 = arith.constant 0 : index
    %88 = vector.load %arg3[%c0_47, %c0_48] : memref<1x96xf32, #tpu.memory_space<vmem>>, vector<1x96xf32>
    %89 = vector.broadcast %88 : vector<1x96xf32> to vector<64x96xf32>
    %90 = arith.mulf %87, %89 : vector<64x96xf32>
    %c0_49 = arith.constant 0 : index
    %c0_50 = arith.constant 0 : index
    %91 = vector.load %arg4[%c0_49, %c0_50] : memref<1x96xf32, #tpu.memory_space<vmem>>, vector<1x96xf32>
    %92 = vector.broadcast %91 : vector<1x96xf32> to vector<64x96xf32>
    %93 = arith.addf %90, %92 : vector<64x96xf32>
    %cst_51 = arith.constant 0.000000e+00 : f32
    %94 = vector.broadcast %cst_51 : f32 to vector<64x96xf32>
    %95 = arith.maximumf %93, %94 : vector<64x96xf32>
    %c0_52 = arith.constant 0 : index
    %c0_53 = arith.constant 0 : index
    %c0_54 = arith.constant 0 : index
    %96 = vector.load %arg7[%c0_52, %c0_53, %c0_54] : memref<1x64x96xf32, #tpu.memory_space<vmem>>, vector<1x64x96xf32>
    %97 = vector.shape_cast %96 : vector<1x64x96xf32> to vector<64x96xf32>
    %98 = vector.shape_cast %95 : vector<64x96xf32> to vector<1x64x96xf32>
    tpu.vector_store %arg7[%c0_52, %c0_53, %c0_54], %98 {strides = array<i32>} : memref<1x64x96xf32, #tpu.memory_space<vmem>>, vector<1x64x96xf32>,
    return
  }
  func.func @transform_0(%arg0: i32) -> (i32, i32, i32, i32) {
    %c0_i32 = arith.constant 0 : i32
    %c0_i32_0 = arith.constant 0 : i32
    %c0_i32_1 = arith.constant 0 : i32
    %c0_i32_2 = arith.constant 0 : i32
    return %arg0, %c0_i32, %c0_i32_0, %c0_i32_1 : i32, i32, i32, i32
  }
  func.func @transform_1(%arg0: i32) -> (i32, i32, i32) {
    %c0_i32 = arith.constant 0 : i32
    %c0_i32_0 = arith.constant 0 : i32
    %c0_i32_1 = arith.constant 0 : i32
    %c0_i32_2 = arith.constant 0 : i32
    return %c0_i32, %c0_i32_0, %c0_i32_1 : i32, i32, i32
  }
  func.func @transform_2(%arg0: i32) -> (i32, i32) {
    %c0_i32 = arith.constant 0 : i32
    %c0_i32_0 = arith.constant 0 : i32
    %c0_i32_1 = arith.constant 0 : i32
    return %c0_i32, %c0_i32_0 : i32, i32
  }
  func.func @transform_3(%arg0: i32) -> (i32, i32) {
    %c0_i32 = arith.constant 0 : i32
    %c0_i32_0 = arith.constant 0 : i32
    %c0_i32_1 = arith.constant 0 : i32
    return %c0_i32, %c0_i32_0 : i32, i32
  }
  func.func @transform_4(%arg0: i32) -> (i32, i32) {
    %c0_i32 = arith.constant 0 : i32
    %c0_i32_0 = arith.constant 0 : i32
    %c0_i32_1 = arith.constant 0 : i32
    return %c0_i32, %c0_i32_0 : i32, i32
  }
  func.func @transform_5(%arg0: i32) -> (i32, i32) {
    %c0_i32 = arith.constant 0 : i32
    %c0_i32_0 = arith.constant 0 : i32
    %c0_i32_1 = arith.constant 0 : i32
    return %c0_i32, %c0_i32_0 : i32, i32
  }
  func.func @transform_6(%arg0: i32) -> (i32, i32, i32) {
    %c0_i32 = arith.constant 0 : i32
    %c0_i32_0 = arith.constant 0 : i32
    %c0_i32_1 = arith.constant 0 : i32
    return %arg0, %c0_i32, %c0_i32_0 : i32, i32, i32
  }
}

module attributes {stable_mosaic.version = 11 : i64} {
  func.func @_up2x_sa_fuse_pad_kernel(%arg0: i32, %arg1: memref<1x256x96xf32, #tpu.memory_space<vmem>>, %arg2: memref<1x64x96xf32, #tpu.memory_space<vmem>>, %arg3: memref<256x64xf32, #tpu.memory_space<vmem>>, %arg4: memref<96x1xf32, #tpu.memory_space<vmem>>, %arg5: memref<1x18x18x96xf32, #tpu.memory_space<vmem>>) attributes {dimension_semantics = [#tpu.dimension_semantics<parallel>], iteration_bounds = array<i64: 2>, scalar_prefetch = 0 : i64, scratch_operands = 0 : i64, tpu.core_type = #tpu.core_type<tc>, window_params = [{transform_indices = @transform_0, window_bounds = array<i64: 1, 256, 96>}, {transform_indices = @transform_1, window_bounds = array<i64: 1, 64, 96>}, {pipeline_mode = #tpu.pipeline_mode<synchronous>, transform_indices = @transform_2, window_bounds = array<i64: 256, 64>}, {pipeline_mode = #tpu.pipeline_mode<synchronous>, transform_indices = @transform_3, window_bounds = array<i64: 96, 1>}, {transform_indices = @transform_4, window_bounds = array<i64: 1, 18, 18, 96>}]} {
    %c0 = arith.constant 0 : index
    %c0_0 = arith.constant 0 : index
    %c0_1 = arith.constant 0 : index
    %0 = vector.load %arg1[%c0, %c0_0, %c0_1] : memref<1x256x96xf32, #tpu.memory_space<vmem>>, vector<1x256x96xf32>
    %1 = vector.shape_cast %0 : vector<1x256x96xf32> to vector<256x96xf32>
    %cst = arith.constant dense<0.000000e+00> : vector<96xf32>
    %2 = vector.multi_reduction <add>, %1, %cst [0] : vector<256x96xf32> to vector<96xf32>
    %3 = vector.shape_cast %2 : vector<96xf32> to vector<1x96xf32>
    %cst_2 = arith.constant 2.560000e+02 : f32
    %4 = vector.broadcast %cst_2 : f32 to vector<1x96xf32>
    %5 = arith.divf %3, %4 : vector<1x96xf32>
    %6 = vector.broadcast %5 : vector<1x96xf32> to vector<256x96xf32>
    %7 = arith.addf %1, %6 : vector<256x96xf32>
    %c0_3 = arith.constant 0 : index
    %c0_4 = arith.constant 0 : index
    %8 = vector.load %arg4[%c0_3, %c0_4] : memref<96x1xf32, #tpu.memory_space<vmem>>, vector<96x1xf32>
    %cst_5 = arith.constant dense<0.000000e+00> : vector<256x1xf32>
    %9 = tpu.matmul %7, %8, %cst_5 {dimension_numbers = #tpu.dot_dimension_numbers<[1], [0], [0], [1], [0, 0, 1, 1], [], []>} : vector<256x96xf32>, vector<96x1xf32>, vector<256x1xf32> -> vector<256x1xf32>
    %10 = arith.negf %9 : vector<256x1xf32>
    %11 = math.exp %10 : vector<256x1xf32>
    %cst_6 = arith.constant 1.000000e+00 : f32
    %12 = vector.broadcast %cst_6 : f32 to vector<256x1xf32>
    %13 = arith.addf %12, %11 : vector<256x1xf32>
    %14 = arith.divf %12, %13 : vector<256x1xf32>
    %cst_7 = arith.constant 1.000000e+00 : f32
    %15 = vector.broadcast %cst_7 : f32 to vector<256x1xf32>
    %16 = arith.addf %15, %14 : vector<256x1xf32>
    %c0_8 = arith.constant 0 : index
    %c0_9 = arith.constant 0 : index
    %17 = vector.load %arg3[%c0_8, %c0_9] : memref<256x64xf32, #tpu.memory_space<vmem>>, vector<256x64xf32>
    %c0_10 = arith.constant 0 : index
    %c0_11 = arith.constant 0 : index
    %c0_12 = arith.constant 0 : index
    %18 = vector.load %arg2[%c0_10, %c0_11, %c0_12] : memref<1x64x96xf32, #tpu.memory_space<vmem>>, vector<1x64x96xf32>
    %19 = vector.shape_cast %18 : vector<1x64x96xf32> to vector<64x96xf32>
    %cst_13 = arith.constant dense<0.000000e+00> : vector<256x96xf32>
    %20 = tpu.matmul %17, %19, %cst_13 {dimension_numbers = #tpu.dot_dimension_numbers<[1], [0], [0], [1], [0, 0, 1, 1], [], []>} : vector<256x64xf32>, vector<64x96xf32>, vector<256x96xf32> -> vector<256x96xf32>
    %21 = vector.broadcast %16 : vector<256x1xf32> to vector<256x96xf32>
    %22 = arith.mulf %21, %20 : vector<256x96xf32>
    %cst_14 = arith.constant 0.000000e+00 : f32
    %23 = vector.broadcast %cst_14 : f32 to vector<18x18x96xf32>
    %c0_15 = arith.constant 0 : index
    %c0_16 = arith.constant 0 : index
    %c0_17 = arith.constant 0 : index
    %c0_18 = arith.constant 0 : index
    %24 = vector.load %arg5[%c0_15, %c0_16, %c0_17, %c0_18] : memref<1x18x18x96xf32, #tpu.memory_space<vmem>>, vector<1x18x18x96xf32>
    %25 = vector.shape_cast %24 : vector<1x18x18x96xf32> to vector<18x18x96xf32>
    %26 = vector.shape_cast %23 : vector<18x18x96xf32> to vector<1x18x18x96xf32>
    tpu.vector_store %arg5[%c0_15, %c0_16, %c0_17, %c0_18], %26 {strides = array<i32>} : memref<1x18x18x96xf32, #tpu.memory_space<vmem>>, vector<1x18x18x96xf32>,
    %27 = vector.shape_cast %22 : vector<256x96xf32> to vector<16x16x96xf32>
    %c0_19 = arith.constant 0 : index
    %c1 = arith.constant 1 : index
    %c1_20 = arith.constant 1 : index
    %c0_21 = arith.constant 0 : index
    %28 = vector.load %arg5[%c0_19, %c1, %c1_20, %c0_21] : memref<1x18x18x96xf32, #tpu.memory_space<vmem>>, vector<1x16x16x96xf32>
    %29 = vector.shape_cast %28 : vector<1x16x16x96xf32> to vector<16x16x96xf32>
    %30 = vector.shape_cast %27 : vector<16x16x96xf32> to vector<1x16x16x96xf32>
    tpu.vector_store %arg5[%c0_19, %c1, %c1_20, %c0_21], %30 {strides = array<i32>} : memref<1x18x18x96xf32, #tpu.memory_space<vmem>>, vector<1x16x16x96xf32>,
    return
  }
  func.func @transform_0(%arg0: i32) -> (i32, i32, i32) {
    %c0_i32 = arith.constant 0 : i32
    %c0_i32_0 = arith.constant 0 : i32
    %c0_i32_1 = arith.constant 0 : i32
    return %arg0, %c0_i32, %c0_i32_0 : i32, i32, i32
  }
  func.func @transform_1(%arg0: i32) -> (i32, i32, i32) {
    %c0_i32 = arith.constant 0 : i32
    %c0_i32_0 = arith.constant 0 : i32
    %c0_i32_1 = arith.constant 0 : i32
    return %arg0, %c0_i32, %c0_i32_0 : i32, i32, i32
  }
  func.func @transform_2(%arg0: i32) -> (i32, i32) {
    %c0_i32 = arith.constant 0 : i32
    %c0_i32_0 = arith.constant 0 : i32
    %c0_i32_1 = arith.constant 0 : i32
    return %c0_i32, %c0_i32_0 : i32, i32
  }
  func.func @transform_3(%arg0: i32) -> (i32, i32) {
    %c0_i32 = arith.constant 0 : i32
    %c0_i32_0 = arith.constant 0 : i32
    %c0_i32_1 = arith.constant 0 : i32
    return %c0_i32, %c0_i32_0 : i32, i32
  }
  func.func @transform_4(%arg0: i32) -> (i32, i32, i32, i32) {
    %c0_i32 = arith.constant 0 : i32
    %c0_i32_0 = arith.constant 0 : i32
    %c0_i32_1 = arith.constant 0 : i32
    %c0_i32_2 = arith.constant 0 : i32
    return %arg0, %c0_i32, %c0_i32_0, %c0_i32_1 : i32, i32, i32, i32
  }
}

module attributes {stable_mosaic.version = 11 : i64} {
  func.func @_conv_pred_seg_kernel(%arg0: i32, %arg1: memref<1x18x18x96xf32, #tpu.memory_space<vmem>>, %arg2: memref<9x96x16xbf16, #tpu.memory_space<vmem>>, %arg3: memref<1x16xf32, #tpu.memory_space<vmem>>, %arg4: memref<16x1xf32, #tpu.memory_space<vmem>>, %arg5: memref<1x1xf32, #tpu.memory_space<vmem>>, %arg6: memref<1x256x1xf32, #tpu.memory_space<vmem>>) attributes {dimension_semantics = [#tpu.dimension_semantics<parallel>], iteration_bounds = array<i64: 2>, scalar_prefetch = 0 : i64, scratch_operands = 0 : i64, tpu.core_type = #tpu.core_type<tc>, window_params = [{transform_indices = @transform_0, window_bounds = array<i64: 1, 18, 18, 96>}, {pipeline_mode = #tpu.pipeline_mode<synchronous>, transform_indices = @transform_1, window_bounds = array<i64: 9, 96, 16>}, {pipeline_mode = #tpu.pipeline_mode<synchronous>, transform_indices = @transform_2, window_bounds = array<i64: 1, 16>}, {pipeline_mode = #tpu.pipeline_mode<synchronous>, transform_indices = @transform_3, window_bounds = array<i64: 16, 1>}, {pipeline_mode = #tpu.pipeline_mode<synchronous>, transform_indices = @transform_4, window_bounds = array<i64: 1, 1>}, {transform_indices = @transform_5, window_bounds = array<i64: 1, 256, 1>}]} {
    %c0 = arith.constant 0 : index
    %c0_0 = arith.constant 0 : index
    %c0_1 = arith.constant 0 : index
    %c0_2 = arith.constant 0 : index
    %0 = vector.load %arg1[%c0, %c0_0, %c0_1, %c0_2] : memref<1x18x18x96xf32, #tpu.memory_space<vmem>>, vector<1x18x18x96xf32>
    %1 = vector.shape_cast %0 : vector<1x18x18x96xf32> to vector<18x18x96xf32>
    %2 = vector.extract_strided_slice %1 {offsets = [0, 0, 0], sizes = [16, 16, 96], strides = [1, 1, 1]} : vector<18x18x96xf32> to vector<16x16x96xf32>
    %3 = vector.shape_cast %2 : vector<16x16x96xf32> to vector<256x96xf32>
    %4 = arith.truncf %3 : vector<256x96xf32> to vector<256x96xbf16>
    %c0_3 = arith.constant 0 : index
    %c0_4 = arith.constant 0 : index
    %c0_5 = arith.constant 0 : index
    %5 = vector.load %arg2[%c0_3, %c0_4, %c0_5] : memref<9x96x16xbf16, #tpu.memory_space<vmem>>, vector<1x96x16xbf16>
    %6 = vector.shape_cast %5 : vector<1x96x16xbf16> to vector<96x16xbf16>
    %cst = arith.constant dense<0.000000e+00> : vector<256x16xf32>
    %7 = tpu.matmul %4, %6, %cst {dimension_numbers = #tpu.dot_dimension_numbers<[1], [0], [0], [1], [0, 0, 1, 1], [], []>} : vector<256x96xbf16>, vector<96x16xbf16>, vector<256x16xf32> -> vector<256x16xf32>
    %8 = vector.extract_strided_slice %1 {offsets = [0, 1, 0], sizes = [16, 16, 96], strides = [1, 1, 1]} : vector<18x18x96xf32> to vector<16x16x96xf32>
    %9 = vector.shape_cast %8 : vector<16x16x96xf32> to vector<256x96xf32>
    %10 = arith.truncf %9 : vector<256x96xf32> to vector<256x96xbf16>
    %c1 = arith.constant 1 : index
    %c0_6 = arith.constant 0 : index
    %c0_7 = arith.constant 0 : index
    %11 = vector.load %arg2[%c1, %c0_6, %c0_7] : memref<9x96x16xbf16, #tpu.memory_space<vmem>>, vector<1x96x16xbf16>
    %12 = vector.shape_cast %11 : vector<1x96x16xbf16> to vector<96x16xbf16>
    %cst_8 = arith.constant dense<0.000000e+00> : vector<256x16xf32>
    %13 = tpu.matmul %10, %12, %cst_8 {dimension_numbers = #tpu.dot_dimension_numbers<[1], [0], [0], [1], [0, 0, 1, 1], [], []>} : vector<256x96xbf16>, vector<96x16xbf16>, vector<256x16xf32> -> vector<256x16xf32>
    %14 = arith.addf %7, %13 : vector<256x16xf32>
    %15 = vector.extract_strided_slice %1 {offsets = [0, 2, 0], sizes = [16, 16, 96], strides = [1, 1, 1]} : vector<18x18x96xf32> to vector<16x16x96xf32>
    %16 = vector.shape_cast %15 : vector<16x16x96xf32> to vector<256x96xf32>
    %17 = arith.truncf %16 : vector<256x96xf32> to vector<256x96xbf16>
    %c2 = arith.constant 2 : index
    %c0_9 = arith.constant 0 : index
    %c0_10 = arith.constant 0 : index
    %18 = vector.load %arg2[%c2, %c0_9, %c0_10] : memref<9x96x16xbf16, #tpu.memory_space<vmem>>, vector<1x96x16xbf16>
    %19 = vector.shape_cast %18 : vector<1x96x16xbf16> to vector<96x16xbf16>
    %cst_11 = arith.constant dense<0.000000e+00> : vector<256x16xf32>
    %20 = tpu.matmul %17, %19, %cst_11 {dimension_numbers = #tpu.dot_dimension_numbers<[1], [0], [0], [1], [0, 0, 1, 1], [], []>} : vector<256x96xbf16>, vector<96x16xbf16>, vector<256x16xf32> -> vector<256x16xf32>
    %21 = arith.addf %14, %20 : vector<256x16xf32>
    %22 = vector.extract_strided_slice %1 {offsets = [1, 0, 0], sizes = [16, 16, 96], strides = [1, 1, 1]} : vector<18x18x96xf32> to vector<16x16x96xf32>
    %23 = vector.shape_cast %22 : vector<16x16x96xf32> to vector<256x96xf32>
    %24 = arith.truncf %23 : vector<256x96xf32> to vector<256x96xbf16>
    %c3 = arith.constant 3 : index
    %c0_12 = arith.constant 0 : index
    %c0_13 = arith.constant 0 : index
    %25 = vector.load %arg2[%c3, %c0_12, %c0_13] : memref<9x96x16xbf16, #tpu.memory_space<vmem>>, vector<1x96x16xbf16>
    %26 = vector.shape_cast %25 : vector<1x96x16xbf16> to vector<96x16xbf16>
    %cst_14 = arith.constant dense<0.000000e+00> : vector<256x16xf32>
    %27 = tpu.matmul %24, %26, %cst_14 {dimension_numbers = #tpu.dot_dimension_numbers<[1], [0], [0], [1], [0, 0, 1, 1], [], []>} : vector<256x96xbf16>, vector<96x16xbf16>, vector<256x16xf32> -> vector<256x16xf32>
    %28 = arith.addf %21, %27 : vector<256x16xf32>
    %29 = vector.extract_strided_slice %1 {offsets = [1, 1, 0], sizes = [16, 16, 96], strides = [1, 1, 1]} : vector<18x18x96xf32> to vector<16x16x96xf32>
    %30 = vector.shape_cast %29 : vector<16x16x96xf32> to vector<256x96xf32>
    %31 = arith.truncf %30 : vector<256x96xf32> to vector<256x96xbf16>
    %c4 = arith.constant 4 : index
    %c0_15 = arith.constant 0 : index
    %c0_16 = arith.constant 0 : index
    %32 = vector.load %arg2[%c4, %c0_15, %c0_16] : memref<9x96x16xbf16, #tpu.memory_space<vmem>>, vector<1x96x16xbf16>
    %33 = vector.shape_cast %32 : vector<1x96x16xbf16> to vector<96x16xbf16>
    %cst_17 = arith.constant dense<0.000000e+00> : vector<256x16xf32>
    %34 = tpu.matmul %31, %33, %cst_17 {dimension_numbers = #tpu.dot_dimension_numbers<[1], [0], [0], [1], [0, 0, 1, 1], [], []>} : vector<256x96xbf16>, vector<96x16xbf16>, vector<256x16xf32> -> vector<256x16xf32>
    %35 = arith.addf %28, %34 : vector<256x16xf32>
    %36 = vector.extract_strided_slice %1 {offsets = [1, 2, 0], sizes = [16, 16, 96], strides = [1, 1, 1]} : vector<18x18x96xf32> to vector<16x16x96xf32>
    %37 = vector.shape_cast %36 : vector<16x16x96xf32> to vector<256x96xf32>
    %38 = arith.truncf %37 : vector<256x96xf32> to vector<256x96xbf16>
    %c5 = arith.constant 5 : index
    %c0_18 = arith.constant 0 : index
    %c0_19 = arith.constant 0 : index
    %39 = vector.load %arg2[%c5, %c0_18, %c0_19] : memref<9x96x16xbf16, #tpu.memory_space<vmem>>, vector<1x96x16xbf16>
    %40 = vector.shape_cast %39 : vector<1x96x16xbf16> to vector<96x16xbf16>
    %cst_20 = arith.constant dense<0.000000e+00> : vector<256x16xf32>
    %41 = tpu.matmul %38, %40, %cst_20 {dimension_numbers = #tpu.dot_dimension_numbers<[1], [0], [0], [1], [0, 0, 1, 1], [], []>} : vector<256x96xbf16>, vector<96x16xbf16>, vector<256x16xf32> -> vector<256x16xf32>
    %42 = arith.addf %35, %41 : vector<256x16xf32>
    %43 = vector.extract_strided_slice %1 {offsets = [2, 0, 0], sizes = [16, 16, 96], strides = [1, 1, 1]} : vector<18x18x96xf32> to vector<16x16x96xf32>
    %44 = vector.shape_cast %43 : vector<16x16x96xf32> to vector<256x96xf32>
    %45 = arith.truncf %44 : vector<256x96xf32> to vector<256x96xbf16>
    %c6 = arith.constant 6 : index
    %c0_21 = arith.constant 0 : index
    %c0_22 = arith.constant 0 : index
    %46 = vector.load %arg2[%c6, %c0_21, %c0_22] : memref<9x96x16xbf16, #tpu.memory_space<vmem>>, vector<1x96x16xbf16>
    %47 = vector.shape_cast %46 : vector<1x96x16xbf16> to vector<96x16xbf16>
    %cst_23 = arith.constant dense<0.000000e+00> : vector<256x16xf32>
    %48 = tpu.matmul %45, %47, %cst_23 {dimension_numbers = #tpu.dot_dimension_numbers<[1], [0], [0], [1], [0, 0, 1, 1], [], []>} : vector<256x96xbf16>, vector<96x16xbf16>, vector<256x16xf32> -> vector<256x16xf32>
    %49 = arith.addf %42, %48 : vector<256x16xf32>
    %50 = vector.extract_strided_slice %1 {offsets = [2, 1, 0], sizes = [16, 16, 96], strides = [1, 1, 1]} : vector<18x18x96xf32> to vector<16x16x96xf32>
    %51 = vector.shape_cast %50 : vector<16x16x96xf32> to vector<256x96xf32>
    %52 = arith.truncf %51 : vector<256x96xf32> to vector<256x96xbf16>
    %c7 = arith.constant 7 : index
    %c0_24 = arith.constant 0 : index
    %c0_25 = arith.constant 0 : index
    %53 = vector.load %arg2[%c7, %c0_24, %c0_25] : memref<9x96x16xbf16, #tpu.memory_space<vmem>>, vector<1x96x16xbf16>
    %54 = vector.shape_cast %53 : vector<1x96x16xbf16> to vector<96x16xbf16>
    %cst_26 = arith.constant dense<0.000000e+00> : vector<256x16xf32>
    %55 = tpu.matmul %52, %54, %cst_26 {dimension_numbers = #tpu.dot_dimension_numbers<[1], [0], [0], [1], [0, 0, 1, 1], [], []>} : vector<256x96xbf16>, vector<96x16xbf16>, vector<256x16xf32> -> vector<256x16xf32>
    %56 = arith.addf %49, %55 : vector<256x16xf32>
    %57 = vector.extract_strided_slice %1 {offsets = [2, 2, 0], sizes = [16, 16, 96], strides = [1, 1, 1]} : vector<18x18x96xf32> to vector<16x16x96xf32>
    %58 = vector.shape_cast %57 : vector<16x16x96xf32> to vector<256x96xf32>
    %59 = arith.truncf %58 : vector<256x96xf32> to vector<256x96xbf16>
    %c8 = arith.constant 8 : index
    %c0_27 = arith.constant 0 : index
    %c0_28 = arith.constant 0 : index
    %60 = vector.load %arg2[%c8, %c0_27, %c0_28] : memref<9x96x16xbf16, #tpu.memory_space<vmem>>, vector<1x96x16xbf16>
    %61 = vector.shape_cast %60 : vector<1x96x16xbf16> to vector<96x16xbf16>
    %cst_29 = arith.constant dense<0.000000e+00> : vector<256x16xf32>
    %62 = tpu.matmul %59, %61, %cst_29 {dimension_numbers = #tpu.dot_dimension_numbers<[1], [0], [0], [1], [0, 0, 1, 1], [], []>} : vector<256x96xbf16>, vector<96x16xbf16>, vector<256x16xf32> -> vector<256x16xf32>
    %63 = arith.addf %56, %62 : vector<256x16xf32>
    %c0_30 = arith.constant 0 : index
    %c0_31 = arith.constant 0 : index
    %64 = vector.load %arg3[%c0_30, %c0_31] : memref<1x16xf32, #tpu.memory_space<vmem>>, vector<1x16xf32>
    %65 = vector.broadcast %64 : vector<1x16xf32> to vector<256x16xf32>
    %66 = arith.addf %63, %65 : vector<256x16xf32>
    %cst_32 = arith.constant 0.000000e+00 : f32
    %67 = vector.broadcast %cst_32 : f32 to vector<256x16xf32>
    %68 = arith.maximumf %66, %67 : vector<256x16xf32>
    %c0_33 = arith.constant 0 : index
    %c0_34 = arith.constant 0 : index
    %69 = vector.load %arg4[%c0_33, %c0_34] : memref<16x1xf32, #tpu.memory_space<vmem>>, vector<16x1xf32>
    %cst_35 = arith.constant dense<0.000000e+00> : vector<256x1xf32>
    %70 = tpu.matmul %68, %69, %cst_35 {dimension_numbers = #tpu.dot_dimension_numbers<[1], [0], [0], [1], [0, 0, 1, 1], [], []>} : vector<256x16xf32>, vector<16x1xf32>, vector<256x1xf32> -> vector<256x1xf32>
    %c0_36 = arith.constant 0 : index
    %c0_37 = arith.constant 0 : index
    %71 = vector.load %arg5[%c0_36, %c0_37] : memref<1x1xf32, #tpu.memory_space<vmem>>, vector<1x1xf32>
    %72 = vector.broadcast %71 : vector<1x1xf32> to vector<256x1xf32>
    %73 = arith.addf %70, %72 : vector<256x1xf32>
    %c0_38 = arith.constant 0 : index
    %c0_39 = arith.constant 0 : index
    %c0_40 = arith.constant 0 : index
    %74 = vector.load %arg6[%c0_38, %c0_39, %c0_40] : memref<1x256x1xf32, #tpu.memory_space<vmem>>, vector<1x256x1xf32>
    %75 = vector.shape_cast %74 : vector<1x256x1xf32> to vector<256x1xf32>
    %76 = vector.shape_cast %73 : vector<256x1xf32> to vector<1x256x1xf32>
    tpu.vector_store %arg6[%c0_38, %c0_39, %c0_40], %76 {strides = array<i32>} : memref<1x256x1xf32, #tpu.memory_space<vmem>>, vector<1x256x1xf32>,
    return
  }
  func.func @transform_0(%arg0: i32) -> (i32, i32, i32, i32) {
    %c0_i32 = arith.constant 0 : i32
    %c0_i32_0 = arith.constant 0 : i32
    %c0_i32_1 = arith.constant 0 : i32
    %c0_i32_2 = arith.constant 0 : i32
    return %arg0, %c0_i32, %c0_i32_0, %c0_i32_1 : i32, i32, i32, i32
  }
  func.func @transform_1(%arg0: i32) -> (i32, i32, i32) {
    %c0_i32 = arith.constant 0 : i32
    %c0_i32_0 = arith.constant 0 : i32
    %c0_i32_1 = arith.constant 0 : i32
    %c0_i32_2 = arith.constant 0 : i32
    return %c0_i32, %c0_i32_0, %c0_i32_1 : i32, i32, i32
  }
  func.func @transform_2(%arg0: i32) -> (i32, i32) {
    %c0_i32 = arith.constant 0 : i32
    %c0_i32_0 = arith.constant 0 : i32
    %c0_i32_1 = arith.constant 0 : i32
    return %c0_i32, %c0_i32_0 : i32, i32
  }
  func.func @transform_3(%arg0: i32) -> (i32, i32) {
    %c0_i32 = arith.constant 0 : i32
    %c0_i32_0 = arith.constant 0 : i32
    %c0_i32_1 = arith.constant 0 : i32
    return %c0_i32, %c0_i32_0 : i32, i32
  }
  func.func @transform_4(%arg0: i32) -> (i32, i32) {
    %c0_i32 = arith.constant 0 : i32
    %c0_i32_0 = arith.constant 0 : i32
    %c0_i32_1 = arith.constant 0 : i32
    return %c0_i32, %c0_i32_0 : i32, i32
  }
  func.func @transform_5(%arg0: i32) -> (i32, i32, i32) {
    %c0_i32 = arith.constant 0 : i32
    %c0_i32_0 = arith.constant 0 : i32
    %c0_i32_1 = arith.constant 0 : i32
    return %arg0, %c0_i32, %c0_i32_0 : i32, i32, i32
  }
}

module attributes {stable_mosaic.version = 11 : i64} {
  func.func @_upsample4x_sigmoid_kernel(%arg0: i32, %arg1: memref<1x16x16xf32, #tpu.memory_space<vmem>>, %arg2: memref<64x16xf32, #tpu.memory_space<vmem>>, %arg3: memref<16x64xf32, #tpu.memory_space<vmem>>, %arg4: memref<1x64x64xf32, #tpu.memory_space<vmem>>) attributes {dimension_semantics = [#tpu.dimension_semantics<parallel>], iteration_bounds = array<i64: 2>, scalar_prefetch = 0 : i64, scratch_operands = 0 : i64, tpu.core_type = #tpu.core_type<tc>, window_params = [{transform_indices = @transform_0, window_bounds = array<i64: 1, 16, 16>}, {pipeline_mode = #tpu.pipeline_mode<synchronous>, transform_indices = @transform_1, window_bounds = array<i64: 64, 16>}, {pipeline_mode = #tpu.pipeline_mode<synchronous>, transform_indices = @transform_2, window_bounds = array<i64: 16, 64>}, {transform_indices = @transform_3, window_bounds = array<i64: 1, 64, 64>}]} {
    %c0 = arith.constant 0 : index
    %c0_0 = arith.constant 0 : index
    %c0_1 = arith.constant 0 : index
    %0 = vector.load %arg1[%c0, %c0_0, %c0_1] : memref<1x16x16xf32, #tpu.memory_space<vmem>>, vector<1x16x16xf32>
    %1 = vector.shape_cast %0 : vector<1x16x16xf32> to vector<16x16xf32>
    %c0_2 = arith.constant 0 : index
    %c0_3 = arith.constant 0 : index
    %2 = vector.load %arg3[%c0_2, %c0_3] : memref<16x64xf32, #tpu.memory_space<vmem>>, vector<16x64xf32>
    %cst = arith.constant dense<0.000000e+00> : vector<16x64xf32>
    %3 = tpu.matmul %1, %2, %cst {dimension_numbers = #tpu.dot_dimension_numbers<[1], [0], [0], [1], [0, 0, 1, 1], [], []>} : vector<16x16xf32>, vector<16x64xf32>, vector<16x64xf32> -> vector<16x64xf32>
    %c0_4 = arith.constant 0 : index
    %c0_5 = arith.constant 0 : index
    %4 = vector.load %arg2[%c0_4, %c0_5] : memref<64x16xf32, #tpu.memory_space<vmem>>, vector<64x16xf32>
    %cst_6 = arith.constant dense<0.000000e+00> : vector<64x64xf32>
    %5 = tpu.matmul %4, %3, %cst_6 {dimension_numbers = #tpu.dot_dimension_numbers<[1], [0], [0], [1], [0, 0, 1, 1], [], []>} : vector<64x16xf32>, vector<16x64xf32>, vector<64x64xf32> -> vector<64x64xf32>
    %6 = arith.negf %5 : vector<64x64xf32>
    %7 = math.exp %6 : vector<64x64xf32>
    %cst_7 = arith.constant 1.000000e+00 : f32
    %8 = vector.broadcast %cst_7 : f32 to vector<64x64xf32>
    %9 = arith.addf %8, %7 : vector<64x64xf32>
    %10 = arith.divf %8, %9 : vector<64x64xf32>
    %c0_8 = arith.constant 0 : index
    %c0_9 = arith.constant 0 : index
    %c0_10 = arith.constant 0 : index
    %11 = vector.load %arg4[%c0_8, %c0_9, %c0_10] : memref<1x64x64xf32, #tpu.memory_space<vmem>>, vector<1x64x64xf32>
    %12 = vector.shape_cast %11 : vector<1x64x64xf32> to vector<64x64xf32>
    %13 = vector.shape_cast %10 : vector<64x64xf32> to vector<1x64x64xf32>
    tpu.vector_store %arg4[%c0_8, %c0_9, %c0_10], %13 {strides = array<i32>} : memref<1x64x64xf32, #tpu.memory_space<vmem>>, vector<1x64x64xf32>,
    return
  }
  func.func @transform_0(%arg0: i32) -> (i32, i32, i32) {
    %c0_i32 = arith.constant 0 : i32
    %c0_i32_0 = arith.constant 0 : i32
    %c0_i32_1 = arith.constant 0 : i32
    return %arg0, %c0_i32, %c0_i32_0 : i32, i32, i32
  }
  func.func @transform_1(%arg0: i32) -> (i32, i32) {
    %c0_i32 = arith.constant 0 : i32
    %c0_i32_0 = arith.constant 0 : i32
    %c0_i32_1 = arith.constant 0 : i32
    return %c0_i32, %c0_i32_0 : i32, i32
  }
  func.func @transform_2(%arg0: i32) -> (i32, i32) {
    %c0_i32 = arith.constant 0 : i32
    %c0_i32_0 = arith.constant 0 : i32
    %c0_i32_1 = arith.constant 0 : i32
    return %c0_i32, %c0_i32_0 : i32, i32
  }
  func.func @transform_3(%arg0: i32) -> (i32, i32, i32) {
    %c0_i32 = arith.constant 0 : i32
    %c0_i32_0 = arith.constant 0 : i32
    %c0_i32_1 = arith.constant 0 : i32
    return %arg0, %c0_i32, %c0_i32_0 : i32, i32, i32
  }
}

</mosaic_0001>

<bundles_post_ra>
// kernel: hiformer1_forward.7
= control target key start
LH: loop header
LB: loop body
LE: loop exit
PB: predicated region body
PF: predicated region fallthrough
CT: control target
= control target key end

     0   :  { %s1044_s15 = smov 0   ;;  %s1443_s0 = inlined_call_operand.vmem [shape: f32[2,64,192], index: 0, kind: input, shape index: {}]   ;;  %s1444_s1 = inlined_call_operand.vmem [shape: f32[2,16,192], index: 1, kind: input, shape index: {}]   ;;  %s1445_s2 = inlined_call_operand.vmem [shape: f32[64,16], index: 2, kind: input, shape index: {}]   ;;  %s1446_s3 = inlined_call_operand.vmem [shape: f32[192,1], index: 3, kind: input, shape index: {}]   ;;  %s1447_s4 = inlined_call_operand.vmem [shape: f32[2,10,10,192], index: 4, kind: output, shape index: {}]  }
   0x1 LB: > { %s894_s16 = sadd.s32 4294967295, %s1015_s15   ;;  %p898_p0 = scmp.ge.s32.totalorder %s1015_s15, 1  ;;  %s1015_s15 = sphi %s1044_s15, %s14_s15  }
   0x2   : > { %p172_p1 = scmp.lt.s32.totalorder %s1015_s15, 3 }
   0x4   : > { %p173_p2 = pnand %p898_p0, %p172_p1 }
   0x5   : > { %p203_p3 = scmp.lt.s32.totalorder (!%p173_p2), %s894_s16, 1 }
   0x6   : > { %176 = sbr.rel (%p173_p2) target bundleno = 446 (0x1be), region = 36 }
   0xb   : > { %v303_v0 = vld [vmem:[%s1446_s3 + $0x78] sm:$0xff]  ;;  %v1017_v1 = vmov 0.0   ;;  %v302_v2 = vld [vmem:[%s1446_s3 + $0x70] sm:$0xff]  ;;  %s1449_s16 = smov (!%p203_p3, %s894_s16), 1  ;;  %v301_v3 = vld [vmem:[%s1446_s3 + $0x68] sm:$0xff]  ;;  %vm247_vm0 = vcmask 523264  }
   0xc   : > { %336 = vmatprep.subr.mxu0 %v1017_v1  ;;  %598 = vmatprep.mubr.f32.mxu1 %v1017_v1  ;;  %s962_s23 = sshll.u32 %s1449_s16, 7  ;;  %s964_s24 = smul.u32 320, %s1449_s16  ;;  %v300_v4 = vld [vmem:[%s1446_s3 + $0x60] sm:$0xff]  ;;  %v299_v5 = vld [vmem:[%s1446_s3 + $0x58] sm:$0xff]  ;;  %v298_v9 = vld [vmem:[%s1446_s3 + $0x50] sm:$0xff]  ;;  %vm509_vm1 = vcmask 130048  }
   0xd   : > { %337 = vmatpush1.msra.mxu0 %v303_v0  ;;  %s1075_s29 = scalar_lea.vmem %s1443_s0, %s962_s23  ;;  %s963_s9 = sshll.u32 %s1449_s16, 5  ;;  %v297_v17 = vld [vmem:[%s1446_s3 + $0x48] sm:$0xff]  ;;  %v296_v21 = vld [vmem:[%s1446_s3 + $0x40] sm:$0xff]  ;;  %v295_v34 = vld [vmem:[%s1446_s3 + $0x38] sm:$0xff]  ;;  %vm706_vm2 = vcmask 517120   ;;  %vm794_vm3 = vcmask 523265  }
   0xe   : > { %338 = vmatprep.subr.mxu0 %v1017_v1  ;;  %s1080_s6 = scalar_lea.vmem %s1447_s4, %s964_s24  ;;  %v1158_v6 = vld [vmem:[%s1075_s29 + $0x8] sm:$0xff]  ;;  %v1161_v7 = vld [vmem:[%s1075_s29 + $0x18] sm:$0xff]  ;;  %v1183_v16 = vld [vmem:[%s1075_s29] sm:$0xff]  ;;  %s212_s14 = scalar_lea.vmem %s1444_s1, %s963_s9  ;;  %vm797_vm4 = vcmask 516096  }
   0xf   : > { %339 = vmatpush1.msra.mxu0 %v302_v2  ;;  %703 = vst [vmem:[%s1080_s6] sm:$0xff] %v1017_v1  ;;  %704 = vst.msk [vmem:[%s1080_s6 + $0x8] sm:$0xff] %vm247_vm0, %v1017_v1  ;;  %v1164_v8 = vld [vmem:[%s1075_s29 + $0x28] sm:$0xff]  ;;  %v1171_v10 = vld [vmem:[%s1075_s29 + $0x38] sm:$0xff]  ;;  %v248_v11 = vsel %vm247_vm0, %v1158_v6, 0.0  ;;  %v249_v12 = vsel %vm247_vm0, %v1161_v7, 0.0 }
  0x10   : > { %340 = vmatprep.subr.mxu0 %v1017_v1  ;;  %705 = vst [vmem:[%s1080_s6 + $0x10] sm:$0x3] %v1017_v1  ;;  %708 = vst [vmem:[%s1080_s6 + $0x20] sm:$0xff] %v1017_v1  ;;  %v251_v13 = vsel %vm247_vm0, %v1164_v8, 0.0  ;;  %v1180_v14 = vld [vmem:[%s1075_s29 + $0x48] sm:$0xff]  ;;  %v250_v15 = vadd.f32 %v249_v12, %v248_v11  ;;  %v253_v18 = vsel %vm247_vm0, %v1171_v10, 0.0 }
  0x11   : > { %341 = vmatpush1.msra.mxu0 %v301_v3  ;;  %709 = vst.msk [vmem:[%s1080_s6 + $0x28] sm:$0xff] %vm247_vm0, %v1017_v1  ;;  %710 = vst [vmem:[%s1080_s6 + $0x30] sm:$0x3] %v1017_v1  ;;  %v1195_v19 = vld [vmem:[%s1075_s29 + $0x10] sm:$0xff]  ;;  %v1198_v20 = vld [vmem:[%s1075_s29 + $0x20] sm:$0xff]  ;;  %v255_v25 = vsel %vm247_vm0, %v1180_v14, 0.0 }
  0x12   : > { %342 = vmatprep.subr.mxu0 %v1017_v1  ;;  %712 = vst [vmem:[%s1080_s6 + $0x40] sm:$0xff] %v1017_v1  ;;  %713 = vst.msk [vmem:[%s1080_s6 + $0x48] sm:$0xff] %vm247_vm0, %v1017_v1  ;;  %v1204_v22 = vld [vmem:[%s1075_s29 + $0x58] sm:$0xff]  ;;  %v252_v23 = vadd.f32 %v251_v13, %v250_v15  ;;  %v234_v24 = vadd.f32 %v1195_v19, %v1183_v16  ;;  %v1212_v26 = vld [vmem:[%s1075_s29 + $0x30] sm:$0xff] }
  0x13   : > { %714 = vst [vmem:[%s1080_s6 + $0x50] sm:$0x3] %v1017_v1  ;;  %716 = vst [vmem:[%s1080_s6 + $0x60] sm:$0xff] %v1017_v1  ;;  %343 = vmatpush1.msra.mxu0 %v300_v4  ;;  %v508_v27 = vld [vmem:[%s212_s14 + $0x18] sm:$0xff]  ;;  %v507_v28 = vld [vmem:[%s212_s14 + $0x10] sm:$0xff]  ;;  %v257_v35 = vsel %vm247_vm0, %v1204_v22, 0.0 }
  0x14   : > { %717 = vst.msk [vmem:[%s1080_s6 + $0x68] sm:$0xff] %vm247_vm0, %v1017_v1  ;;  %718 = vst [vmem:[%s1080_s6 + $0x70] sm:$0x3] %v1017_v1  ;;  %344 = vmatprep.subr.mxu0 %v1017_v1  ;;  %v1215_v29 = vld [vmem:[%s1075_s29 + $0x68] sm:$0xff]  ;;  %v254_v30 = vadd.f32 %v253_v18, %v252_v23  ;;  %v235_v31 = vadd.f32 %v234_v24, %v1198_v20  ;;  %562 = vmatprep.subr.mxu1 %v508_v27  ;;  %v505_v33 = vld [vmem:[%s212_s14] sm:$0xff] }
  0x15   : > { %720 = vst [vmem:[%s1080_s6 + $0x80] sm:$0xff] %v1017_v1  ;;  %721 = vst.msk [vmem:[%s1080_s6 + $0x88] sm:$0xff] %vm247_vm0, %v1017_v1  ;;  %345 = vmatpush1.msra.mxu0 %v299_v5  ;;  %v506_v32 = vld [vmem:[%s212_s14 + $0x8] sm:$0xff]  ;;  %v1225_v36 = vld [vmem:[%s1075_s29 + $0x40] sm:$0xff]  ;;  %563 = vmatpush1.msra.mxu1 %v507_v28  ;;  %v259_v42 = vsel %vm247_vm0, %v1215_v29, 0.0 }
  0x16   : > { %722 = vst [vmem:[%s1080_s6 + $0x90] sm:$0x3] %v1017_v1  ;;  %724 = vst [vmem:[%s1080_s6 + $0xa0] sm:$0xff] %v1017_v1  ;;  %346 = vmatprep.subr.mxu0 %v1017_v1  ;;  %v497_v37 = vld [vmem:[%s1445_s2] sm:$0xff]  ;;  %v1231_v38 = vld [vmem:[%s1075_s29 + $0x78] sm:$0xff]  ;;  %v256_v39 = vadd.f32 %v255_v25, %v254_v30  ;;  %v236_v40 = vadd.f32 %v235_v31, %v1212_v26  ;;  %564 = vmatprep.subr.mxu1 %v506_v32 }
  0x17   : > { %725 = vst.msk [vmem:[%s1080_s6 + $0xa8] sm:$0xff] %vm247_vm0, %v1017_v1  ;;  %726 = vst [vmem:[%s1080_s6 + $0xb0] sm:$0x3] %v1017_v1  ;;  %347 = vmatpush1.msra.mxu0 %v298_v9  ;;  %v294_v41 = vld [vmem:[%s1446_s3 + $0x30] sm:$0xff]  ;;  %565 = vmatpush1.msra.mxu1 %v505_v33  ;;  %v293_v46 = vld [vmem:[%s1446_s3 + $0x28] sm:$0xff]  ;;  %v261_v47 = vsel %vm247_vm0, %v1231_v38, 0.0 }
  0x18   : > { %728 = vst [vmem:[%s1080_s6 + $0xc0] sm:$0xff] %v1017_v1  ;;  %729 = vst.msk [vmem:[%s1080_s6 + $0xc8] sm:$0xff] %vm247_vm0, %v1017_v1  ;;  %348 = vmatprep.subr.mxu0 %v1017_v1  ;;  %v1241_v43 = vld [vmem:[%s1075_s29 + $0x50] sm:$0xff]  ;;  %v258_v44 = vadd.f32 %v257_v35, %v256_v39  ;;  %v237_v45 = vadd.f32 %v236_v40, %v1225_v36  ;;  %920 = vmatmul.mubr.msk.f32.vlgmr.msra.gmra.mxu1 %vm509_vm1, %v497_v37  ;;  %v1252_v48 = vld [vmem:[%s1075_s29 + $0x60] sm:$0xff] }
  0x19   : > { %730 = vst [vmem:[%s1080_s6 + $0xd0] sm:$0x3] %v1017_v1  ;;  %732 = vst [vmem:[%s1080_s6 + $0xe0] sm:$0xff] %v1017_v1  ;;  %349 = vmatpush1.msra.mxu0 %v297_v17  ;;  %604 = vmatprep.mubr.f32.mxu1 %v1017_v1  ;;  %v498_v49 = vld [vmem:[%s1445_s2 + $0x8] sm:$0xff]  ;;  %v292_v52 = vld [vmem:[%s1446_s3 + $0x20] sm:$0xff] }
  0x1a   : > { %733 = vst.msk [vmem:[%s1080_s6 + $0xe8] sm:$0xff] %vm247_vm0, %v1017_v1  ;;  %734 = vst [vmem:[%s1080_s6 + $0xf0] sm:$0x3] %v1017_v1  ;;  %350 = vmatprep.subr.mxu0 %v1017_v1  ;;  %v260_v50 = vadd.f32 %v259_v42, %v258_v44  ;;  %v238_v51 = vadd.f32 %v237_v45, %v1241_v43  ;;  %v1264_v53 = vld [vmem:[%s1075_s29 + $0x70] sm:$0xff]  ;;  %v291_v56 = vld [vmem:[%s1446_s3 + $0x18] sm:$0xff] }
  0x1b   : > { %736 = vst [vmem:[%s1080_s6 + $0x100] sm:$0xff] %v1017_v1  ;;  %737 = vst.msk [vmem:[%s1080_s6 + $0x108] sm:$0xff] %vm247_vm0, %v1017_v1  ;;  %351 = vmatpush1.msra.mxu0 %v296_v21  ;;  %v499_v57 = vld [vmem:[%s1445_s2 + $0x10] sm:$0xff]  ;;  %v289_v63 = vld [vmem:[%s1446_s3 + $0x8] sm:$0xff] }
  0x1c   : > { %738 = vst [vmem:[%s1080_s6 + $0x110] sm:$0x3] %v1017_v1  ;;  %740 = vst [vmem:[%s1080_s6 + $0x120] sm:$0xff] %v1017_v1  ;;  %352 = vmatprep.subr.mxu0 %v1017_v1  ;;  %v262_v54 = vadd.f32 %v261_v47, %v260_v50  ;;  %v239_v55 = vadd.f32 %v238_v51, %v1252_v48  ;;  %921 = vmatmul.mubr.msk.f32.gmra.mxu1 %vm509_vm1, %v498_v49  ;;  %v290_v60 = vld [vmem:[%s1446_s3 + $0x10] sm:$0xff]  ;;  %v500_v0 = vld [vmem:[%s1445_s2 + $0x18] sm:$0xff] }
  0x1d   : > { %741 = vst.msk [vmem:[%s1080_s6 + $0x128] sm:$0xff] %vm247_vm0, %v1017_v1  ;;  %742 = vst [vmem:[%s1080_s6 + $0x130] sm:$0x3] %v1017_v1  ;;  %353 = vmatpush1.msra.mxu0 %v295_v34  ;;  %610 = vmatprep.mubr.f32.mxu1 %v1017_v1  ;;  %v288_v4 = vld [vmem:[%s1446_s3] sm:$0xff]  ;;  %v311_v11 = vld [vmem:[%s1446_s3 + $0xb8] sm:$0xff] }
  0x1e   : > { %354 = vmatprep.subr.mxu0 %v1017_v1  ;;  %v263_v58 = vrot.slane %v262_v54, 4  ;;  %v240_v59 = vadd.f32 %v239_v55, %v1264_v53  ;;  %v501_v12 = vld [vmem:[%s1445_s2 + $0x20] sm:$0xff]  ;;  %v310_v17 = vld [vmem:[%s1446_s3 + $0xb0] sm:$0xff]  ;;  %v309_v23 = vld [vmem:[%s1446_s3 + $0xa8] sm:$0xff]  ;;  %707 = vst.msk [vmem:[%s1080_s6 + $0x18] sm:$0x3] %vm706_vm2, %v1017_v1 }
  0x1f   : > { %355 = vmatpush1.msra.mxu0 %v294_v41  ;;  %v502_v24 = vld [vmem:[%s1445_s2 + $0x28] sm:$0xff]  ;;  %v308_v27 = vld [vmem:[%s1446_s3 + $0xa0] sm:$0xff]  ;;  %v307_v31 = vld [vmem:[%s1446_s3 + $0x98] sm:$0xff]  ;;  %711 = vst.msk [vmem:[%s1080_s6 + $0x38] sm:$0x3] %vm706_vm2, %v1017_v1 }
  0x20   : > { %356 = vmatprep.subr.mxu0 %v1017_v1  ;;  %v264_v61 = vadd.f32 %v263_v58, %v262_v54  ;;  %v241_v62 = vrot.slane %v240_v59, 4  ;;  %922 = vmatmul.mubr.msk.f32.gmra.mxu1 %vm509_vm1, %v499_v57  ;;  %v503_v32 = vld [vmem:[%s1445_s2 + $0x30] sm:$0xff]  ;;  %v305_v34 = vld [vmem:[%s1446_s3 + $0x88] sm:$0xff]  ;;  %v504_v35 = vld [vmem:[%s1445_s2 + $0x38] sm:$0xff]  ;;  %743 = vst.msk [vmem:[%s1080_s6 + $0x138] sm:$0x3] %vm706_vm2, %v1017_v1 }
  0x21   : > { %357 = vmatpush1.msra.mxu0 %v293_v46  ;;  %616 = vmatprep.mubr.f32.mxu1 %v1017_v1  ;;  %v304_v37 = vld [vmem:[%s1446_s3 + $0x80] sm:$0xff]  ;;  %715 = vst.msk [vmem:[%s1080_s6 + $0x58] sm:$0x3] %vm706_vm2, %v1017_v1  ;;  %719 = vst.msk [vmem:[%s1080_s6 + $0x78] sm:$0x3] %vm706_vm2, %v1017_v1 }
  0x22   : > { %358 = vmatprep.subr.mxu0 %v1017_v1  ;;  %v265_v2 = vrot.slane %v264_v61, 2  ;;  %v242_v3 = vadd.f32 %v241_v62, %v240_v59  ;;  %723 = vst.msk [vmem:[%s1080_s6 + $0x98] sm:$0x3] %vm706_vm2, %v1017_v1  ;;  %727 = vst.msk [vmem:[%s1080_s6 + $0xb8] sm:$0x3] %vm706_vm2, %v1017_v1 }
  0x23   : > { %359 = vmatpush1.msra.mxu0 %v292_v52  ;;  %731 = vst.msk [vmem:[%s1080_s6 + $0xd8] sm:$0x3] %vm706_vm2, %v1017_v1  ;;  %735 = vst.msk [vmem:[%s1080_s6 + $0xf8] sm:$0x3] %vm706_vm2, %v1017_v1 }
  0x24   : > { %360 = vmatprep.subr.mxu0 %v1017_v1  ;;  %v266_v5 = vadd.f32 %v265_v2, %v264_v61  ;;  %v243_v9 = vrot.slane %v242_v3, 2  ;;  %923 = vmatmul.mubr.msk.f32.gmra.mxu1 %vm509_vm1, %v500_v0  ;;  %739 = vst.msk [vmem:[%s1080_s6 + $0x118] sm:$0x3] %vm706_vm2, %v1017_v1 }
  0x25   : > { %361 = vmatpush1.msra.mxu0 %v291_v56  ;;  %622 = vmatprep.mubr.f32.mxu1 %v1017_v1 }
  0x26   : > { %362 = vmatprep.subr.mxu0 %v1017_v1  ;;  %v267_v13 = vrot.slane %v266_v5, 1  ;;  %v244_v15 = vadd.f32 %v243_v9, %v242_v3 }
  0x27   : > { %363 = vmatpush1.msra.mxu0 %v290_v60 }
  0x28   : > { %364 = vmatprep.subr.mxu0 %v1017_v1  ;;  %v268_v18 = vadd.f32 %v267_v13, %v266_v5  ;;  %v245_v21 = vrot.slane %v244_v15, 1  ;;  %924 = vmatmul.mubr.msk.f32.gmra.mxu1 %vm509_vm1, %v501_v12 }
  0x29   : > { %365 = vmatpush1.msra.mxu0 %v289_v63  ;;  %628 = vmatprep.mubr.f32.mxu1 %v1017_v1 }
  0x2a   : > { %366 = vmatprep.subr.mxu0 %v1017_v1  ;;  %v271_v25 = vmul.f32 0.015625, %v268_v18  ;;  %v246_v28 = vadd.f32 %v245_v21, %v244_v15 }
  0x2b   : > { %367 = vmatpush1.msra.mxu0 %v288_v4 }
  0x2c   : > { %384 = vmatprep.subr.mxu0 %v1017_v1  ;;  %v273_v30 = vadd.f32 %v271_v25, %v1158_v6  ;;  %925 = vmatmul.mubr.msk.f32.gmra.mxu1 %vm509_vm1, %v502_v24  ;;  %v306_v6 = vld [vmem:[%s1446_s3 + $0x90] sm:$0xff]  ;;  %v270_v33 = vmul.f32 0.015625, %v246_v28  ;;  %v275_v40 = vadd.f32 %v271_v25, %v1161_v7  ;;  %v277_v42 = vadd.f32 %v271_v25, %v1164_v8 }
  0x2d   : > { %385 = vmatpush2.msra.mxu0 %v311_v11  ;;  %634 = vmatprep.mubr.f32.mxu1 %v1017_v1  ;;  %v281_v45 = vadd.f32 %v271_v25, %v1180_v14  ;;  %v283_v8 = vadd.f32 %v271_v25, %v1204_v22  ;;  %v287_v22 = vadd.f32 %v271_v25, %v1231_v38 }
  0x2e   : > { %386 = vmatprep.subr.mxu0 %v1017_v1  ;;  %904 = vmatprep.mubr.msk.f32.mxu0 %vm247_vm0, %v273_v30  ;;  %v272_v39 = vadd.f32 %v270_v33, %v1183_v16  ;;  %v274_v41 = vadd.f32 %v270_v33, %v1195_v19  ;;  %v276_v44 = vadd.f32 %v270_v33, %v1198_v20 }
  0x2f   : > { %387 = vmatpush2.msra.mxu0 %v310_v17  ;;  %v279_v16 = vadd.f32 %v271_v25, %v1171_v10  ;;  %v278_v7 = vadd.f32 %v270_v33, %v1212_v26  ;;  %v280_v19 = vadd.f32 %v270_v33, %v1225_v36  ;;  %v282_v20 = vadd.f32 %v270_v33, %v1241_v43 }
  0x30   : > { %388 = vmatprep.subr.mxu0 %v1017_v1  ;;  %926 = vmatmul.mubr.msk.f32.gmra.mxu1 %vm509_vm1, %v503_v32  ;;  %v285_v10 = vadd.f32 %v271_v25, %v1215_v29  ;;  %v284_v14 = vadd.f32 %v270_v33, %v1252_v48  ;;  %v286_v26 = vadd.f32 %v270_v33, %v1264_v53  ;;  %v1018_v29 = vmov 0  }
  0x31   : > { %389 = vmatpush2.msra.mxu0 %v309_v23  ;;  %640 = vmatprep.mubr.f32.mxu1 %v1017_v1 }
  0x32   : > { %390 = vmatprep.subr.mxu0 %v1017_v1  ;;  %975 = vset.pattern.permute.xlu0 %v1018_v29 }
  0x33   : > { %391 = vmatpush2.msra.mxu0 %v308_v27  ;;  %976 = vset.pattern.permute.xlu1 %v1018_v29 }
  0x34   : > { %392 = vmatprep.subr.mxu0 %v1017_v1  ;;  %927 = vmatmul.mubr.msk.f32.gmra.mxu1 %vm509_vm1, %v504_v35 }
  0x35   : > { %393 = vmatpush2.msra.mxu0 %v307_v31 }
  0x36   : > { %394 = vmatprep.subr.mxu0 %v1017_v1 }
  0x37   : > { %395 = vmatpush2.msra.mxu0 %v306_v6 }
  0x38   : > { %396 = vmatprep.subr.mxu0 %v1017_v1 }
  0x39   : > { %397 = vmatpush2.msra.mxu0 %v305_v34 }
  0x3a   : > { %398 = vmatprep.subr.mxu0 %v1017_v1 }
  0x3b   : > { %399 = vmatpush2.msra.mxu0 %v304_v37 }
  0x3c   : > { %401 = vmatmul.mubr.f32.vlgmr.msra.gmra.mxu0 %v272_v39 }
  0x3d   : > { %905 = vmatprep.mubr.msk.f32.mxu0 %vm247_vm0, %v275_v40 }
  0x40   : > { %406 = vmatmul.mubr.f32.gmra.mxu0 %v274_v41 }
  0x41   : > { %906 = vmatprep.mubr.msk.f32.mxu0 %vm247_vm0, %v277_v42 }
  0x44   : > { %411 = vmatmul.mubr.f32.gmra.mxu0 %v276_v44 }
  0x45   : > { %907 = vmatprep.mubr.msk.f32.mxu0 %vm247_vm0, %v279_v16 }
  0x48   : > { %416 = vmatmul.mubr.f32.gmra.mxu0 %v278_v7 }
  0x49   : > { %908 = vmatprep.mubr.msk.f32.mxu0 %vm247_vm0, %v281_v45 }
  0x4c   : > { %421 = vmatmul.mubr.f32.gmra.mxu0 %v280_v19 }
  0x4d   : > { %909 = vmatprep.mubr.msk.f32.mxu0 %vm247_vm0, %v283_v8 }
  0x50   : > { %426 = vmatmul.mubr.f32.gmra.mxu0 %v282_v20 }
  0x51   : > { %910 = vmatprep.mubr.msk.f32.mxu0 %vm247_vm0, %v285_v10 }
  0x54   : > { %431 = vmatmul.mubr.f32.gmra.mxu0 %v284_v14 }
  0x55   : > { %911 = vmatprep.mubr.msk.f32.mxu0 %vm247_vm0, %v287_v22 }
  0x58   : > { %436 = vmatmul.mubr.f32.gmra.mxu0 %v286_v26 }
  0xd8   : > { %v600_v19 = vpop.f32.mrf.mxu1 }
  0xda   : > { %v602_v8 = vpop.f32.mrf.mxu1 }
  0xdc   : > { %v606_v20 = vpop.f32.mrf.mxu1 }
  0xde   : > { %v608_v10 = vpop.f32.mrf.mxu1 }
  0xe0   : > { %v612_v14 = vpop.f32.mrf.mxu1 }
  0xe2   : > { %v614_v22 = vpop.f32.mrf.mxu1 }
  0xe4   : > { %v618_v26 = vpop.f32.mrf.mxu1 }
  0xe6   : > { %v620_v29 = vpop.f32.mrf.mxu1 }
  0xfc   : > { %v402_v36 = vpop.f32.mrf.mxu0 }
  0xfd   : > { %v912_v38 = vmul.f32 -1.442695, %v402_v36 }
  0xfe   : > { %v404_v43 = vpop.f32.mrf.mxu0 }
  0xff   : > { %977 = vpow2.f32 %v912_v38  ;;  %v624_v38 = vpop.f32.mrf.mxu1 }
 0x100   : > { %v407_v46 = vpop.f32.mrf.mxu0 }
 0x101   : > { %v913_v47 = vmul.f32 -1.442695, %v407_v46 }
 0x102   : > { %v409_v48 = vpop.f32.mrf.mxu0 }
 0x103   : > { %979 = vpow2.f32 %v913_v47 }
 0x104   : > { %v412_v49 = vpop.f32.mrf.mxu0 }
 0x105   : > { %v914_v50 = vmul.f32 -1.442695, %v412_v49 }
 0x106   : > { %v414_v51 = vpop.f32.mrf.mxu0 }
 0x107   : > { %981 = vpow2.f32 %v914_v50  ;;  %v626_v50 = vpop.f32.mrf.mxu1 }
 0x108   : > { %v417_v52 = vpop.f32.mrf.mxu0 }
 0x109   : > { %v915_v53 = vmul.f32 -1.442695, %v417_v52 }
 0x10a   : > { %v419_v54 = vpop.f32.mrf.mxu0 }
 0x10b   : > { %983 = vpow2.f32 %v915_v53 }
 0x10c   : > { %v978_v55 = vpop.eup %977  ;;  %v422_v56 = vpop.f32.mrf.mxu0 }
 0x10d   : > { %v465_v57 = vadd.f32 1.0, %v978_v55  ;;  %v916_v1 = vmul.f32 -1.442695, %v422_v56  ;;  %v630_v56 = vpop.f32.mrf.mxu1 }
 0x10e   : > { %v424_v58 = vpop.f32.mrf.mxu0 }
 0x10f   : > { %985 = vpow2.f32 %v916_v1 }
 0x110   : > { %v980_v59 = vpop.eup %979  ;;  %v427_v60 = vpop.f32.mrf.mxu0  ;;  %987 = vrcp.f32 %v465_v57 }
 0x111   : > { %v466_v61 = vadd.f32 1.0, %v980_v59  ;;  %v917_v62 = vmul.f32 -1.442695, %v427_v60 }
 0x112   : > { %v429_v63 = vpop.f32.mrf.mxu0 }
 0x113   : > { %989 = vrcp.f32 %v466_v61  ;;  %v632_v61 = vpop.f32.mrf.mxu1 }
 0x114   : > { %v982_v0 = vpop.eup %981  ;;  %991 = vpow2.f32 %v917_v62  ;;  %v432_v2 = vpop.f32.mrf.mxu0 }
 0x115   : > { %v467_v3 = vadd.f32 1.0, %v982_v0  ;;  %v918_v4 = vmul.f32 -1.442695, %v432_v2 }
 0x116   : > { %v434_v5 = vpop.f32.mrf.mxu0 }
 0x117   : > { %993 = vpow2.f32 %v918_v4 }
 0x118   : > { %v984_v9 = vpop.eup %983  ;;  %v437_v11 = vpop.f32.mrf.mxu0  ;;  %995 = vrcp.f32 %v467_v3 }
 0x119   : > { %v468_v12 = vadd.f32 1.0, %v984_v9  ;;  %v919_v13 = vmul.f32 -1.442695, %v437_v11  ;;  %v636_v9 = vpop.f32.mrf.mxu1 }
 0x11a   : > { %v439_v15 = vpop.f32.mrf.mxu0 }
 0x11b   : > { %997 = vrcp.f32 %v468_v12  ;;  %v638_v15 = vpop.f32.mrf.mxu1 }
 0x11c   : > { %v986_v17 = vpop.eup %985  ;;  %999 = vpow2.f32 %v919_v13 }
 0x11d   : > { %v988_v18 = vpop.eup %987  ;;  %v469_v21 = vadd.f32 1.0, %v986_v17 }
 0x11e   : > { %v489_v23 = vadd.f32 1.0, %v988_v18 }
 0x11f   : > { %1001 = vrcp.f32 %v469_v21 }
 0x120   : > { %v990_v24 = vpop.eup %989  ;;  %649 = vperm.xlu0 %975, %v489_v23  }
 0x121   : > { %v992_v25 = vpop.eup %991  ;;  %v490_v27 = vadd.f32 1.0, %v990_v24 }
 0x122   : > { %v470_v28 = vadd.f32 1.0, %v992_v25  ;;  %v642_v25 = vpop.f32.mrf.mxu1 }
 0x124   : > { %v994_v30 = vpop.eup %993  ;;  %1003 = vrcp.f32 %v470_v28  ;;  %654 = vperm.xlu0 %975, %v490_v27  }
 0x125   : > { %v996_v31 = vpop.eup %995  ;;  %v471_v32 = vadd.f32 1.0, %v994_v30 }
 0x126   : > { %v491_v6 = vadd.f32 1.0, %v996_v31 }
 0x127   : > { %1005 = vrcp.f32 %v471_v32  ;;  %v644_v32 = vpop.f32.mrf.mxu1 }
 0x128   : > { %v998_v33 = vpop.eup %997  ;;  %659 = vperm.xlu1 %976, %v491_v6  }
 0x129   : > { %v1000_v34 = vpop.eup %999  ;;  %v492_v35 = vadd.f32 1.0, %v998_v33 }
 0x12a   : > { %v472_v37 = vadd.f32 1.0, %v1000_v34 }
 0x12c   : > { %v1002_v39 = vpop.eup %1001  ;;  %1007 = vrcp.f32 %v472_v37  ;;  %664 = vperm.xlu1 %976, %v492_v35  }
 0x12d   : > { %v493_v40 = vadd.f32 1.0, %v1002_v39 }
 0x12f   : > { %669 = vperm.xlu0 %975, %v493_v40  }
 0x131   : > { %v1004_v41 = vpop.eup %1003 }
 0x132   : > { %v494_v42 = vadd.f32 1.0, %v1004_v41 }
 0x134   : > { %v1006_v44 = vpop.eup %1005  ;;  %674 = vperm.xlu1 %976, %v494_v42  }
 0x135   : > { %v495_v16 = vadd.f32 1.0, %v1006_v44 }
 0x137   : > { %679 = vperm.xlu0 %975, %v495_v16  }
 0x139   : > { %v1008_v7 = vpop.eup %1007 }
 0x13a   : > { %v496_v45 = vadd.f32 1.0, %v1008_v7 }
 0x13c   : > { %684 = vperm.xlu1 %976, %v496_v45  }
 0x19b   : > { %v650_v36 = vpop.permute.xlu0 %649 }
 0x19c   : > { %v687_v43 = vmul.f32 %v650_v36, %v600_v19  ;;  %v688_v46 = vmul.f32 %v650_v36, %v602_v8 }
 0x19e   : > { %v760_v47 = vrot.slane %v687_v43, 7  ;;  %v761_v48 = vrot.slane %v688_v46, 7 }
 0x19f   : > { %v655_v49 = vpop.permute.xlu0 %654 }
 0x1a0   : > { %928 = vst [vmem:[%s1080_s6 + $0x20] sm:$0xfe] %v760_v47  ;;  %929 = vst.msk [vmem:[%s1080_s6 + $0x28] sm:$0xfe] %vm794_vm3, %v761_v48  ;;  %v689_v51 = vmul.f32 %v655_v49, %v606_v20  ;;  %v690_v52 = vmul.f32 %v655_v49, %v608_v10 }
 0x1a1   : > { %930 = vst [vmem:[%s1080_s6 + $0x30] sm:$0x1] %v760_v47  ;;  %931 = vst.msk [vmem:[%s1080_s6 + $0x38] sm:$0x1] %vm797_vm4, %v761_v48 }
 0x1a2   : > { %v762_v53 = vrot.slane %v689_v51, 7  ;;  %v763_v54 = vrot.slane %v690_v52, 7 }
 0x1a3   : > { %v660_v55 = vpop.permute.xlu1 %659 }
 0x1a4   : > { %932 = vst [vmem:[%s1080_s6 + $0x40] sm:$0xfe] %v762_v53  ;;  %933 = vst.msk [vmem:[%s1080_s6 + $0x48] sm:$0xfe] %vm794_vm3, %v763_v54  ;;  %v691_v57 = vmul.f32 %v660_v55, %v612_v14  ;;  %v692_v1 = vmul.f32 %v660_v55, %v614_v22 }
 0x1a5   : > { %934 = vst [vmem:[%s1080_s6 + $0x50] sm:$0x1] %v762_v53  ;;  %935 = vst.msk [vmem:[%s1080_s6 + $0x58] sm:$0x1] %vm797_vm4, %v763_v54 }
 0x1a6   : > { %v764_v58 = vrot.slane %v691_v57, 7  ;;  %v765_v59 = vrot.slane %v692_v1, 7 }
 0x1a7   : > { %v665_v60 = vpop.permute.xlu1 %664 }
 0x1a8   : > { %936 = vst [vmem:[%s1080_s6 + $0x60] sm:$0xfe] %v764_v58  ;;  %937 = vst.msk [vmem:[%s1080_s6 + $0x68] sm:$0xfe] %vm794_vm3, %v765_v59  ;;  %v693_v62 = vmul.f32 %v665_v60, %v618_v26  ;;  %v694_v63 = vmul.f32 %v665_v60, %v620_v29 }
 0x1a9   : > { %938 = vst [vmem:[%s1080_s6 + $0x70] sm:$0x1] %v764_v58  ;;  %939 = vst.msk [vmem:[%s1080_s6 + $0x78] sm:$0x1] %vm797_vm4, %v765_v59 }
 0x1aa   : > { %v766_v0 = vrot.slane %v693_v62, 7  ;;  %v767_v2 = vrot.slane %v694_v63, 7  ;;  %v670_v3 = vpop.permute.xlu0 %669 }
 0x1ab   : > { %v695_v4 = vmul.f32 %v670_v3, %v624_v38  ;;  %v696_v5 = vmul.f32 %v670_v3, %v626_v50 }
 0x1ac   : > { %940 = vst [vmem:[%s1080_s6 + $0x80] sm:$0xfe] %v766_v0  ;;  %941 = vst.msk [vmem:[%s1080_s6 + $0x88] sm:$0xfe] %vm794_vm3, %v767_v2 }
 0x1ad   : > { %942 = vst [vmem:[%s1080_s6 + $0x90] sm:$0x1] %v766_v0  ;;  %943 = vst.msk [vmem:[%s1080_s6 + $0x98] sm:$0x1] %vm797_vm4, %v767_v2  ;;  %v768_v11 = vrot.slane %v695_v4, 7  ;;  %v769_v12 = vrot.slane %v696_v5, 7 }
 0x1af   : > { %944 = vst [vmem:[%s1080_s6 + $0xa0] sm:$0xfe] %v768_v11  ;;  %945 = vst.msk [vmem:[%s1080_s6 + $0xa8] sm:$0xfe] %vm794_vm3, %v769_v12  ;;  %v675_v13 = vpop.permute.xlu1 %674 }
 0x1b0   : > { %946 = vst [vmem:[%s1080_s6 + $0xb0] sm:$0x1] %v768_v11  ;;  %947 = vst.msk [vmem:[%s1080_s6 + $0xb8] sm:$0x1] %vm797_vm4, %v769_v12  ;;  %v697_v17 = vmul.f32 %v675_v13, %v630_v56  ;;  %v698_v18 = vmul.f32 %v675_v13, %v632_v61 }
 0x1b2   : > { %v770_v21 = vrot.slane %v697_v17, 7  ;;  %v771_v23 = vrot.slane %v698_v18, 7  ;;  %v680_v24 = vpop.permute.xlu0 %679 }
 0x1b3   : > { %v699_v27 = vmul.f32 %v680_v24, %v636_v9  ;;  %v700_v28 = vmul.f32 %v680_v24, %v638_v15 }
 0x1b4   : > { %948 = vst [vmem:[%s1080_s6 + $0xc0] sm:$0xfe] %v770_v21  ;;  %949 = vst.msk [vmem:[%s1080_s6 + $0xc8] sm:$0xfe] %vm794_vm3, %v771_v23 }
 0x1b5   : > { %950 = vst [vmem:[%s1080_s6 + $0xd0] sm:$0x1] %v770_v21  ;;  %951 = vst.msk [vmem:[%s1080_s6 + $0xd8] sm:$0x1] %vm797_vm4, %v771_v23  ;;  %v772_v30 = vrot.slane %v699_v27, 7  ;;  %v773_v31 = vrot.slane %v700_v28, 7 }
 0x1b7   : > { %952 = vst [vmem:[%s1080_s6 + $0xe0] sm:$0xfe] %v772_v30  ;;  %953 = vst.msk [vmem:[%s1080_s6 + $0xe8] sm:$0xfe] %vm794_vm3, %v773_v31  ;;  %v685_v6 = vpop.permute.xlu1 %684 }
 0x1b8   : > { %954 = vst [vmem:[%s1080_s6 + $0xf0] sm:$0x1] %v772_v30  ;;  %955 = vst.msk [vmem:[%s1080_s6 + $0xf8] sm:$0x1] %vm797_vm4, %v773_v31  ;;  %v701_v33 = vmul.f32 %v685_v6, %v642_v25  ;;  %v702_v34 = vmul.f32 %v685_v6, %v644_v32 }
 0x1ba   : > { %v774_v35 = vrot.slane %v701_v33, 7  ;;  %v775_v37 = vrot.slane %v702_v34, 7 }
 0x1bc   : > { %956 = vst [vmem:[%s1080_s6 + $0x100] sm:$0xfe] %v774_v35  ;;  %957 = vst.msk [vmem:[%s1080_s6 + $0x108] sm:$0xfe] %vm794_vm3, %v775_v37 }
 0x1bd   : > { %958 = vst [vmem:[%s1080_s6 + $0x110] sm:$0x1] %v774_v35  ;;  %959 = vst.msk [vmem:[%s1080_s6 + $0x118] sm:$0x1] %vm797_vm4, %v775_v37 }
 0x1be PF: > { %s14_s15 = sadd.s32 1, %s1015_s15  }
 0x1bf   : > { %p11_p4 = scmp.ge.s32.totalorder %s14_s15, 4  }
 0x1c1   :  { %13 = sbr.rel (!%p11_p4) target bundleno = 1 (0x1), region = 70 }

// kernel: hiformer1_forward.8
= control target key start
LH: loop header
LB: loop body
LE: loop exit
PB: predicated region body
PF: predicated region fallthrough
CT: control target
= control target key end

     0   :  { %s3267_s21 = smov 0   ;;  %s4504_s0 = inlined_call_operand.vmem [shape: f32[2,10,10,192], index: 0, kind: input, shape index: {}]   ;;  %s4505_s1 = inlined_call_operand.vmem [shape: bf16[9,192,96], index: 1, kind: input, shape index: {}]   ;;  %s4506_s2 = inlined_call_operand.vmem [shape: f32[1,96], index: 2, kind: input, shape index: {}]   ;;  %s4507_s3 = inlined_call_operand.vmem [shape: f32[1,96], index: 3, kind: input, shape index: {}]   ;;  %s4508_s4 = inlined_call_operand.vmem [shape: f32[96,32], index: 4, kind: input, shape index: {}]   ;;  %s4509_s5 = inlined_call_operand.vmem [shape: f32[32,96], index: 5, kind: input, shape index: {}]   ;;  %s4510_s6 = inlined_call_operand.vmem [shape: f32[2,64,96], index: 6, kind: output, shape index: {}]  }
   0x1 LB: > { %s2634_s22 = sadd.s32 4294967295, %s3227_s21   ;;  %p2638_p0 = scmp.ge.s32.totalorder %s3227_s21, 1  ;;  %s3227_s21 = sphi %s3267_s21, %s16_s21  }
   0x2   : > { %p212_p1 = scmp.lt.s32.totalorder %s3227_s21, 3 }
   0x4   : > { %p213_p2 = pnand %p2638_p0, %p212_p1 }
   0x6   : > { %216 = sbr.rel (%p213_p2) target bundleno = 1329 (0x531), region = 44 }
   0xb   : > { %v3111_v0 = vld [vmem:[%s4505_s1 + $0x98] sm:$0xff]   ;;  %v4511_v1 = vmov 0   ;;  %v3113_v3 = vld [vmem:[%s4505_s1 + $0x90] sm:$0xff]   ;;  %v3115_v5 = vld [vmem:[%s4505_s1 + $0x88] sm:$0xff]   ;;  %p242_p3 = scmp.lt.s32.totalorder %s2634_s22, 1  ;;  %vm357_vm0 = vcmask 1046528  }
   0xc   : > { %540 = vmatprep.subr.bf16.mxu0 %v4511_v1  ;;  %689 = vmatprep.subr.bf16.mxu1 %v4511_v1  ;;  %v3112_v2 = vld [vmem:[%s4505_s1 + $0x38] sm:$0xff]   ;;  %v3114_v4 = vld [vmem:[%s4505_s1 + $0x30] sm:$0xff]   ;;  %v3116_v6 = vld [vmem:[%s4505_s1 + $0x28] sm:$0xff]   ;;  %vm527_vm1 = vcmask 523264   ;;  %vm754_vm2 = vcmask 1045504   ;;  %vm3231_vm3 = vmmov 0  }
   0xd   : > { %541 = vmatpush1.bf16.msra.mxu0 %v3111_v0  ;;  %690 = vmatpush1.bf16.msra.mxu1 %v3112_v2  ;;  %v3117_v7 = vld [vmem:[%s4505_s1 + $0x80] sm:$0xff]   ;;  %s4527_s22 = smov (!%p242_p3, %s2634_s22), 1  ;;  %v3119_v9 = vld [vmem:[%s4505_s1 + $0x78] sm:$0xff]   ;;  %v3121_v11 = vld [vmem:[%s4505_s1 + $0x70] sm:$0xff]   ;;  %vm2144_vm4 = vcmask 785408   ;;  %vm2257_vm5 = vcmask 261120  }
   0xe   : > { %542 = vmatprep.subr.bf16.mxu0 %v4511_v1  ;;  %691 = vmatprep.subr.bf16.mxu1 %v4511_v1  ;;  %v3118_v8 = vld [vmem:[%s4505_s1 + $0x20] sm:$0xff]   ;;  %v3120_v10 = vld [vmem:[%s4505_s1 + $0x18] sm:$0xff]   ;;  %s3099_s19 = smul.u32 320, %s4527_s22  ;;  %v3122_v12 = vld [vmem:[%s4505_s1 + $0x10] sm:$0xff]   ;;  %s2986_s20 = sshll.u32 %s4527_s22, 6 }
   0xf   : > { %v3123_v13 = vld [vmem:[%s4505_s1 + $0x68] sm:$0xff]   ;;  %v3125_v23 = vld [vmem:[%s4505_s1 + $0x60] sm:$0xff]   ;;  %v3127_v34 = vld [vmem:[%s4505_s1 + $0xb8] sm:$0xff]   ;;  %s251_s25 = scalar_lea.vmem %s4510_s6, %s2986_s20 }
  0x10   : > { %s3329_s28 = scalar_lea.vmem %s4504_s0, %s3099_s19  ;;  %v3124_v14 = vld [vmem:[%s4505_s1 + $0x8] sm:$0xff]   ;;  %v3126_v27 = vld [vmem:[%s4505_s1] sm:$0xff]   ;;  %v3128_v36 = vld [vmem:[%s4505_s1 + $0x58] sm:$0xff]  }
  0x11   : > { %543 = vmatpush1.bf16.msra.mxu0 %v3113_v3  ;;  %692 = vmatpush1.bf16.msra.mxu1 %v3114_v4  ;;  %v3340_v15 = vld [vmem:[%s3329_s28 + $0x8] sm:$0xff]  ;;  %v3343_v16 = vld [vmem:[%s3329_s28 + $0x18] sm:$0x3]  ;;  %v3129_v37 = vld [vmem:[%s4505_s1 + $0xb0] sm:$0xff]  }
  0x12   : > { %544 = vmatprep.subr.bf16.mxu0 %v4511_v1  ;;  %693 = vmatprep.subr.bf16.mxu1 %v4511_v1  ;;  %v3346_v17 = vld [vmem:[%s3329_s28 + $0x28] sm:$0xff]  ;;  %v3349_v18 = vld [vmem:[%s3329_s28 + $0x38] sm:$0x3]  ;;  %v361_v21 = vrot.slane %v3340_v15, 1  ;;  %v362_v24 = vrot.slane %v3343_v16, 1  ;;  %v3397_v38 = vld [vmem:[%s3329_s28] sm:$0xff] }
  0x13   : > { %v3352_v19 = vld [vmem:[%s3329_s28 + $0x48] sm:$0xff]  ;;  %v3355_v20 = vld [vmem:[%s3329_s28 + $0x58] sm:$0x3]  ;;  %v294_v22 = vpack.c.bf16 %v3346_v17, %v3340_v15  ;;  %v367_v25 = vrot.slane %v3346_v17, 1  ;;  %v368_v26 = vrot.slane %v3349_v18, 1  ;;  %v3130_v39 = vld [vmem:[%s4505_s1 + $0x50] sm:$0xff]  }
  0x14   : > { %v373_v28 = vrot.slane %v3352_v19, 1  ;;  %v374_v29 = vrot.slane %v3355_v20, 1  ;;  %v363_v30 = vsel %vm357_vm0, %v361_v21, %v362_v24  ;;  %v3403_v40 = vld [vmem:[%s3329_s28 + $0x20] sm:$0xff]  ;;  %v3406_v41 = vld [vmem:[%s3329_s28 + $0x10] sm:$0x3]  ;;  %v3410_v42 = vld [vmem:[%s3329_s28 + $0x68] sm:$0xff] }
  0x15   : > { %545 = vmatpush1.bf16.msra.mxu0 %v3115_v5  ;;  %694 = vmatpush1.bf16.msra.mxu1 %v3116_v6  ;;  %v3375_v31 = vsel %vm357_vm0, %v367_v25, %v368_v26  ;;  %v3413_v43 = vld [vmem:[%s3329_s28 + $0x30] sm:$0x3]  ;;  %v3131_v44 = vld [vmem:[%s4505_s1 + $0xa8] sm:$0xff]   ;;  %v3420_v45 = vld [vmem:[%s3329_s28 + $0x78] sm:$0x3]  ;;  %v358_v46 = vrot.slane %v3397_v38, 1 }
  0x16   : > { %546 = vmatprep.subr.bf16.mxu0 %v4511_v1  ;;  %695 = vmatprep.subr.bf16.mxu1 %v4511_v1  ;;  %v3379_v32 = vsel %vm357_vm0, %v373_v28, %v374_v29  ;;  %v423_v33 = vpack.c.bf16 %v3375_v31, %v363_v30  ;;  %v359_v47 = vrot.slane %v3406_v41, 1  ;;  %v364_v48 = vrot.slane %v3403_v40, 1  ;;  %v3132_v50 = vld [vmem:[%s4505_s1 + $0x48] sm:$0xff]   ;;  %v3431_v51 = vld [vmem:[%s3329_s28 + $0x40] sm:$0xff]  ;;  %v3434_v52 = vld [vmem:[%s3329_s28 + $0x50] sm:$0x3] }
  0x17   : > { %2694 = vmatprep.mubr.msk.bf16.mxu1 %vm527_vm1, %v294_v22  ;;  %v365_v49 = vrot.slane %v3413_v43, 1  ;;  %v3133_v53 = vld [vmem:[%s4505_s1 + $0xa0] sm:$0xff]   ;;  %v379_v54 = vrot.slane %v3410_v42, 1  ;;  %v370_v55 = vrot.slane %v3431_v51, 1  ;;  %v371_v56 = vrot.slane %v3434_v52, 1  ;;  %v3135_v2 = vld [vmem:[%s4505_s1 + $0xf8] sm:$0xff]  }
  0x18   : > { %2678 = vmatprep.mubr.msk.bf16.mxu0 %vm527_vm1, %v423_v33  ;;  %v3134_v57 = vld [vmem:[%s4505_s1 + $0x40] sm:$0xff]   ;;  %v380_v58 = vrot.slane %v3420_v45, 1  ;;  %v360_v60 = vsel %vm357_vm0, %v358_v46, %v359_v47  ;;  %v3459_v63 = vld [vmem:[%s3329_s28 + $0x70] sm:$0x3]  ;;  %v3468_v3 = vld [vmem:[%s3329_s28 + $0x88] sm:$0xff]  ;;  %v3513_v29 = vpack.c.bf16 %v3410_v42, %v3352_v19  ;;  %v758_v0 = vrot.slane %v3340_v15, 2 }
  0x19   : > { %547 = vmatpush1.bf16.msra.mxu0 %v3117_v7  ;;  %696 = vmatpush1.bf16.msra.mxu1 %v3118_v8  ;;  %v3448_v59 = vld [vmem:[%s3329_s28 + $0x60] sm:$0xff]  ;;  %v3452_v61 = vsel %vm357_vm0, %v364_v48, %v365_v49  ;;  %v3455_v62 = vsel %vm357_vm0, %v370_v55, %v371_v56  ;;  %v3475_v6 = vld [vmem:[%s3329_s28 + $0x98] sm:$0x3]  ;;  %v3478_v7 = vld [vmem:[%s3329_s28 + $0xa8] sm:$0xff]  ;;  %v764_v35 = vrot.slane %v3346_v17, 2 }
  0x1a   : > { %548 = vmatprep.subr.bf16.mxu0 %v4511_v1  ;;  %697 = vmatprep.subr.bf16.mxu1 %v4511_v1  ;;  %v3471_v4 = vsel %vm357_vm0, %v379_v54, %v380_v58  ;;  %v422_v5 = vpack.c.bf16 %v3452_v61, %v360_v60  ;;  %v3481_v8 = vld [vmem:[%s3329_s28 + $0xb8] sm:$0x3]  ;;  %v3493_v21 = vld [vmem:[%s3329_s28 + $0x90] sm:$0x3]  ;;  %v3509_v28 = vld [vmem:[%s3329_s28 + $0xa0] sm:$0xff] }
  0x1b   : > { %v3136_v22 = vld [vmem:[%s4505_s1 + $0x158] sm:$0xff]   ;;  %v383_v25 = vrot.slane %v3493_v21, 1  ;;  %v3504_v26 = vpack.c.bf16 %v3471_v4, %v3379_v32  ;;  %v3519_v33 = vld [vmem:[%s3329_s28 + $0xb0] sm:$0x3]  ;;  %v388_v47 = vrot.slane %v3509_v28, 1  ;;  %v3544_v49 = vld [vmem:[%s3329_s28 + $0xc8] sm:$0xff] }
  0x1c   : > { %v389_v48 = vrot.slane %v3519_v33, 1  ;;  %v3559_v55 = vld [vmem:[%s3329_s28 + $0xe8] sm:$0xff]  ;;  %v3562_v56 = vld [vmem:[%s3329_s28 + $0xf8] sm:$0x3]  ;;  %v3567_v60 = vld [vmem:[%s3329_s28 + $0xc0] sm:$0xff] }
  0x1d   : > { %549 = vmatpush1.bf16.msra.mxu0 %v3119_v9  ;;  %698 = vmatpush1.bf16.msra.mxu1 %v3120_v10  ;;  %v385_v9 = vrot.slane %v3468_v3, 1  ;;  %v293_v10 = vpack.c.bf16 %v3403_v40, %v3397_v38  ;;  %v3145_v15 = vld [vmem:[%s4505_s1 + $0xd0] sm:$0xff]  }
  0x1e   : > { %550 = vmatprep.subr.bf16.mxu0 %v4511_v1  ;;  %699 = vmatprep.subr.bf16.mxu1 %v4511_v1 }
  0x21   : > { %551 = vmatpush1.bf16.msra.mxu0 %v3121_v11  ;;  %700 = vmatpush1.bf16.msra.mxu1 %v3122_v12  ;;  %v376_v11 = vrot.slane %v3448_v59, 1  ;;  %v377_v12 = vrot.slane %v3459_v63, 1 }
  0x22   : > { %552 = vmatprep.subr.bf16.mxu0 %v4511_v1  ;;  %701 = vmatprep.subr.bf16.mxu1 %v4511_v1 }
  0x25   : > { %553 = vmatpush1.bf16.msra.mxu0 %v3123_v13  ;;  %702 = vmatpush1.bf16.msra.mxu1 %v3124_v14  ;;  %v386_v13 = vrot.slane %v3475_v6, 1  ;;  %v3490_v14 = vld [vmem:[%s3329_s28 + $0x80] sm:$0xff] }
  0x26   : > { %554 = vmatprep.subr.bf16.mxu0 %v4511_v1  ;;  %703 = vmatprep.subr.bf16.mxu1 %v4511_v1  ;;  %v382_v24 = vrot.slane %v3490_v14, 1 }
  0x27   : > { %v3516_v30 = vsel %vm357_vm0, %v385_v9, %v386_v13  ;;  %v3577_v9 = vld [vmem:[%s3329_s28 + $0xd0] sm:$0x3]  ;;  %v3141_v13 = vld [vmem:[%s4505_s1 + $0xe0] sm:$0xff]  }
  0x29   : > { %555 = vmatpush1.bf16.msra.mxu0 %v3125_v23  ;;  %704 = vmatpush1.bf16.msra.mxu1 %v3126_v27  ;;  %v391_v23 = vrot.slane %v3478_v7, 1  ;;  %v392_v27 = vrot.slane %v3481_v8, 1 }
  0x2a   : > { %564 = vmatprep.subr.bf16.mxu0 %v4511_v1  ;;  %713 = vmatprep.subr.bf16.mxu1 %v4511_v1 }
  0x2b   : > { %v3556_v54 = vsel %vm357_vm0, %v391_v23, %v392_v27  ;;  %v403_v23 = vrot.slane %v3559_v55, 1  ;;  %v3600_v27 = vsel %vm357_vm0, %v388_v47, %v389_v48  ;;  %v3622_v48 = vld [vmem:[%s3329_s28 + $0xf0] sm:$0x3]  ;;  %v3144_v47 = vld [vmem:[%s4505_s1 + $0x138] sm:$0xff]  }
  0x2d   : > { %565 = vmatpush2.bf16.msra.mxu0 %v3127_v34  ;;  %714 = vmatpush2.bf16.msra.mxu1 %v3128_v36  ;;  %v3137_v34 = vld [vmem:[%s4505_s1 + $0xf0] sm:$0xff]   ;;  %v3525_v36 = vsel %vm357_vm0, %v376_v11, %v377_v12  ;;  %v394_v11 = vrot.slane %v3567_v60, 1  ;;  %v395_v12 = vrot.slane %v3577_v9, 1 }
  0x2e   : > { %566 = vmatprep.subr.bf16.mxu0 %v4511_v1  ;;  %715 = vmatprep.subr.bf16.mxu1 %v4511_v1 }
  0x2f   : > { %v3610_v46 = vsel %vm357_vm0, %v394_v11, %v395_v12  ;;  %v401_v12 = vrot.slane %v3622_v48, 1 }
  0x31   : > { %567 = vmatpush2.bf16.msra.mxu0 %v3129_v37  ;;  %716 = vmatpush2.bf16.msra.mxu1 %v3130_v39  ;;  %v3528_v37 = vsel %vm357_vm0, %v382_v24, %v383_v25  ;;  %v404_v24 = vrot.slane %v3562_v56, 1  ;;  %v3142_v25 = vld [vmem:[%s4505_s1 + $0x140] sm:$0xff]  }
  0x32   : > { %568 = vmatprep.subr.bf16.mxu0 %v4511_v1  ;;  %717 = vmatprep.subr.bf16.mxu1 %v4511_v1  ;;  %v3614_v39 = vld [vmem:[%s3329_s28 + $0xe0] sm:$0xff] }
  0x33   : > { %v400_v11 = vrot.slane %v3614_v39, 1 }
  0x35   : > { %569 = vmatpush2.bf16.msra.mxu0 %v3131_v44  ;;  %718 = vmatpush2.bf16.msra.mxu1 %v3132_v50  ;;  %v3138_v44 = vld [vmem:[%s4505_s1 + $0x150] sm:$0xff]   ;;  %v3547_v50 = vld [vmem:[%s3329_s28 + $0xd8] sm:$0x3] }
  0x36   : > { %570 = vmatprep.subr.bf16.mxu0 %v4511_v1  ;;  %719 = vmatprep.subr.bf16.mxu1 %v4511_v1  ;;  %v398_v58 = vrot.slane %v3547_v50, 1 }
  0x39   : > { %571 = vmatpush2.bf16.msra.mxu0 %v3133_v53  ;;  %720 = vmatpush2.bf16.msra.mxu1 %v3134_v57  ;;  %v3551_v53 = vpack.c.bf16 %v3525_v36, %v3455_v62  ;;  %v397_v57 = vrot.slane %v3544_v49, 1 }
  0x3a   : > { %936 = vmatprep.subr.bf16.mxu0 %v4511_v1  ;;  %1126 = vmatprep.subr.bf16.mxu1 %v4511_v1 }
  0x3c   : > { %573 = vmatmul.mubr.bf16.vlgmr.msra.gmra.mxu0 %v422_v5  ;;  %722 = vmatmul.mubr.bf16.vlgmr.msra.gmra.mxu1 %v293_v10  ;;  %v3574_v5 = vpack.c.bf16 %v3448_v59, %v3431_v51  ;;  %v3140_v10 = vld [vmem:[%s4505_s1 + $0x148] sm:$0xff]  }
  0x3d   : > { %937 = vmatpush1.bf16.msra.mxu0 %v3135_v2  ;;  %1127 = vmatpush1.bf16.msra.mxu1 %v3136_v22  ;;  %v3139_v2 = vld [vmem:[%s4505_s1 + $0xe8] sm:$0xff]   ;;  %v3591_v22 = vpack.c.bf16 %v3556_v54, %v3516_v30 }
  0x3e   : > { %938 = vmatprep.subr.bf16.mxu0 %v4511_v1  ;;  %1128 = vmatprep.subr.bf16.mxu1 %v4511_v1 }
  0x3f   : > { %2679 = vmatprep.mubr.msk.bf16.mxu0 %vm527_vm1, %v3504_v26  ;;  %2695 = vmatprep.mubr.msk.bf16.mxu1 %vm527_vm1, %v3513_v29 }
  0x41   : > { %939 = vmatpush1.bf16.msra.mxu0 %v3137_v34  ;;  %1129 = vmatpush1.bf16.msra.mxu1 %v3138_v44  ;;  %v3604_v34 = vpack.c.bf16 %v3478_v7, %v3468_v3  ;;  %v3607_v44 = vsel %vm357_vm0, %v397_v57, %v398_v58  ;;  %v3143_v57 = vld [vmem:[%s4505_s1 + $0xd8] sm:$0xff]   ;;  %v3632_v58 = vpack.c.bf16 %v3600_v27, %v3528_v37 }
  0x42   : > { %940 = vmatprep.subr.bf16.mxu0 %v4511_v1  ;;  %1130 = vmatprep.subr.bf16.mxu1 %v4511_v1 }
  0x44   : > { %581 = vmatmul.mubr.bf16.gmra.mxu0 %v3551_v53  ;;  %730 = vmatmul.mubr.bf16.gmra.mxu1 %v3574_v5 }
  0x45   : > { %941 = vmatpush1.bf16.msra.mxu0 %v3139_v2  ;;  %1131 = vmatpush1.bf16.msra.mxu1 %v3140_v10  ;;  %v3637_v2 = vsel %vm357_vm0, %v403_v23, %v404_v24  ;;  %v3641_v10 = vpack.c.bf16 %v3509_v28, %v3490_v14  ;;  %v759_v23 = vrot.slane %v3343_v16, 2  ;;  %v765_v24 = vrot.slane %v3349_v18, 2  ;;  %v3146_v18 = vld [vmem:[%s4505_s1 + $0x130] sm:$0xff]  }
  0x46   : > { %942 = vmatprep.subr.bf16.mxu0 %v4511_v1  ;;  %1132 = vmatprep.subr.bf16.mxu1 %v4511_v1  ;;  %v3668_v16 = vsel %vm357_vm0, %v400_v11, %v401_v12  ;;  %v3147_v12 = vld [vmem:[%s4505_s1 + $0xc8] sm:$0xff]  }
  0x47   : > { %2680 = vmatprep.mubr.msk.bf16.mxu0 %vm527_vm1, %v3591_v22  ;;  %2696 = vmatprep.mubr.msk.bf16.mxu1 %vm527_vm1, %v3604_v34  ;;  %v3685_v11 = vsel %vm754_vm2, %v764_v35, %v765_v24  ;;  %v3150_v24 = vld [vmem:[%s4505_s1 + $0x120] sm:$0xff]  }
  0x49   : > { %943 = vmatpush1.bf16.msra.mxu0 %v3141_v13  ;;  %1133 = vmatpush1.bf16.msra.mxu1 %v3142_v25  ;;  %v3654_v13 = vpack.c.bf16 %v3637_v2, %v3607_v44  ;;  %v3660_v25 = vpack.c.bf16 %v3559_v55, %v3544_v49 }
  0x4a   : > { %944 = vmatprep.subr.bf16.mxu0 %v4511_v1  ;;  %1134 = vmatprep.subr.bf16.mxu1 %v4511_v1 }
  0x4b   : > { %4515 = vst [vmem:[#allocation2_spill] sm:$0xff] %v3654_v13  ;;  %4516 = vst [vmem:[#allocation3_spill] sm:$0xff] %v3660_v25 }
  0x4c   : > { %589 = vmatmul.mubr.bf16.gmra.mxu0 %v3632_v58  ;;  %738 = vmatmul.mubr.bf16.gmra.mxu1 %v3641_v10 }
  0x4d   : > { %945 = vmatpush1.bf16.msra.mxu0 %v3143_v57  ;;  %1135 = vmatpush1.bf16.msra.mxu1 %v3144_v47  ;;  %v3679_v57 = vpack.c.bf16 %v3668_v16, %v3610_v46  ;;  %v760_v47 = vsel %vm754_vm2, %v758_v0, %v759_v23  ;;  %v1010_v0 = vpack.c.bf16 %v3352_v19, %v3346_v17  ;;  %v3149_v23 = vld [vmem:[%s4505_s1 + $0xc0] sm:$0xff]   ;;  %v3151_v17 = vld [vmem:[%s4505_s1 + $0x118] sm:$0xff]  }
  0x4e   : > { %946 = vmatprep.subr.bf16.mxu0 %v4511_v1  ;;  %1136 = vmatprep.subr.bf16.mxu1 %v4511_v1  ;;  %v3692_v1 = vpack.c.bf16 %v3614_v39, %v3567_v60  ;;  %v820_v35 = vpack.c.bf16 %v3685_v11, %v760_v47  ;;  %v755_v47 = vrot.slane %v3397_v38, 2  ;;  %v3156_v38 = vld [vmem:[%s4505_s1 + $0x168] sm:$0xff]  }
  0x4f   : > { %2681 = vmatprep.mubr.msk.bf16.mxu0 %vm527_vm1, %v3654_v13  ;;  %2697 = vmatprep.mubr.msk.bf16.mxu1 %vm527_vm1, %v3660_v25  ;;  %v4517_v13 = vmov 0   ;;  %v3148_v25 = vld [vmem:[%s4505_s1 + $0x128] sm:$0xff]  }
  0x51   : > { %947 = vmatpush1.bf16.msra.mxu0 %v3145_v15  ;;  %1137 = vmatpush1.bf16.msra.mxu1 %v3146_v18  ;;  %v3153_v15 = vld [vmem:[%s4505_s1 + $0x110] sm:$0xff]  }
  0x52   : > { %948 = vmatprep.subr.bf16.mxu0 %v4517_v13  ;;  %1138 = vmatprep.subr.bf16.mxu1 %v4517_v13  ;;  %v3154_v18 = vld [vmem:[%s4505_s1 + $0x170] sm:$0xff]  }
  0x54   : > { %597 = vmatmul.mubr.bf16.gmra.mxu0 %v3679_v57  ;;  %746 = vmatmul.mubr.bf16.gmra.mxu1 %v3692_v1 }
  0x55   : > { %949 = vmatpush1.bf16.msra.mxu0 %v3147_v12  ;;  %1139 = vmatpush1.bf16.msra.mxu1 %v3148_v25  ;;  %v3152_v25 = vld [vmem:[%s4505_s1 + $0x178] sm:$0xff]   ;;  %v756_v12 = vrot.slane %v3406_v41, 2  ;;  %v771_v41 = vrot.slane %v3355_v20, 2 }
  0x56   : > { %950 = vmatprep.subr.bf16.mxu0 %v4517_v13  ;;  %1140 = vmatprep.subr.bf16.mxu1 %v4517_v13 }
  0x57   : > { %2734 = vmatprep.mubr.msk.bf16.mxu0 %vm527_vm1, %v820_v35  ;;  %2774 = vmatprep.mubr.msk.bf16.mxu1 %vm527_vm1, %v1010_v0  ;;  %v762_v35 = vrot.slane %v3413_v43, 2  ;;  %v761_v0 = vrot.slane %v3403_v40, 2  ;;  %v770_v43 = vrot.slane %v3352_v19, 2  ;;  %v3158_v19 = vld [vmem:[%s4505_s1 + $0x160] sm:$0xff]  }
  0x59   : > { %951 = vmatpush1.bf16.msra.mxu0 %v3149_v23  ;;  %1141 = vmatpush1.bf16.msra.mxu1 %v3150_v24  ;;  %v3155_v23 = vld [vmem:[%s4505_s1 + $0x108] sm:$0xff]   ;;  %v757_v24 = vsel %vm754_vm2, %v755_v47, %v756_v12  ;;  %v767_v47 = vrot.slane %v3431_v51, 2  ;;  %v3762_v12 = vsel %vm754_vm2, %v770_v43, %v771_v41  ;;  %v1012_v41 = vpack.c.bf16 %v3468_v3, %v3410_v42 }
  0x5a   : > { %960 = vmatprep.subr.bf16.mxu0 %v4517_v13  ;;  %1150 = vmatprep.subr.bf16.mxu1 %v4517_v13  ;;  %v782_v43 = vrot.slane %v3468_v3, 2  ;;  %v3162_v3 = vld [vmem:[%s4505_s1 + $0x210] sm:$0xff]  }
  0x5d   : > { %961 = vmatpush2.bf16.msra.mxu0 %v3151_v17  ;;  %1151 = vmatpush2.bf16.msra.mxu1 %v3152_v25  ;;  %v3746_v17 = vsel %vm754_vm2, %v761_v0, %v762_v35  ;;  %v776_v25 = vrot.slane %v3410_v42, 2  ;;  %v773_v0 = vrot.slane %v3448_v59, 2  ;;  %v3161_v42 = vld [vmem:[%s4505_s1 + $0x1b0] sm:$0xff]  }
  0x5e   : > { %962 = vmatprep.subr.bf16.mxu0 %v4517_v13  ;;  %1152 = vmatprep.subr.bf16.mxu1 %v4517_v13  ;;  %v819_v20 = vpack.c.bf16 %v3746_v17, %v757_v24  ;;  %v1009_v24 = vpack.c.bf16 %v3431_v51, %v3403_v40  ;;  %v783_v40 = vrot.slane %v3475_v6, 2 }
  0x61   : > { %963 = vmatpush2.bf16.msra.mxu0 %v3153_v15  ;;  %1153 = vmatpush2.bf16.msra.mxu1 %v3154_v18  ;;  %v777_v15 = vrot.slane %v3420_v45, 2  ;;  %v3157_v18 = vld [vmem:[%s4505_s1 + $0x100] sm:$0xff]   ;;  %v768_v45 = vrot.slane %v3434_v52, 2  ;;  %v3160_v52 = vld [vmem:[%s4505_s1 + $0x218] sm:$0xff]  }
  0x62   : > { %964 = vmatprep.subr.bf16.mxu0 %v4517_v13  ;;  %1154 = vmatprep.subr.bf16.mxu1 %v4517_v13 }
  0x63   : > { %v3765_v35 = vsel %vm754_vm2, %v776_v25, %v777_v15  ;;  %v3788_v51 = vsel %vm754_vm2, %v767_v47, %v768_v45  ;;  %v788_v15 = vrot.slane %v3478_v7, 2  ;;  %v780_v47 = vrot.slane %v3493_v21, 2 }
  0x64   : > { %v785_v45 = vrot.slane %v3509_v28, 2 }
  0x65   : > { %965 = vmatpush2.bf16.msra.mxu0 %v3155_v23  ;;  %1155 = vmatpush2.bf16.msra.mxu1 %v3156_v38  ;;  %v774_v23 = vrot.slane %v3459_v63, 2  ;;  %v3159_v38 = vld [vmem:[%s4505_s1 + $0x1b8] sm:$0xff]   ;;  %v3781_v63 = vpack.c.bf16 %v3765_v35, %v3762_v12 }
  0x66   : > { %966 = vmatprep.subr.bf16.mxu0 %v4517_v13  ;;  %1156 = vmatprep.subr.bf16.mxu1 %v4517_v13 }
  0x67   : > { %v3791_v25 = vsel %vm754_vm2, %v773_v0, %v774_v23  ;;  %v3163_v0 = vld [vmem:[%s4505_s1 + $0x1a8] sm:$0xff]   ;;  %v1011_v23 = vpack.c.bf16 %v3490_v14, %v3448_v59  ;;  %v1014_v59 = vpack.c.bf16 %v3544_v49, %v3478_v7  ;;  %v3166_v7 = vld [vmem:[%s4505_s1 + $0x200] sm:$0xff]  }
  0x68   : > { %v3807_v6 = vpack.c.bf16 %v3791_v25, %v3788_v51 }
  0x69   : > { %967 = vmatpush2.bf16.msra.mxu0 %v3157_v18  ;;  %1157 = vmatpush2.bf16.msra.mxu1 %v3158_v19  ;;  %v789_v18 = vrot.slane %v3481_v8, 2  ;;  %v779_v8 = vrot.slane %v3490_v14, 2  ;;  %v3812_v19 = vsel %vm754_vm2, %v782_v43, %v783_v40  ;;  %v800_v14 = vrot.slane %v3559_v55, 2  ;;  %v3165_v43 = vld [vmem:[%s4505_s1 + $0x1a0] sm:$0xff]  }
  0x6a   : > { %1328 = vmatprep.subr.bf16.mxu0 %v4517_v13  ;;  %1526 = vmatprep.subr.bf16.mxu1 %v4517_v13 }
  0x6b   : > { %v3845_v40 = vsel %vm754_vm2, %v779_v8, %v780_v47  ;;  %v797_v8 = vrot.slane %v3614_v39, 2  ;;  %v798_v47 = vrot.slane %v3622_v48, 2  ;;  %v3170_v48 = vld [vmem:[%s4505_s1 + $0x1f0] sm:$0xff]  }
  0x6c   : > { %969 = vmatmul.mubr.bf16.vlgmr.msra.gmra.mxu0 %v819_v20  ;;  %1159 = vmatmul.mubr.bf16.vlgmr.msra.gmra.mxu1 %v1009_v24  ;;  %v3815_v20 = vsel %vm754_vm2, %v788_v15, %v789_v18  ;;  %v3164_v24 = vld [vmem:[%s4505_s1 + $0x208] sm:$0xff]   ;;  %v3167_v18 = vld [vmem:[%s4505_s1 + $0x198] sm:$0xff]  }
  0x6d   : > { %1329 = vmatpush1.bf16.msra.mxu0 %v3159_v38  ;;  %1527 = vmatpush1.bf16.msra.mxu1 %v3160_v52  ;;  %v786_v38 = vrot.slane %v3519_v33, 2  ;;  %v3832_v21 = vpack.c.bf16 %v3815_v20, %v3812_v19  ;;  %v794_v52 = vrot.slane %v3544_v49, 2  ;;  %v801_v33 = vrot.slane %v3562_v56, 2 }
  0x6e   : > { %1330 = vmatprep.subr.bf16.mxu0 %v4517_v13  ;;  %1528 = vmatprep.subr.bf16.mxu1 %v4517_v13  ;;  %v791_v49 = vrot.slane %v3567_v60, 2  ;;  %v792_v56 = vrot.slane %v3577_v9, 2  ;;  %v1013_v9 = vpack.c.bf16 %v3567_v60, %v3509_v28  ;;  %v3169_v28 = vld [vmem:[%s4505_s1 + $0x190] sm:$0xff]  }
  0x6f   : > { %2735 = vmatprep.mubr.msk.bf16.mxu0 %vm527_vm1, %v3781_v63  ;;  %2775 = vmatprep.mubr.msk.bf16.mxu1 %vm527_vm1, %v1012_v41  ;;  %v795_v41 = vrot.slane %v3547_v50, 2  ;;  %v3848_v50 = vsel %vm754_vm2, %v785_v45, %v786_v38  ;;  %v3878_v45 = vld [vmem:[%s3329_s28 + $0x108] sm:$0xff] }
  0x70   : > { %v3861_v15 = vpack.c.bf16 %v3848_v50, %v3845_v40  ;;  %v1016_v60 = vpack.c.bf16 %v3878_v45, %v3559_v55  ;;  %v3899_v38 = vsel %vm754_vm2, %v791_v49, %v792_v56  ;;  %v3179_v49 = vld [vmem:[%s4505_s1 + $0x1c8] sm:$0xff]  }
  0x71   : > { %1331 = vmatpush1.bf16.msra.mxu0 %v3161_v42  ;;  %1529 = vmatpush1.bf16.msra.mxu1 %v3162_v3  ;;  %v3868_v42 = vsel %vm754_vm2, %v794_v52, %v795_v41  ;;  %v3871_v3 = vsel %vm754_vm2, %v800_v14, %v801_v33  ;;  %v3906_v52 = vld [vmem:[%s3329_s28 + $0x100] sm:$0xff]  ;;  %v3171_v41 = vld [vmem:[%s4505_s1 + $0x188] sm:$0xff]   ;;  %v1410_v33 = vpack.c.bf16 %v3762_v12, %v3685_v11  ;;  %v3175_v11 = vld [vmem:[%s4505_s1 + $0x1d8] sm:$0xff]  }
  0x72   : > { %1332 = vmatprep.subr.bf16.mxu0 %v4517_v13  ;;  %1530 = vmatprep.subr.bf16.mxu1 %v4517_v13  ;;  %v3172_v14 = vld [vmem:[%s4505_s1 + $0x1e8] sm:$0xff]   ;;  %v3176_v12 = vld [vmem:[%s4505_s1 + $0x238] sm:$0xff]  }
  0x73   : > { %v3180_v56 = vld [vmem:[%s4505_s1 + $0x228] sm:$0xff]  }
  0x74   : > { %977 = vmatmul.mubr.bf16.gmra.mxu0 %v3807_v6  ;;  %1167 = vmatmul.mubr.bf16.gmra.mxu1 %v1011_v23  ;;  %v3887_v23 = vpack.c.bf16 %v3871_v3, %v3868_v42 }
  0x75   : > { %1333 = vmatpush1.bf16.msra.mxu0 %v3163_v0  ;;  %1531 = vmatpush1.bf16.msra.mxu1 %v3164_v24  ;;  %v3168_v0 = vld [vmem:[%s4505_s1 + $0x1f8] sm:$0xff]   ;;  %v3902_v24 = vsel %vm754_vm2, %v797_v8, %v798_v47  ;;  %v3182_v8 = vld [vmem:[%s4505_s1 + $0x220] sm:$0xff]  }
  0x76   : > { %1334 = vmatprep.subr.bf16.mxu0 %v4517_v13  ;;  %1532 = vmatprep.subr.bf16.mxu1 %v4517_v13  ;;  %v3913_v55 = vpack.c.bf16 %v3902_v24, %v3899_v38  ;;  %v3183_v47 = vld [vmem:[%s4505_s1 + $0x278] sm:$0xff]  }
  0x77   : > { %2736 = vmatprep.mubr.msk.bf16.mxu0 %vm527_vm1, %v3832_v21  ;;  %2776 = vmatprep.mubr.msk.bf16.mxu1 %vm527_vm1, %v1014_v59  ;;  %v1015_v59 = vpack.c.bf16 %v3906_v52, %v3614_v39  ;;  %v3173_v39 = vld [vmem:[%s4505_s1 + $0x180] sm:$0xff]  }
  0x79   : > { %1335 = vmatpush1.bf16.msra.mxu0 %v3165_v43  ;;  %1533 = vmatpush1.bf16.msra.mxu1 %v3166_v7  ;;  %v3174_v43 = vld [vmem:[%s4505_s1 + $0x1e0] sm:$0xff]   ;;  %v4518_v7 = vpack.c.bf16 %v3379_v32, %v3375_v31  ;;  %v3177_v31 = vld [vmem:[%s4505_s1 + $0x1d0] sm:$0xff]  }
  0x7a   : > { %1336 = vmatprep.subr.bf16.mxu0 %v4517_v13  ;;  %1534 = vmatprep.subr.bf16.mxu1 %v4517_v13  ;;  %v3178_v32 = vld [vmem:[%s4505_s1 + $0x230] sm:$0xff]  }
  0x7c   : > { %985 = vmatmul.mubr.bf16.gmra.mxu0 %v3861_v15  ;;  %1175 = vmatmul.mubr.bf16.gmra.mxu1 %v1013_v9  ;;  %v1409_v9 = vpack.c.bf16 %v3788_v51, %v3746_v17  ;;  %v1412_v17 = vpack.c.bf16 %v3812_v19, %v3765_v35  ;;  %v3185_v51 = vld [vmem:[%s4505_s1 + $0x270] sm:$0xff]   ;;  %v1411_v35 = vpack.c.bf16 %v3845_v40, %v3791_v25  ;;  %v288_v19 = vld [vmem:[%s3329_s28 + $0x118] sm:$0x3]  ;;  %v1206_v25 = vrot.slane %v3878_v45, 1 }
  0x7d   : > { %1337 = vmatpush1.bf16.msra.mxu0 %v3167_v18  ;;  %1535 = vmatpush1.bf16.msra.mxu1 %v3168_v0  ;;  %v3181_v18 = vld [vmem:[%s4505_s1 + $0x1c0] sm:$0xff]   ;;  %v3184_v0 = vld [vmem:[%s4505_s1 + $0x2d8] sm:$0xff]   ;;  %v1207_v40 = vrot.slane %v288_v19, 1 }
  0x7e   : > { %1338 = vmatprep.subr.bf16.mxu0 %v4517_v13  ;;  %1536 = vmatprep.subr.bf16.mxu1 %v4517_v13 }
  0x7f   : > { %2737 = vmatprep.mubr.msk.bf16.mxu0 %vm527_vm1, %v3887_v23  ;;  %2777 = vmatprep.mubr.msk.bf16.mxu1 %vm527_vm1, %v1016_v60  ;;  %v3186_v60 = vld [vmem:[%s4505_s1 + $0x2d0] sm:$0xff]  }
  0x81   : > { %1339 = vmatpush1.bf16.msra.mxu0 %v3169_v28  ;;  %1537 = vmatpush1.bf16.msra.mxu1 %v3170_v48  ;;  %v4519_v28 = vpack.c.bf16 %v3455_v62, %v3452_v61  ;;  %v4520_v61 = vpack.c.bf16 %v3516_v30, %v3471_v4  ;;  %v3187_v62 = vld [vmem:[%s4505_s1 + $0x268] sm:$0xff]   ;;  %v4521_v30 = vpack.c.bf16 %v3528_v37, %v3525_v36  ;;  %v3190_v36 = vld [vmem:[%s4505_s1 + $0x2c0] sm:$0xff]   ;;  %v287_v37 = vld [vmem:[%s3329_s28 + $0x110] sm:$0x3] }
  0x82   : > { %1340 = vmatprep.subr.bf16.mxu0 %v4517_v13  ;;  %1538 = vmatprep.subr.bf16.mxu1 %v4517_v13  ;;  %v3188_v4 = vld [vmem:[%s4505_s1 + $0x2c8] sm:$0xff]   ;;  %v1414_v48 = vpack.c.bf16 %v3868_v42, %v3815_v20  ;;  %v4522_v20 = vpack.c.bf16 %v3607_v44, %v3556_v54  ;;  %v4035_v42 = vsel %vm357_vm0, %v1206_v25, %v1207_v40  ;;  %v3192_v44 = vld [vmem:[%s4505_s1 + $0x2b8] sm:$0xff]  }
  0x84   : > { %993 = vmatmul.mubr.bf16.gmra.mxu0 %v3913_v55  ;;  %1183 = vmatmul.mubr.bf16.gmra.mxu1 %v1015_v59  ;;  %v1404_v59 = vrot.slane %v3878_v45, 2 }
  0x85   : > { %1341 = vmatpush1.bf16.msra.mxu0 %v3171_v41  ;;  %1539 = vmatpush1.bf16.msra.mxu1 %v3172_v14  ;;  %v3189_v41 = vld [vmem:[%s4505_s1 + $0x260] sm:$0xff]   ;;  %v1405_v14 = vrot.slane %v288_v19, 2 }
  0x86   : > { %1342 = vmatprep.subr.bf16.mxu0 %v4517_v13  ;;  %1540 = vmatprep.subr.bf16.mxu1 %v4517_v13  ;;  %v4525_v19 = vld [vmem:[#allocation2_spill] sm:$0xff] }
  0x87   : > { %2814 = vmatprep.mubr.msk.bf16.mxu0 %vm527_vm1, %v4518_v7  ;;  %2854 = vmatprep.mubr.msk.bf16.mxu1 %vm527_vm1, %v1410_v33  ;;  %v3191_v33 = vld [vmem:[%s4505_s1 + $0x258] sm:$0xff]   ;;  %v1204_v7 = vrot.slane %v287_v37, 1  ;;  %v4044_v54 = vsel %vm754_vm2, %v1404_v59, %v1405_v14  ;;  %v3212_v59 = vld [vmem:[%s4505_s1 + $0x310] sm:$0xff]  }
  0x89   : > { %1343 = vmatpush1.bf16.msra.mxu0 %v3173_v39  ;;  %1541 = vmatpush1.bf16.msra.mxu1 %v3174_v43  ;;  %v1413_v39 = vpack.c.bf16 %v3899_v38, %v3848_v50  ;;  %v1203_v43 = vrot.slane %v3906_v52, 1  ;;  %v1218_v50 = vpack.c.bf16 %v4035_v42, %v3637_v2  ;;  %v4523_v38 = vpack.c.bf16 %v3610_v46, %v3600_v27  ;;  %v3194_v46 = vld [vmem:[%s4505_s1 + $0x2b0] sm:$0xff]  }
  0x8a   : > { %1352 = vmatprep.subr.bf16.mxu0 %v4517_v13  ;;  %1550 = vmatprep.subr.bf16.mxu1 %v4517_v13 }
  0x8d   : > { %1353 = vmatpush2.bf16.msra.mxu0 %v3175_v11  ;;  %1551 = vmatpush2.bf16.msra.mxu1 %v3176_v12  ;;  %v1401_v11 = vrot.slane %v3906_v52, 2  ;;  %v1402_v12 = vrot.slane %v287_v37, 2  ;;  %v3216_v37 = vld [vmem:[%s4505_s1 + $0x350] sm:$0xff]  }
  0x8e   : > { %1354 = vmatprep.subr.bf16.mxu0 %v4517_v13  ;;  %1552 = vmatprep.subr.bf16.mxu1 %v4517_v13 }
  0x8f   : > { %v4070_v27 = vsel %vm754_vm2, %v1401_v11, %v1402_v12 }
  0x91   : > { %1355 = vmatpush2.bf16.msra.mxu0 %v3177_v31  ;;  %1553 = vmatpush2.bf16.msra.mxu1 %v3178_v32  ;;  %v1416_v31 = vpack.c.bf16 %v4044_v54, %v3871_v3  ;;  %v3193_v32 = vld [vmem:[%s4505_s1 + $0x250] sm:$0xff]   ;;  %v3195_v3 = vld [vmem:[%s4505_s1 + $0x248] sm:$0xff]  }
  0x92   : > { %1356 = vmatprep.subr.bf16.mxu0 %v4517_v13  ;;  %1554 = vmatprep.subr.bf16.mxu1 %v4517_v13 }
  0x95   : > { %1357 = vmatpush2.bf16.msra.mxu0 %v3179_v49  ;;  %1555 = vmatpush2.bf16.msra.mxu1 %v3180_v56  ;;  %v4063_v49 = vsel %vm357_vm0, %v1203_v43, %v1204_v7  ;;  %v1415_v56 = vpack.c.bf16 %v4070_v27, %v3902_v24  ;;  %v3198_v24 = vld [vmem:[%s4505_s1 + $0x2a0] sm:$0xff]  }
  0x96   : > { %1358 = vmatprep.subr.bf16.mxu0 %v4517_v13  ;;  %1556 = vmatprep.subr.bf16.mxu1 %v4517_v13  ;;  %v1217_v2 = vpack.c.bf16 %v4063_v49, %v3668_v16  ;;  %v3197_v16 = vld [vmem:[%s4505_s1 + $0x240] sm:$0xff]  }
  0x99   : > { %1359 = vmatpush2.bf16.msra.mxu0 %v3181_v18  ;;  %1557 = vmatpush2.bf16.msra.mxu1 %v3182_v8  ;;  %v3196_v18 = vld [vmem:[%s4505_s1 + $0x2a8] sm:$0xff]   ;;  %v3199_v8 = vld [vmem:[%s4505_s1 + $0x298] sm:$0xff]  }
  0x9a   : > { %1701 = vmatprep.subr.bf16.mxu0 %v4517_v13  ;;  %1888 = vmatprep.subr.bf16.mxu1 %v4517_v13 }
  0x9c   : > { %1361 = vmatmul.mubr.bf16.vlgmr.msra.gmra.mxu0 %v4519_v28  ;;  %1559 = vmatmul.mubr.bf16.vlgmr.msra.gmra.mxu1 %v1409_v9  ;;  %v3200_v9 = vld [vmem:[%s4505_s1 + $0x2f8] sm:$0xff]   ;;  %v3205_v28 = vld [vmem:[%s4505_s1 + $0x280] sm:$0xff]  }
  0x9d   : > { %1702 = vmatpush1.bf16.msra.mxu0 %v3183_v47  ;;  %1889 = vmatpush1.bf16.msra.mxu1 %v3184_v0  ;;  %v3203_v47 = vld [vmem:[%s4505_s1 + $0x288] sm:$0xff]  }
  0x9e   : > { %1703 = vmatprep.subr.bf16.mxu0 %v4517_v13  ;;  %1890 = vmatprep.subr.bf16.mxu1 %v4517_v13  ;;  %v3204_v0 = vld [vmem:[%s4505_s1 + $0x2e8] sm:$0xff]  }
  0x9f   : > { %2815 = vmatprep.mubr.msk.bf16.mxu0 %vm527_vm1, %v4520_v61  ;;  %2855 = vmatprep.mubr.msk.bf16.mxu1 %vm527_vm1, %v1412_v17  ;;  %v3206_v17 = vld [vmem:[%s4505_s1 + $0x2e0] sm:$0xff]   ;;  %v4152_v61 = vld [vmem:[%s3329_s28 + $0x138] sm:$0x3] }
  0xa1   : > { %1704 = vmatpush1.bf16.msra.mxu0 %v3185_v51  ;;  %1891 = vmatpush1.bf16.msra.mxu1 %v3186_v60  ;;  %v3207_v51 = vld [vmem:[%s4505_s1 + $0x338] sm:$0xff]   ;;  %v3208_v60 = vld [vmem:[%s4505_s1 + $0x330] sm:$0xff]  }
  0xa2   : > { %1705 = vmatprep.subr.bf16.mxu0 %v4517_v13  ;;  %1892 = vmatprep.subr.bf16.mxu1 %v4517_v13 }
  0xa4   : > { %1369 = vmatmul.mubr.bf16.gmra.mxu0 %v4521_v30  ;;  %1567 = vmatmul.mubr.bf16.gmra.mxu1 %v1411_v35  ;;  %v4524_v35 = vld [vmem:[#allocation3_spill] sm:$0xff] }
  0xa5   : > { %1706 = vmatpush1.bf16.msra.mxu0 %v3187_v62  ;;  %1893 = vmatpush1.bf16.msra.mxu1 %v3188_v4  ;;  %v1782_v62 = vrot.slane %v4152_v61, 1  ;;  %v4171_v4 = vld [vmem:[%s3329_s28 + $0x130] sm:$0x3] }
  0xa6   : > { %1707 = vmatprep.subr.bf16.mxu0 %v4517_v13  ;;  %1894 = vmatprep.subr.bf16.mxu1 %v4517_v13  ;;  %v1779_v40 = vrot.slane %v4171_v4, 1 }
  0xa7   : > { %2816 = vmatprep.mubr.msk.bf16.mxu0 %vm527_vm1, %v4522_v20  ;;  %2856 = vmatprep.mubr.msk.bf16.mxu1 %vm527_vm1, %v1414_v48  ;;  %v3217_v20 = vld [vmem:[%s4505_s1 + $0x348] sm:$0xff]  }
  0xa9   : > { %1708 = vmatpush1.bf16.msra.mxu0 %v3189_v41  ;;  %1895 = vmatpush1.bf16.msra.mxu1 %v3190_v36  ;;  %v3214_v36 = vld [vmem:[%s4505_s1 + $0x300] sm:$0xff]  }
  0xaa   : > { %1709 = vmatprep.subr.bf16.mxu0 %v4517_v13  ;;  %1896 = vmatprep.subr.bf16.mxu1 %v4517_v13 }
  0xac   : > { %1377 = vmatmul.mubr.bf16.gmra.mxu0 %v4523_v38  ;;  %1575 = vmatmul.mubr.bf16.gmra.mxu1 %v1413_v39 }
  0xad   : > { %1710 = vmatpush1.bf16.msra.mxu0 %v3191_v33  ;;  %1897 = vmatpush1.bf16.msra.mxu1 %v3192_v44 }
  0xae   : > { %1711 = vmatprep.subr.bf16.mxu0 %v4517_v13  ;;  %1898 = vmatprep.subr.bf16.mxu1 %v4517_v13 }
  0xaf   : > { %2817 = vmatprep.mubr.msk.bf16.mxu0 %vm527_vm1, %v1218_v50  ;;  %2857 = vmatprep.mubr.msk.bf16.mxu1 %vm527_vm1, %v1416_v31  ;;  %v1965_v31 = vrot.slane %v4152_v61, 2 }
  0xb1   : > { %1712 = vmatpush1.bf16.msra.mxu0 %v3193_v32  ;;  %1899 = vmatpush1.bf16.msra.mxu1 %v3194_v46 }
  0xb2   : > { %1713 = vmatprep.subr.bf16.mxu0 %v4517_v13  ;;  %1900 = vmatprep.subr.bf16.mxu1 %v4517_v13 }
  0xb4   : > { %1385 = vmatmul.mubr.bf16.gmra.mxu0 %v1217_v2  ;;  %1583 = vmatmul.mubr.bf16.gmra.mxu1 %v1415_v56 }
  0xb5   : > { %1714 = vmatpush1.bf16.msra.mxu0 %v3195_v3  ;;  %1901 = vmatpush1.bf16.msra.mxu1 %v3196_v18 }
  0xb6   : > { %1715 = vmatprep.subr.bf16.mxu0 %v4517_v13  ;;  %1902 = vmatprep.subr.bf16.mxu1 %v4517_v13 }
  0xb7   : > { %2894 = vmatprep.mubr.msk.bf16.mxu0 %vm527_vm1, %v3513_v29  ;;  %2934 = vmatprep.mubr.msk.bf16.mxu1 %vm527_vm1, %v3504_v26  ;;  %v3201_v29 = vld [vmem:[%s4505_s1 + $0x290] sm:$0xff]  }
  0xb8   : > { %v3202_v26 = vld [vmem:[%s4505_s1 + $0x2f0] sm:$0xff]  }
  0xb9   : > { %1716 = vmatpush1.bf16.msra.mxu0 %v3197_v16  ;;  %1903 = vmatpush1.bf16.msra.mxu1 %v3198_v24  ;;  %v1962_v16 = vrot.slane %v4171_v4, 2 }
  0xba   : > { %1725 = vmatprep.subr.bf16.mxu0 %v4517_v13  ;;  %1912 = vmatprep.subr.bf16.mxu1 %v4517_v13 }
  0xbd   : > { %1726 = vmatpush2.bf16.msra.mxu0 %v3199_v8  ;;  %1913 = vmatpush2.bf16.msra.mxu1 %v3200_v9 }
  0xbe   : > { %1727 = vmatprep.subr.bf16.mxu0 %v4517_v13  ;;  %1914 = vmatprep.subr.bf16.mxu1 %v4517_v13 }
  0xc1   : > { %1728 = vmatpush2.bf16.msra.mxu0 %v3201_v29  ;;  %1915 = vmatpush2.bf16.msra.mxu1 %v3202_v26 }
  0xc2   : > { %1729 = vmatprep.subr.bf16.mxu0 %v4517_v13  ;;  %1916 = vmatprep.subr.bf16.mxu1 %v4517_v13 }
  0xc5   : > { %1730 = vmatpush2.bf16.msra.mxu0 %v3203_v47  ;;  %1917 = vmatpush2.bf16.msra.mxu1 %v3204_v0 }
  0xc6   : > { %1731 = vmatprep.subr.bf16.mxu0 %v4517_v13  ;;  %1918 = vmatprep.subr.bf16.mxu1 %v4517_v13 }
  0xc9   : > { %1732 = vmatpush2.bf16.msra.mxu0 %v3205_v28  ;;  %1919 = vmatpush2.bf16.msra.mxu1 %v3206_v17 }
  0xca   : > { %2071 = vmatprep.subr.bf16.mxu0 %v4517_v13 }
  0xcc   : > { %1734 = vmatmul.mubr.bf16.vlgmr.msra.gmra.mxu0 %v3574_v5  ;;  %1921 = vmatmul.mubr.bf16.vlgmr.msra.gmra.mxu1 %v3551_v53  ;;  %v3209_v5 = vld [vmem:[%s4505_s1 + $0x328] sm:$0xff]  }
  0xcd   : > { %2072 = vmatpush1.bf16.msra.mxu0 %v3207_v51  ;;  %2895 = vmatprep.mubr.msk.bf16.mxu0 %vm527_vm1, %v3604_v34  ;;  %v4149_v53 = vld [vmem:[%s3329_s28 + $0x128] sm:$0xff] }
  0xce   : > { %2073 = vmatprep.subr.bf16.mxu0 %v4517_v13  ;;  %2935 = vmatprep.mubr.msk.bf16.mxu1 %vm527_vm1, %v3591_v22  ;;  %v1781_v34 = vrot.slane %v4149_v53, 1  ;;  %v3210_v22 = vld [vmem:[%s4505_s1 + $0x320] sm:$0xff]   ;;  %v1600_v48 = vpack.c.bf16 %v4149_v53, %v3878_v45  ;;  %v1964_v12 = vrot.slane %v4149_v53, 2 }
  0xd0   : > { %v1783_v30 = vsel %vm357_vm0, %v1781_v34, %v1782_v62  ;;  %v1966_v46 = vsel %vm754_vm2, %v1964_v12, %v1965_v31 }
  0xd1   : > { %2074 = vmatpush1.bf16.msra.mxu0 %v3208_v60  ;;  %v1787_v41 = vpack.c.bf16 %v1783_v30, %v4035_v42  ;;  %v1970_v18 = vpack.c.bf16 %v1966_v46, %v4044_v54 }
  0xd2   : > { %2075 = vmatprep.subr.bf16.mxu0 %v4517_v13 }
  0xd4   : > { %1742 = vmatmul.mubr.bf16.gmra.mxu0 %v3641_v10  ;;  %1929 = vmatmul.mubr.bf16.gmra.mxu1 %v3632_v58  ;;  %v4168_v10 = vld [vmem:[%s3329_s28 + $0x120] sm:$0xff]  ;;  %v3211_v58 = vld [vmem:[%s4505_s1 + $0x318] sm:$0xff]  }
  0xd5   : > { %2076 = vmatpush1.bf16.msra.mxu0 %v3209_v5  ;;  %2896 = vmatprep.mubr.msk.bf16.mxu0 %vm527_vm1, %v4524_v35  ;;  %v1778_v25 = vrot.slane %v4168_v10, 1  ;;  %v1599_v14 = vpack.c.bf16 %v4168_v10, %v3906_v52  ;;  %v3215_v52 = vld [vmem:[%s4505_s1 + $0x358] sm:$0xff]   ;;  %v1961_v56 = vrot.slane %v4168_v10, 2 }
  0xd6   : > { %2077 = vmatprep.subr.bf16.mxu0 %v4517_v13  ;;  %2936 = vmatprep.mubr.msk.bf16.mxu1 %vm527_vm1, %v4525_v19 }
  0xd7   : > { %v1780_v45 = vsel %vm357_vm0, %v1778_v25, %v1779_v40  ;;  %v1963_v29 = vsel %vm754_vm2, %v1961_v56, %v1962_v16 }
  0xd8   : > { %v1969_v17 = vpack.c.bf16 %v1963_v29, %v4070_v27 }
  0xd9   : > { %2078 = vmatpush1.bf16.msra.mxu0 %v3210_v22 }
  0xda   : > { %2079 = vmatprep.subr.bf16.mxu0 %v4517_v13 }
  0xdc   : > { %1750 = vmatmul.mubr.bf16.gmra.mxu0 %v3692_v1  ;;  %1937 = vmatmul.mubr.bf16.gmra.mxu1 %v3679_v57  ;;  %v3213_v1 = vld [vmem:[%s4505_s1 + $0x308] sm:$0xff]   ;;  %v1786_v57 = vpack.c.bf16 %v1780_v45, %v4063_v49 }
  0xdd   : > { %2080 = vmatpush1.bf16.msra.mxu0 %v3211_v58  ;;  %2897 = vmatprep.mubr.msk.bf16.mxu0 %vm527_vm1, %v1600_v48 }
  0xde   : > { %2081 = vmatprep.subr.bf16.mxu0 %v4517_v13  ;;  %2937 = vmatprep.mubr.msk.bf16.mxu1 %vm527_vm1, %v1787_v41 }
  0xe1   : > { %2082 = vmatpush1.bf16.msra.mxu0 %v3212_v59 }
  0xe2   : > { %2083 = vmatprep.subr.bf16.mxu0 %v4517_v13 }
  0xe4   : > { %1758 = vmatmul.mubr.bf16.gmra.mxu0 %v1599_v14  ;;  %1945 = vmatmul.mubr.bf16.gmra.mxu1 %v1786_v57 }
  0xe5   : > { %2084 = vmatpush1.bf16.msra.mxu0 %v3213_v1  ;;  %2974 = vmatprep.mubr.msk.bf16.mxu0 %vm527_vm1, %v3781_v63  ;;  %v3218_v63 = vld [vmem:[%s4505_s1 + $0x340] sm:$0xff]  }
  0xe6   : > { %2085 = vmatprep.subr.bf16.mxu0 %v4517_v13 }
  0xe9   : > { %2086 = vmatpush1.bf16.msra.mxu0 %v3214_v36 }
  0xea   : > { %2095 = vmatprep.subr.bf16.mxu0 %v4517_v13 }
  0xed   : > { %2096 = vmatpush2.bf16.msra.mxu0 %v3215_v52 }
  0xee   : > { %2097 = vmatprep.subr.bf16.mxu0 %v4517_v13 }
  0xf1   : > { %2098 = vmatpush2.bf16.msra.mxu0 %v3216_v37 }
  0xf2   : > { %2099 = vmatprep.subr.bf16.mxu0 %v4517_v13 }
  0xf5   : > { %2100 = vmatpush2.bf16.msra.mxu0 %v3217_v20 }
  0xf6   : > { %2101 = vmatprep.subr.bf16.mxu0 %v4517_v13 }
  0xf9   : > { %2102 = vmatpush2.bf16.msra.mxu0 %v3218_v63 }
  0xfc   : > { %v574_v42 = vpop.f32.mrf.mxu0  ;;  %2104 = vmatmul.mubr.bf16.vlgmr.msra.gmra.mxu0 %v3807_v6  ;;  %v723_v33 = vpop.f32.mrf.mxu1 }
  0xfd   : > { %2975 = vmatprep.mubr.msk.bf16.mxu0 %vm527_vm1, %v3832_v21  ;;  %v724_v39 = vadd.f32 %v723_v33, %v574_v42 }
  0xfe   : > { %v576_v43 = vpop.f32.mrf.mxu0  ;;  %v725_v7 = vpop.f32.mrf.mxu1 }
 0x100   : > { %v577_v44 = vpop.f32.mrf.mxu0  ;;  %v726_v11 = vpop.f32.mrf.mxu1 }
 0x101   : > { %v727_v50 = vadd.f32 %v726_v11, %v577_v44 }
 0x102   : > { %v579_v38 = vpop.f32.mrf.mxu0  ;;  %v728_v13 = vpop.f32.mrf.mxu1 }
 0x104   : > { %2112 = vmatmul.mubr.bf16.gmra.mxu0 %v3861_v15  ;;  %v582_v32 = vpop.f32.mrf.mxu0  ;;  %v731_v6 = vpop.f32.mrf.mxu1 }
 0x105   : > { %2976 = vmatprep.mubr.msk.bf16.mxu0 %vm527_vm1, %v3887_v23  ;;  %v732_v49 = vadd.f32 %v731_v6, %v582_v32 }
 0x106   : > { %v584_v21 = vpop.f32.mrf.mxu0  ;;  %v733_v2 = vpop.f32.mrf.mxu1 }
 0x108   : > { %v585_v3 = vpop.f32.mrf.mxu0  ;;  %v734_v24 = vpop.f32.mrf.mxu1 }
 0x109   : > { %v735_v15 = vadd.f32 %v734_v24, %v585_v3 }
 0x10a   : > { %v587_v8 = vpop.f32.mrf.mxu0  ;;  %v736_v9 = vpop.f32.mrf.mxu1 }
 0x10c   : > { %2120 = vmatmul.mubr.bf16.gmra.mxu0 %v3913_v55  ;;  %v590_v23 = vpop.f32.mrf.mxu0  ;;  %v739_v26 = vpop.f32.mrf.mxu1 }
 0x10d   : > { %2977 = vmatprep.mubr.msk.bf16.mxu0 %vm527_vm1, %v1970_v18  ;;  %v740_v0 = vadd.f32 %v739_v26, %v590_v23 }
 0x10e   : > { %v592_v47 = vpop.f32.mrf.mxu0  ;;  %v741_v28 = vpop.f32.mrf.mxu1 }
 0x110   : > { %v593_v54 = vpop.f32.mrf.mxu0  ;;  %v742_v51 = vpop.f32.mrf.mxu1 }
 0x111   : > { %v743_v5 = vadd.f32 %v742_v51, %v593_v54  ;;  %v3230_v54 = vmov 0.0   ;;  %v4262_v51 = vld [vmem:[%s4508_s4 + $0x50] sm:$0xff] }
 0x112   : > { %v595_v60 = vpop.f32.mrf.mxu0  ;;  %v744_v53 = vpop.f32.mrf.mxu1  ;;  %3023 = vmatprep.subr.mxu1 %v3230_v54  ;;  %3047 = vmatprep.mubr.msk.f32.mxu1 %vm3231_vm3, %v3230_v54 }
 0x113   : > { %v4269_v60 = vld [vmem:[%s4508_s4 + $0x48] sm:$0xff]  ;;  %v4283_v53 = vld [vmem:[%s4508_s4 + $0x38] sm:$0xff] }
 0x114   : > { %2128 = vmatmul.mubr.bf16.gmra.mxu0 %v1969_v17  ;;  %v598_v61 = vpop.f32.mrf.mxu0  ;;  %v747_v34 = vpop.f32.mrf.mxu1  ;;  %v4254_v17 = vld [vmem:[%s4508_s4 + $0x58] sm:$0xff] }
 0x115   : > { %v748_v62 = vadd.f32 %v747_v34, %v598_v61  ;;  %3024 = vmatpush3.msra.mxu1 %v4254_v17 }
 0x116   : > { %v600_v55 = vpop.f32.mrf.mxu0  ;;  %v749_v22 = vpop.f32.mrf.mxu1  ;;  %3025 = vmatprep.subr.mxu1 %v3230_v54 }
 0x117   : > { %3026 = vmatpush3.msra.mxu1 %v4262_v51 }
 0x118   : > { %v601_v35 = vpop.f32.mrf.mxu0  ;;  %v750_v19 = vpop.f32.mrf.mxu1  ;;  %3027 = vmatprep.subr.mxu1 %v3230_v54 }
 0x119   : > { %v751_v4 = vadd.f32 %v750_v19, %v601_v35  ;;  %3028 = vmatpush3.msra.mxu1 %v4269_v60 }
 0x11a   : > { %v603_v10 = vpop.f32.mrf.mxu0  ;;  %v752_v30 = vpop.f32.mrf.mxu1  ;;  %3029 = vmatprep.subr.mxu1 %v3230_v54 }
 0x11b   : > { %v4299_v10 = vld [vmem:[%s4508_s4 + $0x28] sm:$0xff] }
 0x12c   : > { %v970_v58 = vpop.f32.mrf.mxu0  ;;  %v1160_v25 = vpop.f32.mrf.mxu1 }
 0x12d   : > { %v1001_v48 = vadd.f32 %v970_v58, %v724_v39 }
 0x12e   : > { %v972_v27 = vpop.f32.mrf.mxu0  ;;  %v1162_v41 = vpop.f32.mrf.mxu1 }
 0x12f   : > { %v1191_v40 = vadd.f32 %v1160_v25, %v1001_v48  ;;  %v4307_v48 = vld [vmem:[%s4508_s4 + $0x20] sm:$0xff]  ;;  %v4316_v41 = vld [vmem:[%s4508_s4 + $0x18] sm:$0xff] }
 0x130   : > { %v973_v59 = vpop.f32.mrf.mxu0  ;;  %v1163_v14 = vpop.f32.mrf.mxu1 }
 0x131   : > { %v1002_v45 = vadd.f32 %v973_v59, %v727_v50 }
 0x132   : > { %v975_v1 = vpop.f32.mrf.mxu0  ;;  %v1165_v36 = vpop.f32.mrf.mxu1 }
 0x133   : > { %v4237_v57 = vadd.f32 %v1163_v14, %v1002_v45  ;;  %v4324_v1 = vld [vmem:[%s4508_s4 + $0x10] sm:$0xff] }
 0x134   : > { %v978_v52 = vpop.f32.mrf.mxu0  ;;  %v1168_v20 = vpop.f32.mrf.mxu1 }
 0x135   : > { %v1003_v37 = vadd.f32 %v978_v52, %v732_v49 }
 0x136   : > { %v980_v63 = vpop.f32.mrf.mxu0  ;;  %v1170_v33 = vpop.f32.mrf.mxu1 }
 0x137   : > { %v4239_v42 = vadd.f32 %v1168_v20, %v1003_v37  ;;  %v4333_v37 = vld [vmem:[%s4508_s4 + $0x8] sm:$0xff]  ;;  %v4339_v63 = vld [vmem:[%s4508_s4] sm:$0xff] }
 0x138   : > { %v981_v43 = vpop.f32.mrf.mxu0  ;;  %v1171_v7 = vpop.f32.mrf.mxu1 }
 0x139   : > { %v1004_v39 = vadd.f32 %v981_v43, %v735_v15 }
 0x13a   : > { %v983_v44 = vpop.f32.mrf.mxu0  ;;  %v1173_v12 = vpop.f32.mrf.mxu1 }
 0x13b   : > { %v4241_v11 = vadd.f32 %v1171_v7, %v1004_v39 }
 0x13c   : > { %v986_v50 = vpop.f32.mrf.mxu0  ;;  %v1176_v31 = vpop.f32.mrf.mxu1 }
 0x13d   : > { %v1005_v38 = vadd.f32 %v986_v50, %v740_v0 }
 0x13e   : > { %v988_v13 = vpop.f32.mrf.mxu0  ;;  %v1178_v6 = vpop.f32.mrf.mxu1 }
 0x13f   : > { %v4243_v32 = vadd.f32 %v1176_v31, %v1005_v38 }
 0x140   : > { %v989_v21 = vpop.f32.mrf.mxu0  ;;  %v1179_v46 = vpop.f32.mrf.mxu1 }
 0x141   : > { %v1006_v49 = vadd.f32 %v989_v21, %v743_v5  ;;  %v4274_v5 = vld [vmem:[%s4508_s4 + $0x40] sm:$0xff] }
 0x142   : > { %v991_v2 = vpop.f32.mrf.mxu0  ;;  %v1181_v56 = vpop.f32.mrf.mxu1  ;;  %3030 = vmatpush3.msra.mxu1 %v4274_v5 }
 0x143   : > { %v4245_v3 = vadd.f32 %v1179_v46, %v1006_v49  ;;  %3031 = vmatprep.subr.mxu1 %v3230_v54 }
 0x144   : > { %v994_v18 = vpop.f32.mrf.mxu0  ;;  %v1184_v24 = vpop.f32.mrf.mxu1  ;;  %3032 = vmatpush3.msra.mxu1 %v4283_v53 }
 0x145   : > { %v1007_v16 = vadd.f32 %v994_v18, %v748_v62  ;;  %3033 = vmatprep.subr.mxu1 %v3230_v54  ;;  %v4290_v62 = vld [vmem:[%s4508_s4 + $0x30] sm:$0xff] }
 0x146   : > { %v996_v8 = vpop.f32.mrf.mxu0  ;;  %v1186_v9 = vpop.f32.mrf.mxu1  ;;  %3034 = vmatpush3.msra.mxu1 %v4290_v62 }
 0x147   : > { %v4247_v15 = vadd.f32 %v1184_v24, %v1007_v16  ;;  %3035 = vmatprep.subr.mxu1 %v3230_v54 }
 0x148   : > { %v997_v23 = vpop.f32.mrf.mxu0  ;;  %v1187_v26 = vpop.f32.mrf.mxu1  ;;  %3036 = vmatpush3.msra.mxu1 %v4299_v10 }
 0x149   : > { %v1008_v29 = vadd.f32 %v997_v23, %v751_v4  ;;  %3037 = vmatprep.subr.mxu1 %v3230_v54 }
 0x14a   : > { %v999_v47 = vpop.f32.mrf.mxu0  ;;  %v1189_v28 = vpop.f32.mrf.mxu1  ;;  %3038 = vmatpush3.msra.mxu1 %v4307_v48 }
 0x14b   : > { %v4249_v0 = vadd.f32 %v1187_v26, %v1008_v29  ;;  %3039 = vmatprep.subr.mxu1 %v3230_v54 }
 0x14c   : > { %3040 = vmatpush3.msra.mxu1 %v4316_v41 }
 0x14d   : > { %3041 = vmatprep.subr.mxu1 %v3230_v54 }
 0x14e   : > { %3042 = vmatpush3.msra.mxu1 %v4324_v1 }
 0x14f   : > { %3043 = vmatprep.subr.mxu1 %v3230_v54 }
 0x150   : > { %3044 = vmatpush3.msra.mxu1 %v4333_v37 }
 0x151   : > { %3045 = vmatprep.subr.mxu1 %v3230_v54 }
 0x152   : > { %3046 = vmatpush3.msra.mxu1 %v4339_v63 }
 0x153   : > { %3050 = vmatprep.subr.mxu1 %v3230_v54 }
 0x15c   : > { %v1362_v61 = vpop.f32.mrf.mxu0  ;;  %v1560_v55 = vpop.f32.mrf.mxu1 }
 0x15d   : > { %v1393_v34 = vadd.f32 %v1362_v61, %v1191_v40 }
 0x15e   : > { %v1364_v22 = vpop.f32.mrf.mxu0  ;;  %v1562_v19 = vpop.f32.mrf.mxu1 }
 0x15f   : > { %v4293_v35 = vadd.f32 %v1560_v55, %v1393_v34 }
 0x160   : > { %v1365_v4 = vpop.f32.mrf.mxu0  ;;  %v1563_v58 = vpop.f32.mrf.mxu1 }
 0x161   : > { %v1394_v30 = vadd.f32 %v1365_v4, %v4237_v57 }
 0x162   : > { %v1367_v25 = vpop.f32.mrf.mxu0  ;;  %v1565_v40 = vpop.f32.mrf.mxu1 }
 0x163   : > { %v4310_v27 = vadd.f32 %v1563_v58, %v1394_v30 }
 0x164   : > { %v1370_v59 = vpop.f32.mrf.mxu0  ;;  %v1568_v14 = vpop.f32.mrf.mxu1 }
 0x165   : > { %v1395_v45 = vadd.f32 %v1370_v59, %v4239_v42 }
 0x166   : > { %v1372_v57 = vpop.f32.mrf.mxu0  ;;  %v1570_v52 = vpop.f32.mrf.mxu1 }
 0x167   : > { %v4327_v36 = vadd.f32 %v1568_v14, %v1395_v45 }
 0x168   : > { %v1373_v20 = vpop.f32.mrf.mxu0  ;;  %v1571_v33 = vpop.f32.mrf.mxu1 }
 0x169   : > { %v1396_v42 = vadd.f32 %v1373_v20, %v4241_v11 }
 0x16a   : > { %v1375_v43 = vpop.f32.mrf.mxu0  ;;  %v1573_v7 = vpop.f32.mrf.mxu1 }
 0x16b   : > { %v4346_v39 = vadd.f32 %v1571_v33, %v1396_v42 }
 0x16c   : > { %v1378_v44 = vpop.f32.mrf.mxu0  ;;  %v1576_v50 = vpop.f32.mrf.mxu1 }
 0x16d   : > { %v1397_v12 = vadd.f32 %v1378_v44, %v4243_v32 }
 0x16e   : > { %v1380_v11 = vpop.f32.mrf.mxu0  ;;  %v1578_v31 = vpop.f32.mrf.mxu1 }
 0x16f   : > { %v4350_v38 = vadd.f32 %v1576_v50, %v1397_v12 }
 0x170   : > { %v1381_v13 = vpop.f32.mrf.mxu0  ;;  %v1579_v21 = vpop.f32.mrf.mxu1 }
 0x171   : > { %v1398_v6 = vadd.f32 %v1381_v13, %v4245_v3 }
 0x172   : > { %v1383_v49 = vpop.f32.mrf.mxu0  ;;  %v1581_v2 = vpop.f32.mrf.mxu1 }
 0x173   : > { %v1596_v46 = vadd.f32 %v1579_v21, %v1398_v6 }
 0x174   : > { %v1386_v56 = vpop.f32.mrf.mxu0  ;;  %v1584_v16 = vpop.f32.mrf.mxu1 }
 0x175   : > { %v1399_v18 = vadd.f32 %v1386_v56, %v4247_v15 }
 0x176   : > { %v1388_v24 = vpop.f32.mrf.mxu0  ;;  %v1586_v32 = vpop.f32.mrf.mxu1 }
 0x177   : > { %v4354_v8 = vadd.f32 %v1584_v16, %v1399_v18 }
 0x178   : > { %v1389_v9 = vpop.f32.mrf.mxu0  ;;  %v1587_v29 = vpop.f32.mrf.mxu1 }
 0x179   : > { %v1400_v23 = vadd.f32 %v1389_v9, %v4249_v0 }
 0x17a   : > { %v1391_v26 = vpop.f32.mrf.mxu0  ;;  %v1589_v3 = vpop.f32.mrf.mxu1 }
 0x17b   : > { %v4357_v47 = vadd.f32 %v1587_v29, %v1400_v23 }
 0x18c   : > { %v1735_v28 = vpop.f32.mrf.mxu0  ;;  %v1922_v61 = vpop.f32.mrf.mxu1 }
 0x18d   : > { %v1766_v9 = vadd.f32 %v1735_v28, %v4293_v35 }
 0x18e   : > { %v1737_v34 = vpop.f32.mrf.mxu0  ;;  %v1924_v55 = vpop.f32.mrf.mxu1 }
 0x18f   : > { %v1953_v55 = vadd.f32 %v1922_v61, %v1766_v9 }
 0x190   : > { %v1738_v22 = vpop.f32.mrf.mxu0  ;;  %v1925_v19 = vpop.f32.mrf.mxu1 }
 0x191   : > { %v1767_v24 = vadd.f32 %v1738_v22, %v4310_v27 }
 0x192   : > { %v1740_v15 = vpop.f32.mrf.mxu0  ;;  %v1927_v4 = vpop.f32.mrf.mxu1 }
 0x193   : > { %v1954_v26 = vadd.f32 %v1925_v19, %v1767_v24 }
 0x194   : > { %v1743_v30 = vpop.f32.mrf.mxu0  ;;  %v1930_v58 = vpop.f32.mrf.mxu1 }
 0x195   : > { %v1768_v23 = vadd.f32 %v1743_v30, %v4327_v36 }
 0x196   : > { %v1745_v25 = vpop.f32.mrf.mxu0  ;;  %v1932_v40 = vpop.f32.mrf.mxu1 }
 0x197   : > { %v1955_v15 = vadd.f32 %v1930_v58, %v1768_v23 }
 0x198   : > { %v1746_v59 = vpop.f32.mrf.mxu0  ;;  %v1933_v45 = vpop.f32.mrf.mxu1 }
 0x199   : > { %v1769_v3 = vadd.f32 %v1746_v59, %v4346_v39 }
 0x19a   : > { %v1748_v0 = vpop.f32.mrf.mxu0  ;;  %v1935_v14 = vpop.f32.mrf.mxu1 }
 0x19b   : > { %v1956_v14 = vadd.f32 %v1933_v45, %v1769_v3 }
 0x19c   : > { %v1751_v57 = vpop.f32.mrf.mxu0  ;;  %v1938_v52 = vpop.f32.mrf.mxu1 }
 0x19d   : > { %v1770_v4 = vadd.f32 %v1751_v57, %v4350_v38 }
 0x19e   : > { %v1753_v20 = vpop.f32.mrf.mxu0  ;;  %v1940_v42 = vpop.f32.mrf.mxu1 }
 0x19f   : > { %v1957_v36 = vadd.f32 %v1938_v52, %v1770_v4 }
 0x1a0   : > { %v1754_v33 = vpop.f32.mrf.mxu0  ;;  %v1941_v43 = vpop.f32.mrf.mxu1 }
 0x1a1   : > { %v1771_v40 = vadd.f32 %v1754_v33, %v1596_v46 }
 0x1a2   : > { %v1756_v7 = vpop.f32.mrf.mxu0  ;;  %v1943_v44 = vpop.f32.mrf.mxu1 }
 0x1a3   : > { %v1958_v61 = vadd.f32 %v1941_v43, %v1771_v40 }
 0x1a4   : > { %v1759_v12 = vpop.f32.mrf.mxu0  ;;  %v1946_v50 = vpop.f32.mrf.mxu1 }
 0x1a5   : > { %v1772_v38 = vadd.f32 %v1759_v12, %v4354_v8 }
 0x1a6   : > { %v1761_v11 = vpop.f32.mrf.mxu0  ;;  %v1948_v31 = vpop.f32.mrf.mxu1 }
 0x1a7   : > { %v1959_v33 = vadd.f32 %v1946_v50, %v1772_v38 }
 0x1a8   : > { %v1762_v13 = vpop.f32.mrf.mxu0  ;;  %v1949_v6 = vpop.f32.mrf.mxu1 }
 0x1a9   : > { %v1773_v8 = vadd.f32 %v1762_v13, %v4357_v47 }
 0x1aa   : > { %v1764_v21 = vpop.f32.mrf.mxu0  ;;  %v1951_v49 = vpop.f32.mrf.mxu1 }
 0x1ab   : > { %v1960_v49 = vadd.f32 %v1949_v6, %v1773_v8  ;;  %v4401_v6 = vld [vmem:[%s4509_s5 + $0x18] sm:$0xff] }
 0x1bc   : > { %v2105_v2 = vpop.f32.mrf.mxu0 }
 0x1bd   : > { %v4366_v27 = vadd.f32 %v2105_v2, %v1953_v55  ;;  %v4418_v55 = vld [vmem:[%s4509_s5 + $0x8] sm:$0xff] }
 0x1be   : > { %v2107_v56 = vpop.f32.mrf.mxu0 }
 0x1bf   : > { %v2145_v46 = vsel %vm2144_vm4, %v4366_v27, 0.0 }
 0x1c0   : > { %v2108_v18 = vpop.f32.mrf.mxu0 }
 0x1c1   : > { %v4364_v25 = vadd.f32 %v2108_v18, %v1954_v26 }
 0x1c2   : > { %v2110_v16 = vpop.f32.mrf.mxu0 }
 0x1c3   : > { %v2146_v39 = vsel %vm2144_vm4, %v4364_v25, 0.0 }
 0x1c4   : > { %v2113_v32 = vpop.f32.mrf.mxu0  ;;  %v2147_v59 = vadd.f32 %v2146_v39, %v2145_v46 }
 0x1c5   : > { %v4368_v22 = vadd.f32 %v2113_v32, %v1955_v15  ;;  %v4425_v15 = vld [vmem:[%s4509_s5] sm:$0xff] }
 0x1c6   : > { %v2115_v29 = vpop.f32.mrf.mxu0 }
 0x1c7   : > { %v2148_v30 = vsel %vm2144_vm4, %v4368_v22, 0.0 }
 0x1c8   : > { %v2116_v34 = vpop.f32.mrf.mxu0  ;;  %v2149_v20 = vadd.f32 %v2148_v30, %v2147_v59 }
 0x1c9   : > { %v4372_v28 = vadd.f32 %v2116_v34, %v1956_v14  ;;  %v4407_v34 = vld [vmem:[%s4509_s5 + $0x10] sm:$0xff] }
 0x1ca   : > { %v2118_v0 = vpop.f32.mrf.mxu0 }
 0x1cb   : > { %v2150_v57 = vsel %vm2144_vm4, %v4372_v28, 0.0 }
 0x1cc   : > { %v2121_v35 = vpop.f32.mrf.mxu0  ;;  %v2151_v7 = vadd.f32 %v2150_v57, %v2149_v20 }
 0x1cd   : > { %v4379_v58 = vadd.f32 %v2121_v35, %v1957_v36 }
 0x1ce   : > { %v2123_v19 = vpop.f32.mrf.mxu0 }
 0x1cf   : > { %v2152_v43 = vsel %vm2144_vm4, %v4379_v58, 0.0 }
 0x1d0   : > { %v2124_v45 = vpop.f32.mrf.mxu0  ;;  %v2153_v31 = vadd.f32 %v2152_v43, %v2151_v7 }
 0x1d1   : > { %v4383_v52 = vadd.f32 %v2124_v45, %v1958_v61 }
 0x1d2   : > { %v2126_v42 = vpop.f32.mrf.mxu0 }
 0x1d3   : > { %v2154_v12 = vsel %vm2144_vm4, %v4383_v52, 0.0 }
 0x1d4   : > { %v2129_v44 = vpop.f32.mrf.mxu0  ;;  %v2155_v56 = vadd.f32 %v2154_v12, %v2153_v31 }
 0x1d5   : > { %v4390_v11 = vadd.f32 %v2129_v44, %v1959_v33 }
 0x1d6   : > { %v2131_v21 = vpop.f32.mrf.mxu0 }
 0x1d7   : > { %v2156_v2 = vsel %vm2144_vm4, %v4390_v11, 0.0 }
 0x1d8   : > { %v2132_v50 = vpop.f32.mrf.mxu0  ;;  %v2157_v47 = vadd.f32 %v2156_v2, %v2155_v56 }
 0x1d9   : > { %v4394_v18 = vadd.f32 %v2132_v50, %v1960_v49 }
 0x1da   : > { %v2134_v13 = vpop.f32.mrf.mxu0 }
 0x1db   : > { %v2158_v16 = vsel %vm2144_vm4, %v4394_v18, 0.0 }
 0x1dc   : > { %v2159_v24 = vadd.f32 %v2158_v16, %v2157_v47 }
 0x1de   : > { %v2160_v32 = vrot.slane %v2159_v24, 4 }
 0x1e0   : > { %v2161_v9 = vadd.f32 %v2160_v32, %v2159_v24  ;;  %v2982_v32 = vld [vmem:[%s4506_s2] ss:$0 sm:$0xff] }
 0x1e2   : > { %v2162_v23 = vrot.slane %v2161_v9, 2 }
 0x1e4   : > { %v2163_v29 = vadd.f32 %v2162_v23, %v2161_v9 }
 0x1e6   : > { %v2164_v26 = vrot.slane %v2163_v29, 1 }
 0x1e8   : > { %v2165_v3 = vadd.f32 %v2164_v26, %v2163_v29 }
 0x1ea   : > { %3048 = vmatmul.mubr.msk.f32.vlgmr.msra.gmra.mxu1 %vm2144_vm4, %v2165_v3 }
 0x1eb   : > { %3051 = vmatpush3.msra.mxu1 %v4401_v6  ;;  %3058 = vmatprep.mubr.msk.f32.mxu1 %vm3231_vm3, %v3230_v54 }
 0x1ec   : > { %3052 = vmatprep.subr.mxu1 %v3230_v54 }
 0x1ed   : > { %3053 = vmatpush3.msra.mxu1 %v4407_v34 }
 0x1ee   : > { %3054 = vmatprep.subr.mxu1 %v3230_v54 }
 0x1ef   : > { %3055 = vmatpush3.msra.mxu1 %v4418_v55 }
 0x1f0   : > { %3056 = vmatprep.subr.mxu1 %v3230_v54 }
 0x1f1   : > { %3057 = vmatpush3.msra.mxu1 %v4425_v15 }
 0x1f2   : > { %3061 = vmatprep.subr.mxu1 %v3230_v54 }
 0x2aa   : > { %v2247_v4 = vpop.f32.mrf.mxu1 }
 0x2ab   : > { %v2252_v40 = vmul.f32 0.0052083335, %v2247_v4 }
 0x2ac   : > { %v3049_v0 = vpop.f32.mrf.mxu1 }
 0x2ad   : > { %3059 = vmatmul.mubr.msk.f32.vlgmr.msra.gmra.mxu1 %vm2257_vm5, %v2252_v40 }
 0x2ae   : > { %3062 = vmatpush3.msra.mxu1 %v4254_v17  ;;  %3085 = vmatprep.mubr.msk.f32.mxu1 %vm3231_vm3, %v3230_v54  ;;  %v2331_v17 = vlaneseq }
 0x2af   : > { %3063 = vmatprep.subr.mxu1 %v3230_v54 }
 0x2b0   : > { %3064 = vmatpush3.msra.mxu1 %v4262_v51  ;;  %v2332_v51 = vshrl.u32 %v2331_v17, 7 }
 0x2b1   : > { %3065 = vmatprep.subr.mxu1 %v3230_v54 }
 0x2b2   : > { %3066 = vmatpush3.msra.mxu1 %v4269_v60  ;;  %v2333_v60 = vsub.s32 0, %v2332_v51 }
 0x2b3   : > { %3067 = vmatprep.subr.mxu1 %v3230_v54 }
 0x2b4   : > { %3068 = vmatpush3.msra.mxu1 %v4274_v5 }
 0x2b5   : > { %3069 = vmatprep.subr.mxu1 %v3230_v54 }
 0x2b6   : > { %3070 = vmatpush3.msra.mxu1 %v4283_v53 }
 0x2b7   : > { %3071 = vmatprep.subr.mxu1 %v3230_v54 }
 0x2b8   : > { %3072 = vmatpush3.msra.mxu1 %v4290_v62 }
 0x2b9   : > { %3073 = vmatprep.subr.mxu1 %v3230_v54 }
 0x2ba   : > { %3074 = vmatpush3.msra.mxu1 %v4299_v10 }
 0x2bb   : > { %3075 = vmatprep.subr.mxu1 %v3230_v54 }
 0x2bc   : > { %3076 = vmatpush3.msra.mxu1 %v4307_v48 }
 0x2bd   : > { %3077 = vmatprep.subr.mxu1 %v3230_v54 }
 0x2be   : > { %3078 = vmatpush3.msra.mxu1 %v4316_v41 }
 0x2bf   : > { %3079 = vmatprep.subr.mxu1 %v3230_v54 }
 0x2c0   : > { %3080 = vmatpush3.msra.mxu1 %v4324_v1 }
 0x2c1   : > { %3081 = vmatprep.subr.mxu1 %v3230_v54 }
 0x2c2   : > { %3082 = vmatpush3.msra.mxu1 %v4333_v37 }
 0x2c3   : > { %3083 = vmatprep.subr.mxu1 %v3230_v54 }
 0x2c4   : > { %3084 = vmatpush3.msra.mxu1 %v4339_v63 }
 0x2c5   : > { %3088 = vmatprep.subr.mxu1 %v3230_v54 }
 0x36d   : > { %v2327_v5 = vpop.f32.mrf.mxu1 }
 0x36e   : > { %v2334_v53 = vrot.slane %v2327_v5, %v2333_v60 }
 0x36f   : > { %v3060_v62 = vpop.f32.mrf.mxu1 }
 0x370   : > { %v2335_v10 = vsub.f32 %v4366_v27, %v2334_v53  ;;  %v2336_v48 = vsub.f32 %v4364_v25, %v2334_v53  ;;  %v2337_v41 = vsub.f32 %v4368_v22, %v2334_v53  ;;  %v2338_v1 = vsub.f32 %v4372_v28, %v2334_v53 }
 0x371   : > { %v2339_v37 = vsub.f32 %v4379_v58, %v2334_v53  ;;  %v2340_v36 = vsub.f32 %v4383_v52, %v2334_v53  ;;  %v2341_v27 = vsub.f32 %v4390_v11, %v2334_v53  ;;  %v2342_v28 = vsub.f32 %v4394_v18, %v2334_v53 }
 0x372   : > { %v2343_v14 = vmul.f32 %v2335_v10, %v2335_v10  ;;  %v2344_v63 = vmul.f32 %v2336_v48, %v2336_v48  ;;  %v2345_v35 = vmul.f32 %v2337_v41, %v2337_v41  ;;  %v2346_v39 = vmul.f32 %v2338_v1, %v2338_v1 }
 0x373   : > { %v2347_v25 = vmul.f32 %v2339_v37, %v2339_v37  ;;  %v2348_v30 = vmul.f32 %v2340_v36, %v2340_v36  ;;  %v2349_v45 = vmul.f32 %v2341_v27, %v2341_v27  ;;  %v2350_v20 = vmul.f32 %v2342_v28, %v2342_v28 }
 0x374   : > { %v2351_v61 = vsel %vm2144_vm4, %v2343_v14, 0.0  ;;  %v2352_v19 = vsel %vm2144_vm4, %v2344_v63, 0.0  ;;  %v2354_v22 = vsel %vm2144_vm4, %v2345_v35, 0.0  ;;  %v2356_v58 = vsel %vm2144_vm4, %v2346_v39, 0.0 }
 0x375   : > { %v2353_v38 = vadd.f32 %v2352_v19, %v2351_v61  ;;  %v2358_v57 = vsel %vm2144_vm4, %v2347_v25, 0.0  ;;  %v2360_v42 = vsel %vm2144_vm4, %v2348_v30, 0.0  ;;  %v2362_v8 = vsel %vm2144_vm4, %v2349_v45, 0.0 }
 0x376   : > { %v2364_v7 = vsel %vm2144_vm4, %v2350_v20, 0.0 }
 0x377   : > { %v2355_v46 = vadd.f32 %v2354_v22, %v2353_v38 }
 0x379   : > { %v2357_v59 = vadd.f32 %v2356_v58, %v2355_v46 }
 0x37b   : > { %v2359_v52 = vadd.f32 %v2358_v57, %v2357_v59 }
 0x37d   : > { %v2361_v33 = vadd.f32 %v2360_v42, %v2359_v52 }
 0x37f   : > { %v2363_v43 = vadd.f32 %v2362_v8, %v2361_v33 }
 0x381   : > { %v2365_v44 = vadd.f32 %v2364_v7, %v2363_v43 }
 0x383   : > { %v2366_v12 = vrot.slane %v2365_v44, 4 }
 0x385   : > { %v2367_v11 = vadd.f32 %v2366_v12, %v2365_v44 }
 0x387   : > { %v2368_v31 = vrot.slane %v2367_v11, 2 }
 0x389   : > { %v2369_v21 = vadd.f32 %v2368_v31, %v2367_v11 }
 0x38b   : > { %v2370_v49 = vrot.slane %v2369_v21, 1 }
 0x38d   : > { %v2371_v2 = vadd.f32 %v2370_v49, %v2369_v21 }
 0x38f   : > { %3086 = vmatmul.mubr.msk.f32.vlgmr.msra.gmra.mxu1 %vm2144_vm4, %v2371_v2 }
 0x390   : > { %3089 = vmatpush3.msra.mxu1 %v4401_v6  ;;  %3096 = vmatprep.mubr.msk.f32.mxu1 %vm3231_vm3, %v3230_v54 }
 0x391   : > { %3090 = vmatprep.subr.mxu1 %v3230_v54 }
 0x392   : > { %3091 = vmatpush3.msra.mxu1 %v4407_v34 }
 0x393   : > { %3092 = vmatprep.subr.mxu1 %v3230_v54 }
 0x394   : > { %3093 = vmatpush3.msra.mxu1 %v4418_v55 }
 0x395   : > { %3094 = vmatprep.subr.mxu1 %v3230_v54 }
 0x396   : > { %3095 = vmatpush3.msra.mxu1 %v4425_v15  ;;  %v2983_v15 = vld [vmem:[%s4507_s3] ss:$0 sm:$0xff] }
 0x44f   : > { %v2441_v56 = vpop.f32.mrf.mxu1 }
 0x450   : > { %v2445_v50 = vmul.f32 0.0052083335, %v2441_v56 }
 0x451   : > { %v3087_v18 = vpop.f32.mrf.mxu1 }
 0x452   : > { %v2446_v47 = vadd.f32 1e-05, %v2445_v50 }
 0x454   : > { %3219 = vrsqrt.f32 %v2446_v47 }
 0x461   : > { %v3220_v13 = vpop.eup %3219 }
 0x462   : > { %3097 = vmatmul.mubr.msk.f32.vlgmr.msra.gmra.mxu1 %vm2257_vm5, %v3220_v13 }
 0x522   : > { %v2517_v16 = vpop.f32.mrf.mxu1 }
 0x523   : > { %v2524_v24 = vrot.slane %v2517_v16, %v2333_v60 }
 0x524   : > { %v3098_v9 = vpop.f32.mrf.mxu1 }
 0x525   : > { %v2525_v23 = vmul.f32 %v2524_v24, %v2335_v10  ;;  %v2526_v54 = vmul.f32 %v2524_v24, %v2336_v48  ;;  %v2527_v29 = vmul.f32 %v2524_v24, %v2337_v41  ;;  %v2528_v26 = vmul.f32 %v2524_v24, %v2338_v1 }
 0x526   : > { %v2529_v3 = vmul.f32 %v2524_v24, %v2339_v37  ;;  %v2530_v6 = vmul.f32 %v2524_v24, %v2340_v36  ;;  %v2531_v34 = vmul.f32 %v2524_v24, %v2341_v27  ;;  %v2532_v55 = vmul.f32 %v2524_v24, %v2342_v28 }
 0x527   : > { %v2540_v4 = vmul.f32 %v2982_v32, %v2525_v23  ;;  %v2541_v40 = vmul.f32 %v2982_v32, %v2526_v54  ;;  %v2542_v0 = vmul.f32 %v2982_v32, %v2527_v29  ;;  %v2543_v17 = vmul.f32 %v2982_v32, %v2528_v26 }
 0x528   : > { %v2544_v51 = vmul.f32 %v2982_v32, %v2529_v3  ;;  %v2545_v60 = vmul.f32 %v2982_v32, %v2530_v6  ;;  %v2546_v5 = vmul.f32 %v2982_v32, %v2531_v34  ;;  %v2547_v53 = vmul.f32 %v2982_v32, %v2532_v55 }
 0x529   : > { %v2555_v62 = vadd.f32 %v2983_v15, %v2540_v4  ;;  %v2556_v10 = vadd.f32 %v2983_v15, %v2541_v40  ;;  %v2557_v48 = vadd.f32 %v2983_v15, %v2542_v0  ;;  %v2558_v41 = vadd.f32 %v2983_v15, %v2543_v17 }
 0x52a   : > { %v2559_v1 = vadd.f32 %v2983_v15, %v2544_v51  ;;  %v2560_v37 = vadd.f32 %v2983_v15, %v2545_v60  ;;  %v2561_v14 = vadd.f32 %v2983_v15, %v2546_v5  ;;  %v2562_v63 = vadd.f32 %v2983_v15, %v2547_v53 }
 0x52b   : > { %v2563_v35 = vmax.f32 %v2555_v62, 0.0  ;;  %v2564_v36 = vmax.f32 %v2556_v10, 0.0  ;;  %v2565_v39 = vmax.f32 %v2557_v48, 0.0  ;;  %v2566_v61 = vmax.f32 %v2558_v41, 0.0 }
 0x52c   : > { %v2567_v19 = vmax.f32 %v2559_v1, 0.0  ;;  %v2568_v38 = vmax.f32 %v2560_v37, 0.0  ;;  %v2569_v27 = vmax.f32 %v2561_v14, 0.0  ;;  %v2570_v25 = vmax.f32 %v2562_v63, 0.0 }
 0x52d   : > { %2571 = vst.msk [vmem:[%s251_s25] sm:$0xff] %vm2144_vm4, %v2563_v35  ;;  %2572 = vst.msk [vmem:[%s251_s25 + $0x8] sm:$0xff] %vm2144_vm4, %v2564_v36 }
 0x52e   : > { %2573 = vst.msk [vmem:[%s251_s25 + $0x10] sm:$0xff] %vm2144_vm4, %v2565_v39  ;;  %2574 = vst.msk [vmem:[%s251_s25 + $0x18] sm:$0xff] %vm2144_vm4, %v2566_v61 }
 0x52f   : > { %2575 = vst.msk [vmem:[%s251_s25 + $0x20] sm:$0xff] %vm2144_vm4, %v2567_v19  ;;  %2576 = vst.msk [vmem:[%s251_s25 + $0x28] sm:$0xff] %vm2144_vm4, %v2568_v38 }
 0x530   : > { %2577 = vst.msk [vmem:[%s251_s25 + $0x30] sm:$0xff] %vm2144_vm4, %v2569_v27  ;;  %2578 = vst.msk [vmem:[%s251_s25 + $0x38] sm:$0xff] %vm2144_vm4, %v2570_v25 }
 0x531 PF: > { %s16_s21 = sadd.s32 1, %s3227_s21  }
 0x532   : > { %p13_p4 = scmp.ge.s32.totalorder %s16_s21, 4  }
 0x534   :  { %15 = sbr.rel (!%p13_p4) target bundleno = 1 (0x1), region = 82 }

// kernel: hiformer1_forward.6
= control target key start
LH: loop header
LB: loop body
LE: loop exit
PB: predicated region body
PF: predicated region fallthrough
CT: control target
= control target key end

     0   :  { %s6024_s21 = smov 0   ;;  %s7929_s0 = inlined_call_operand.vmem [shape: f32[2,6,6,384], index: 0, kind: input, shape index: {}]   ;;  %s7930_s1 = inlined_call_operand.vmem [shape: bf16[9,384,192], index: 1, kind: input, shape index: {}]   ;;  %s7931_s2 = inlined_call_operand.vmem [shape: f32[1,192], index: 2, kind: input, shape index: {}]   ;;  %s7932_s3 = inlined_call_operand.vmem [shape: f32[1,192], index: 3, kind: input, shape index: {}]   ;;  %s7933_s4 = inlined_call_operand.vmem [shape: f32[192,32], index: 4, kind: input, shape index: {}]   ;;  %s7934_s5 = inlined_call_operand.vmem [shape: f32[32,192], index: 5, kind: input, shape index: {}]   ;;  %s7935_s6 = inlined_call_operand.vmem [shape: f32[2,16,192], index: 6, kind: output, shape index: {}]  }
   0x1 LB: > { %s4416_s22 = sadd.s32 4294967295, %s5985_s21   ;;  %p4420_p0 = scmp.ge.s32.totalorder %s5985_s21, 1  ;;  %s5985_s21 = sphi %s6024_s21, %s16_s21  }
   0x2   : > { %p212_p1 = scmp.lt.s32.totalorder %s5985_s21, 3 }
   0x4   : > { %p213_p2 = pnand %p4420_p0, %p212_p1 }
   0x6   : > { %216 = sbr.rel (%p213_p2) target bundleno = 1508 (0x5e4), region = 44 }
   0xb   : > { %v5292_v0 = vld [vmem:[%s7930_s1 + $0x1f4] ss:$8 sps:$4 sm:$0xff]   ;;  %v5987_v2 = vmov 0   ;;  %v5296_v3 = vld [vmem:[%s7930_s1 + $0x1f0] ss:$8 sps:$4 sm:$0xff]   ;;  %p242_p3 = scmp.lt.s32.totalorder %s4416_s22, 1 }
   0xc   : > { %v5294_v1 = vld [vmem:[%s7930_s1 + $0x2f4] ss:$8 sps:$4 sm:$0xff]   ;;  %772 = vmatprep.mubr.bf16.mxu1 %v5987_v2  ;;  %697 = vmatprep.subr.bf16.mxu0 %v5292_v0  ;;  %v5297_v4 = vld [vmem:[%s7930_s1 + $0x2f0] ss:$8 sps:$4 sm:$0xff]   ;;  %v5298_v5 = vld [vmem:[%s7930_s1 + $0x1e4] ss:$8 sps:$4 sm:$0xff]  }
   0xd   : > { %740 = vmatprep.subr.bf16.mxu1 %v5294_v1  ;;  %698 = vmatpush1.bf16.msra.mxu0 %v5296_v3  ;;  %v5300_v6 = vld [vmem:[%s7930_s1 + $0x2e4] ss:$8 sps:$4 sm:$0xff]   ;;  %v5302_v7 = vld [vmem:[%s7930_s1 + $0x1e0] ss:$8 sps:$4 sm:$0xff]   ;;  %v5304_v9 = vld [vmem:[%s7930_s1 + $0x1d4] ss:$8 sps:$4 sm:$0xff]  }
   0xe   : > { %741 = vmatpush1.bf16.msra.mxu1 %v5297_v4  ;;  %699 = vmatprep.subr.bf16.mxu0 %v5298_v5  ;;  %v5303_v8 = vld [vmem:[%s7930_s1 + $0x2e0] ss:$8 sps:$4 sm:$0xff]   ;;  %v5306_v10 = vld [vmem:[%s7930_s1 + $0x2d4] ss:$8 sps:$4 sm:$0xff]   ;;  %v5308_v11 = vld [vmem:[%s7930_s1 + $0x1d0] ss:$8 sps:$4 sm:$0xff]  }
   0xf   : > { %742 = vmatprep.subr.bf16.mxu1 %v5300_v6  ;;  %v5309_v12 = vld [vmem:[%s7930_s1 + $0x2d0] ss:$8 sps:$4 sm:$0xff]   ;;  %v5310_v13 = vld [vmem:[%s7930_s1 + $0x1c4] ss:$8 sps:$4 sm:$0xff]   ;;  %v5314_v15 = vld [vmem:[%s7930_s1 + $0x1c0] ss:$8 sps:$4 sm:$0xff]  }
  0x10   : > { %v5312_v14 = vld [vmem:[%s7930_s1 + $0x2c4] ss:$8 sps:$4 sm:$0xff]   ;;  %v5315_v16 = vld [vmem:[%s7930_s1 + $0x2c0] ss:$8 sps:$4 sm:$0xff]   ;;  %v5316_v17 = vld [vmem:[%s7930_s1 + $0x1b4] ss:$8 sps:$4 sm:$0xff]  }
  0x11   : > { %700 = vmatpush1.bf16.msra.mxu0 %v5302_v7  ;;  %v5318_v18 = vld [vmem:[%s7930_s1 + $0x2b4] ss:$8 sps:$4 sm:$0xff]   ;;  %s7951_s22 = smov (!%p242_p3, %s4416_s22), 1  ;;  %v5320_v19 = vld [vmem:[%s7930_s1 + $0x1b0] ss:$8 sps:$4 sm:$0xff]   ;;  %vm358_vm0 = vcmask 1042432  }
  0x12   : > { %743 = vmatpush1.bf16.msra.mxu1 %v5303_v8  ;;  %701 = vmatprep.subr.bf16.mxu0 %v5304_v9  ;;  %v5321_v20 = vld [vmem:[%s7930_s1 + $0x2b0] ss:$8 sps:$4 sm:$0xff]   ;;  %v5322_v21 = vld [vmem:[%s7930_s1 + $0x1a4] ss:$8 sps:$4 sm:$0xff]   ;;  %s5281_s23 = smul.u32 144, %s7951_s22  ;;  %vm359_vm1 = vcmask 1046532  }
  0x13   : > { %744 = vmatprep.subr.bf16.mxu1 %v5306_v10  ;;  %v5324_v22 = vld [vmem:[%s7930_s1 + $0x2a4] ss:$8 sps:$4 sm:$0xff]   ;;  %v5326_v23 = vld [vmem:[%s7930_s1 + $0x1a0] ss:$8 sps:$4 sm:$0xff]   ;;  %v5328_v25 = vld [vmem:[%s7930_s1 + $0x194] ss:$8 sps:$4 sm:$0xff]  }
  0x14   : > { %v5327_v24 = vld [vmem:[%s7930_s1 + $0x2a0] ss:$8 sps:$4 sm:$0xff]   ;;  %v5330_v26 = vld [vmem:[%s7930_s1 + $0x294] ss:$8 sps:$4 sm:$0xff]   ;;  %s6121_s10 = scalar_lea.vmem %s7929_s0, %s5281_s23  ;;  %vm1109_vm2 = vcmask 1041408   ;;  %vm6155_vm3 = vmor %vm358_vm0, %vm359_vm1  ;;  %vm1110_vm4 = vcmask 1045508  }
  0x15   : > { %702 = vmatpush1.bf16.msra.mxu0 %v5308_v11  ;;  %v5332_v27 = vld [vmem:[%s7930_s1 + $0x190] ss:$8 sps:$4 sm:$0xff]   ;;  %v5334_v29 = vld [vmem:[%s7930_s1 + $0x184] ss:$8 sps:$4 sm:$0xff]   ;;  %v5338_v44 = vld [vmem:[%s7930_s1 + $0x180] ss:$8 sps:$4 sm:$0xff]  }
  0x16   : > { %745 = vmatpush1.bf16.msra.mxu1 %v5309_v12  ;;  %703 = vmatprep.subr.bf16.mxu0 %v5310_v13  ;;  %v5333_v28 = vld [vmem:[%s7930_s1 + $0x290] ss:$8 sps:$4 sm:$0xff]   ;;  %v6136_v31 = vld [vmem:[%s6121_s10 + $0x28] sm:$0x3f]  ;;  %v6139_v32 = vld [vmem:[%s6121_s10 + $0x40] sm:$0x3f] }
  0x17   : > { %746 = vmatprep.subr.bf16.mxu1 %v5312_v14  ;;  %v6133_v30 = vld [vmem:[%s6121_s10 + $0x10] sm:$0x3f]  ;;  %v5336_v33 = vld [vmem:[%s7930_s1 + $0x284] ss:$8 sps:$4 sm:$0xff]   ;;  %v6145_v34 = vld [vmem:[%s6121_s10 + $0x58] sm:$0x3f]  ;;  %v353_v36 = vcombine.high %v6136_v31, %v6136_v31  ;;  %v355_v37 = vcombine.high %v6139_v32, %v6139_v32 }
  0x18   : > { %v351_v35 = vcombine.high %v6133_v30, %v6133_v30  ;;  %v4429_v39 = vrot.slane %v6133_v30, 9  ;;  %v357_v40 = vcombine.high %v6145_v34, %v6145_v34  ;;  %v4431_v41 = vrot.slane %v6136_v31, 9  ;;  %v5339_v48 = vld [vmem:[%s7930_s1 + $0x280] ss:$8 sps:$4 sm:$0xff]   ;;  %v5340_v49 = vld [vmem:[%s7930_s1 + $0x274] ss:$8 sps:$4 sm:$0xff]   ;;  %vm6211_vm5 = vmor %vm1109_vm2, %vm1110_vm4 }
  0x19   : > { %704 = vmatpush1.bf16.msra.mxu0 %v5314_v15  ;;  %v4433_v42 = vrot.slane %v6139_v32, 9  ;;  %v4435_v43 = vrot.slane %v6145_v34, 9  ;;  %v375_v46 = vrot.slane %v353_v36, 5  ;;  %v383_v47 = vrot.slane %v355_v37, 5  ;;  %v5344_v53 = vld [vmem:[%s7930_s1 + $0x74] ss:$8 sps:$4 sm:$0xff]  }
  0x1a   : > { %747 = vmatpush1.bf16.msra.mxu1 %v5315_v16  ;;  %705 = vmatprep.subr.bf16.mxu0 %v5316_v17  ;;  %v367_v45 = vrot.slane %v351_v35, 5  ;;  %v391_v50 = vrot.slane %v357_v40, 5  ;;  %v289_v51 = vcombine.low %v6133_v30, %v6136_v31  ;;  %v6178_v52 = vcombine.low %v6139_v32, %v6145_v34  ;;  %v5342_v60 = vld [vmem:[%s7930_s1 + $0x70] ss:$8 sps:$4 sm:$0xff]   ;;  %v5351_v0 = vld [vmem:[%s7930_s1 + $0x264] ss:$8 sps:$4 sm:$0xff]  }
  0x1b   : > { %748 = vmatprep.subr.bf16.mxu1 %v5318_v18  ;;  %v6187_v55 = vsel %vm6155_vm3, %v4431_v41, %v375_v46  ;;  %v6191_v56 = vsel %vm6155_vm3, %v4433_v42, %v383_v47  ;;  %v5345_v61 = vld [vmem:[%s7930_s1 + $0x270] ss:$8 sps:$4 sm:$0xff]   ;;  %v4581_v1 = vrot.slane %v6133_v30, 10  ;;  %v1118_v3 = vrot.slane %v351_v35, 6  ;;  %v5355_v5 = vld [vmem:[%s7930_s1 + $0x64] ss:$8 sps:$4 sm:$0xff]  }
  0x1c   : > { %v368_v54 = vsel %vm6155_vm3, %v4429_v39, %v367_v45  ;;  %v6195_v57 = vsel %vm6155_vm3, %v4435_v43, %v391_v50  ;;  %v1948_v59 = vcombine.low %v6187_v55, %v6191_v56  ;;  %v4583_v6 = vrot.slane %v6136_v31, 10  ;;  %v5353_v10 = vld [vmem:[%s7930_s1 + $0x60] ss:$8 sps:$4 sm:$0xff]   ;;  %v5357_v15 = vld [vmem:[%s7930_s1 + $0x254] ss:$8 sps:$4 sm:$0xff]   ;;  %s5280_s19 = sshll.u32 %s7951_s22, 5 }
  0x1d   : > { %706 = vmatpush1.bf16.msra.mxu0 %v5320_v19  ;;  %v395_v58 = vcombine.low %v368_v54, %v6187_v55  ;;  %v6208_v62 = vcombine.low %v6191_v56, %v6195_v57  ;;  %v1126_v7 = vrot.slane %v353_v36, 6  ;;  %v6226_v8 = vsel %vm6211_vm5, %v4581_v1, %v1118_v3  ;;  %v5356_v14 = vld [vmem:[%s7930_s1 + $0x260] ss:$8 sps:$4 sm:$0xff]   ;;  %v5361_v17 = vld [vmem:[%s7930_s1 + $0x54] ss:$8 sps:$4 sm:$0xff]   ;;  %s251_s24 = scalar_lea.vmem %s7935_s6, %s5280_s19 }
  0x1e   : > { %749 = vmatpush1.bf16.msra.mxu1 %v5321_v20  ;;  %707 = vmatprep.subr.bf16.mxu0 %v5322_v21  ;;  %v4585_v9 = vrot.slane %v6139_v32, 10  ;;  %v1134_v12 = vrot.slane %v355_v37, 6  ;;  %v4587_v13 = vrot.slane %v6145_v34, 10  ;;  %v1142_v16 = vrot.slane %v357_v40, 6  ;;  %v5359_v20 = vld [vmem:[%s7930_s1 + $0x50] ss:$8 sps:$4 sm:$0xff]  }
  0x1f   : > { %750 = vmatprep.subr.bf16.mxu1 %v5324_v22  ;;  %v407_v4 = vpack.c.bf16 %v6208_v62, %v395_v58  ;;  %v6234_v11 = vsel %vm6211_vm5, %v4583_v6, %v1126_v7  ;;  %v5362_v21 = vld [vmem:[%s7930_s1 + $0x250] ss:$8 sps:$4 sm:$0xff]   ;;  %v5363_v22 = vld [vmem:[%s7930_s1 + $0x244] ss:$8 sps:$4 sm:$0xff]   ;;  %v5469_v55 = vld [vmem:[%s7930_s1 + $0x354] ss:$8 sps:$4 sm:$0xff]  }
  0x20   : > { %v6248_v18 = vsel %vm6211_vm5, %v4585_v9, %v1134_v12  ;;  %v6252_v19 = vsel %vm6211_vm5, %v4587_v13, %v1142_v16  ;;  %v5374_v35 = vld [vmem:[%s7930_s1 + $0x230] ss:$8 sps:$4 sm:$0xff]   ;;  %v6292_v37 = vld [vmem:[%s6121_s10 + $0x20] sm:$0x3f]  ;;  %v6307_v43 = vld [vmem:[%s6121_s10 + $0x48] sm:$0x3f] }
  0x21   : > { %708 = vmatpush1.bf16.msra.mxu0 %v5326_v23  ;;  %v5367_v23 = vld [vmem:[%s7930_s1 + $0x44] ss:$8 sps:$4 sm:$0xff]   ;;  %v6289_v36 = vld [vmem:[%s6121_s10 + $0x18] sm:$0x3f]  ;;  %v6295_v39 = vld [vmem:[%s6121_s10 + $0x30] sm:$0x3f] }
  0x22   : > { %751 = vmatpush1.bf16.msra.mxu1 %v5327_v24  ;;  %709 = vmatprep.subr.bf16.mxu0 %v5328_v25  ;;  %v5365_v24 = vld [vmem:[%s7930_s1 + $0x40] ss:$8 sps:$4 sm:$0xff]   ;;  %v6304_v42 = vld [vmem:[%s6121_s10 + $0x38] sm:$0x3f]  ;;  %v6314_v45 = vcombine.low %v6289_v36, %v6292_v37  ;;  %v6318_v46 = vcombine.high %v6289_v36, %v6292_v37  ;;  %v5379_v58 = vld [vmem:[%s7930_s1 + $0x24] ss:$8 sps:$4 sm:$0xff]  }
  0x23   : > { %752 = vmatprep.subr.bf16.mxu1 %v5330_v26  ;;  %v5368_v25 = vld [vmem:[%s7930_s1 + $0x240] ss:$8 sps:$4 sm:$0xff]   ;;  %v5369_v26 = vld [vmem:[%s7930_s1 + $0x234] ss:$8 sps:$4 sm:$0xff]   ;;  %v5466_v30 = vld [vmem:[%s7930_s1 + $0x464] ss:$8 sps:$4 sm:$0xff]  }
  0x24   : > { %v371_v1 = vrot.slane %v6318_v46, 5  ;;  %v5377_v12 = vld [vmem:[%s7930_s1 + $0x20] ss:$8 sps:$4 sm:$0xff]   ;;  %v5381_v16 = vld [vmem:[%s7930_s1 + $0x214] ss:$8 sps:$4 sm:$0xff]   ;;  %vm3935_vm6 = vcmask 523264  }
  0x25   : > { %710 = vmatpush1.bf16.msra.mxu0 %v5332_v27  ;;  %v5373_v27 = vld [vmem:[%s7930_s1 + $0x34] ss:$8 sps:$4 sm:$0xff]   ;;  %v5380_v13 = vld [vmem:[%s7930_s1 + $0x220] ss:$8 sps:$4 sm:$0xff]   ;;  %vm4052_vm7 = vcmask 261120  }
  0x26   : > { %753 = vmatpush1.bf16.msra.mxu1 %v5333_v28  ;;  %711 = vmatprep.subr.bf16.mxu0 %v5334_v29  ;;  %v6279_v28 = vld [vmem:[%s6121_s10] sm:$0x3f]  ;;  %v254_v29 = vld [vmem:[%s6121_s10 + $0x8] sm:$0x3f]  ;;  %v5472_v56 = vld [vmem:[%s7930_s1 + $0x454] ss:$8 sps:$4 sm:$0xff]  }
  0x27   : > { %754 = vmatprep.subr.bf16.mxu1 %v5336_v33  ;;  %v5371_v33 = vld [vmem:[%s7930_s1 + $0x30] ss:$8 sps:$4 sm:$0xff]   ;;  %v6298_v40 = vcombine.low %v6279_v28, %v254_v29  ;;  %v6301_v41 = vcombine.high %v6279_v28, %v254_v29  ;;  %v4425_v47 = vcombine.low %v254_v29, %v6292_v37  ;;  %v5894_v38 = vld [vmem:[%s7930_s1 + $0xb00] ss:$8 sps:$4 sm:$0xff]  }
  0x28   : > { %v6401_v29 = vld [vmem:[%s6121_s10 + $0x70] sm:$0x3f]  ;;  %v5964_v63 = vld [vmem:[%s7930_s1 + $0xd00] ss:$8 sps:$4 sm:$0xff]  }
  0x29   : > { %712 = vmatpush1.bf16.msra.mxu0 %v5338_v44  ;;  %v6310_v44 = vld [vmem:[%s6121_s10 + $0x50] sm:$0x3f]  ;;  %v4428_v54 = vrot.slane %v6298_v40, 9 }
  0x2a   : > { %755 = vmatpush1.bf16.msra.mxu1 %v5339_v48  ;;  %713 = vmatprep.subr.bf16.mxu0 %v5340_v49  ;;  %v5375_v48 = vld [vmem:[%s7930_s1 + $0x224] ss:$8 sps:$4 sm:$0xff]   ;;  %v6326_v49 = vcombine.low %v6295_v39, %v6304_v42  ;;  %v6330_v50 = vcombine.low %v6307_v43, %v6310_v44  ;;  %v6352_v6 = vcombine.low %v6304_v42, %v6310_v44 }
  0x2b   : > { %1023 = vmatprep.subr.bf16.mxu1 %v5344_v53  ;;  %v6334_v53 = vcombine.high %v6295_v39, %v6304_v42 }
  0x2c   : > { %v4432_v3 = vrot.slane %v6326_v49, 9 }
  0x2d   : > { %773 = vmatmul.mubr.bf16.vlgmr.msra.gmra.mxu1 %v407_v4  ;;  %714 = vmatpush2.bf16.msra.mxu0 %v5345_v61  ;;  %v363_v61 = vrot.slane %v6301_v41, 5  ;;  %v379_v4 = vrot.slane %v6334_v53, 5 }
  0x2e   : > { %1024 = vmatpush1.bf16.msra.mxu1 %v5342_v60  ;;  %715 = vmatprep.subr.bf16.mxu0 %v5351_v0  ;;  %v6342_v60 = vcombine.high %v6307_v43, %v6310_v44  ;;  %v4430_v0 = vrot.slane %v6314_v45, 9 }
  0x2f   : > { %1025 = vmatprep.subr.bf16.mxu1 %v5355_v5  ;;  %v4434_v5 = vrot.slane %v6330_v50, 9  ;;  %v364_v7 = vsel %vm6155_vm3, %v4428_v54, %v363_v61  ;;  %v5403_v54 = vld [vmem:[%s7930_s1 + $0xf4] ss:$8 sps:$4 sm:$0xff]   ;;  %v4685_v61 = vcombine.low %v6292_v37, %v6304_v42  ;;  %v5527_v42 = vld [vmem:[%s7930_s1 + $0x3b0] ss:$8 sps:$4 sm:$0xff]  }
  0x30   : > { %v6358_v9 = vsel %vm6155_vm3, %v4430_v0, %v371_v1  ;;  %v4684_v1 = vcombine.low %v6289_v36, %v6295_v39  ;;  %v5532_v37 = vld [vmem:[%s7930_s1 + $0x4b4] ss:$8 sps:$4 sm:$0xff]  }
  0x31   : > { %716 = vmatpush2.bf16.msra.mxu0 %v5356_v14  ;;  %v6369_v14 = vsel %vm6155_vm3, %v4432_v3, %v379_v4  ;;  %v1544_v3 = vcombine.low %v6136_v31, %v6139_v32  ;;  %v1547_v4 = vcombine.low %v6145_v34, %v6401_v29  ;;  %v5412_v32 = vld [vmem:[%s7930_s1 + $0x164] ss:$8 sps:$4 sm:$0xff]  }
  0x32   : > { %1026 = vmatpush1.bf16.msra.mxu1 %v5353_v10  ;;  %717 = vmatprep.subr.bf16.mxu0 %v5357_v15  ;;  %v387_v10 = vrot.slane %v6342_v60, 5  ;;  %v394_v15 = vcombine.high %v364_v7, %v6358_v9 }
  0x33   : > { %1027 = vmatprep.subr.bf16.mxu1 %v5361_v17  ;;  %v5385_v17 = vld [vmem:[%s7930_s1 + $0x14] ss:$8 sps:$4 sm:$0xff]   ;;  %v6441_v34 = vpack.c.bf16 %v1547_v4, %v1544_v3  ;;  %v4785_v3 = vrot.slane %v6401_v29, 9  ;;  %v5431_v4 = vld [vmem:[%s7930_s1 + $0xa0] ss:$8 sps:$4 sm:$0xff]  }
  0x35   : > { %718 = vmatpush2.bf16.msra.mxu0 %v5362_v21  ;;  %v300_v21 = vpack.c.bf16 %v6352_v6, %v4425_v47  ;;  %v5389_v47 = vld [vmem:[%s7930_s1] ss:$8 sps:$4 sm:$0xff]  }
  0x36   : > { %1028 = vmatpush1.bf16.msra.mxu1 %v5359_v20  ;;  %719 = vmatprep.subr.bf16.mxu0 %v5363_v22  ;;  %v6380_v20 = vsel %vm6155_vm3, %v4434_v5, %v387_v10  ;;  %v5401_v5 = vld [vmem:[%s7930_s1 + $0xf0] ss:$8 sps:$4 sm:$0xff]   ;;  %v5409_v10 = vld [vmem:[%s7930_s1 + $0xe4] ss:$8 sps:$4 sm:$0xff]  }
  0x37   : > { %1029 = vmatprep.subr.bf16.mxu1 %v5367_v23  ;;  %v6385_v22 = vcombine.high %v6369_v14, %v6380_v20  ;;  %1055 = vmatprep.mubr.bf16.mxu1 %v300_v21  ;;  %v5383_v23 = vld [vmem:[%s7930_s1 + $0x10] ss:$8 sps:$4 sm:$0xff]  }
  0x38   : > { %v5416_v21 = vld [vmem:[%s7930_s1 + $0x150] ss:$8 sps:$4 sm:$0xff]  }
  0x39   : > { %720 = vmatpush2.bf16.msra.mxu0 %v5368_v25  ;;  %v406_v25 = vpack.c.bf16 %v6385_v22, %v394_v15  ;;  %v5415_v15 = vld [vmem:[%s7930_s1 + $0xd4] ss:$8 sps:$4 sm:$0xff]  }
  0x3a   : > { %1030 = vmatpush1.bf16.msra.mxu1 %v5365_v24  ;;  %721 = vmatprep.subr.bf16.mxu0 %v5369_v26  ;;  %v5386_v24 = vld [vmem:[%s7930_s1 + $0x210] ss:$8 sps:$4 sm:$0xff]   ;;  %v5387_v26 = vld [vmem:[%s7930_s1 + $0x204] ss:$8 sps:$4 sm:$0xff]  }
  0x3b   : > { %1031 = vmatprep.subr.bf16.mxu1 %v5373_v27  ;;  %v5391_v27 = vld [vmem:[%s7930_s1 + $0x4] ss:$8 sps:$4 sm:$0xff]   ;;  %729 = vmatprep.mubr.bf16.mxu0 %v406_v25  ;;  %v5419_v25 = vld [vmem:[%s7930_s1 + $0xc0] ss:$8 sps:$4 sm:$0xff]  }
  0x3d   : > { %722 = vmatpush2.bf16.msra.mxu0 %v5374_v35  ;;  %v6406_v35 = vcombine.low %v6369_v14, %v6380_v20 }
  0x3e   : > { %1032 = vmatpush1.bf16.msra.mxu1 %v5371_v33  ;;  %723 = vmatprep.subr.bf16.mxu0 %v5375_v48  ;;  %v393_v33 = vcombine.low %v364_v7, %v6358_v9  ;;  %v5392_v48 = vld [vmem:[%s7930_s1 + $0x200] ss:$8 sps:$4 sm:$0xff]   ;;  %v5404_v7 = vld [vmem:[%s7930_s1 + $0x170] ss:$8 sps:$4 sm:$0xff]  }
  0x3f   : > { %1033 = vmatprep.subr.bf16.mxu1 %v5379_v58  ;;  %v5406_v58 = vld [vmem:[%s7930_s1 + $0x174] ss:$8 sps:$4 sm:$0xff]  }
  0x40   : > { %v405_v0 = vpack.c.bf16 %v6406_v35, %v393_v33  ;;  %v5430_v33 = vld [vmem:[%s7930_s1 + $0x134] ss:$8 sps:$4 sm:$0xff]  }
  0x41   : > { %724 = vmatpush2.bf16.msra.mxu0 %v5380_v13  ;;  %v5410_v13 = vld [vmem:[%s7930_s1 + $0x160] ss:$8 sps:$4 sm:$0xff]  }
  0x42   : > { %1034 = vmatpush1.bf16.msra.mxu1 %v5377_v12  ;;  %725 = vmatprep.subr.bf16.mxu0 %v5381_v16  ;;  %v5407_v12 = vld [vmem:[%s7930_s1 + $0xe0] ss:$8 sps:$4 sm:$0xff]   ;;  %v5418_v16 = vld [vmem:[%s7930_s1 + $0x154] ss:$8 sps:$4 sm:$0xff]  }
  0x43   : > { %1035 = vmatprep.subr.bf16.mxu1 %v5385_v17  ;;  %v5413_v17 = vld [vmem:[%s7930_s1 + $0xd0] ss:$8 sps:$4 sm:$0xff]  }
  0x45   : > { %726 = vmatpush2.bf16.msra.mxu0 %v5386_v24  ;;  %v5424_v24 = vld [vmem:[%s7930_s1 + $0x144] ss:$8 sps:$4 sm:$0xff]  }
  0x46   : > { %1036 = vmatpush1.bf16.msra.mxu1 %v5383_v23  ;;  %727 = vmatprep.subr.bf16.mxu0 %v5387_v26  ;;  %v5421_v23 = vld [vmem:[%s7930_s1 + $0xc4] ss:$8 sps:$4 sm:$0xff]   ;;  %v5422_v26 = vld [vmem:[%s7930_s1 + $0x140] ss:$8 sps:$4 sm:$0xff]  }
  0x47   : > { %1037 = vmatprep.subr.bf16.mxu1 %v5391_v27  ;;  %v5427_v27 = vld [vmem:[%s7930_s1 + $0xb4] ss:$8 sps:$4 sm:$0xff]  }
  0x49   : > { %728 = vmatpush2.bf16.msra.mxu0 %v5392_v48  ;;  %v5428_v48 = vld [vmem:[%s7930_s1 + $0x130] ss:$8 sps:$4 sm:$0xff]  }
  0x4a   : > { %1038 = vmatpush1.bf16.msra.mxu1 %v5389_v47  ;;  %1066 = vmatprep.subr.bf16.mxu0 %v5406_v58  ;;  %v5425_v47 = vld [vmem:[%s7930_s1 + $0xb0] ss:$8 sps:$4 sm:$0xff]   ;;  %v5433_v58 = vld [vmem:[%s7930_s1 + $0xa4] ss:$8 sps:$4 sm:$0xff]  }
  0x4b   : > { %1039 = vmatprep.subr.bf16.mxu1 %v5403_v54  ;;  %v6488_v54 = vcombine.high %v6401_v29, %v6401_v29  ;;  %v5442_v29 = vld [vmem:[%s7930_s1 + $0x114] ss:$8 sps:$4 sm:$0xff]  }
  0x4c   : > { %730 = vmatmul.mubr.bf16.vlgmr.msra.gmra.mxu0 %v405_v0  ;;  %v5436_v0 = vld [vmem:[%s7930_s1 + $0x124] ss:$8 sps:$4 sm:$0xff]  }
  0x4d   : > { %1067 = vmatpush1.bf16.msra.mxu0 %v5404_v7  ;;  %1098 = vmatprep.mubr.bf16.mxu0 %v5987_v2  ;;  %v1944_v7 = vrot.slane %v6488_v54, 5 }
  0x4e   : > { %1040 = vmatpush2.bf16.msra.mxu1 %v5401_v5  ;;  %1068 = vmatprep.subr.bf16.mxu0 %v5412_v32  ;;  %v5434_v5 = vld [vmem:[%s7930_s1 + $0x120] ss:$8 sps:$4 sm:$0xff]   ;;  %v4580_v32 = vrot.slane %v6298_v40, 10  ;;  %v5437_v40 = vld [vmem:[%s7930_s1 + $0x90] ss:$8 sps:$4 sm:$0xff]  }
  0x4f   : > { %1041 = vmatprep.subr.bf16.mxu1 %v5409_v10  ;;  %v5439_v10 = vld [vmem:[%s7930_s1 + $0x94] ss:$8 sps:$4 sm:$0xff]  }
  0x51   : > { %1069 = vmatpush1.bf16.msra.mxu0 %v5410_v13  ;;  %v4582_v13 = vrot.slane %v6314_v45, 10  ;;  %v5445_v45 = vld [vmem:[%s7930_s1 + $0x84] ss:$8 sps:$4 sm:$0xff]  }
  0x52   : > { %1042 = vmatpush2.bf16.msra.mxu1 %v5407_v12  ;;  %1070 = vmatprep.subr.bf16.mxu0 %v5418_v16  ;;  %v1114_v12 = vrot.slane %v6301_v41, 6  ;;  %v4584_v16 = vrot.slane %v6326_v49, 10  ;;  %v5440_v41 = vld [vmem:[%s7930_s1 + $0x110] ss:$8 sps:$4 sm:$0xff]   ;;  %v6532_v49 = vsel %vm6155_vm3, %v4785_v3, %v1944_v7  ;;  %v301_v3 = vpack.c.bf16 %v6178_v52, %v289_v51  ;;  %v5461_v7 = vld [vmem:[%s7930_s1 + $0x360] ss:$8 sps:$4 sm:$0xff]  }
  0x53   : > { %1043 = vmatprep.subr.bf16.mxu1 %v5415_v15  ;;  %v1122_v15 = vrot.slane %v6318_v46, 6  ;;  %v5448_v46 = vld [vmem:[%s7930_s1 + $0x104] ss:$8 sps:$4 sm:$0xff]  }
  0x55   : > { %1071 = vmatpush1.bf16.msra.mxu0 %v5416_v21  ;;  %v4586_v21 = vrot.slane %v6330_v50, 10  ;;  %v4424_v50 = vcombine.low %v6279_v28, %v6289_v36  ;;  %v5443_v28 = vld [vmem:[%s7930_s1 + $0x80] ss:$8 sps:$4 sm:$0xff]   ;;  %v5616_v36 = vld [vmem:[%s7930_s1 + $0x764] ss:$8 sps:$4 sm:$0xff]  }
  0x56   : > { %1044 = vmatpush2.bf16.msra.mxu1 %v5413_v17  ;;  %1072 = vmatprep.subr.bf16.mxu0 %v5424_v24  ;;  %v1130_v17 = vrot.slane %v6334_v53, 6  ;;  %v6538_v53 = vcombine.low %v6295_v39, %v6307_v43  ;;  %v6546_v24 = vsel %vm6211_vm5, %v4582_v13, %v1122_v15  ;;  %v5446_v43 = vld [vmem:[%s7930_s1 + $0x100] ss:$8 sps:$4 sm:$0xff]  }
  0x57   : > { %1045 = vmatprep.subr.bf16.mxu1 %v5421_v23  ;;  %v1138_v23 = vrot.slane %v6342_v60, 6  ;;  %v6542_v60 = vsel %vm6211_vm5, %v4580_v32, %v1114_v12  ;;  %v5475_v32 = vld [vmem:[%s7930_s1 + $0x344] ss:$8 sps:$4 sm:$0xff]   ;;  %v5473_v13 = vld [vmem:[%s7930_s1 + $0x340] ss:$8 sps:$4 sm:$0xff]  }
  0x58   : > { %v5478_v12 = vld [vmem:[%s7930_s1 + $0x444] ss:$8 sps:$4 sm:$0xff]   ;;  %v5476_v15 = vld [vmem:[%s7930_s1 + $0x440] ss:$8 sps:$4 sm:$0xff]  }
  0x59   : > { %1073 = vmatpush1.bf16.msra.mxu0 %v5422_v26  ;;  %v6554_v26 = vsel %vm6211_vm5, %v4586_v21, %v1138_v23  ;;  %v5479_v21 = vld [vmem:[%s7930_s1 + $0x330] ss:$8 sps:$4 sm:$0xff]  }
  0x5a   : > { %1046 = vmatpush2.bf16.msra.mxu1 %v5419_v25  ;;  %1074 = vmatprep.subr.bf16.mxu0 %v5430_v33  ;;  %v6550_v25 = vsel %vm6211_vm5, %v4584_v16, %v1130_v17  ;;  %v5460_v33 = vld [vmem:[%s7930_s1 + $0x474] ss:$8 sps:$4 sm:$0xff]   ;;  %v5482_v23 = vld [vmem:[%s7930_s1 + $0x430] ss:$8 sps:$4 sm:$0xff]  }
  0x5b   : > { %1047 = vmatprep.subr.bf16.mxu1 %v5427_v27  ;;  %v5457_v27 = vld [vmem:[%s7930_s1 + $0x374] ss:$8 sps:$4 sm:$0xff]  }
  0x5c   : > { %v5481_v16 = vld [vmem:[%s7930_s1 + $0x334] ss:$8 sps:$4 sm:$0xff]  }
  0x5d   : > { %1075 = vmatpush1.bf16.msra.mxu0 %v5428_v48  ;;  %v1145_v48 = vcombine.high %v6542_v60, %v6546_v24  ;;  %v5484_v17 = vld [vmem:[%s7930_s1 + $0x434] ss:$8 sps:$4 sm:$0xff]  }
  0x5e   : > { %1048 = vmatpush2.bf16.msra.mxu1 %v5425_v47  ;;  %1076 = vmatprep.subr.bf16.mxu0 %v5436_v0  ;;  %v1951_v47 = vcombine.low %v6195_v57, %v6532_v49  ;;  %v299_v0 = vpack.c.bf16 %v6538_v53, %v4424_v50  ;;  %v5455_v57 = vld [vmem:[%s7930_s1 + $0x370] ss:$8 sps:$4 sm:$0xff]   ;;  %v5493_v50 = vld [vmem:[%s7930_s1 + $0x314] ss:$8 sps:$4 sm:$0xff]  }
  0x5f   : > { %1049 = vmatprep.subr.bf16.mxu1 %v5433_v58  ;;  %v6574_v58 = vcombine.high %v6550_v25, %v6554_v26 }
  0x60   : > { %v6597_v51 = vpack.c.bf16 %v1951_v47, %v1948_v59  ;;  %v5467_v59 = vld [vmem:[%s7930_s1 + $0x350] ss:$8 sps:$4 sm:$0xff]   ;;  %v5502_v47 = vld [vmem:[%s7930_s1 + $0x404] ss:$8 sps:$4 sm:$0xff]  }
  0x61   : > { %1077 = vmatpush1.bf16.msra.mxu0 %v5434_v5  ;;  %v5463_v5 = vld [vmem:[%s7930_s1 + $0x364] ss:$8 sps:$4 sm:$0xff]   ;;  %v1157_v31 = vpack.c.bf16 %v6574_v58, %v1145_v48  ;;  %v1146_v48 = vcombine.low %v6226_v8, %v6234_v11  ;;  %v5505_v8 = vld [vmem:[%s7930_s1 + $0x3f4] ss:$8 sps:$4 sm:$0xff]  }
  0x62   : > { %1050 = vmatpush2.bf16.msra.mxu1 %v5431_v4  ;;  %1078 = vmatprep.subr.bf16.mxu0 %v5442_v29  ;;  %v5458_v4 = vld [vmem:[%s7930_s1 + $0x470] ss:$8 sps:$4 sm:$0xff]  }
  0x63   : > { %1051 = vmatprep.subr.bf16.mxu1 %v5439_v10  ;;  %v5464_v10 = vld [vmem:[%s7930_s1 + $0x460] ss:$8 sps:$4 sm:$0xff]   ;;  %v5470_v29 = vld [vmem:[%s7930_s1 + $0x450] ss:$8 sps:$4 sm:$0xff]  }
  0x65   : > { %1079 = vmatpush1.bf16.msra.mxu0 %v5440_v41  ;;  %v5490_v41 = vld [vmem:[%s7930_s1 + $0x424] ss:$8 sps:$4 sm:$0xff]  }
  0x66   : > { %1052 = vmatpush2.bf16.msra.mxu1 %v5437_v40  ;;  %1080 = vmatprep.subr.bf16.mxu0 %v5448_v46  ;;  %v5487_v40 = vld [vmem:[%s7930_s1 + $0x324] ss:$8 sps:$4 sm:$0xff]   ;;  %v5488_v46 = vld [vmem:[%s7930_s1 + $0x420] ss:$8 sps:$4 sm:$0xff]  }
  0x67   : > { %1053 = vmatprep.subr.bf16.mxu1 %v5445_v45  ;;  %v5485_v45 = vld [vmem:[%s7930_s1 + $0x320] ss:$8 sps:$4 sm:$0xff]  }
  0x69   : > { %1081 = vmatpush1.bf16.msra.mxu0 %v5446_v43  ;;  %v5491_v43 = vld [vmem:[%s7930_s1 + $0x310] ss:$8 sps:$4 sm:$0xff]  }
  0x6a   : > { %1054 = vmatpush2.bf16.msra.mxu1 %v5443_v28  ;;  %1448 = vmatprep.subr.bf16.mxu0 %v5457_v27  ;;  %v5496_v28 = vld [vmem:[%s7930_s1 + $0x414] ss:$8 sps:$4 sm:$0xff]   ;;  %v5494_v27 = vld [vmem:[%s7930_s1 + $0x410] ss:$8 sps:$4 sm:$0xff]  }
  0x6b   : > { %1491 = vmatprep.subr.bf16.mxu1 %v5460_v33  ;;  %v5499_v33 = vld [vmem:[%s7930_s1 + $0x304] ss:$8 sps:$4 sm:$0xff]  }
  0x6c   : > { %1099 = vmatmul.mubr.bf16.vlgmr.msra.gmra.mxu0 %v301_v3  ;;  %v5497_v3 = vld [vmem:[%s7930_s1 + $0x300] ss:$8 sps:$4 sm:$0xff]  }
  0x6d   : > { %1056 = vmatmul.mubr.bf16.vlgmr.msra.gmra.mxu1 %v299_v0  ;;  %1449 = vmatpush1.bf16.msra.mxu0 %v5455_v57  ;;  %v6676_v0 = vcombine.low %v6248_v18, %v6252_v19  ;;  %v5500_v57 = vld [vmem:[%s7930_s1 + $0x400] ss:$8 sps:$4 sm:$0xff]  }
  0x6e   : > { %1492 = vmatpush1.bf16.msra.mxu1 %v5458_v4  ;;  %1450 = vmatprep.subr.bf16.mxu0 %v5463_v5  ;;  %v5508_v4 = vld [vmem:[%s7930_s1 + $0x4f4] ss:$8 sps:$4 sm:$0xff]  }
  0x6f   : > { %1493 = vmatprep.subr.bf16.mxu1 %v5466_v30  ;;  %1523 = vmatprep.mubr.bf16.mxu1 %v5987_v2  ;;  %v1158_v5 = vpack.c.bf16 %v6676_v0, %v1146_v48  ;;  %v5503_v30 = vld [vmem:[%s7930_s1 + $0x3f0] ss:$8 sps:$4 sm:$0xff]   ;;  %v5550_v48 = vld [vmem:[%s7930_s1 + $0x484] ss:$8 sps:$4 sm:$0xff]  }
  0x70   : > { %1480 = vmatprep.mubr.bf16.mxu0 %v1157_v31  ;;  %v5506_v31 = vld [vmem:[%s7930_s1 + $0x4f0] ss:$8 sps:$4 sm:$0xff]  }
  0x71   : > { %1451 = vmatpush1.bf16.msra.mxu0 %v5461_v7  ;;  %v5511_v7 = vld [vmem:[%s7930_s1 + $0x3e4] ss:$8 sps:$4 sm:$0xff]  }
  0x72   : > { %1494 = vmatpush1.bf16.msra.mxu1 %v5464_v10  ;;  %1452 = vmatprep.subr.bf16.mxu0 %v5469_v55  ;;  %v5514_v10 = vld [vmem:[%s7930_s1 + $0x4e4] ss:$8 sps:$4 sm:$0xff]   ;;  %v5509_v55 = vld [vmem:[%s7930_s1 + $0x3e0] ss:$8 sps:$4 sm:$0xff]  }
  0x73   : > { %1495 = vmatprep.subr.bf16.mxu1 %v5472_v56  ;;  %v5512_v56 = vld [vmem:[%s7930_s1 + $0x4e0] ss:$8 sps:$4 sm:$0xff]  }
  0x75   : > { %1453 = vmatpush1.bf16.msra.mxu0 %v5467_v59  ;;  %v5517_v59 = vld [vmem:[%s7930_s1 + $0x3d4] ss:$8 sps:$4 sm:$0xff]  }
  0x76   : > { %1496 = vmatpush1.bf16.msra.mxu1 %v5470_v29  ;;  %1454 = vmatprep.subr.bf16.mxu0 %v5475_v32  ;;  %v5520_v29 = vld [vmem:[%s7930_s1 + $0x4d4] ss:$8 sps:$4 sm:$0xff]   ;;  %v6716_v32 = vld [vmem:[%s6121_s10 + $0x68] sm:$0x3f] }
  0x77   : > { %1497 = vmatprep.subr.bf16.mxu1 %v5478_v12  ;;  %v5515_v12 = vld [vmem:[%s7930_s1 + $0x3d0] ss:$8 sps:$4 sm:$0xff]  }
  0x79   : > { %1455 = vmatpush1.bf16.msra.mxu0 %v5473_v13  ;;  %v5518_v13 = vld [vmem:[%s7930_s1 + $0x4d0] ss:$8 sps:$4 sm:$0xff]  }
  0x7a   : > { %1498 = vmatpush1.bf16.msra.mxu1 %v5476_v15  ;;  %1456 = vmatprep.subr.bf16.mxu0 %v5481_v16  ;;  %v4687_v15 = vcombine.low %v6310_v44, %v6716_v32  ;;  %v5523_v16 = vld [vmem:[%s7930_s1 + $0x3c4] ss:$8 sps:$4 sm:$0xff]   ;;  %v5521_v44 = vld [vmem:[%s7930_s1 + $0x3c0] ss:$8 sps:$4 sm:$0xff]  }
  0x7b   : > { %1499 = vmatprep.subr.bf16.mxu1 %v5484_v17  ;;  %v5526_v17 = vld [vmem:[%s7930_s1 + $0x4c4] ss:$8 sps:$4 sm:$0xff]  }
  0x7d   : > { %1457 = vmatpush1.bf16.msra.mxu0 %v5479_v21  ;;  %v1555_v21 = vpack.c.bf16 %v4687_v15, %v4685_v61  ;;  %v5530_v61 = vld [vmem:[%s7930_s1 + $0x4b0] ss:$8 sps:$4 sm:$0xff]  }
  0x7e   : > { %1500 = vmatpush1.bf16.msra.mxu1 %v5482_v23  ;;  %1458 = vmatprep.subr.bf16.mxu0 %v5487_v40  ;;  %v5524_v23 = vld [vmem:[%s7930_s1 + $0x4c0] ss:$8 sps:$4 sm:$0xff]   ;;  %v5529_v40 = vld [vmem:[%s7930_s1 + $0x3b4] ss:$8 sps:$4 sm:$0xff]   ;;  %v5566_v15 = vld [vmem:[%s7930_s1 + $0x5d0] ss:$8 sps:$4 sm:$0xff]  }
  0x7f   : > { %1501 = vmatprep.subr.bf16.mxu1 %v5490_v41  ;;  %v5535_v41 = vld [vmem:[%s7930_s1 + $0x3a4] ss:$8 sps:$4 sm:$0xff]  }
  0x81   : > { %1459 = vmatpush1.bf16.msra.mxu0 %v5485_v45  ;;  %v5538_v45 = vld [vmem:[%s7930_s1 + $0x4a4] ss:$8 sps:$4 sm:$0xff]  }
  0x82   : > { %1502 = vmatpush1.bf16.msra.mxu1 %v5488_v46  ;;  %1460 = vmatprep.subr.bf16.mxu0 %v5493_v50  ;;  %v5533_v46 = vld [vmem:[%s7930_s1 + $0x3a0] ss:$8 sps:$4 sm:$0xff]  }
  0x83   : > { %1503 = vmatprep.subr.bf16.mxu1 %v5496_v28  ;;  %v5536_v50 = vld [vmem:[%s7930_s1 + $0x4a0] ss:$8 sps:$4 sm:$0xff]   ;;  %v5541_v28 = vld [vmem:[%s7930_s1 + $0x394] ss:$8 sps:$4 sm:$0xff]  }
  0x85   : > { %1461 = vmatpush1.bf16.msra.mxu0 %v5491_v43  ;;  %v5544_v43 = vld [vmem:[%s7930_s1 + $0x494] ss:$8 sps:$4 sm:$0xff]  }
  0x86   : > { %1504 = vmatpush1.bf16.msra.mxu1 %v5494_v27  ;;  %1462 = vmatprep.subr.bf16.mxu0 %v5499_v33  ;;  %v5539_v27 = vld [vmem:[%s7930_s1 + $0x390] ss:$8 sps:$4 sm:$0xff]  }
  0x87   : > { %1505 = vmatprep.subr.bf16.mxu1 %v5502_v47  ;;  %v5542_v33 = vld [vmem:[%s7930_s1 + $0x490] ss:$8 sps:$4 sm:$0xff]   ;;  %v5547_v47 = vld [vmem:[%s7930_s1 + $0x384] ss:$8 sps:$4 sm:$0xff]  }
  0x89   : > { %1463 = vmatpush1.bf16.msra.mxu0 %v5497_v3  ;;  %v5545_v3 = vld [vmem:[%s7930_s1 + $0x380] ss:$8 sps:$4 sm:$0xff]  }
  0x8a   : > { %1506 = vmatpush1.bf16.msra.mxu1 %v5500_v57  ;;  %1464 = vmatprep.subr.bf16.mxu0 %v5505_v8  ;;  %v5548_v57 = vld [vmem:[%s7930_s1 + $0x480] ss:$8 sps:$4 sm:$0xff]   ;;  %v1144_v8 = vcombine.low %v6542_v60, %v6546_v24  ;;  %v5551_v60 = vld [vmem:[%s7930_s1 + $0x570] ss:$8 sps:$4 sm:$0xff]  }
  0x8b   : > { %1846 = vmatprep.subr.bf16.mxu1 %v5508_v4  ;;  %v6793_v4 = vcombine.low %v6550_v25, %v6554_v26 }
  0x8d   : > { %1524 = vmatmul.mubr.bf16.vlgmr.msra.gmra.mxu1 %v1158_v5  ;;  %1465 = vmatpush2.bf16.msra.mxu0 %v5503_v30  ;;  %v5553_v5 = vld [vmem:[%s7930_s1 + $0x574] ss:$8 sps:$4 sm:$0xff]  }
  0x8e   : > { %1847 = vmatpush1.bf16.msra.mxu1 %v5506_v31  ;;  %1466 = vmatprep.subr.bf16.mxu0 %v5511_v7  ;;  %v5556_v30 = vld [vmem:[%s7930_s1 + $0x5f4] ss:$8 sps:$4 sm:$0xff]   ;;  %v1156_v31 = vpack.c.bf16 %v6793_v4, %v1144_v8  ;;  %v5554_v7 = vld [vmem:[%s7930_s1 + $0x5f0] ss:$8 sps:$4 sm:$0xff]   ;;  %v5598_v8 = vld [vmem:[%s7930_s1 + $0x584] ss:$8 sps:$4 sm:$0xff]  }
  0x8f   : > { %1848 = vmatprep.subr.bf16.mxu1 %v5514_v10  ;;  %1878 = vmatprep.mubr.bf16.mxu1 %v1555_v21  ;;  %v5559_v10 = vld [vmem:[%s7930_s1 + $0x564] ss:$8 sps:$4 sm:$0xff]   ;;  %v5569_v21 = vld [vmem:[%s7930_s1 + $0x540] ss:$8 sps:$4 sm:$0xff]  }
  0x91   : > { %1467 = vmatpush2.bf16.msra.mxu0 %v5509_v55  ;;  %v5562_v55 = vld [vmem:[%s7930_s1 + $0x5e4] ss:$8 sps:$4 sm:$0xff]  }
  0x92   : > { %1849 = vmatpush1.bf16.msra.mxu1 %v5512_v56  ;;  %1468 = vmatprep.subr.bf16.mxu0 %v5517_v59  ;;  %v5557_v56 = vld [vmem:[%s7930_s1 + $0x560] ss:$8 sps:$4 sm:$0xff]  }
  0x93   : > { %1850 = vmatprep.subr.bf16.mxu1 %v5520_v29  ;;  %v5560_v59 = vld [vmem:[%s7930_s1 + $0x5e0] ss:$8 sps:$4 sm:$0xff]   ;;  %v5565_v29 = vld [vmem:[%s7930_s1 + $0x554] ss:$8 sps:$4 sm:$0xff]  }
  0x95   : > { %1469 = vmatpush2.bf16.msra.mxu0 %v5515_v12  ;;  %v5568_v12 = vld [vmem:[%s7930_s1 + $0x5d4] ss:$8 sps:$4 sm:$0xff]  }
  0x96   : > { %1851 = vmatpush1.bf16.msra.mxu1 %v5518_v13  ;;  %1470 = vmatprep.subr.bf16.mxu0 %v5523_v16  ;;  %v5563_v13 = vld [vmem:[%s7930_s1 + $0x550] ss:$8 sps:$4 sm:$0xff]   ;;  %v5571_v16 = vld [vmem:[%s7930_s1 + $0x544] ss:$8 sps:$4 sm:$0xff]  }
  0x97   : > { %1852 = vmatprep.subr.bf16.mxu1 %v5526_v17  ;;  %v5574_v17 = vld [vmem:[%s7930_s1 + $0x5c4] ss:$8 sps:$4 sm:$0xff]  }
  0x99   : > { %1471 = vmatpush2.bf16.msra.mxu0 %v5521_v44  ;;  %v5572_v44 = vld [vmem:[%s7930_s1 + $0x5c0] ss:$8 sps:$4 sm:$0xff]  }
  0x9a   : > { %1853 = vmatpush1.bf16.msra.mxu1 %v5524_v23  ;;  %1472 = vmatprep.subr.bf16.mxu0 %v5529_v40  ;;  %v5577_v23 = vld [vmem:[%s7930_s1 + $0x534] ss:$8 sps:$4 sm:$0xff]  }
  0x9b   : > { %1854 = vmatprep.subr.bf16.mxu1 %v5532_v37  ;;  %v5580_v40 = vld [vmem:[%s7930_s1 + $0x5b4] ss:$8 sps:$4 sm:$0xff]   ;;  %v5575_v37 = vld [vmem:[%s7930_s1 + $0x530] ss:$8 sps:$4 sm:$0xff]  }
  0x9d   : > { %1473 = vmatpush2.bf16.msra.mxu0 %v5527_v42  ;;  %v5578_v42 = vld [vmem:[%s7930_s1 + $0x5b0] ss:$8 sps:$4 sm:$0xff]  }
  0x9e   : > { %1855 = vmatpush1.bf16.msra.mxu1 %v5530_v61  ;;  %1474 = vmatprep.subr.bf16.mxu0 %v5535_v41  ;;  %v5583_v61 = vld [vmem:[%s7930_s1 + $0x524] ss:$8 sps:$4 sm:$0xff]  }
  0x9f   : > { %1856 = vmatprep.subr.bf16.mxu1 %v5538_v45  ;;  %v5586_v41 = vld [vmem:[%s7930_s1 + $0x5a4] ss:$8 sps:$4 sm:$0xff]  }
  0xa0   : > { %v265_v45 = vld [vmem:[%s6121_s10 + $0x60] sm:$0x3f] }
  0xa1   : > { %1475 = vmatpush2.bf16.msra.mxu0 %v5533_v46  ;;  %v5581_v46 = vld [vmem:[%s7930_s1 + $0x520] ss:$8 sps:$4 sm:$0xff]  }
  0xa2   : > { %1857 = vmatpush1.bf16.msra.mxu1 %v5536_v50  ;;  %1476 = vmatprep.subr.bf16.mxu0 %v5541_v28  ;;  %v5584_v50 = vld [vmem:[%s7930_s1 + $0x5a0] ss:$8 sps:$4 sm:$0xff]   ;;  %v6871_v28 = vcombine.low %v265_v45, %v6716_v32 }
  0xa3   : > { %1858 = vmatprep.subr.bf16.mxu1 %v5544_v43  ;;  %v6874_v43 = vcombine.high %v265_v45, %v6716_v32  ;;  %v5590_v32 = vld [vmem:[%s7930_s1 + $0x590] ss:$8 sps:$4 sm:$0xff]  }
  0xa5   : > { %1477 = vmatpush2.bf16.msra.mxu0 %v5539_v27  ;;  %v5589_v27 = vld [vmem:[%s7930_s1 + $0x514] ss:$8 sps:$4 sm:$0xff]  }
  0xa6   : > { %1859 = vmatpush1.bf16.msra.mxu1 %v5542_v33  ;;  %1478 = vmatprep.subr.bf16.mxu0 %v5547_v47  ;;  %v5592_v33 = vld [vmem:[%s7930_s1 + $0x594] ss:$8 sps:$4 sm:$0xff]   ;;  %v5587_v47 = vld [vmem:[%s7930_s1 + $0x510] ss:$8 sps:$4 sm:$0xff]  }
  0xa7   : > { %1860 = vmatprep.subr.bf16.mxu1 %v5550_v48  ;;  %v4784_v48 = vrot.slane %v6871_v28, 9 }
  0xa9   : > { %1479 = vmatpush2.bf16.msra.mxu0 %v5545_v3  ;;  %v1940_v3 = vrot.slane %v6874_v43, 5 }
  0xaa   : > { %1861 = vmatpush1.bf16.msra.mxu1 %v5548_v57  ;;  %1889 = vmatprep.subr.bf16.mxu0 %v5556_v30  ;;  %v5595_v57 = vld [vmem:[%s7930_s1 + $0x504] ss:$8 sps:$4 sm:$0xff]   ;;  %v5596_v30 = vld [vmem:[%s7930_s1 + $0x580] ss:$8 sps:$4 sm:$0xff]  }
  0xab   : > { %1862 = vmatprep.subr.bf16.mxu1 %v5553_v5  ;;  %v5593_v5 = vld [vmem:[%s7930_s1 + $0x500] ss:$8 sps:$4 sm:$0xff]  }
  0xac   : > { %1481 = vmatmul.mubr.bf16.vlgmr.msra.gmra.mxu0 %v1156_v31  ;;  %v5975_v31 = vld [vmem:[%s6121_s10 + $0x48] sm:$0x3f] }
  0xad   : > { %1890 = vmatpush1.bf16.msra.mxu0 %v5554_v7  ;;  %1921 = vmatprep.mubr.bf16.mxu0 %v5987_v2  ;;  %v6905_v7 = vsel %vm6155_vm3, %v4784_v48, %v1940_v3  ;;  %v5646_v48 = vld [vmem:[%s7930_s1 + $0x714] ss:$8 sps:$4 sm:$0xff]   ;;  %v5641_v3 = vld [vmem:[%s7930_s1 + $0x610] ss:$8 sps:$4 sm:$0xff]  }
  0xae   : > { %1863 = vmatpush2.bf16.msra.mxu1 %v5551_v60  ;;  %1891 = vmatprep.subr.bf16.mxu0 %v5562_v55  ;;  %v4686_v60 = vcombine.low %v5975_v31, %v265_v45  ;;  %v5610_v55 = vld [vmem:[%s7930_s1 + $0x774] ss:$8 sps:$4 sm:$0xff]   ;;  %v5629_v45 = vld [vmem:[%s7930_s1 + $0x630] ss:$8 sps:$4 sm:$0xff]   ;;  %v5652_v31 = vld [vmem:[%s7930_s1 + $0x704] ss:$8 sps:$4 sm:$0xff]  }
  0xaf   : > { %1864 = vmatprep.subr.bf16.mxu1 %v5559_v10  ;;  %v5607_v10 = vld [vmem:[%s7930_s1 + $0x674] ss:$8 sps:$4 sm:$0xff]  }
  0xb1   : > { %1892 = vmatpush1.bf16.msra.mxu0 %v5560_v59  ;;  %v1950_v59 = vcombine.high %v6380_v20, %v6905_v7 }
  0xb2   : > { %1865 = vmatpush2.bf16.msra.mxu1 %v5557_v56  ;;  %1893 = vmatprep.subr.bf16.mxu0 %v5568_v12  ;;  %v1947_v56 = vcombine.high %v6358_v9, %v6369_v14  ;;  %v5605_v12 = vld [vmem:[%s7930_s1 + $0x670] ss:$8 sps:$4 sm:$0xff]  }
  0xb3   : > { %1866 = vmatprep.subr.bf16.mxu1 %v5565_v29  ;;  %v1554_v29 = vpack.c.bf16 %v4686_v60, %v4684_v1  ;;  %v5611_v1 = vld [vmem:[%s7930_s1 + $0x660] ss:$8 sps:$4 sm:$0xff]  }
  0xb4   : > { %v1959_v39 = vpack.c.bf16 %v1950_v59, %v1947_v56  ;;  %v5647_v60 = vld [vmem:[%s7930_s1 + $0x600] ss:$8 sps:$4 sm:$0xff]   ;;  %v2349_v56 = vcombine.high %v6546_v24, %v6550_v25 }
  0xb5   : > { %1894 = vmatpush1.bf16.msra.mxu0 %v5566_v15  ;;  %v5613_v15 = vld [vmem:[%s7930_s1 + $0x664] ss:$8 sps:$4 sm:$0xff]  }
  0xb6   : > { %1867 = vmatpush2.bf16.msra.mxu1 %v5563_v13  ;;  %1895 = vmatprep.subr.bf16.mxu0 %v5574_v17  ;;  %v5608_v13 = vld [vmem:[%s7930_s1 + $0x770] ss:$8 sps:$4 sm:$0xff]   ;;  %v5619_v17 = vld [vmem:[%s7930_s1 + $0x654] ss:$8 sps:$4 sm:$0xff]  }
  0xb7   : > { %1868 = vmatprep.subr.bf16.mxu1 %v5571_v16  ;;  %v5614_v16 = vld [vmem:[%s7930_s1 + $0x760] ss:$8 sps:$4 sm:$0xff]  }
  0xb9   : > { %1896 = vmatpush1.bf16.msra.mxu0 %v5572_v44  ;;  %v5620_v44 = vld [vmem:[%s7930_s1 + $0x750] ss:$8 sps:$4 sm:$0xff]  }
  0xba   : > { %1869 = vmatpush2.bf16.msra.mxu1 %v5569_v21  ;;  %1897 = vmatprep.subr.bf16.mxu0 %v5580_v40  ;;  %v5617_v21 = vld [vmem:[%s7930_s1 + $0x650] ss:$8 sps:$4 sm:$0xff]   ;;  %v5628_v40 = vld [vmem:[%s7930_s1 + $0x744] ss:$8 sps:$4 sm:$0xff]  }
  0xbb   : > { %1870 = vmatprep.subr.bf16.mxu1 %v5577_v23  ;;  %v5625_v23 = vld [vmem:[%s7930_s1 + $0x644] ss:$8 sps:$4 sm:$0xff]  }
  0xbd   : > { %1898 = vmatpush1.bf16.msra.mxu0 %v5578_v42  ;;  %v5626_v42 = vld [vmem:[%s7930_s1 + $0x740] ss:$8 sps:$4 sm:$0xff]  }
  0xbe   : > { %1871 = vmatpush2.bf16.msra.mxu1 %v5575_v37  ;;  %1899 = vmatprep.subr.bf16.mxu0 %v5586_v41  ;;  %v5623_v37 = vld [vmem:[%s7930_s1 + $0x640] ss:$8 sps:$4 sm:$0xff]   ;;  %v5634_v41 = vld [vmem:[%s7930_s1 + $0x734] ss:$8 sps:$4 sm:$0xff]  }
  0xbf   : > { %1872 = vmatprep.subr.bf16.mxu1 %v5583_v61  ;;  %v5631_v61 = vld [vmem:[%s7930_s1 + $0x634] ss:$8 sps:$4 sm:$0xff]  }
  0xc1   : > { %1900 = vmatpush1.bf16.msra.mxu0 %v5584_v50  ;;  %v5637_v50 = vld [vmem:[%s7930_s1 + $0x624] ss:$8 sps:$4 sm:$0xff]  }
  0xc2   : > { %1873 = vmatpush2.bf16.msra.mxu1 %v5581_v46  ;;  %1901 = vmatprep.subr.bf16.mxu0 %v5592_v33  ;;  %v5632_v46 = vld [vmem:[%s7930_s1 + $0x730] ss:$8 sps:$4 sm:$0xff]   ;;  %v5635_v33 = vld [vmem:[%s7930_s1 + $0x620] ss:$8 sps:$4 sm:$0xff]  }
  0xc3   : > { %1874 = vmatprep.subr.bf16.mxu1 %v5589_v27  ;;  %v5640_v27 = vld [vmem:[%s7930_s1 + $0x724] ss:$8 sps:$4 sm:$0xff]  }
  0xc5   : > { %1902 = vmatpush1.bf16.msra.mxu0 %v5590_v32  ;;  %v5643_v32 = vld [vmem:[%s7930_s1 + $0x614] ss:$8 sps:$4 sm:$0xff]  }
  0xc6   : > { %1875 = vmatpush2.bf16.msra.mxu1 %v5587_v47  ;;  %1903 = vmatprep.subr.bf16.mxu0 %v5598_v8  ;;  %v5638_v47 = vld [vmem:[%s7930_s1 + $0x720] ss:$8 sps:$4 sm:$0xff]   ;;  %v4882_v8 = vrot.slane %v6871_v28, 10 }
  0xc7   : > { %1876 = vmatprep.subr.bf16.mxu1 %v5595_v57  ;;  %v5644_v57 = vld [vmem:[%s7930_s1 + $0x710] ss:$8 sps:$4 sm:$0xff]   ;;  %v5650_v28 = vld [vmem:[%s7930_s1 + $0x700] ss:$8 sps:$4 sm:$0xff]  }
  0xc9   : > { %1904 = vmatpush1.bf16.msra.mxu0 %v5596_v30  ;;  %v5649_v30 = vld [vmem:[%s7930_s1 + $0x604] ss:$8 sps:$4 sm:$0xff]  }
  0xca   : > { %1877 = vmatpush2.bf16.msra.mxu1 %v5593_v5  ;;  %2250 = vmatprep.subr.bf16.mxu0 %v5607_v10  ;;  %v2342_v5 = vrot.slane %v6874_v43, 6  ;;  %v5655_v10 = vld [vmem:[%s7930_s1 + $0x6f4] ss:$8 sps:$4 sm:$0xff]  }
  0xcb   : > { %2293 = vmatprep.subr.bf16.mxu1 %v5610_v55  ;;  %v5658_v55 = vld [vmem:[%s7930_s1 + $0x7f4] ss:$8 sps:$4 sm:$0xff]  }
  0xcc   : > { %1922 = vmatmul.mubr.bf16.vlgmr.msra.gmra.mxu0 %v6441_v34  ;;  %v5622_v34 = vld [vmem:[%s7930_s1 + $0x754] ss:$8 sps:$4 sm:$0xff]   ;;  %v7016_v43 = vsel %vm6211_vm5, %v4882_v8, %v2342_v5  ;;  %v5695_v8 = vld [vmem:[%s7930_s1 + $0x680] ss:$8 sps:$4 sm:$0xff]   ;;  %v1946_v5 = vcombine.low %v6358_v9, %v6369_v14  ;;  %v5703_v14 = vld [vmem:[%s7930_s1 + $0x870] ss:$8 sps:$4 sm:$0xff]  }
  0xcd   : > { %1879 = vmatmul.mubr.bf16.vlgmr.msra.gmra.mxu1 %v1554_v29  ;;  %2251 = vmatpush1.bf16.msra.mxu0 %v5605_v12  ;;  %v2352_v59 = vcombine.high %v6554_v26, %v7016_v43  ;;  %v5653_v29 = vld [vmem:[%s7930_s1 + $0x6f0] ss:$8 sps:$4 sm:$0xff]  }
  0xce   : > { %2294 = vmatpush1.bf16.msra.mxu1 %v5608_v13  ;;  %2252 = vmatprep.subr.bf16.mxu0 %v5613_v15  ;;  %v5656_v12 = vld [vmem:[%s7930_s1 + $0x7f0] ss:$8 sps:$4 sm:$0xff]   ;;  %v5661_v13 = vld [vmem:[%s7930_s1 + $0x6e4] ss:$8 sps:$4 sm:$0xff]  }
  0xcf   : > { %2295 = vmatprep.subr.bf16.mxu1 %v5616_v36  ;;  %2325 = vmatprep.mubr.bf16.mxu1 %v5987_v2  ;;  %v5664_v15 = vld [vmem:[%s7930_s1 + $0x7e4] ss:$8 sps:$4 sm:$0xff]   ;;  %v2361_v36 = vpack.c.bf16 %v2352_v59, %v2349_v56  ;;  %v5709_v56 = vld [vmem:[%s7930_s1 + $0x860] ss:$8 sps:$4 sm:$0xff]  }
  0xd0   : > { %2282 = vmatprep.mubr.bf16.mxu0 %v1959_v39  ;;  %v5659_v39 = vld [vmem:[%s7930_s1 + $0x6e0] ss:$8 sps:$4 sm:$0xff]  }
  0xd1   : > { %2253 = vmatpush1.bf16.msra.mxu0 %v5611_v1  ;;  %v5662_v1 = vld [vmem:[%s7930_s1 + $0x7e0] ss:$8 sps:$4 sm:$0xff]  }
  0xd2   : > { %2296 = vmatpush1.bf16.msra.mxu1 %v5614_v16  ;;  %2254 = vmatprep.subr.bf16.mxu0 %v5619_v17  ;;  %v5667_v16 = vld [vmem:[%s7930_s1 + $0x6d4] ss:$8 sps:$4 sm:$0xff]   ;;  %v5665_v17 = vld [vmem:[%s7930_s1 + $0x6d0] ss:$8 sps:$4 sm:$0xff]   ;;  %v5712_v59 = vld [vmem:[%s7930_s1 + $0x8e0] ss:$8 sps:$4 sm:$0xff]  }
  0xd3   : > { %2297 = vmatprep.subr.bf16.mxu1 %v5622_v34  ;;  %v5668_v34 = vld [vmem:[%s7930_s1 + $0x7d0] ss:$8 sps:$4 sm:$0xff]  }
  0xd5   : > { %2255 = vmatpush1.bf16.msra.mxu0 %v5617_v21  ;;  %v5673_v21 = vld [vmem:[%s7930_s1 + $0x6c4] ss:$8 sps:$4 sm:$0xff]  }
  0xd6   : > { %2298 = vmatpush1.bf16.msra.mxu1 %v5620_v44  ;;  %2256 = vmatprep.subr.bf16.mxu0 %v5625_v23  ;;  %v5676_v44 = vld [vmem:[%s7930_s1 + $0x7c4] ss:$8 sps:$4 sm:$0xff]   ;;  %v5671_v23 = vld [vmem:[%s7930_s1 + $0x6c0] ss:$8 sps:$4 sm:$0xff]  }
  0xd7   : > { %2299 = vmatprep.subr.bf16.mxu1 %v5628_v40  ;;  %v5674_v40 = vld [vmem:[%s7930_s1 + $0x7c0] ss:$8 sps:$4 sm:$0xff]  }
  0xd9   : > { %2257 = vmatpush1.bf16.msra.mxu0 %v5623_v37  ;;  %v5679_v37 = vld [vmem:[%s7930_s1 + $0x6b4] ss:$8 sps:$4 sm:$0xff]  }
  0xda   : > { %2300 = vmatpush1.bf16.msra.mxu1 %v5626_v42  ;;  %2258 = vmatprep.subr.bf16.mxu0 %v5631_v61  ;;  %v5682_v42 = vld [vmem:[%s7930_s1 + $0x7b4] ss:$8 sps:$4 sm:$0xff]   ;;  %v5677_v61 = vld [vmem:[%s7930_s1 + $0x6b0] ss:$8 sps:$4 sm:$0xff]  }
  0xdb   : > { %2301 = vmatprep.subr.bf16.mxu1 %v5634_v41  ;;  %v5680_v41 = vld [vmem:[%s7930_s1 + $0x7b0] ss:$8 sps:$4 sm:$0xff]  }
  0xdd   : > { %2259 = vmatpush1.bf16.msra.mxu0 %v5629_v45  ;;  %v5685_v45 = vld [vmem:[%s7930_s1 + $0x6a4] ss:$8 sps:$4 sm:$0xff]  }
  0xde   : > { %2302 = vmatpush1.bf16.msra.mxu1 %v5632_v46  ;;  %2260 = vmatprep.subr.bf16.mxu0 %v5637_v50  ;;  %v5688_v46 = vld [vmem:[%s7930_s1 + $0x7a4] ss:$8 sps:$4 sm:$0xff]   ;;  %v5683_v50 = vld [vmem:[%s7930_s1 + $0x6a0] ss:$8 sps:$4 sm:$0xff]  }
  0xdf   : > { %2303 = vmatprep.subr.bf16.mxu1 %v5640_v27  ;;  %v5686_v27 = vld [vmem:[%s7930_s1 + $0x7a0] ss:$8 sps:$4 sm:$0xff]  }
  0xe1   : > { %2261 = vmatpush1.bf16.msra.mxu0 %v5635_v33  ;;  %v5691_v33 = vld [vmem:[%s7930_s1 + $0x694] ss:$8 sps:$4 sm:$0xff]  }
  0xe2   : > { %2304 = vmatpush1.bf16.msra.mxu1 %v5638_v47  ;;  %2262 = vmatprep.subr.bf16.mxu0 %v5643_v32  ;;  %v5694_v47 = vld [vmem:[%s7930_s1 + $0x794] ss:$8 sps:$4 sm:$0xff]   ;;  %v5689_v32 = vld [vmem:[%s7930_s1 + $0x690] ss:$8 sps:$4 sm:$0xff]  }
  0xe3   : > { %2305 = vmatprep.subr.bf16.mxu1 %v5646_v48  ;;  %v5692_v48 = vld [vmem:[%s7930_s1 + $0x790] ss:$8 sps:$4 sm:$0xff]  }
  0xe5   : > { %2263 = vmatpush1.bf16.msra.mxu0 %v5641_v3  ;;  %v5697_v3 = vld [vmem:[%s7930_s1 + $0x684] ss:$8 sps:$4 sm:$0xff]  }
  0xe6   : > { %2306 = vmatpush1.bf16.msra.mxu1 %v5644_v57  ;;  %2264 = vmatprep.subr.bf16.mxu0 %v5649_v30  ;;  %v5700_v57 = vld [vmem:[%s7930_s1 + $0x784] ss:$8 sps:$4 sm:$0xff]   ;;  %v1949_v30 = vcombine.low %v6380_v20, %v6905_v7  ;;  %v5706_v20 = vld [vmem:[%s7930_s1 + $0x8f0] ss:$8 sps:$4 sm:$0xff]  }
  0xe7   : > { %2307 = vmatprep.subr.bf16.mxu1 %v5652_v31  ;;  %v5698_v31 = vld [vmem:[%s7930_s1 + $0x780] ss:$8 sps:$4 sm:$0xff]  }
  0xe8   : > { %v1958_v9 = vpack.c.bf16 %v1949_v30, %v1946_v5  ;;  %v5745_v5 = vld [vmem:[%s7930_s1 + $0x800] ss:$8 sps:$4 sm:$0xff]  }
  0xe9   : > { %2265 = vmatpush1.bf16.msra.mxu0 %v5647_v60  ;;  %v5705_v60 = vld [vmem:[%s7930_s1 + $0x874] ss:$8 sps:$4 sm:$0xff]  }
  0xea   : > { %2308 = vmatpush1.bf16.msra.mxu1 %v5650_v28  ;;  %2266 = vmatprep.subr.bf16.mxu0 %v5655_v10  ;;  %v5708_v28 = vld [vmem:[%s7930_s1 + $0x8f4] ss:$8 sps:$4 sm:$0xff]   ;;  %v5711_v10 = vld [vmem:[%s7930_s1 + $0x864] ss:$8 sps:$4 sm:$0xff]  }
  0xeb   : > { %2652 = vmatprep.subr.bf16.mxu1 %v5658_v55  ;;  %v5714_v55 = vld [vmem:[%s7930_s1 + $0x8e4] ss:$8 sps:$4 sm:$0xff]  }
  0xed   : > { %2326 = vmatmul.mubr.bf16.vlgmr.msra.gmra.mxu1 %v6597_v51  ;;  %2267 = vmatpush2.bf16.msra.mxu0 %v5653_v29  ;;  %v5670_v51 = vld [vmem:[%s7930_s1 + $0x7d4] ss:$8 sps:$4 sm:$0xff]  }
  0xee   : > { %2653 = vmatpush1.bf16.msra.mxu1 %v5656_v12  ;;  %2268 = vmatprep.subr.bf16.mxu0 %v5661_v13  ;;  %v5717_v29 = vld [vmem:[%s7930_s1 + $0x854] ss:$8 sps:$4 sm:$0xff]   ;;  %v5715_v13 = vld [vmem:[%s7930_s1 + $0x850] ss:$8 sps:$4 sm:$0xff]  }
  0xef   : > { %2654 = vmatprep.subr.bf16.mxu1 %v5664_v15  ;;  %2684 = vmatprep.mubr.bf16.mxu1 %v2361_v36  ;;  %v5720_v12 = vld [vmem:[%s7930_s1 + $0x8d4] ss:$8 sps:$4 sm:$0xff]   ;;  %v5718_v15 = vld [vmem:[%s7930_s1 + $0x8d0] ss:$8 sps:$4 sm:$0xff]   ;;  %v5723_v36 = vld [vmem:[%s7930_s1 + $0x844] ss:$8 sps:$4 sm:$0xff]  }
  0xf1   : > { %2269 = vmatpush2.bf16.msra.mxu0 %v5659_v39  ;;  %v5726_v39 = vld [vmem:[%s7930_s1 + $0x8c4] ss:$8 sps:$4 sm:$0xff]  }
  0xf2   : > { %2655 = vmatpush1.bf16.msra.mxu1 %v5662_v1  ;;  %2270 = vmatprep.subr.bf16.mxu0 %v5667_v16  ;;  %v5721_v1 = vld [vmem:[%s7930_s1 + $0x840] ss:$8 sps:$4 sm:$0xff]  }
  0xf3   : > { %2656 = vmatprep.subr.bf16.mxu1 %v5670_v51  ;;  %v5724_v16 = vld [vmem:[%s7930_s1 + $0x8c0] ss:$8 sps:$4 sm:$0xff]   ;;  %v5729_v51 = vld [vmem:[%s7930_s1 + $0x834] ss:$8 sps:$4 sm:$0xff]  }
  0xf5   : > { %2271 = vmatpush2.bf16.msra.mxu0 %v5665_v17  ;;  %v5732_v17 = vld [vmem:[%s7930_s1 + $0x8b4] ss:$8 sps:$4 sm:$0xff]  }
  0xf6   : > { %2657 = vmatpush1.bf16.msra.mxu1 %v5668_v34  ;;  %2272 = vmatprep.subr.bf16.mxu0 %v5673_v21  ;;  %v5727_v34 = vld [vmem:[%s7930_s1 + $0x830] ss:$8 sps:$4 sm:$0xff]  }
  0xf7   : > { %2658 = vmatprep.subr.bf16.mxu1 %v5676_v44  ;;  %v5730_v21 = vld [vmem:[%s7930_s1 + $0x8b0] ss:$8 sps:$4 sm:$0xff]   ;;  %v5735_v44 = vld [vmem:[%s7930_s1 + $0x824] ss:$8 sps:$4 sm:$0xff]  }
  0xf9   : > { %2273 = vmatpush2.bf16.msra.mxu0 %v5671_v23  ;;  %v5738_v23 = vld [vmem:[%s7930_s1 + $0x8a4] ss:$8 sps:$4 sm:$0xff]  }
  0xfa   : > { %2659 = vmatpush1.bf16.msra.mxu1 %v5674_v40  ;;  %2274 = vmatprep.subr.bf16.mxu0 %v5679_v37  ;;  %v5733_v40 = vld [vmem:[%s7930_s1 + $0x820] ss:$8 sps:$4 sm:$0xff]  }
  0xfb   : > { %2660 = vmatprep.subr.bf16.mxu1 %v5682_v42  ;;  %v5736_v37 = vld [vmem:[%s7930_s1 + $0x8a0] ss:$8 sps:$4 sm:$0xff]   ;;  %v7197_v42 = vld [vmem:[%s6121_s10 + $0x70] sm:$0x3f] }
  0xfd   : > { %2275 = vmatpush2.bf16.msra.mxu0 %v5677_v61  ;;  %v4883_v61 = vrot.slane %v7197_v42, 10 }
  0xfe   : > { %2661 = vmatpush1.bf16.msra.mxu1 %v5680_v41  ;;  %2276 = vmatprep.subr.bf16.mxu0 %v5685_v45  ;;  %v5741_v41 = vld [vmem:[%s7930_s1 + $0x814] ss:$8 sps:$4 sm:$0xff]  }
  0xff   : > { %2662 = vmatprep.subr.bf16.mxu1 %v5688_v46  ;;  %v5744_v45 = vld [vmem:[%s7930_s1 + $0x894] ss:$8 sps:$4 sm:$0xff]   ;;  %v2346_v46 = vrot.slane %v6488_v54, 6  ;;  %v5750_v54 = vld [vmem:[%s7930_s1 + $0x884] ss:$8 sps:$4 sm:$0xff]  }
 0x101   : > { %2277 = vmatpush2.bf16.msra.mxu0 %v5683_v50  ;;  %v5739_v50 = vld [vmem:[%s7930_s1 + $0x810] ss:$8 sps:$4 sm:$0xff]  }
 0x102   : > { %2663 = vmatpush1.bf16.msra.mxu1 %v5686_v27  ;;  %2278 = vmatprep.subr.bf16.mxu0 %v5691_v33  ;;  %v5742_v27 = vld [vmem:[%s7930_s1 + $0x890] ss:$8 sps:$4 sm:$0xff]   ;;  %v5747_v33 = vld [vmem:[%s7930_s1 + $0x804] ss:$8 sps:$4 sm:$0xff]  }
 0x103   : > { %2664 = vmatprep.subr.bf16.mxu1 %v5694_v47  ;;  %v7221_v47 = vsel %vm6211_vm5, %v4883_v61, %v2346_v46  ;;  %v5792_v61 = vld [vmem:[%s7930_s1 + $0xa14] ss:$8 sps:$4 sm:$0xff]   ;;  %v5787_v46 = vld [vmem:[%s7930_s1 + $0x910] ss:$8 sps:$4 sm:$0xff]  }
 0x105   : > { %2279 = vmatpush2.bf16.msra.mxu0 %v5689_v32  ;;  %v2348_v32 = vcombine.low %v6546_v24, %v6550_v25  ;;  %v5748_v24 = vld [vmem:[%s7930_s1 + $0x880] ss:$8 sps:$4 sm:$0xff]   ;;  %v5753_v25 = vld [vmem:[%s7930_s1 + $0x974] ss:$8 sps:$4 sm:$0xff]  }
 0x106   : > { %2665 = vmatpush1.bf16.msra.mxu1 %v5692_v48  ;;  %2280 = vmatprep.subr.bf16.mxu0 %v5697_v3  ;;  %v2351_v48 = vcombine.low %v6554_v26, %v7016_v43  ;;  %v2350_v3 = vcombine.low %v6234_v11, %v6248_v18  ;;  %v5756_v11 = vld [vmem:[%s7930_s1 + $0xa74] ss:$8 sps:$4 sm:$0xff]   ;;  %v5977_v18 = vld [vmem:[%s6121_s10 + $0x68] sm:$0x3f] }
 0x107   : > { %2666 = vmatprep.subr.bf16.mxu1 %v5700_v57  ;;  %v2353_v57 = vcombine.low %v6252_v19, %v7221_v47 }
 0x108   : > { %v2360_v26 = vpack.c.bf16 %v2351_v48, %v2348_v32 }
 0x109   : > { %2281 = vmatpush2.bf16.msra.mxu0 %v5695_v8  ;;  %v269_v8 = vld [vmem:[%s6121_s10 + $0x80] sm:$0x3f]  ;;  %v2362_v30 = vpack.c.bf16 %v2353_v57, %v2350_v3 }
 0x10a   : > { %2667 = vmatpush1.bf16.msra.mxu1 %v5698_v31  ;;  %2695 = vmatprep.subr.bf16.mxu0 %v5708_v28  ;;  %v4981_v19 = vcombine.low %v5977_v18, %v269_v8  ;;  %v5751_v31 = vld [vmem:[%s7930_s1 + $0x970] ss:$8 sps:$4 sm:$0xff]   ;;  %v5759_v28 = vld [vmem:[%s7930_s1 + $0x964] ss:$8 sps:$4 sm:$0xff]  }
 0x10b   : > { %2668 = vmatprep.subr.bf16.mxu1 %v5705_v60  ;;  %v5754_v60 = vld [vmem:[%s7930_s1 + $0xa70] ss:$8 sps:$4 sm:$0xff]  }
 0x10c   : > { %2283 = vmatmul.mubr.bf16.vlgmr.msra.gmra.mxu0 %v1958_v9  ;;  %v5762_v9 = vld [vmem:[%s7930_s1 + $0xa64] ss:$8 sps:$4 sm:$0xff]  }
 0x10d   : > { %2696 = vmatpush1.bf16.msra.mxu0 %v5706_v20  ;;  %2727 = vmatprep.mubr.bf16.mxu0 %v5987_v2  ;;  %v5757_v20 = vld [vmem:[%s7930_s1 + $0x960] ss:$8 sps:$4 sm:$0xff]  }
 0x10e   : > { %2669 = vmatpush2.bf16.msra.mxu1 %v5703_v14  ;;  %2697 = vmatprep.subr.bf16.mxu0 %v5714_v55  ;;  %v2753_v14 = vpack.c.bf16 %v4981_v19, %v6352_v6  ;;  %v5765_v55 = vld [vmem:[%s7930_s1 + $0x954] ss:$8 sps:$4 sm:$0xff]   ;;  %v5799_v19 = vld [vmem:[%s7930_s1 + $0x9f0] ss:$8 sps:$4 sm:$0xff]  }
 0x10f   : > { %2670 = vmatprep.subr.bf16.mxu1 %v5711_v10  ;;  %v5760_v10 = vld [vmem:[%s7930_s1 + $0xa60] ss:$8 sps:$4 sm:$0xff]   ;;  %v5768_v6 = vld [vmem:[%s7930_s1 + $0xa54] ss:$8 sps:$4 sm:$0xff]  }
 0x111   : > { %2698 = vmatpush1.bf16.msra.mxu0 %v5712_v59  ;;  %v5766_v59 = vld [vmem:[%s7930_s1 + $0xa50] ss:$8 sps:$4 sm:$0xff]  }
 0x112   : > { %2671 = vmatpush2.bf16.msra.mxu1 %v5709_v56  ;;  %2699 = vmatprep.subr.bf16.mxu0 %v5720_v12  ;;  %v5763_v56 = vld [vmem:[%s7930_s1 + $0x950] ss:$8 sps:$4 sm:$0xff]   ;;  %v5774_v12 = vld [vmem:[%s7930_s1 + $0xa44] ss:$8 sps:$4 sm:$0xff]  }
 0x113   : > { %2672 = vmatprep.subr.bf16.mxu1 %v5717_v29  ;;  %v5771_v29 = vld [vmem:[%s7930_s1 + $0x944] ss:$8 sps:$4 sm:$0xff]  }
 0x115   : > { %2700 = vmatpush1.bf16.msra.mxu0 %v5718_v15  ;;  %v5772_v15 = vld [vmem:[%s7930_s1 + $0xa40] ss:$8 sps:$4 sm:$0xff]  }
 0x116   : > { %2673 = vmatpush2.bf16.msra.mxu1 %v5715_v13  ;;  %2701 = vmatprep.subr.bf16.mxu0 %v5726_v39  ;;  %v5769_v13 = vld [vmem:[%s7930_s1 + $0x940] ss:$8 sps:$4 sm:$0xff]   ;;  %v5780_v39 = vld [vmem:[%s7930_s1 + $0xa34] ss:$8 sps:$4 sm:$0xff]  }
 0x117   : > { %2674 = vmatprep.subr.bf16.mxu1 %v5723_v36  ;;  %v5777_v36 = vld [vmem:[%s7930_s1 + $0x934] ss:$8 sps:$4 sm:$0xff]  }
 0x119   : > { %2702 = vmatpush1.bf16.msra.mxu0 %v5724_v16  ;;  %v5778_v16 = vld [vmem:[%s7930_s1 + $0xa30] ss:$8 sps:$4 sm:$0xff]  }
 0x11a   : > { %2675 = vmatpush2.bf16.msra.mxu1 %v5721_v1  ;;  %2703 = vmatprep.subr.bf16.mxu0 %v5732_v17  ;;  %v5775_v1 = vld [vmem:[%s7930_s1 + $0x930] ss:$8 sps:$4 sm:$0xff]   ;;  %v5786_v17 = vld [vmem:[%s7930_s1 + $0xa24] ss:$8 sps:$4 sm:$0xff]  }
 0x11b   : > { %2676 = vmatprep.subr.bf16.mxu1 %v5729_v51  ;;  %v5783_v51 = vld [vmem:[%s7930_s1 + $0x924] ss:$8 sps:$4 sm:$0xff]  }
 0x11d   : > { %2704 = vmatpush1.bf16.msra.mxu0 %v5730_v21 }
 0x11e   : > { %2677 = vmatpush2.bf16.msra.mxu1 %v5727_v34  ;;  %2705 = vmatprep.subr.bf16.mxu0 %v5738_v23  ;;  %v7308_v34 = vld [vmem:[%s6121_s10 + $0x78] sm:$0x3f]  ;;  %v5781_v23 = vld [vmem:[%s7930_s1 + $0x920] ss:$8 sps:$4 sm:$0xff]  }
 0x11f   : > { %2678 = vmatprep.subr.bf16.mxu1 %v5735_v44  ;;  %v2745_v21 = vcombine.low %v7308_v34, %v269_v8  ;;  %v3134_v44 = vcombine.high %v7308_v34, %v269_v8  ;;  %v5793_v8 = vld [vmem:[%s7930_s1 + $0x900] ss:$8 sps:$4 sm:$0xff]  }
 0x121   : > { %2706 = vmatpush1.bf16.msra.mxu0 %v5736_v37  ;;  %v5789_v37 = vld [vmem:[%s7930_s1 + $0x914] ss:$8 sps:$4 sm:$0xff]   ;;  %v5176_v3 = vrot.slane %v2745_v21, 10  ;;  %v3534_v57 = vrot.slane %v3134_v44, 6 }
 0x122   : > { %2679 = vmatpush2.bf16.msra.mxu1 %v5733_v40  ;;  %2707 = vmatprep.subr.bf16.mxu0 %v5744_v45  ;;  %v5784_v40 = vld [vmem:[%s7930_s1 + $0xa20] ss:$8 sps:$4 sm:$0xff]   ;;  %v3138_v45 = vrot.slane %v3134_v44, 5  ;;  %v5844_v44 = vld [vmem:[%s7930_s1 + $0x984] ss:$8 sps:$4 sm:$0xff]  }
 0x123   : > { %2680 = vmatprep.subr.bf16.mxu1 %v5741_v41  ;;  %v5078_v41 = vrot.slane %v2745_v21, 9  ;;  %v5839_v21 = vld [vmem:[%s7930_s1 + $0xa90] ss:$8 sps:$4 sm:$0xff]  }
 0x125   : > { %2708 = vmatpush1.bf16.msra.mxu0 %v5742_v27  ;;  %v7331_v27 = vld [vmem:[%s6121_s10 + $0x88] sm:$0x3f]  ;;  %v7343_v48 = vsel %vm6155_vm3, %v5078_v41, %v3138_v45  ;;  %v5854_v45 = vld [vmem:[%s7930_s1 + $0xb74] ss:$8 sps:$4 sm:$0xff]  }
 0x126   : > { %2681 = vmatpush2.bf16.msra.mxu1 %v5739_v50  ;;  %2709 = vmatprep.subr.bf16.mxu0 %v5750_v54  ;;  %v5790_v50 = vld [vmem:[%s7930_s1 + $0xa10] ss:$8 sps:$4 sm:$0xff]   ;;  %v5798_v54 = vld [vmem:[%s7930_s1 + $0xa04] ss:$8 sps:$4 sm:$0xff]   ;;  %v2748_v32 = vcombine.low %v7197_v42, %v7331_v27  ;;  %v5801_v42 = vld [vmem:[%s7930_s1 + $0x9f4] ss:$8 sps:$4 sm:$0xff]  }
 0x127   : > { %2682 = vmatprep.subr.bf16.mxu1 %v5747_v33  ;;  %v5795_v33 = vld [vmem:[%s7930_s1 + $0x904] ss:$8 sps:$4 sm:$0xff]   ;;  %v5845_v41 = vld [vmem:[%s7930_s1 + $0xa80] ss:$8 sps:$4 sm:$0xff]  }
 0x128   : > { %v2754_v18 = vpack.c.bf16 %v2748_v32, %v6178_v52  ;;  %v5811_v52 = vld [vmem:[%s7930_s1 + $0xae4] ss:$8 sps:$4 sm:$0xff]   ;;  %v5858_v32 = vld [vmem:[%s7930_s1 + $0xb60] ss:$8 sps:$4 sm:$0xff]  }
 0x129   : > { %2710 = vmatpush1.bf16.msra.mxu0 %v5748_v24  ;;  %v5804_v24 = vld [vmem:[%s7930_s1 + $0xaf4] ss:$8 sps:$4 sm:$0xff]  }
 0x12a   : > { %2683 = vmatpush2.bf16.msra.mxu1 %v5745_v5  ;;  %3044 = vmatprep.subr.bf16.mxu0 %v5753_v25  ;;  %v5796_v5 = vld [vmem:[%s7930_s1 + $0xa00] ss:$8 sps:$4 sm:$0xff]   ;;  %v7359_v25 = vsel %vm6211_vm5, %v5176_v3, %v3534_v57  ;;  %v5866_v57 = vld [vmem:[%s7930_s1 + $0xb54] ss:$8 sps:$4 sm:$0xff]  }
 0x12b   : > { %3087 = vmatprep.subr.bf16.mxu1 %v5756_v11  ;;  %v3145_v11 = vcombine.high %v6905_v7, %v7343_v48  ;;  %v5861_v3 = vld [vmem:[%s7930_s1 + $0xbe0] ss:$8 sps:$4 sm:$0xff]  }
 0x12c   : > { %2728 = vmatmul.mubr.bf16.vlgmr.msra.gmra.mxu0 %v2362_v30  ;;  %v5808_v30 = vld [vmem:[%s7930_s1 + $0x9e4] ss:$8 sps:$4 sm:$0xff]  }
 0x12d   : > { %2685 = vmatmul.mubr.bf16.vlgmr.msra.gmra.mxu1 %v2360_v26  ;;  %3045 = vmatpush1.bf16.msra.mxu0 %v5751_v31  ;;  %v5802_v26 = vld [vmem:[%s7930_s1 + $0xaf0] ss:$8 sps:$4 sm:$0xff]   ;;  %v3151_v31 = vpack.c.bf16 %v3145_v11, %v6385_v22  ;;  %v5817_v22 = vld [vmem:[%s7930_s1 + $0xad4] ss:$8 sps:$4 sm:$0xff]   ;;  %v5875_v11 = vld [vmem:[%s7930_s1 + $0xbc4] ss:$8 sps:$4 sm:$0xff]  }
 0x12e   : > { %3088 = vmatpush1.bf16.msra.mxu1 %v5754_v60  ;;  %3046 = vmatprep.subr.bf16.mxu0 %v5759_v28  ;;  %v5806_v60 = vld [vmem:[%s7930_s1 + $0x9e0] ss:$8 sps:$4 sm:$0xff]  }
 0x12f   : > { %3089 = vmatprep.subr.bf16.mxu1 %v5762_v9  ;;  %3119 = vmatprep.mubr.bf16.mxu1 %v5987_v2  ;;  %v5809_v28 = vld [vmem:[%s7930_s1 + $0xae0] ss:$8 sps:$4 sm:$0xff]   ;;  %v5814_v9 = vld [vmem:[%s7930_s1 + $0x9d4] ss:$8 sps:$4 sm:$0xff]  }
 0x130   : > { %3076 = vmatprep.mubr.bf16.mxu0 %v2753_v14  ;;  %v5812_v14 = vld [vmem:[%s7930_s1 + $0x9d0] ss:$8 sps:$4 sm:$0xff]  }
 0x131   : > { %3047 = vmatpush1.bf16.msra.mxu0 %v5757_v20  ;;  %v5815_v20 = vld [vmem:[%s7930_s1 + $0xad0] ss:$8 sps:$4 sm:$0xff]  }
 0x132   : > { %3090 = vmatpush1.bf16.msra.mxu1 %v5760_v10  ;;  %3048 = vmatprep.subr.bf16.mxu0 %v5765_v55  ;;  %v5820_v10 = vld [vmem:[%s7930_s1 + $0x9c4] ss:$8 sps:$4 sm:$0xff]  }
 0x133   : > { %3091 = vmatprep.subr.bf16.mxu1 %v5768_v6  ;;  %v5823_v55 = vld [vmem:[%s7930_s1 + $0xac4] ss:$8 sps:$4 sm:$0xff]   ;;  %v5818_v6 = vld [vmem:[%s7930_s1 + $0x9c0] ss:$8 sps:$4 sm:$0xff]  }
 0x135   : > { %3049 = vmatpush1.bf16.msra.mxu0 %v5763_v56  ;;  %v5821_v56 = vld [vmem:[%s7930_s1 + $0xac0] ss:$8 sps:$4 sm:$0xff]  }
 0x136   : > { %3092 = vmatpush1.bf16.msra.mxu1 %v5766_v59  ;;  %3050 = vmatprep.subr.bf16.mxu0 %v5771_v29  ;;  %v5826_v59 = vld [vmem:[%s7930_s1 + $0x9b4] ss:$8 sps:$4 sm:$0xff]  }
 0x137   : > { %3093 = vmatprep.subr.bf16.mxu1 %v5774_v12  ;;  %v5829_v29 = vld [vmem:[%s7930_s1 + $0xab4] ss:$8 sps:$4 sm:$0xff]   ;;  %v5824_v12 = vld [vmem:[%s7930_s1 + $0x9b0] ss:$8 sps:$4 sm:$0xff]  }
 0x139   : > { %3051 = vmatpush1.bf16.msra.mxu0 %v5769_v13  ;;  %v5827_v13 = vld [vmem:[%s7930_s1 + $0xab0] ss:$8 sps:$4 sm:$0xff]  }
 0x13a   : > { %3094 = vmatpush1.bf16.msra.mxu1 %v5772_v15  ;;  %3052 = vmatprep.subr.bf16.mxu0 %v5777_v36  ;;  %v5832_v15 = vld [vmem:[%s7930_s1 + $0x9a4] ss:$8 sps:$4 sm:$0xff]  }
 0x13b   : > { %3095 = vmatprep.subr.bf16.mxu1 %v5780_v39  ;;  %v5835_v36 = vld [vmem:[%s7930_s1 + $0xaa4] ss:$8 sps:$4 sm:$0xff]   ;;  %v5830_v39 = vld [vmem:[%s7930_s1 + $0x9a0] ss:$8 sps:$4 sm:$0xff]  }
 0x13d   : > { %3053 = vmatpush1.bf16.msra.mxu0 %v5775_v1  ;;  %v5833_v1 = vld [vmem:[%s7930_s1 + $0xaa0] ss:$8 sps:$4 sm:$0xff]  }
 0x13e   : > { %3096 = vmatpush1.bf16.msra.mxu1 %v5778_v16  ;;  %3054 = vmatprep.subr.bf16.mxu0 %v5783_v51  ;;  %v5838_v16 = vld [vmem:[%s7930_s1 + $0x994] ss:$8 sps:$4 sm:$0xff]  }
 0x13f   : > { %3097 = vmatprep.subr.bf16.mxu1 %v5786_v17  ;;  %v5841_v51 = vld [vmem:[%s7930_s1 + $0xa94] ss:$8 sps:$4 sm:$0xff]   ;;  %v5836_v17 = vld [vmem:[%s7930_s1 + $0x990] ss:$8 sps:$4 sm:$0xff]  }
 0x141   : > { %3055 = vmatpush1.bf16.msra.mxu0 %v5781_v23  ;;  %v5847_v23 = vld [vmem:[%s7930_s1 + $0xa84] ss:$8 sps:$4 sm:$0xff]  }
 0x142   : > { %3098 = vmatpush1.bf16.msra.mxu1 %v5784_v40  ;;  %3056 = vmatprep.subr.bf16.mxu0 %v5789_v37  ;;  %v5978_v40 = vld [vmem:[%s6121_s10 + $0x60] sm:$0x3f] }
 0x143   : > { %3099 = vmatprep.subr.bf16.mxu1 %v5792_v61  ;;  %v4980_v37 = vcombine.low %v5978_v40, %v7308_v34  ;;  %v5842_v61 = vld [vmem:[%s7930_s1 + $0x980] ss:$8 sps:$4 sm:$0xff]   ;;  %v5857_v34 = vld [vmem:[%s7930_s1 + $0xbf4] ss:$8 sps:$4 sm:$0xff]  }
 0x144   : > { %v5909_v40 = vld [vmem:[%s7930_s1 + $0xc54] ss:$8 sps:$4 sm:$0xff]  }
 0x145   : > { %3057 = vmatpush1.bf16.msra.mxu0 %v5787_v46  ;;  %v2752_v46 = vpack.c.bf16 %v4980_v37, %v6538_v53  ;;  %v5863_v53 = vld [vmem:[%s7930_s1 + $0xbe4] ss:$8 sps:$4 sm:$0xff]   ;;  %v5907_v37 = vld [vmem:[%s7930_s1 + $0xc50] ss:$8 sps:$4 sm:$0xff]  }
 0x146   : > { %3100 = vmatpush1.bf16.msra.mxu1 %v5790_v50  ;;  %3058 = vmatprep.subr.bf16.mxu0 %v5795_v33  ;;  %v5852_v50 = vld [vmem:[%s7930_s1 + $0xb70] ss:$8 sps:$4 sm:$0xff]  }
 0x147   : > { %3101 = vmatprep.subr.bf16.mxu1 %v5798_v54  ;;  %v5855_v33 = vld [vmem:[%s7930_s1 + $0xbf0] ss:$8 sps:$4 sm:$0xff]   ;;  %v5860_v54 = vld [vmem:[%s7930_s1 + $0xb64] ss:$8 sps:$4 sm:$0xff]  }
 0x149   : > { %3059 = vmatpush1.bf16.msra.mxu0 %v5793_v8  ;;  %v5869_v8 = vld [vmem:[%s7930_s1 + $0xbd4] ss:$8 sps:$4 sm:$0xff]  }
 0x14a   : > { %3102 = vmatpush1.bf16.msra.mxu1 %v5796_v5  ;;  %3060 = vmatprep.subr.bf16.mxu0 %v5801_v42  ;;  %v5864_v5 = vld [vmem:[%s7930_s1 + $0xb50] ss:$8 sps:$4 sm:$0xff]  }
 0x14b   : > { %3442 = vmatprep.subr.bf16.mxu1 %v5804_v24  ;;  %v5867_v42 = vld [vmem:[%s7930_s1 + $0xbd0] ss:$8 sps:$4 sm:$0xff]   ;;  %v5872_v24 = vld [vmem:[%s7930_s1 + $0xb44] ss:$8 sps:$4 sm:$0xff]  }
 0x14d   : > { %3120 = vmatmul.mubr.bf16.vlgmr.msra.gmra.mxu1 %v2754_v18  ;;  %3061 = vmatpush2.bf16.msra.mxu0 %v5799_v19  ;;  %v5870_v18 = vld [vmem:[%s7930_s1 + $0xb40] ss:$8 sps:$4 sm:$0xff]  }
 0x14e   : > { %3443 = vmatpush1.bf16.msra.mxu1 %v5802_v26  ;;  %3062 = vmatprep.subr.bf16.mxu0 %v5808_v30  ;;  %v5873_v19 = vld [vmem:[%s7930_s1 + $0xbc0] ss:$8 sps:$4 sm:$0xff]   ;;  %v5878_v26 = vld [vmem:[%s7930_s1 + $0xb34] ss:$8 sps:$4 sm:$0xff]  }
 0x14f   : > { %3444 = vmatprep.subr.bf16.mxu1 %v5811_v52  ;;  %3474 = vmatprep.mubr.bf16.mxu1 %v3151_v31  ;;  %v5881_v30 = vld [vmem:[%s7930_s1 + $0xbb4] ss:$8 sps:$4 sm:$0xff]   ;;  %v5876_v52 = vld [vmem:[%s7930_s1 + $0xb30] ss:$8 sps:$4 sm:$0xff]  }
 0x150   : > { %v5879_v31 = vld [vmem:[%s7930_s1 + $0xbb0] ss:$8 sps:$4 sm:$0xff]  }
 0x151   : > { %3063 = vmatpush2.bf16.msra.mxu0 %v5806_v60  ;;  %v7521_v60 = vcombine.high %v7331_v27, %v7331_v27 }
 0x152   : > { %3445 = vmatpush1.bf16.msra.mxu1 %v5809_v28  ;;  %3064 = vmatprep.subr.bf16.mxu0 %v5814_v9  ;;  %v5884_v28 = vld [vmem:[%s7930_s1 + $0xb24] ss:$8 sps:$4 sm:$0xff]  }
 0x153   : > { %3446 = vmatprep.subr.bf16.mxu1 %v5817_v22  ;;  %v5887_v9 = vld [vmem:[%s7930_s1 + $0xba4] ss:$8 sps:$4 sm:$0xff]   ;;  %v5882_v22 = vld [vmem:[%s7930_s1 + $0xb20] ss:$8 sps:$4 sm:$0xff]  }
 0x155   : > { %3065 = vmatpush2.bf16.msra.mxu0 %v5812_v14  ;;  %v5885_v14 = vld [vmem:[%s7930_s1 + $0xba0] ss:$8 sps:$4 sm:$0xff]  }
 0x156   : > { %3447 = vmatpush1.bf16.msra.mxu1 %v5815_v20  ;;  %3066 = vmatprep.subr.bf16.mxu0 %v5820_v10  ;;  %v5079_v20 = vrot.slane %v7331_v27, 9  ;;  %v3142_v10 = vrot.slane %v7521_v60, 5 }
 0x157   : > { %3448 = vmatprep.subr.bf16.mxu1 %v5823_v55  ;;  %v5890_v55 = vld [vmem:[%s7930_s1 + $0xb14] ss:$8 sps:$4 sm:$0xff]  }
 0x159   : > { %3067 = vmatpush2.bf16.msra.mxu0 %v5818_v6  ;;  %v5893_v6 = vld [vmem:[%s7930_s1 + $0xb94] ss:$8 sps:$4 sm:$0xff]  }
 0x15a   : > { %3449 = vmatpush1.bf16.msra.mxu1 %v5821_v56  ;;  %3068 = vmatprep.subr.bf16.mxu0 %v5826_v59  ;;  %v5888_v56 = vld [vmem:[%s7930_s1 + $0xb10] ss:$8 sps:$4 sm:$0xff]  }
 0x15b   : > { %3450 = vmatprep.subr.bf16.mxu1 %v5829_v29  ;;  %v5891_v59 = vld [vmem:[%s7930_s1 + $0xb90] ss:$8 sps:$4 sm:$0xff]   ;;  %v3143_v29 = vsel %vm6155_vm3, %v5079_v20, %v3142_v10  ;;  %v5949_v20 = vld [vmem:[%s7930_s1 + $0xcc0] ss:$8 sps:$4 sm:$0xff]   ;;  %v5957_v10 = vld [vmem:[%s7930_s1 + $0xcb4] ss:$8 sps:$4 sm:$0xff]  }
 0x15d   : > { %3069 = vmatpush2.bf16.msra.mxu0 %v5824_v12  ;;  %v5896_v12 = vld [vmem:[%s7930_s1 + $0xb04] ss:$8 sps:$4 sm:$0xff]  }
 0x15e   : > { %3451 = vmatpush1.bf16.msra.mxu1 %v5827_v13  ;;  %3070 = vmatprep.subr.bf16.mxu0 %v5832_v15  ;;  %v5899_v13 = vld [vmem:[%s7930_s1 + $0xb84] ss:$8 sps:$4 sm:$0xff]   ;;  %v3144_v15 = vcombine.low %v6905_v7, %v7343_v48  ;;  %v3541_v7 = vcombine.high %v7016_v43, %v7359_v25 }
 0x15f   : > { %3452 = vmatprep.subr.bf16.mxu1 %v5835_v36  ;;  %v3146_v36 = vcombine.low %v6532_v49, %v3143_v29  ;;  %v5924_v49 = vld [vmem:[%s7930_s1 + $0xd74] ss:$8 sps:$4 sm:$0xff]   ;;  %v5967_v29 = vld [vmem:[%s7930_s1 + $0xc90] ss:$8 sps:$4 sm:$0xff]  }
 0x160   : > { %v3150_v48 = vpack.c.bf16 %v3144_v15, %v6406_v35  ;;  %v3547_v35 = vpack.c.bf16 %v3541_v7, %v6574_v58  ;;  %v5936_v58 = vld [vmem:[%s7930_s1 + $0xd54] ss:$8 sps:$4 sm:$0xff]   ;;  %v5970_v15 = vld [vmem:[%s7930_s1 + $0xc80] ss:$8 sps:$4 sm:$0xff]  }
 0x161   : > { %3071 = vmatpush2.bf16.msra.mxu0 %v5830_v39  ;;  %v5897_v39 = vld [vmem:[%s7930_s1 + $0xb80] ss:$8 sps:$4 sm:$0xff]  }
 0x162   : > { %3453 = vmatpush1.bf16.msra.mxu1 %v5833_v1  ;;  %3072 = vmatprep.subr.bf16.mxu0 %v5838_v16  ;;  %v5903_v1 = vld [vmem:[%s7930_s1 + $0xc74] ss:$8 sps:$4 sm:$0xff]   ;;  %v3152_v16 = vpack.c.bf16 %v3146_v36, %v6208_v62  ;;  %v5930_v62 = vld [vmem:[%s7930_s1 + $0xd64] ss:$8 sps:$4 sm:$0xff]  }
 0x163   : > { %3454 = vmatprep.subr.bf16.mxu1 %v5841_v51  ;;  %v5901_v51 = vld [vmem:[%s7930_s1 + $0xc70] ss:$8 sps:$4 sm:$0xff]   ;;  %v3954_v7 = vld [vmem:[%s7933_s4 + $0x48] sm:$0xff] }
 0x165   : > { %3073 = vmatpush2.bf16.msra.mxu0 %v5836_v17  ;;  %v5922_v17 = vld [vmem:[%s7930_s1 + $0xd70] ss:$8 sps:$4 sm:$0xff]  }
 0x166   : > { %3455 = vmatpush1.bf16.msra.mxu1 %v5839_v21  ;;  %3074 = vmatprep.subr.bf16.mxu0 %v5844_v44  ;;  %v5906_v21 = vld [vmem:[%s7930_s1 + $0xc64] ss:$8 sps:$4 sm:$0xff]   ;;  %v5904_v44 = vld [vmem:[%s7930_s1 + $0xc60] ss:$8 sps:$4 sm:$0xff]  }
 0x167   : > { %3456 = vmatprep.subr.bf16.mxu1 %v5847_v23  ;;  %v5928_v23 = vld [vmem:[%s7930_s1 + $0xd60] ss:$8 sps:$4 sm:$0xff]  }
 0x169   : > { %3075 = vmatpush2.bf16.msra.mxu0 %v5842_v61  ;;  %v5934_v61 = vld [vmem:[%s7930_s1 + $0xd50] ss:$8 sps:$4 sm:$0xff]  }
 0x16a   : > { %3457 = vmatpush1.bf16.msra.mxu1 %v5845_v41  ;;  %3485 = vmatprep.subr.bf16.mxu0 %v5857_v34  ;;  %v5912_v41 = vld [vmem:[%s7930_s1 + $0xc44] ss:$8 sps:$4 sm:$0xff]   ;;  %v5940_v34 = vld [vmem:[%s7930_s1 + $0xd40] ss:$8 sps:$4 sm:$0xff]  }
 0x16b   : > { %3458 = vmatprep.subr.bf16.mxu1 %v5854_v45  ;;  %v5910_v45 = vld [vmem:[%s7930_s1 + $0xc40] ss:$8 sps:$4 sm:$0xff]  }
 0x16c   : > { %3077 = vmatmul.mubr.bf16.vlgmr.msra.gmra.mxu0 %v2752_v46  ;;  %v5915_v46 = vld [vmem:[%s7930_s1 + $0xc34] ss:$8 sps:$4 sm:$0xff]  }
 0x16d   : > { %3486 = vmatpush1.bf16.msra.mxu0 %v5855_v33  ;;  %3517 = vmatprep.mubr.bf16.mxu0 %v5987_v2  ;;  %v5913_v33 = vld [vmem:[%s7930_s1 + $0xc30] ss:$8 sps:$4 sm:$0xff]  }
 0x16e   : > { %3459 = vmatpush2.bf16.msra.mxu1 %v5852_v50  ;;  %3487 = vmatprep.subr.bf16.mxu0 %v5863_v53  ;;  %v5948_v50 = vld [vmem:[%s7930_s1 + $0xd34] ss:$8 sps:$4 sm:$0xff]   ;;  %v5918_v53 = vld [vmem:[%s7930_s1 + $0xc24] ss:$8 sps:$4 sm:$0xff]  }
 0x16f   : > { %3460 = vmatprep.subr.bf16.mxu1 %v5860_v54  ;;  %v5946_v54 = vld [vmem:[%s7930_s1 + $0xd30] ss:$8 sps:$4 sm:$0xff]  }
 0x171   : > { %3488 = vmatpush1.bf16.msra.mxu0 %v5861_v3  ;;  %v5916_v3 = vld [vmem:[%s7930_s1 + $0xc20] ss:$8 sps:$4 sm:$0xff]  }
 0x172   : > { %3461 = vmatpush2.bf16.msra.mxu1 %v5858_v32  ;;  %3489 = vmatprep.subr.bf16.mxu0 %v5869_v8  ;;  %v5954_v32 = vld [vmem:[%s7930_s1 + $0xd24] ss:$8 sps:$4 sm:$0xff]   ;;  %v5177_v8 = vrot.slane %v7331_v27, 10  ;;  %v5958_v27 = vld [vmem:[%s7930_s1 + $0xd10] ss:$8 sps:$4 sm:$0xff]  }
 0x173   : > { %3462 = vmatprep.subr.bf16.mxu1 %v5866_v57  ;;  %v5952_v57 = vld [vmem:[%s7930_s1 + $0xd20] ss:$8 sps:$4 sm:$0xff]  }
 0x175   : > { %3490 = vmatpush1.bf16.msra.mxu0 %v5867_v42  ;;  %v5921_v42 = vld [vmem:[%s7930_s1 + $0xc14] ss:$8 sps:$4 sm:$0xff]  }
 0x176   : > { %3463 = vmatpush2.bf16.msra.mxu1 %v5864_v5  ;;  %3491 = vmatprep.subr.bf16.mxu0 %v5875_v11  ;;  %v3538_v5 = vrot.slane %v7521_v60, 6  ;;  %v5919_v11 = vld [vmem:[%s7930_s1 + $0xc10] ss:$8 sps:$4 sm:$0xff]  }
 0x177   : > { %3464 = vmatprep.subr.bf16.mxu1 %v5872_v24  ;;  %v5960_v24 = vld [vmem:[%s7930_s1 + $0xd14] ss:$8 sps:$4 sm:$0xff]  }
 0x179   : > { %3492 = vmatpush1.bf16.msra.mxu0 %v5873_v19  ;;  %v5927_v19 = vld [vmem:[%s7930_s1 + $0xc04] ss:$8 sps:$4 sm:$0xff]  }
 0x17a   : > { %3465 = vmatpush2.bf16.msra.mxu1 %v5870_v18  ;;  %3493 = vmatprep.subr.bf16.mxu0 %v5881_v30  ;;  %v3539_v18 = vsel %vm6211_vm5, %v5177_v8, %v3538_v5  ;;  %v7862_v8 = vld [vmem:[%s7934_s5 + $0x38] sm:$0xff] }
 0x17b   : > { %3466 = vmatprep.subr.bf16.mxu1 %v5878_v26  ;;  %v5966_v26 = vld [vmem:[%s7930_s1 + $0xd04] ss:$8 sps:$4 sm:$0xff]   ;;  %v3542_v30 = vcombine.low %v7221_v47, %v3539_v18  ;;  %v5931_v47 = vld [vmem:[%s7930_s1 + $0xcf0] ss:$8 sps:$4 sm:$0xff]   ;;  %7943 = vst [vmem:[#allocation2_spill] sm:$0xff] %v7862_v8 }
 0x17d   : > { %3494 = vmatpush1.bf16.msra.mxu0 %v5879_v31  ;;  %v5933_v31 = vld [vmem:[%s7930_s1 + $0xcf4] ss:$8 sps:$4 sm:$0xff]   ;;  %v3548_v60 = vpack.c.bf16 %v3542_v30, %v6676_v0 }
 0x17e   : > { %3467 = vmatpush2.bf16.msra.mxu1 %v5876_v52  ;;  %3495 = vmatprep.subr.bf16.mxu0 %v5887_v9  ;;  %v5925_v52 = vld [vmem:[%s7930_s1 + $0xc00] ss:$8 sps:$4 sm:$0xff]   ;;  %v5945_v0 = vld [vmem:[%s7930_s1 + $0xcd4] ss:$8 sps:$4 sm:$0xff]  }
 0x17f   : > { %3468 = vmatprep.subr.bf16.mxu1 %v5884_v28  ;;  %v5939_v28 = vld [vmem:[%s7930_s1 + $0xce4] ss:$8 sps:$4 sm:$0xff]   ;;  %v5937_v9 = vld [vmem:[%s7930_s1 + $0xce0] ss:$8 sps:$4 sm:$0xff]  }
 0x181   : > { %3496 = vmatpush1.bf16.msra.mxu0 %v5885_v14  ;;  %v5951_v14 = vld [vmem:[%s7930_s1 + $0xcc4] ss:$8 sps:$4 sm:$0xff]  }
 0x182   : > { %3469 = vmatpush2.bf16.msra.mxu1 %v5882_v22  ;;  %3497 = vmatprep.subr.bf16.mxu0 %v5893_v6  ;;  %v5943_v22 = vld [vmem:[%s7930_s1 + $0xcd0] ss:$8 sps:$4 sm:$0xff]   ;;  %v5963_v6 = vld [vmem:[%s7930_s1 + $0xca4] ss:$8 sps:$4 sm:$0xff]  }
 0x183   : > { %3470 = vmatprep.subr.bf16.mxu1 %v5890_v55  ;;  %v5955_v55 = vld [vmem:[%s7930_s1 + $0xcb0] ss:$8 sps:$4 sm:$0xff]  }
 0x185   : > { %3498 = vmatpush1.bf16.msra.mxu0 %v5891_v59  ;;  %v5969_v59 = vld [vmem:[%s7930_s1 + $0xc94] ss:$8 sps:$4 sm:$0xff]  }
 0x186   : > { %3471 = vmatpush2.bf16.msra.mxu1 %v5888_v56  ;;  %3499 = vmatprep.subr.bf16.mxu0 %v5899_v13  ;;  %v5961_v56 = vld [vmem:[%s7930_s1 + $0xca0] ss:$8 sps:$4 sm:$0xff]   ;;  %v3540_v13 = vcombine.low %v7016_v43, %v7359_v25  ;;  %v3959_v43 = vld [vmem:[%s7933_s4 + $0x70] sm:$0xff] }
 0x187   : > { %3472 = vmatprep.subr.bf16.mxu1 %v5896_v12  ;;  %v5972_v12 = vld [vmem:[%s7930_s1 + $0xc84] ss:$8 sps:$4 sm:$0xff]  }
 0x188   : > { %v3546_v36 = vpack.c.bf16 %v3540_v13, %v6793_v4  ;;  %v3958_v4 = vld [vmem:[%s7933_s4 + $0x68] sm:$0xff]  ;;  %v3957_v25 = vld [vmem:[%s7933_s4 + $0x60] sm:$0xff] }
 0x189   : > { %3500 = vmatpush1.bf16.msra.mxu0 %v5897_v39  ;;  %v7936_v39 = vmov 0.0  }
 0x18a   : > { %3473 = vmatpush2.bf16.msra.mxu1 %v5894_v38  ;;  %3838 = vmatprep.subr.bf16.mxu0 %v5903_v1  ;;  %v3960_v38 = vld [vmem:[%s7933_s4 + $0x78] sm:$0xff] }
 0x18b   : > { %3881 = vmatprep.subr.bf16.mxu1 %v5924_v49  ;;  %v3956_v1 = vld [vmem:[%s7933_s4 + $0x58] sm:$0xff]  ;;  %v3955_v49 = vld [vmem:[%s7933_s4 + $0x50] sm:$0xff] }
 0x18c   : > { %3518 = vmatmul.mubr.bf16.vlgmr.msra.gmra.mxu0 %v3152_v16  ;;  %v3952_v16 = vld [vmem:[%s7933_s4 + $0x38] sm:$0xff] }
 0x18d   : > { %3475 = vmatmul.mubr.bf16.vlgmr.msra.gmra.mxu1 %v3150_v48  ;;  %3839 = vmatpush1.bf16.msra.mxu0 %v5901_v51  ;;  %v3953_v48 = vld [vmem:[%s7933_s4 + $0x40] sm:$0xff]  ;;  %v3951_v51 = vld [vmem:[%s7933_s4 + $0x30] sm:$0xff] }
 0x18e   : > { %3882 = vmatpush1.bf16.msra.mxu1 %v5922_v17  ;;  %3840 = vmatprep.subr.bf16.mxu0 %v5906_v21  ;;  %v3950_v17 = vld [vmem:[%s7933_s4 + $0x28] sm:$0xff]  ;;  %v3949_v21 = vld [vmem:[%s7933_s4 + $0x20] sm:$0xff] }
 0x18f   : > { %3883 = vmatprep.subr.bf16.mxu1 %v5930_v62  ;;  %3913 = vmatprep.mubr.bf16.mxu1 %v5987_v2  ;;  %v5942_v2 = vld [vmem:[%s7930_s1 + $0xd44] ss:$8 sps:$4 sm:$0xff]   ;;  %v3948_v62 = vld [vmem:[%s7933_s4 + $0x18] sm:$0xff] }
 0x190   : > { %3870 = vmatprep.mubr.bf16.mxu0 %v3547_v35  ;;  %v3947_v35 = vld [vmem:[%s7933_s4 + $0x10] sm:$0xff] }
 0x191   : > { %3841 = vmatpush1.bf16.msra.mxu0 %v5904_v44  ;;  %v3946_v44 = vld [vmem:[%s7933_s4 + $0x8] sm:$0xff] }
 0x192   : > { %3884 = vmatpush1.bf16.msra.mxu1 %v5928_v23  ;;  %3842 = vmatprep.subr.bf16.mxu0 %v5909_v40  ;;  %v3945_v23 = vld [vmem:[%s7933_s4] sm:$0xff]  ;;  %v7805_v40 = vpop.f32.mrf.mxu1 }
 0x193   : > { %3885 = vmatprep.subr.bf16.mxu1 %v5936_v58  ;;  %v3968_v58 = vld [vmem:[%s7933_s4 + $0xb8] sm:$0xff] }
 0x195   : > { %3843 = vmatpush1.bf16.msra.mxu0 %v5907_v37  ;;  %v3967_v37 = vld [vmem:[%s7933_s4 + $0xb0] sm:$0xff] }
 0x196   : > { %3886 = vmatpush1.bf16.msra.mxu1 %v5934_v61  ;;  %3844 = vmatprep.subr.bf16.mxu0 %v5912_v41  ;;  %v7817_v61 = vpop.f32.mrf.mxu1  ;;  %v3966_v41 = vld [vmem:[%s7933_s4 + $0xa8] sm:$0xff] }
 0x197   : > { %3887 = vmatprep.subr.bf16.mxu1 %v5942_v2  ;;  %v7824_v2 = vpop.f32.mrf.mxu0 }
 0x199   : > { %3845 = vmatpush1.bf16.msra.mxu0 %v5910_v45  ;;  %v3965_v45 = vld [vmem:[%s7933_s4 + $0xa0] sm:$0xff] }
 0x19a   : > { %3888 = vmatpush1.bf16.msra.mxu1 %v5940_v34  ;;  %3846 = vmatprep.subr.bf16.mxu0 %v5915_v46  ;;  %v7831_v34 = vpop.f32.mrf.mxu1  ;;  %v3964_v46 = vld [vmem:[%s7933_s4 + $0x98] sm:$0xff] }
 0x19b   : > { %3889 = vmatprep.subr.bf16.mxu1 %v5948_v50  ;;  %v3963_v50 = vld [vmem:[%s7933_s4 + $0x90] sm:$0xff] }
 0x19d   : > { %3847 = vmatpush1.bf16.msra.mxu0 %v5913_v33  ;;  %v7841_v33 = vpop.f32.mrf.mxu0 }
 0x19e   : > { %3890 = vmatpush1.bf16.msra.mxu1 %v5946_v54  ;;  %3848 = vmatprep.subr.bf16.mxu0 %v5918_v53  ;;  %v3962_v54 = vld [vmem:[%s7933_s4 + $0x88] sm:$0xff]  ;;  %v7848_v53 = vpop.f32.mrf.mxu1 }
 0x19f   : > { %3891 = vmatprep.subr.bf16.mxu1 %v5954_v32  ;;  %v3961_v32 = vld [vmem:[%s7933_s4 + $0x80] sm:$0xff] }
 0x1a1   : > { %3849 = vmatpush1.bf16.msra.mxu0 %v5916_v3  ;;  %v735_v3 = vpop.f32.mrf.mxu0 }
 0x1a2   : > { %3892 = vmatpush1.bf16.msra.mxu1 %v5952_v57  ;;  %3850 = vmatprep.subr.bf16.mxu0 %v5921_v42  ;;  %v7855_v57 = vpop.f32.mrf.mxu1 }
 0x1a3   : > { %3893 = vmatprep.subr.bf16.mxu1 %v5960_v24  ;;  %v737_v5 = vpop.f32.mrf.mxu0 }
 0x1a4   : > { %v1059_v42 = vpop.f32.mrf.mxu1 }
 0x1a5   : > { %3851 = vmatpush1.bf16.msra.mxu0 %v5919_v11  ;;  %v1100_v24 = vpop.f32.mrf.mxu0 }
 0x1a6   : > { %3894 = vmatpush1.bf16.msra.mxu1 %v5958_v27  ;;  %3852 = vmatprep.subr.bf16.mxu0 %v5927_v19  ;;  %v1061_v11 = vpop.f32.mrf.mxu1 }
 0x1a7   : > { %3895 = vmatprep.subr.bf16.mxu1 %v5966_v26  ;;  %v7865_v27 = vpop.f32.mrf.mxu0 }
 0x1a8   : > { %7944 = vst [vmem:[#allocation3_spill] sm:$0xff] %v7865_v27  ;;  %v1063_v18 = vpop.f32.mrf.mxu1 }
 0x1a9   : > { %3853 = vmatpush1.bf16.msra.mxu0 %v5925_v52  ;;  %v1104_v19 = vpop.f32.mrf.mxu0 }
 0x1aa   : > { %3896 = vmatpush1.bf16.msra.mxu1 %v5964_v63  ;;  %3854 = vmatprep.subr.bf16.mxu0 %v5933_v31  ;;  %v1525_v26 = vpop.f32.mrf.mxu1 }
 0x1ab   : > { %3972 = vmatprep.subr.mxu1 %v7936_v39  ;;  %v7867_v30 = vpop.f32.mrf.mxu0 }
 0x1ac   : > { %7945 = vst [vmem:[#allocation4_spill] sm:$0xff] %v7867_v30  ;;  %v1527_v52 = vpop.f32.mrf.mxu1 }
 0x1ad   : > { %3914 = vmatmul.mubr.bf16.vlgmr.msra.gmra.mxu1 %v3548_v60  ;;  %3855 = vmatpush2.bf16.msra.mxu0 %v5931_v47  ;;  %v1482_v63 = vpop.f32.mrf.mxu0 }
 0x1ae   : > { %3856 = vmatprep.subr.bf16.mxu0 %v5939_v28  ;;  %3973 = vmatpush1.msra.mxu1 %v3960_v38  ;;  %v1529_v31 = vpop.f32.mrf.mxu1 }
 0x1af   : > { %3974 = vmatprep.subr.mxu1 %v7936_v39  ;;  %v1484_v60 = vpop.f32.mrf.mxu0 }
 0x1b0   : > { %3975 = vmatpush1.msra.mxu1 %v3959_v43  ;;  %v1531_v47 = vpop.f32.mrf.mxu1 }
 0x1b1   : > { %3857 = vmatpush2.bf16.msra.mxu0 %v5937_v9  ;;  %3976 = vmatprep.subr.mxu1 %v7936_v39  ;;  %v1486_v28 = vpop.f32.mrf.mxu0 }
 0x1b2   : > { %3858 = vmatprep.subr.bf16.mxu0 %v5945_v0  ;;  %3977 = vmatpush1.msra.mxu1 %v3958_v4  ;;  %v1880_v9 = vpop.f32.mrf.mxu1 }
 0x1b3   : > { %3978 = vmatprep.subr.mxu1 %v7936_v39  ;;  %v1488_v0 = vpop.f32.mrf.mxu0 }
 0x1b4   : > { %3979 = vmatpush1.msra.mxu1 %v3957_v25 }
 0x1b5   : > { %3859 = vmatpush2.bf16.msra.mxu0 %v5943_v22  ;;  %3980 = vmatprep.subr.mxu1 %v7936_v39  ;;  %v1882_v22 = vpop.f32.mrf.mxu1 }
 0x1b6   : > { %3860 = vmatprep.subr.bf16.mxu0 %v5951_v14  ;;  %3981 = vmatpush1.msra.mxu1 %v3956_v1  ;;  %v1923_v14 = vpop.f32.mrf.mxu0 }
 0x1b7   : > { %3982 = vmatprep.subr.mxu1 %v7936_v39 }
 0x1b8   : > { %3983 = vmatpush1.msra.mxu1 %v3955_v49 }
 0x1b9   : > { %3861 = vmatpush2.bf16.msra.mxu0 %v5949_v20  ;;  %3984 = vmatprep.subr.mxu1 %v7936_v39  ;;  %v1884_v20 = vpop.f32.mrf.mxu1 }
 0x1ba   : > { %3862 = vmatprep.subr.bf16.mxu0 %v5957_v10  ;;  %3985 = vmatpush1.msra.mxu1 %v3954_v7  ;;  %v1925_v10 = vpop.f32.mrf.mxu0 }
 0x1bb   : > { %3986 = vmatprep.subr.mxu1 %v7936_v39 }
 0x1bc   : > { %3987 = vmatpush1.msra.mxu1 %v3953_v48 }
 0x1bd   : > { %3863 = vmatpush2.bf16.msra.mxu0 %v5955_v55  ;;  %3988 = vmatprep.subr.mxu1 %v7936_v39  ;;  %v1886_v55 = vpop.f32.mrf.mxu1 }
 0x1be   : > { %3864 = vmatprep.subr.bf16.mxu0 %v5963_v6  ;;  %3989 = vmatpush1.msra.mxu1 %v3952_v16  ;;  %v1927_v6 = vpop.f32.mrf.mxu0 }
 0x1bf   : > { %3990 = vmatprep.subr.mxu1 %v7936_v39 }
 0x1c0   : > { %3991 = vmatpush1.msra.mxu1 %v3951_v51 }
 0x1c1   : > { %3865 = vmatpush2.bf16.msra.mxu0 %v5961_v56  ;;  %3992 = vmatprep.subr.mxu1 %v7936_v39  ;;  %v2327_v56 = vpop.f32.mrf.mxu1 }
 0x1c2   : > { %3866 = vmatprep.subr.bf16.mxu0 %v5969_v59  ;;  %3993 = vmatpush1.msra.mxu1 %v3950_v17  ;;  %v1929_v59 = vpop.f32.mrf.mxu0 }
 0x1c3   : > { %3994 = vmatprep.subr.mxu1 %v7936_v39 }
 0x1c4   : > { %3995 = vmatpush1.msra.mxu1 %v3949_v21 }
 0x1c5   : > { %3867 = vmatpush2.bf16.msra.mxu0 %v5967_v29  ;;  %3996 = vmatprep.subr.mxu1 %v7936_v39  ;;  %v2329_v29 = vpop.f32.mrf.mxu1 }
 0x1c6   : > { %3868 = vmatprep.subr.bf16.mxu0 %v5972_v12  ;;  %3997 = vmatpush1.msra.mxu1 %v3948_v62 }
 0x1c7   : > { %3998 = vmatprep.subr.mxu1 %v7936_v39  ;;  %v2331_v13 = vpop.f32.mrf.mxu1 }
 0x1c8   : > { %3999 = vmatpush1.msra.mxu1 %v3947_v35 }
 0x1c9   : > { %3869 = vmatpush2.bf16.msra.mxu0 %v5970_v15  ;;  %4000 = vmatprep.subr.mxu1 %v7936_v39 }
 0x1ca   : > { %4162 = vmatprep.subr.mxu0 %v7936_v39  ;;  %4001 = vmatpush1.msra.mxu1 %v3946_v44 }
 0x1cb   : > { %4002 = vmatprep.subr.mxu1 %v7936_v39 }
 0x1cc   : > { %3871 = vmatmul.mubr.bf16.vlgmr.msra.gmra.mxu0 %v3546_v36  ;;  %4003 = vmatpush1.msra.mxu1 %v3945_v23  ;;  %v2284_v12 = vpop.f32.mrf.mxu0  ;;  %v2333_v36 = vpop.f32.mrf.mxu1 }
 0x1cd   : > { %4163 = vmatpush1.msra.mxu0 %v3960_v38  ;;  %4020 = vmatprep.subr.mxu1 %v7936_v39 }
 0x1ce   : > { %4164 = vmatprep.subr.mxu0 %v7936_v39  ;;  %4021 = vmatpush2.msra.mxu1 %v3968_v58  ;;  %v2286_v15 = vpop.f32.mrf.mxu0 }
 0x1cf   : > { %4165 = vmatpush1.msra.mxu0 %v3959_v43  ;;  %4022 = vmatprep.subr.mxu1 %v7936_v39 }
 0x1d0   : > { %4166 = vmatprep.subr.mxu0 %v7936_v39  ;;  %4023 = vmatpush2.msra.mxu1 %v3967_v37  ;;  %v2288_v38 = vpop.f32.mrf.mxu0 }
 0x1d1   : > { %4167 = vmatpush1.msra.mxu0 %v3958_v4  ;;  %4024 = vmatprep.subr.mxu1 %v7936_v39 }
 0x1d2   : > { %4168 = vmatprep.subr.mxu0 %v7936_v39  ;;  %4025 = vmatpush2.msra.mxu1 %v3966_v41  ;;  %v2290_v4 = vpop.f32.mrf.mxu0 }
 0x1d3   : > { %4169 = vmatpush1.msra.mxu0 %v3957_v25  ;;  %4026 = vmatprep.subr.mxu1 %v7936_v39 }
 0x1d4   : > { %4170 = vmatprep.subr.mxu0 %v7936_v39  ;;  %4027 = vmatpush2.msra.mxu1 %v3965_v45 }
 0x1d5   : > { %4171 = vmatpush1.msra.mxu0 %v3956_v1  ;;  %4028 = vmatprep.subr.mxu1 %v7936_v39 }
 0x1d6   : > { %4172 = vmatprep.subr.mxu0 %v7936_v39  ;;  %4029 = vmatpush2.msra.mxu1 %v3964_v46 }
 0x1d7   : > { %4173 = vmatpush1.msra.mxu0 %v3955_v49  ;;  %4030 = vmatprep.subr.mxu1 %v7936_v39 }
 0x1d8   : > { %4174 = vmatprep.subr.mxu0 %v7936_v39  ;;  %4031 = vmatpush2.msra.mxu1 %v3963_v50 }
 0x1d9   : > { %4175 = vmatpush1.msra.mxu0 %v3954_v7  ;;  %4032 = vmatprep.subr.mxu1 %v7936_v39 }
 0x1da   : > { %4176 = vmatprep.subr.mxu0 %v7936_v39  ;;  %4033 = vmatpush2.msra.mxu1 %v3962_v54 }
 0x1db   : > { %4177 = vmatpush1.msra.mxu0 %v3953_v48  ;;  %4034 = vmatprep.subr.mxu1 %v7936_v39 }
 0x1dc   : > { %4178 = vmatprep.subr.mxu0 %v7936_v39  ;;  %4035 = vmatpush2.msra.mxu1 %v3961_v32 }
 0x1dd   : > { %4179 = vmatpush1.msra.mxu0 %v3952_v16  ;;  %4080 = vmatprep.subr.mxu1 %v7862_v8 }
 0x1de   : > { %4180 = vmatprep.subr.mxu0 %v7936_v39 }
 0x1df   : > { %4181 = vmatpush1.msra.mxu0 %v3951_v51 }
 0x1e0   : > { %4182 = vmatprep.subr.mxu0 %v7936_v39 }
 0x1e1   : > { %4183 = vmatpush1.msra.mxu0 %v3950_v17 }
 0x1e2   : > { %4184 = vmatprep.subr.mxu0 %v7936_v39 }
 0x1e3   : > { %4185 = vmatpush1.msra.mxu0 %v3949_v21 }
 0x1e4   : > { %4186 = vmatprep.subr.mxu0 %v7936_v39 }
 0x1e5   : > { %4187 = vmatpush1.msra.mxu0 %v3948_v62 }
 0x1e6   : > { %4188 = vmatprep.subr.mxu0 %v7936_v39 }
 0x1e7   : > { %4189 = vmatpush1.msra.mxu0 %v3947_v35 }
 0x1e8   : > { %4190 = vmatprep.subr.mxu0 %v7936_v39 }
 0x1e9   : > { %4191 = vmatpush1.msra.mxu0 %v3946_v44 }
 0x1ea   : > { %4192 = vmatprep.subr.mxu0 %v7936_v39 }
 0x1eb   : > { %4193 = vmatpush1.msra.mxu0 %v3945_v23 }
 0x1ec   : > { %4210 = vmatprep.subr.mxu0 %v7936_v39  ;;  %v2729_v1 = vpop.f32.mrf.mxu0 }
 0x1ed   : > { %4211 = vmatpush2.msra.mxu0 %v3968_v58  ;;  %v2686_v43 = vpop.f32.mrf.mxu1 }
 0x1ee   : > { %4212 = vmatprep.subr.mxu0 %v7936_v39  ;;  %v2731_v7 = vpop.f32.mrf.mxu0 }
 0x1ef   : > { %4213 = vmatpush2.msra.mxu0 %v3967_v37  ;;  %v2688_v25 = vpop.f32.mrf.mxu1 }
 0x1f0   : > { %4214 = vmatprep.subr.mxu0 %v7936_v39  ;;  %v2733_v16 = vpop.f32.mrf.mxu0 }
 0x1f1   : > { %4215 = vmatpush2.msra.mxu0 %v3966_v41  ;;  %v2690_v49 = vpop.f32.mrf.mxu1 }
 0x1f2   : > { %4216 = vmatprep.subr.mxu0 %v7936_v39  ;;  %v2735_v17 = vpop.f32.mrf.mxu0 }
 0x1f3   : > { %4217 = vmatpush2.msra.mxu0 %v3965_v45  ;;  %v2692_v48 = vpop.f32.mrf.mxu1 }
 0x1f4   : > { %4218 = vmatprep.subr.mxu0 %v7936_v39 }
 0x1f5   : > { %4219 = vmatpush2.msra.mxu0 %v3964_v46  ;;  %v775_v46 = vadd.f32 %v7805_v40, %v7824_v2 }
 0x1f6   : > { %4220 = vmatprep.subr.mxu0 %v7936_v39 }
 0x1f7   : > { %4221 = vmatpush2.msra.mxu0 %v3963_v50  ;;  %v777_v50 = vadd.f32 %v7817_v61, %v7841_v33  ;;  %v1058_v8 = vadd.f32 %v7855_v57, %v775_v46  ;;  %v1526_v33 = vadd.f32 %v1525_v26, %v1482_v63  ;;  %v1528_v61 = vadd.f32 %v1527_v52, %v1484_v60  ;;  %v7946_v57 = vld [vmem:[#allocation3_spill] sm:$0xff] }
 0x1f8   : > { %4222 = vmatprep.subr.mxu0 %v7936_v39  ;;  %v1924_v46 = vadd.f32 %v1923_v14, %v1880_v9  ;;  %v1928_v63 = vadd.f32 %v1927_v6, %v1884_v20  ;;  %v1930_v52 = vadd.f32 %v1929_v59, %v1886_v55  ;;  %v2332_v14 = vadd.f32 %v2331_v13, %v2288_v38 }
 0x1f9   : > { %4223 = vmatpush2.msra.mxu0 %v3962_v54  ;;  %v779_v54 = vadd.f32 %v7831_v34, %v735_v3  ;;  %v1060_v30 = vadd.f32 %v1059_v42, %v777_v50  ;;  %v1101_v34 = vadd.f32 %v1100_v24, %v1058_v8  ;;  %v2328_v8 = vadd.f32 %v2327_v56, %v2284_v12 }
 0x1fa   : > { %4224 = vmatprep.subr.mxu0 %v7936_v39  ;;  %v781_v39 = vadd.f32 %v7848_v53, %v737_v5  ;;  %v1530_v5 = vadd.f32 %v1529_v31, %v1486_v28  ;;  %v1532_v53 = vadd.f32 %v1531_v47, %v1488_v0  ;;  %v2330_v24 = vadd.f32 %v2329_v29, %v2286_v15 }
 0x1fb   : > { %4225 = vmatpush2.msra.mxu0 %v3961_v32  ;;  %v1062_v27 = vadd.f32 %v1061_v11, %v779_v54  ;;  %v1103_v42 = vadd.f32 %v7946_v57, %v1060_v30  ;;  %v1926_v11 = vadd.f32 %v1925_v10, %v1882_v22  ;;  %v1534_v26 = vadd.f32 %v1526_v33, %v1101_v34 }
 0x1fc   : > { %v1064_v40 = vadd.f32 %v1063_v18, %v781_v39  ;;  %v7947_v18 = vld [vmem:[#allocation4_spill] sm:$0xff]  ;;  %v2334_v57 = vadd.f32 %v2333_v36, %v2290_v4  ;;  %v2736_v20 = vadd.f32 %v2735_v17, %v2692_v48 }
 0x1fd   : > { %v1105_v50 = vadd.f32 %v1104_v19, %v1062_v27  ;;  %v1535_v60 = vadd.f32 %v1528_v61, %v1103_v42  ;;  %v1932_v9 = vadd.f32 %v1924_v46, %v1534_v26  ;;  %v2730_v19 = vadd.f32 %v2729_v1, %v2686_v43 }
 0x1fe   : > { %v1107_v39 = vadd.f32 %v7947_v18, %v1064_v40  ;;  %v2732_v27 = vadd.f32 %v2731_v7, %v2688_v25  ;;  %v2734_v18 = vadd.f32 %v2733_v16, %v2690_v49 }
 0x1ff   : > { %v1536_v0 = vadd.f32 %v1530_v5, %v1105_v50  ;;  %v1933_v30 = vadd.f32 %v1926_v11, %v1535_v60  ;;  %v2336_v40 = vadd.f32 %v2328_v8, %v1932_v9 }
 0x200   : > { %v1537_v47 = vadd.f32 %v1532_v53, %v1107_v39 }
 0x201   : > { %v1934_v22 = vadd.f32 %v1928_v63, %v1536_v0  ;;  %v2337_v33 = vadd.f32 %v2330_v24, %v1933_v30  ;;  %v2738_v61 = vadd.f32 %v2730_v19, %v2336_v40  ;;  %v4050_v30 = vld [vmem:[%s7934_s5 + $0x30] sm:$0xff]  ;;  %v4048_v19 = vld [vmem:[%s7934_s5 + $0x20] sm:$0xff] }
 0x202   : > { %v1935_v10 = vadd.f32 %v1930_v52, %v1537_v47  ;;  %v4044_v40 = vld [vmem:[%s7934_s5] sm:$0xff] }
 0x203   : > { %v2338_v59 = vadd.f32 %v2332_v14, %v1934_v22  ;;  %v2739_v34 = vadd.f32 %v2732_v27, %v2337_v33  ;;  %v4047_v27 = vld [vmem:[%s7934_s5 + $0x18] sm:$0xff]  ;;  %v7948_v22 = vmov 0.0   ;;  %v7949_v33 = vld [vmem:[#allocation2_spill] sm:$0xff] }
 0x204   : > { %v2339_v15 = vadd.f32 %v2334_v57, %v1935_v10  ;;  %v4049_v57 = vld [vmem:[%s7934_s5 + $0x28] sm:$0xff]  ;;  %v4046_v10 = vld [vmem:[%s7934_s5 + $0x10] sm:$0xff] }
 0x205   : > { %v2740_v36 = vadd.f32 %v2734_v18, %v2338_v59  ;;  %v4045_v18 = vld [vmem:[%s7934_s5 + $0x8] sm:$0xff] }
 0x206   : > { %v2741_v1 = vadd.f32 %v2736_v20, %v2339_v15 }
 0x20d   : > { %v3121_v51 = vpop.f32.mrf.mxu1 }
 0x20f   : > { %v3123_v21 = vpop.f32.mrf.mxu1 }
 0x211   : > { %v3125_v35 = vpop.f32.mrf.mxu1 }
 0x213   : > { %v3127_v23 = vpop.f32.mrf.mxu1 }
 0x22c   : > { %v3078_v62 = vpop.f32.mrf.mxu0 }
 0x22d   : > { %v3122_v55 = vadd.f32 %v3121_v51, %v3078_v62 }
 0x22e   : > { %v3080_v44 = vpop.f32.mrf.mxu0 }
 0x22f   : > { %v3124_v29 = vadd.f32 %v3123_v21, %v3080_v44  ;;  %v3130_v49 = vadd.f32 %v3122_v55, %v2738_v61 }
 0x230   : > { %v3082_v58 = vpop.f32.mrf.mxu0 }
 0x231   : > { %v3126_v12 = vadd.f32 %v3125_v35, %v3082_v58  ;;  %v3131_v51 = vadd.f32 %v3124_v29, %v2739_v34 }
 0x232   : > { %v3084_v41 = vpop.f32.mrf.mxu0 }
 0x233   : > { %v3128_v13 = vadd.f32 %v3127_v23, %v3084_v41  ;;  %v3132_v17 = vadd.f32 %v3126_v12, %v2740_v36 }
 0x235   : > { %v3133_v21 = vadd.f32 %v3128_v13, %v2741_v1 }
 0x24c   : > { %v3519_v32 = vpop.f32.mrf.mxu0 }
 0x24d   : > { %v3476_v37 = vpop.f32.mrf.mxu1 }
 0x24e   : > { %v3521_v3 = vpop.f32.mrf.mxu0  ;;  %v3520_v43 = vadd.f32 %v3519_v32, %v3476_v37 }
 0x24f   : > { %v3478_v45 = vpop.f32.mrf.mxu1 }
 0x250   : > { %v3523_v28 = vpop.f32.mrf.mxu0  ;;  %v3522_v4 = vadd.f32 %v3521_v3, %v3478_v45  ;;  %v3528_v44 = vadd.f32 %v3520_v43, %v3130_v49 }
 0x251   : > { %v3480_v2 = vpop.f32.mrf.mxu1 }
 0x252   : > { %v3525_v6 = vpop.f32.mrf.mxu0  ;;  %v3524_v25 = vadd.f32 %v3523_v28, %v3480_v2  ;;  %v3529_v58 = vadd.f32 %v3522_v4, %v3131_v51 }
 0x253   : > { %v3482_v54 = vpop.f32.mrf.mxu1 }
 0x254   : > { %v3526_v7 = vadd.f32 %v3525_v6, %v3482_v54  ;;  %v3530_v53 = vadd.f32 %v3524_v25, %v3132_v17 }
 0x256   : > { %v3531_v41 = vadd.f32 %v3526_v7, %v3133_v21 }
 0x26d   : > { %v3915_v31 = vpop.f32.mrf.mxu1 }
 0x26f   : > { %v3917_v56 = vpop.f32.mrf.mxu1 }
 0x271   : > { %v3919_v16 = vpop.f32.mrf.mxu1 }
 0x273   : > { %v3921_v46 = vpop.f32.mrf.mxu1 }
 0x28c   : > { %v3872_v38 = vpop.f32.mrf.mxu0 }
 0x28d   : > { %v3916_v62 = vadd.f32 %v3915_v31, %v3872_v38 }
 0x28e   : > { %v3874_v48 = vpop.f32.mrf.mxu0 }
 0x28f   : > { %v3918_v5 = vadd.f32 %v3917_v56, %v3874_v48  ;;  %v3924_v45 = vadd.f32 %v3916_v62, %v3528_v44  ;;  %v4127_v56 = vlaneseq }
 0x290   : > { %v3876_v35 = vpop.f32.mrf.mxu0 }
 0x291   : > { %v3920_v23 = vadd.f32 %v3919_v16, %v3876_v35  ;;  %v7878_v32 = vadd.f32 %v3918_v5, %v3529_v58  ;;  %v4128_v59 = vshrl.u32 %v4127_v56, 7 }
 0x292   : > { %v3878_v37 = vpop.f32.mrf.mxu0 }
 0x293   : > { %v3926_v2 = vadd.f32 %v3920_v23, %v3530_v53  ;;  %v3922_v3 = vadd.f32 %v3921_v46, %v3878_v37  ;;  %v3936_v11 = vsel %vm3935_vm6, %v7878_v32, 0.0  ;;  %v4129_v29 = vsub.s32 0, %v4128_v59 }
 0x295   : > { %v3928_v42 = vadd.f32 %v3926_v2, %v3924_v45  ;;  %v3927_v50 = vadd.f32 %v3922_v3, %v3531_v41 }
 0x297   : > { %v3929_v54 = vrot.slane %v3928_v42, 4  ;;  %v3937_v39 = vsel %vm3935_vm6, %v3927_v50, 0.0 }
 0x298   : > { %v3938_v26 = vadd.f32 %v3937_v39, %v3936_v11  ;;  %v4337_v11 = vld [vmem:[%s7932_s3] sm:$0x3] }
 0x299   : > { %v3930_v63 = vadd.f32 %v3929_v54, %v3928_v42  ;;  %v4329_v54 = vsub.s32 1, %v4128_v59 }
 0x29a   : > { %v3939_v52 = vrot.slane %v3938_v26, 4 }
 0x29b   : > { %v3931_v60 = vrot.slane %v3930_v63, 2 }
 0x29c   : > { %v3940_v8 = vadd.f32 %v3939_v52, %v3938_v26  ;;  %v4342_v52 = vrot.slane %v4337_v11, %v4129_v29 }
 0x29d   : > { %v3932_v24 = vadd.f32 %v3931_v60, %v3930_v63 }
 0x29e   : > { %v3941_v28 = vrot.slane %v3940_v8, 2 }
 0x29f   : > { %v3933_v0 = vrot.slane %v3932_v24, 1 }
 0x2a0   : > { %v3942_v31 = vadd.f32 %v3941_v28, %v3940_v8 }
 0x2a1   : > { %v3934_v14 = vadd.f32 %v3933_v0, %v3932_v24  ;;  %v4346_v0 = vrot.slane %v4337_v11, %v4329_v54 }
 0x2a2   : > { %v3943_v47 = vrot.slane %v3942_v31, 1 }
 0x2a4   : > { %v3944_v9 = vadd.f32 %v3943_v47, %v3942_v31 }
 0x2a6   : > { %5274 = vmatprep.mubr.msk.f32.mxu1 %vm3935_vm6, %v3944_v9 }
 0x2a7   : > { %4037 = vmatmul.mubr.f32.vlgmr.msra.gmra.mxu1 %v3934_v14 }
 0x2a8   : > { %4081 = vmatpush1.msra.mxu1 %v4050_v30  ;;  %4120 = vmatprep.mubr.f32.mxu1 %v7948_v22 }
 0x2a9   : > { %4082 = vmatprep.subr.mxu1 %v4049_v57 }
 0x2aa   : > { %4083 = vmatpush1.msra.mxu1 %v4048_v19 }
 0x2ab   : > { %4084 = vmatprep.subr.mxu1 %v4047_v27 }
 0x2ac   : > { %4085 = vmatpush1.msra.mxu1 %v4046_v10 }
 0x2ad   : > { %4086 = vmatprep.subr.mxu1 %v4045_v18 }
 0x2ae   : > { %4087 = vmatpush1.msra.mxu1 %v4044_v40 }
 0x2af   : > { %4262 = vmatprep.subr.mxu1 %v7949_v33 }
 0x367   : > { %v4038_v20 = vpop.f32.mrf.mxu1 }
 0x368   : > { %v4043_v55 = vmul.f32 0.010416667, %v4038_v20 }
 0x369   : > { %v4040_v6 = vpop.f32.mrf.mxu1 }
 0x36a   : > { %5275 = vmatmul.mubr.msk.f32.vlgmr.msra.gmra.mxu1 %vm4052_vm7, %v4043_v55 }
 0x36b   : > { %4263 = vmatpush1.msra.mxu1 %v4050_v30  ;;  %4302 = vmatprep.mubr.f32.mxu1 %v7948_v22 }
 0x36c   : > { %4264 = vmatprep.subr.mxu1 %v4049_v57 }
 0x36d   : > { %4265 = vmatpush1.msra.mxu1 %v4048_v19 }
 0x36e   : > { %4266 = vmatprep.subr.mxu1 %v4047_v27 }
 0x36f   : > { %4267 = vmatpush1.msra.mxu1 %v4046_v10 }
 0x370   : > { %4268 = vmatprep.subr.mxu1 %v4045_v18 }
 0x371   : > { %4269 = vmatpush1.msra.mxu1 %v4044_v40 }
 0x42a   : > { %v4122_v12 = vpop.f32.mrf.mxu1 }
 0x42b   : > { %v4130_v15 = vrot.slane %v4122_v12, %v4129_v29 }
 0x42c   : > { %v4124_v61 = vpop.f32.mrf.mxu1 }
 0x42d   : > { %v4135_v34 = vsub.f32 %v3924_v45, %v4130_v15  ;;  %v4137_v13 = vsub.f32 %v3926_v2, %v4130_v15  ;;  %v4134_v38 = vrot.slane %v4124_v61, %v4129_v29 }
 0x42f   : > { %v4139_v36 = vmul.f32 %v4135_v34, %v4135_v34  ;;  %v4141_v43 = vmul.f32 %v4137_v13, %v4137_v13  ;;  %v4136_v4 = vsub.f32 %v7878_v32, %v4134_v38  ;;  %v4138_v25 = vsub.f32 %v3927_v50, %v4134_v38  ;;  %v4321_v50 = vld [vmem:[%s7931_s2] sm:$0x3] }
 0x430   : > { %v4326_v63 = vrot.slane %v4321_v50, %v4129_v29  ;;  %v4330_v31 = vrot.slane %v4321_v50, %v4329_v54 }
 0x431   : > { %v4143_v1 = vadd.f32 %v4141_v43, %v4139_v36  ;;  %v4140_v49 = vmul.f32 %v4136_v4, %v4136_v4  ;;  %v4142_v7 = vmul.f32 %v4138_v25, %v4138_v25 }
 0x433   : > { %v4144_v16 = vrot.slane %v4143_v1, 4  ;;  %v4150_v48 = vsel %vm3935_vm6, %v4140_v49, 0.0  ;;  %v4151_v51 = vsel %vm3935_vm6, %v4142_v7, 0.0 }
 0x434   : > { %v4152_v17 = vadd.f32 %v4151_v51, %v4150_v48 }
 0x435   : > { %v4145_v62 = vadd.f32 %v4144_v16, %v4143_v1 }
 0x436   : > { %v4153_v5 = vrot.slane %v4152_v17, 4 }
 0x437   : > { %v4146_v21 = vrot.slane %v4145_v62, 2 }
 0x438   : > { %v4154_v35 = vadd.f32 %v4153_v5, %v4152_v17 }
 0x439   : > { %v4147_v44 = vadd.f32 %v4146_v21, %v4145_v62 }
 0x43a   : > { %v4155_v58 = vrot.slane %v4154_v35, 2 }
 0x43b   : > { %v4148_v23 = vrot.slane %v4147_v44, 1 }
 0x43c   : > { %v4156_v53 = vadd.f32 %v4155_v58, %v4154_v35 }
 0x43d   : > { %v4149_v37 = vadd.f32 %v4148_v23, %v4147_v44 }
 0x43e   : > { %v4157_v41 = vrot.slane %v4156_v53, 1 }
 0x440   : > { %v4158_v46 = vadd.f32 %v4157_v41, %v4156_v53 }
 0x442   : > { %5276 = vmatprep.mubr.msk.f32.mxu0 %vm3935_vm6, %v4158_v46 }
 0x443   : > { %4227 = vmatmul.mubr.f32.vlgmr.msra.gmra.mxu0 %v4149_v37 }
 0x503   : > { %v4228_v45 = vpop.f32.mrf.mxu0 }
 0x504   : > { %v4232_v32 = vmul.f32 0.010416667, %v4228_v45 }
 0x505   : > { %v4230_v2 = vpop.f32.mrf.mxu0 }
 0x506   : > { %v4233_v3 = vadd.f32 1e-05, %v4232_v32 }
 0x508   : > { %5973 = vrsqrt.f32 %v4233_v3 }
 0x515   : > { %v5974_v42 = vpop.eup %5973 }
 0x516   : > { %5277 = vmatmul.mubr.msk.f32.vlgmr.msra.gmra.mxu1 %vm4052_vm7, %v5974_v42 }
 0x5d6   : > { %v4304_v39 = vpop.f32.mrf.mxu1 }
 0x5d7   : > { %v4312_v26 = vrot.slane %v4304_v39, %v4129_v29 }
 0x5d8   : > { %v4306_v60 = vpop.f32.mrf.mxu1 }
 0x5d9   : > { %v4317_v8 = vmul.f32 %v4312_v26, %v4135_v34  ;;  %v4319_v24 = vmul.f32 %v4312_v26, %v4137_v13  ;;  %v4316_v28 = vrot.slane %v4306_v60, %v4129_v29 }
 0x5db   : > { %v4333_v47 = vmul.f32 %v4326_v63, %v4317_v8  ;;  %v4335_v9 = vmul.f32 %v4326_v63, %v4319_v24  ;;  %v4318_v14 = vmul.f32 %v4316_v28, %v4136_v4  ;;  %v4320_v30 = vmul.f32 %v4316_v28, %v4138_v25 }
 0x5dd   : > { %v4349_v57 = vadd.f32 %v4342_v52, %v4333_v47  ;;  %v4351_v19 = vadd.f32 %v4342_v52, %v4335_v9  ;;  %v4334_v27 = vmul.f32 %v4330_v31, %v4318_v14  ;;  %v4336_v22 = vmul.f32 %v4330_v31, %v4320_v30 }
 0x5df   : > { %v4353_v10 = vmax.f32 %v4349_v57, 0.0  ;;  %v4355_v18 = vmax.f32 %v4351_v19, 0.0  ;;  %v4350_v40 = vadd.f32 %v4346_v0, %v4334_v27  ;;  %v4352_v33 = vadd.f32 %v4346_v0, %v4336_v22 }
 0x5e1   : > { %4357 = vst [vmem:[%s251_s24] sm:$0xff] %v4353_v10  ;;  %4359 = vst [vmem:[%s251_s24 + $0x10] sm:$0xff] %v4355_v18  ;;  %v4354_v20 = vmax.f32 %v4350_v40, 0.0  ;;  %v4356_v55 = vmax.f32 %v4352_v33, 0.0 }
 0x5e3   : > { %4358 = vst.msk [vmem:[%s251_s24 + $0x8] sm:$0xff] %vm3935_vm6, %v4354_v20  ;;  %4360 = vst.msk [vmem:[%s251_s24 + $0x18] sm:$0xff] %vm3935_vm6, %v4356_v55 }
 0x5e4 PF: > { %s16_s21 = sadd.s32 1, %s5985_s21  }
 0x5e5   : > { %p13_p4 = scmp.ge.s32.totalorder %s16_s21, 4  }
 0x5e7   :  { %15 = sbr.rel (!%p13_p4) target bundleno = 1 (0x1), region = 82 }

// kernel: hiformer1_forward.9
= control target key start
LH: loop header
LB: loop body
LE: loop exit
PB: predicated region body
PF: predicated region fallthrough
CT: control target
= control target key end

     0   :  { %s2158_s15 = smov 0   ;;  %s2757_s0 = inlined_call_operand.vmem [shape: f32[2,256,96], index: 0, kind: input, shape index: {}]   ;;  %s2758_s1 = inlined_call_operand.vmem [shape: f32[2,64,96], index: 1, kind: input, shape index: {}]   ;;  %s2759_s2 = inlined_call_operand.vmem [shape: f32[256,64], index: 2, kind: input, shape index: {}]   ;;  %s2760_s3 = inlined_call_operand.vmem [shape: f32[96,1], index: 3, kind: input, shape index: {}]   ;;  %s2761_s4 = inlined_call_operand.vmem [shape: f32[2,18,18,96], index: 4, kind: output, shape index: {}]  }
   0x1 LB: > { %s1620_s16 = sadd.s32 4294967295, %s2129_s15   ;;  %p1624_p0 = scmp.ge.s32.totalorder %s2129_s15, 1  ;;  %s2129_s15 = sphi %s2158_s15, %s14_s15  }
   0x2   : > { %p172_p1 = scmp.lt.s32.totalorder %s2129_s15, 3 }
   0x4   : > { %p173_p2 = pnand %p1624_p0, %p172_p1 }
   0x5   : > { %p203_p3 = scmp.lt.s32.totalorder (!%p173_p2), %s1620_s16, 1 }
   0x6   : > { %176 = sbr.rel (%p173_p2) target bundleno = 514 (0x202), region = 36 }
   0xb   : > { %v365_v0 = vld [vmem:[%s2760_s3 + $0x58] sm:$0xff]  ;;  %v364_v1 = vld [vmem:[%s2760_s3 + $0x50] sm:$0xff]  ;;  %v363_v2 = vld [vmem:[%s2760_s3 + $0x48] sm:$0xff]  ;;  %s2763_s16 = smov (!%p203_p3, %s1620_s16), 1  ;;  %vm250_vm0 = vcmask 785408   ;;  %vm951_vm1 = vcmask 523264  }
   0xc   : > { %1846 = vmatprep.subr.mxu0 %v365_v0  ;;  %v362_v3 = vld [vmem:[%s2760_s3 + $0x40] sm:$0xff]  ;;  %s1760_s25 = sshll.u32 %s2763_s16, 8  ;;  %v361_v4 = vld [vmem:[%s2760_s3 + $0x38] sm:$0xff]  ;;  %v360_v12 = vld [vmem:[%s2760_s3 + $0x30] sm:$0xff]  ;;  %s1761_s19 = sshll.u32 %s2763_s16, 6  ;;  %vm1467_vm2 = vcmask 779264  }
   0xd   : > { %1847 = vmatpush3.msra.mxu0 %v365_v0  ;;  %s2187_s30 = scalar_lea.vmem %s2757_s0, %s1760_s25  ;;  %v359_v16 = vld [vmem:[%s2760_s3 + $0x28] sm:$0xff]  ;;  %v358_v20 = vld [vmem:[%s2760_s3 + $0x20] sm:$0xff]  ;;  %v357_v24 = vld [vmem:[%s2760_s3 + $0x18] sm:$0xff]  ;;  %s2268_s26 = scalar_lea.vmem %s2758_s1, %s1761_s19 }
   0xe   : > { %1848 = vmatprep.subr.mxu0 %v364_v1  ;;  %v2190_v5 = vld [vmem:[%s2187_s30] sm:$0xff]  ;;  %v2193_v6 = vld [vmem:[%s2187_s30 + $0x8] sm:$0xff]  ;;  %v2196_v7 = vld [vmem:[%s2187_s30 + $0x10] sm:$0xff]  ;;  %s1982_s18 = smul.u32 432, %s2763_s16 }
   0xf   : > { %1849 = vmatpush3.msra.mxu0 %v364_v1  ;;  %v2199_v8 = vld [vmem:[%s2187_s30 + $0x18] sm:$0xff]  ;;  %v251_v9 = vsel %vm250_vm0, %v2190_v5, 0.0  ;;  %v252_v10 = vsel %vm250_vm0, %v2193_v6, 0.0  ;;  %v254_v11 = vsel %vm250_vm0, %v2196_v7, 0.0  ;;  %v2211_v13 = vld [vmem:[%s2187_s30 + $0x20] sm:$0xff]  ;;  %v2219_v17 = vld [vmem:[%s2187_s30 + $0x28] sm:$0xff] }
  0x10   : > { %1850 = vmatprep.subr.mxu0 %v363_v2  ;;  %v253_v14 = vadd.f32 %v252_v10, %v251_v9  ;;  %v256_v15 = vsel %vm250_vm0, %v2199_v8, 0.0  ;;  %v258_v19 = vsel %vm250_vm0, %v2211_v13, 0.0  ;;  %v2227_v21 = vld [vmem:[%s2187_s30 + $0x30] sm:$0xff]  ;;  %v260_v23 = vsel %vm250_vm0, %v2219_v17, 0.0  ;;  %v2235_v25 = vld [vmem:[%s2187_s30 + $0x38] sm:$0xff]  ;;  %v2243_v29 = vld [vmem:[%s2187_s30 + $0x40] sm:$0xff]  ;;  %s2580_s21 = scalar_lea.vmem %s2761_s4, %s1982_s18 }
  0x11   : > { %1851 = vmatpush3.msra.mxu0 %v363_v2  ;;  %v262_v27 = vsel %vm250_vm0, %v2227_v21, 0.0  ;;  %v356_v28 = vld [vmem:[%s2760_s3 + $0x10] sm:$0xff]  ;;  %v264_v31 = vsel %vm250_vm0, %v2235_v25, 0.0  ;;  %v355_v32 = vld [vmem:[%s2760_s3 + $0x8] sm:$0xff]  ;;  %v266_v35 = vsel %vm250_vm0, %v2243_v29, 0.0  ;;  %v911_v36 = vld [vmem:[%s2759_s2] sm:$0xff] }
  0x12   : > { %1852 = vmatprep.subr.mxu0 %v362_v3  ;;  %v255_v18 = vadd.f32 %v254_v11, %v253_v14  ;;  %v2251_v33 = vld [vmem:[%s2187_s30 + $0x48] sm:$0xff]  ;;  %v354_v37 = vld [vmem:[%s2760_s3] sm:$0xff]  ;;  %v2263_v38 = vld [vmem:[%s2187_s30 + $0x50] sm:$0xff]  ;;  %1934 = vmatprep.mubr.msk.f32.mxu1 %vm951_vm1, %v911_v36 }
  0x13   : > { %1853 = vmatpush3.msra.mxu0 %v362_v3  ;;  %v268_v40 = vsel %vm250_vm0, %v2251_v33, 0.0  ;;  %v950_v41 = vld [vmem:[%s2268_s26 + $0x38] sm:$0xff]  ;;  %v949_v42 = vld [vmem:[%s2268_s26 + $0x30] sm:$0xff]  ;;  %v270_v45 = vsel %vm250_vm0, %v2263_v38, 0.0  ;;  %v948_v46 = vld [vmem:[%s2268_s26 + $0x28] sm:$0xff] }
  0x14   : > { %1854 = vmatprep.subr.mxu0 %v361_v4  ;;  %v257_v22 = vadd.f32 %v256_v15, %v255_v18  ;;  %v2276_v43 = vld [vmem:[%s2187_s30 + $0x58] sm:$0xff]  ;;  %1918 = vmatprep.subr.mxu1 %v950_v41  ;;  %v2282_v47 = vld [vmem:[%s2187_s30 + $0x60] sm:$0xff]  ;;  %v2288_v51 = vld [vmem:[%s2187_s30 + $0x68] sm:$0xff] }
  0x15   : > { %1855 = vmatpush3.msra.mxu0 %v361_v4  ;;  %1919 = vmatpush3.msra.mxu1 %v950_v41  ;;  %v272_v49 = vsel %vm250_vm0, %v2276_v43, 0.0  ;;  %v947_v50 = vld [vmem:[%s2268_s26 + $0x20] sm:$0xff]  ;;  %v274_v53 = vsel %vm250_vm0, %v2282_v47, 0.0  ;;  %v946_v54 = vld [vmem:[%s2268_s26 + $0x18] sm:$0xff]  ;;  %v2294_v55 = vld [vmem:[%s2187_s30 + $0x70] sm:$0xff]  ;;  %v276_v57 = vsel %vm250_vm0, %v2288_v51, 0.0 }
  0x16   : > { %1856 = vmatprep.subr.mxu0 %v360_v12  ;;  %v259_v26 = vadd.f32 %v258_v19, %v257_v22  ;;  %1920 = vmatprep.subr.mxu1 %v949_v42  ;;  %v945_v58 = vld [vmem:[%s2268_s26 + $0x10] sm:$0xff]  ;;  %v2300_v59 = vld [vmem:[%s2187_s30 + $0x78] sm:$0xff]  ;;  %v278_v61 = vsel %vm250_vm0, %v2294_v55, 0.0  ;;  %v944_v62 = vld [vmem:[%s2268_s26 + $0x8] sm:$0xff] }
  0x17   : > { %1857 = vmatpush3.msra.mxu0 %v360_v12  ;;  %1921 = vmatpush3.msra.mxu1 %v949_v42  ;;  %v2306_v63 = vld [vmem:[%s2187_s30 + $0x80] sm:$0xff]  ;;  %v280_v1 = vsel %vm250_vm0, %v2300_v59, 0.0  ;;  %v2312_v3 = vld [vmem:[%s2187_s30 + $0x88] sm:$0xff]  ;;  %v2320_v11 = vld [vmem:[%s2187_s30 + $0x90] sm:$0xff] }
  0x18   : > { %1858 = vmatprep.subr.mxu0 %v359_v16  ;;  %v261_v30 = vadd.f32 %v260_v23, %v259_v26  ;;  %1922 = vmatprep.subr.mxu1 %v948_v46  ;;  %v943_v2 = vld [vmem:[%s2268_s26] sm:$0xff]  ;;  %v282_v9 = vsel %vm250_vm0, %v2306_v63, 0.0  ;;  %v912_v10 = vld [vmem:[%s2759_s2 + $0x8] sm:$0xff]  ;;  %v913_v14 = vld [vmem:[%s2759_s2 + $0x10] sm:$0xff]  ;;  %v284_v15 = vsel %vm250_vm0, %v2312_v3, 0.0  ;;  %v286_v19 = vsel %vm250_vm0, %v2320_v11, 0.0 }
  0x19   : > { %1859 = vmatpush3.msra.mxu0 %v359_v16  ;;  %1923 = vmatpush3.msra.mxu1 %v948_v46  ;;  %v2328_v16 = vld [vmem:[%s2187_s30 + $0x98] sm:$0xff]  ;;  %v2338_v22 = vld [vmem:[%s2187_s30 + $0xa0] sm:$0xff] }
  0x1a   : > { %1860 = vmatprep.subr.mxu0 %v358_v20  ;;  %v263_v34 = vadd.f32 %v262_v27, %v261_v30  ;;  %1924 = vmatprep.subr.mxu1 %v947_v50  ;;  %v288_v26 = vsel %vm250_vm0, %v2328_v16, 0.0  ;;  %v2346_v27 = vld [vmem:[%s2187_s30 + $0xa8] sm:$0xff]  ;;  %v290_v30 = vsel %vm250_vm0, %v2338_v22, 0.0  ;;  %v918_v41 = vld [vmem:[%s2759_s2 + $0x38] sm:$0xff]  ;;  %v2374_v42 = vld [vmem:[%s2187_s30 + $0xc0] sm:$0xff] }
  0x1b   : > { %1861 = vmatpush3.msra.mxu0 %v358_v20  ;;  %1925 = vmatpush3.msra.mxu1 %v947_v50  ;;  %v914_v20 = vld [vmem:[%s2759_s2 + $0x18] sm:$0xff]  ;;  %v292_v36 = vsel %vm250_vm0, %v2346_v27, 0.0  ;;  %v298_v50 = vsel %vm250_vm0, %v2374_v42, 0.0 }
  0x1c   : > { %1862 = vmatprep.subr.mxu0 %v357_v24  ;;  %v265_v39 = vadd.f32 %v264_v31, %v263_v34  ;;  %1926 = vmatprep.subr.mxu1 %v946_v54  ;;  %v916_v31 = vld [vmem:[%s2759_s2 + $0x28] sm:$0xff] }
  0x1d   : > { %1863 = vmatpush3.msra.mxu0 %v357_v24  ;;  %1927 = vmatpush3.msra.mxu1 %v946_v54  ;;  %v915_v24 = vld [vmem:[%s2759_s2 + $0x20] sm:$0xff] }
  0x1e   : > { %1864 = vmatprep.subr.mxu0 %v356_v28  ;;  %v267_v44 = vadd.f32 %v266_v35, %v265_v39  ;;  %1928 = vmatprep.subr.mxu1 %v945_v58  ;;  %v917_v35 = vld [vmem:[%s2759_s2 + $0x30] sm:$0xff] }
  0x1f   : > { %1865 = vmatpush3.msra.mxu0 %v356_v28  ;;  %1929 = vmatpush3.msra.mxu1 %v945_v58  ;;  %v2400_v58 = vld [vmem:[%s2187_s30 + $0xd8] sm:$0xff] }
  0x20   : > { %1866 = vmatprep.subr.mxu0 %v355_v32  ;;  %v269_v48 = vadd.f32 %v268_v40, %v267_v44  ;;  %1930 = vmatprep.subr.mxu1 %v944_v62 }
  0x21   : > { %1867 = vmatpush3.msra.mxu0 %v355_v32  ;;  %1931 = vmatpush3.msra.mxu1 %v944_v62  ;;  %v2356_v32 = vld [vmem:[%s2187_s30 + $0xb0] sm:$0xff]  ;;  %v922_v62 = vld [vmem:[%s2759_s2 + $0x58] sm:$0xff] }
  0x22   : > { %1868 = vmatprep.subr.mxu0 %v354_v37  ;;  %v271_v52 = vadd.f32 %v270_v45, %v269_v48  ;;  %1932 = vmatprep.subr.mxu1 %v943_v2  ;;  %v294_v40 = vsel %vm250_vm0, %v2356_v32, 0.0  ;;  %v919_v45 = vld [vmem:[%s2759_s2 + $0x40] sm:$0xff]  ;;  %v2382_v48 = vld [vmem:[%s2187_s30 + $0xc8] sm:$0xff] }
  0x23   : > { %1869 = vmatpush3.msra.mxu0 %v354_v37  ;;  %1933 = vmatpush3.msra.mxu1 %v943_v2  ;;  %v2364_v37 = vld [vmem:[%s2187_s30 + $0xb8] sm:$0xff]  ;;  %v923_v2 = vld [vmem:[%s2759_s2 + $0x60] sm:$0xff] }
  0x24   : > { %v273_v56 = vadd.f32 %v272_v49, %v271_v52  ;;  %1935 = vmatmul.mubr.msk.f32.vlgmr.msra.gmra.mxu1 %vm951_vm1, %v912_v10  ;;  %v296_v46 = vsel %vm250_vm0, %v2364_v37, 0.0  ;;  %v920_v52 = vld [vmem:[%s2759_s2 + $0x48] sm:$0xff] }
  0x25   : > { %1937 = vmatprep.mubr.msk.f32.mxu1 %vm951_vm1, %v913_v14  ;;  %v924_v14 = vld [vmem:[%s2759_s2 + $0x68] sm:$0xff] }
  0x26   : > { %v275_v60 = vadd.f32 %v274_v53, %v273_v56  ;;  %v2392_v53 = vld [vmem:[%s2187_s30 + $0xd0] sm:$0xff] }
  0x27   : > { %v921_v56 = vld [vmem:[%s2759_s2 + $0x50] sm:$0xff] }
  0x28   : > { %v277_v0 = vadd.f32 %v276_v57, %v275_v60  ;;  %1938 = vmatmul.mubr.msk.f32.gmra.mxu1 %vm951_vm1, %v914_v20  ;;  %v300_v57 = vsel %vm250_vm0, %v2382_v48, 0.0 }
  0x29   : > { %1940 = vmatprep.mubr.msk.f32.mxu1 %vm951_vm1, %v915_v24 }
  0x2a   : > { %v279_v4 = vadd.f32 %v278_v61, %v277_v0  ;;  %v302_v61 = vsel %vm250_vm0, %v2392_v53, 0.0  ;;  %v2410_v0 = vld [vmem:[%s2187_s30 + $0xe0] sm:$0xff] }
  0x2c   : > { %v281_v12 = vadd.f32 %v280_v1, %v279_v4  ;;  %1941 = vmatmul.mubr.msk.f32.gmra.mxu1 %vm951_vm1, %v916_v31  ;;  %v304_v4 = vsel %vm250_vm0, %v2400_v58, 0.0  ;;  %v927_v31 = vld [vmem:[%s2759_s2 + $0x80] sm:$0xff] }
  0x2d   : > { %1943 = vmatprep.mubr.msk.f32.mxu1 %vm951_vm1, %v917_v35 }
  0x2e   : > { %v283_v18 = vadd.f32 %v282_v9, %v281_v12  ;;  %v2418_v9 = vld [vmem:[%s2187_s30 + $0xe8] sm:$0xff]  ;;  %v306_v12 = vsel %vm250_vm0, %v2410_v0, 0.0 }
  0x2f   : > { %v308_v20 = vsel %vm250_vm0, %v2418_v9, 0.0 }
  0x30   : > { %v285_v23 = vadd.f32 %v284_v15, %v283_v18  ;;  %1944 = vmatmul.mubr.msk.f32.gmra.mxu1 %vm951_vm1, %v918_v41  ;;  %v2428_v15 = vld [vmem:[%s2187_s30 + $0xf0] sm:$0xff] }
  0x31   : > { %1946 = vmatprep.mubr.msk.f32.mxu1 %vm951_vm1, %v919_v45 }
  0x32   : > { %v287_v28 = vadd.f32 %v286_v19, %v285_v23  ;;  %v925_v19 = vld [vmem:[%s2759_s2 + $0x70] sm:$0xff]  ;;  %v2436_v23 = vld [vmem:[%s2187_s30 + $0xf8] sm:$0xff] }
  0x34   : > { %v289_v34 = vadd.f32 %v288_v26, %v287_v28  ;;  %1947 = vmatmul.mubr.msk.f32.gmra.mxu1 %vm951_vm1, %v920_v52  ;;  %v310_v26 = vsel %vm250_vm0, %v2428_v15, 0.0  ;;  %v926_v28 = vld [vmem:[%s2759_s2 + $0x78] sm:$0xff] }
  0x35   : > { %1949 = vmatprep.mubr.msk.f32.mxu1 %vm951_vm1, %v921_v56 }
  0x36   : > { %v291_v39 = vadd.f32 %v290_v30, %v289_v34  ;;  %v312_v34 = vsel %vm250_vm0, %v2436_v23, 0.0 }
  0x38   : > { %v293_v44 = vadd.f32 %v292_v36, %v291_v39  ;;  %1950 = vmatmul.mubr.msk.f32.gmra.mxu1 %vm951_vm1, %v922_v62  ;;  %v928_v36 = vld [vmem:[%s2759_s2 + $0x88] sm:$0xff]  ;;  %v931_v62 = vld [vmem:[%s2759_s2 + $0xa0] sm:$0xff] }
  0x39   : > { %1952 = vmatprep.mubr.msk.f32.mxu1 %vm951_vm1, %v923_v2  ;;  %v934_v2 = vld [vmem:[%s2759_s2 + $0xb8] sm:$0xff] }
  0x3a   : > { %v295_v49 = vadd.f32 %v294_v40, %v293_v44 }
  0x3c   : > { %v297_v54 = vadd.f32 %v296_v46, %v295_v49  ;;  %1953 = vmatmul.mubr.msk.f32.gmra.mxu1 %vm951_vm1, %v924_v14  ;;  %v939_v14 = vld [vmem:[%s2759_s2 + $0xe0] sm:$0xff] }
  0x3d   : > { %1955 = vmatprep.mubr.msk.f32.mxu1 %vm951_vm1, %v925_v19  ;;  %v942_v19 = vld [vmem:[%s2759_s2 + $0xf8] sm:$0xff] }
  0x3e   : > { %v299_v60 = vadd.f32 %v298_v50, %v297_v54 }
  0x40   : > { %v301_v1 = vadd.f32 %v300_v57, %v299_v60  ;;  %1956 = vmatmul.mubr.msk.f32.gmra.mxu1 %vm951_vm1, %v926_v28 }
  0x41   : > { %1958 = vmatprep.mubr.msk.f32.mxu1 %vm951_vm1, %v927_v31 }
  0x42   : > { %v303_v10 = vadd.f32 %v302_v61, %v301_v1  ;;  %v933_v1 = vld [vmem:[%s2759_s2 + $0xb0] sm:$0xff] }
  0x44   : > { %v305_v18 = vadd.f32 %v304_v4, %v303_v10  ;;  %1959 = vmatmul.mubr.msk.f32.gmra.mxu1 %vm951_vm1, %v928_v36  ;;  %v935_v4 = vld [vmem:[%s2759_s2 + $0xc0] sm:$0xff]  ;;  %v937_v10 = vld [vmem:[%s2759_s2 + $0xd0] sm:$0xff] }
  0x46   : > { %v307_v24 = vadd.f32 %v306_v12, %v305_v18  ;;  %v938_v12 = vld [vmem:[%s2759_s2 + $0xd8] sm:$0xff]  ;;  %v941_v18 = vld [vmem:[%s2759_s2 + $0xf0] sm:$0xff] }
  0x48   : > { %v309_v30 = vadd.f32 %v308_v20, %v307_v24  ;;  %v2131_v20 = vmov 0  }
  0x49   : > { %1993 = vset.pattern.permute.xlu0 %v2131_v20  ;;  %1994 = vset.pattern.permute.xlu1 %v2131_v20 }
  0x4a   : > { %v311_v35 = vadd.f32 %v310_v26, %v309_v30 }
  0x4c   : > { %v313_v39 = vadd.f32 %v312_v34, %v311_v35 }
  0x4e   : > { %v314_v40 = vrot.slane %v313_v39, 4 }
  0x50   : > { %v315_v41 = vadd.f32 %v314_v40, %v313_v39 }
  0x52   : > { %v316_v44 = vrot.slane %v315_v41, 2 }
  0x54   : > { %v317_v45 = vadd.f32 %v316_v44, %v315_v41 }
  0x56   : > { %v318_v46 = vrot.slane %v317_v45, 1 }
  0x58   : > { %v319_v49 = vadd.f32 %v318_v46, %v317_v45 }
  0x5a   : > { %v321_v50 = vmul.f32 0.00390625, %v319_v49 }
  0x5c   : > { %v322_v52 = vadd.f32 %v321_v50, %v2190_v5  ;;  %v323_v54 = vadd.f32 %v321_v50, %v2193_v6  ;;  %v324_v56 = vadd.f32 %v321_v50, %v2196_v7  ;;  %v325_v57 = vadd.f32 %v321_v50, %v2199_v8 }
  0x5d   : > { %v326_v60 = vadd.f32 %v321_v50, %v2211_v13  ;;  %v327_v61 = vadd.f32 %v321_v50, %v2219_v17  ;;  %v328_v5 = vadd.f32 %v321_v50, %v2227_v21  ;;  %v329_v6 = vadd.f32 %v321_v50, %v2235_v25 }
  0x5e   : > { %1870 = vmatprep.mubr.msk.f32.mxu0 %vm250_vm0, %v322_v52  ;;  %v330_v7 = vadd.f32 %v321_v50, %v2243_v29  ;;  %v331_v8 = vadd.f32 %v321_v50, %v2251_v33  ;;  %v332_v13 = vadd.f32 %v321_v50, %v2263_v38  ;;  %v333_v17 = vadd.f32 %v321_v50, %v2276_v43 }
  0x5f   : > { %1871 = vmatmul.mubr.msk.f32.vlgmr.msra.gmra.mxu0 %vm250_vm0, %v323_v54  ;;  %v334_v21 = vadd.f32 %v321_v50, %v2282_v47  ;;  %v335_v25 = vadd.f32 %v321_v50, %v2288_v51  ;;  %v336_v29 = vadd.f32 %v321_v50, %v2294_v55  ;;  %v337_v33 = vadd.f32 %v321_v50, %v2300_v59 }
  0x60   : > { %1873 = vmatprep.mubr.msk.f32.mxu0 %vm250_vm0, %v324_v56  ;;  %v338_v38 = vadd.f32 %v321_v50, %v2306_v63  ;;  %v339_v43 = vadd.f32 %v321_v50, %v2312_v3  ;;  %v340_v47 = vadd.f32 %v321_v50, %v2320_v11  ;;  %v341_v51 = vadd.f32 %v321_v50, %v2328_v16 }
  0x61   : > { %v342_v55 = vadd.f32 %v321_v50, %v2338_v22  ;;  %v343_v59 = vadd.f32 %v321_v50, %v2346_v27  ;;  %v344_v63 = vadd.f32 %v321_v50, %v2356_v32  ;;  %v345_v3 = vadd.f32 %v321_v50, %v2364_v37 }
  0x62   : > { %v346_v11 = vadd.f32 %v321_v50, %v2374_v42  ;;  %v347_v16 = vadd.f32 %v321_v50, %v2382_v48  ;;  %v348_v22 = vadd.f32 %v321_v50, %v2392_v53  ;;  %v349_v27 = vadd.f32 %v321_v50, %v2400_v58  ;;  %v929_v53 = vld [vmem:[%s2759_s2 + $0x90] sm:$0xff]  ;;  %v930_v58 = vld [vmem:[%s2759_s2 + $0x98] sm:$0xff] }
  0x63   : > { %1874 = vmatmul.mubr.msk.f32.gmra.mxu0 %vm250_vm0, %v325_v57  ;;  %v350_v32 = vadd.f32 %v321_v50, %v2410_v0  ;;  %v351_v37 = vadd.f32 %v321_v50, %v2418_v9  ;;  %v352_v42 = vadd.f32 %v321_v50, %v2428_v15  ;;  %v353_v48 = vadd.f32 %v321_v50, %v2436_v23  ;;  %v932_v0 = vld [vmem:[%s2759_s2 + $0xa8] sm:$0xff] }
  0x64   : > { %1876 = vmatprep.mubr.msk.f32.mxu0 %vm250_vm0, %v326_v60  ;;  %1961 = vmatprep.mubr.msk.f32.mxu1 %vm951_vm1, %v929_v53  ;;  %v936_v9 = vld [vmem:[%s2759_s2 + $0xc8] sm:$0xff]  ;;  %v2132_v23 = vmov 0.0  }
  0x65   : > { %1962 = vmatmul.mubr.msk.f32.gmra.mxu1 %vm951_vm1, %v930_v58  ;;  %v940_v15 = vld [vmem:[%s2759_s2 + $0xe8] sm:$0xff]  ;;  %1468 = vst.msk [vmem:[%s2580_s21 + $0x10] sm:$0x3] %vm1467_vm2, %v2132_v23  ;;  %1471 = vst.msk [vmem:[%s2580_s21 + $0x28] sm:$0x3] %vm1467_vm2, %v2132_v23 }
  0x66   : > { %1964 = vmatprep.mubr.msk.f32.mxu1 %vm951_vm1, %v931_v62  ;;  %1470 = vst.msk [vmem:[%s2580_s21 + $0x20] sm:$0xff] %vm250_vm0, %v2132_v23  ;;  %1465 = vst.msk [vmem:[%s2580_s21] sm:$0xff] %vm250_vm0, %v2132_v23 }
  0x67   : > { %1877 = vmatmul.mubr.msk.f32.gmra.mxu0 %vm250_vm0, %v327_v61  ;;  %1519 = vst.msk [vmem:[%s2580_s21 + $0x1a8] sm:$0x3] %vm1467_vm2, %v2132_v23  ;;  %1474 = vst.msk [vmem:[%s2580_s21 + $0x40] sm:$0x3] %vm1467_vm2, %v2132_v23 }
  0x68   : > { %1879 = vmatprep.mubr.msk.f32.mxu0 %vm250_vm0, %v328_v5  ;;  %1466 = vst.msk [vmem:[%s2580_s21 + $0x8] sm:$0xff] %vm250_vm0, %v2132_v23  ;;  %1469 = vst.msk [vmem:[%s2580_s21 + $0x18] sm:$0xff] %vm250_vm0, %v2132_v23 }
  0x69   : > { %1965 = vmatmul.mubr.msk.f32.gmra.mxu1 %vm951_vm1, %v932_v0  ;;  %1472 = vst.msk [vmem:[%s2580_s21 + $0x30] sm:$0xff] %vm250_vm0, %v2132_v23  ;;  %1473 = vst.msk [vmem:[%s2580_s21 + $0x38] sm:$0xff] %vm250_vm0, %v2132_v23 }
  0x6a   : > { %1967 = vmatprep.mubr.msk.f32.mxu1 %vm951_vm1, %v933_v1  ;;  %1475 = vst.msk [vmem:[%s2580_s21 + $0x48] sm:$0xff] %vm250_vm0, %v2132_v23  ;;  %1476 = vst.msk [vmem:[%s2580_s21 + $0x50] sm:$0xff] %vm250_vm0, %v2132_v23 }
  0x6b   : > { %1880 = vmatmul.mubr.msk.f32.gmra.mxu0 %vm250_vm0, %v329_v6  ;;  %1477 = vst.msk [vmem:[%s2580_s21 + $0x58] sm:$0x3] %vm1467_vm2, %v2132_v23  ;;  %1480 = vst.msk [vmem:[%s2580_s21 + $0x70] sm:$0x3] %vm1467_vm2, %v2132_v23 }
  0x6c   : > { %1882 = vmatprep.mubr.msk.f32.mxu0 %vm250_vm0, %v330_v7  ;;  %1478 = vst.msk [vmem:[%s2580_s21 + $0x60] sm:$0xff] %vm250_vm0, %v2132_v23  ;;  %1479 = vst.msk [vmem:[%s2580_s21 + $0x68] sm:$0xff] %vm250_vm0, %v2132_v23 }
  0x6d   : > { %1968 = vmatmul.mubr.msk.f32.gmra.mxu1 %vm951_vm1, %v934_v2  ;;  %1481 = vst.msk [vmem:[%s2580_s21 + $0x78] sm:$0xff] %vm250_vm0, %v2132_v23  ;;  %1482 = vst.msk [vmem:[%s2580_s21 + $0x80] sm:$0xff] %vm250_vm0, %v2132_v23 }
  0x6e   : > { %1970 = vmatprep.mubr.msk.f32.mxu1 %vm951_vm1, %v935_v4  ;;  %1483 = vst.msk [vmem:[%s2580_s21 + $0x88] sm:$0x3] %vm1467_vm2, %v2132_v23  ;;  %1486 = vst.msk [vmem:[%s2580_s21 + $0xa0] sm:$0x3] %vm1467_vm2, %v2132_v23 }
  0x6f   : > { %1883 = vmatmul.mubr.msk.f32.gmra.mxu0 %vm250_vm0, %v331_v8  ;;  %1484 = vst.msk [vmem:[%s2580_s21 + $0x90] sm:$0xff] %vm250_vm0, %v2132_v23  ;;  %1485 = vst.msk [vmem:[%s2580_s21 + $0x98] sm:$0xff] %vm250_vm0, %v2132_v23 }
  0x70   : > { %1885 = vmatprep.mubr.msk.f32.mxu0 %vm250_vm0, %v332_v13  ;;  %1487 = vst.msk [vmem:[%s2580_s21 + $0xa8] sm:$0xff] %vm250_vm0, %v2132_v23  ;;  %1488 = vst.msk [vmem:[%s2580_s21 + $0xb0] sm:$0xff] %vm250_vm0, %v2132_v23 }
  0x71   : > { %1971 = vmatmul.mubr.msk.f32.gmra.mxu1 %vm951_vm1, %v936_v9  ;;  %1489 = vst.msk [vmem:[%s2580_s21 + $0xb8] sm:$0x3] %vm1467_vm2, %v2132_v23  ;;  %1492 = vst.msk [vmem:[%s2580_s21 + $0xd0] sm:$0x3] %vm1467_vm2, %v2132_v23 }
  0x72   : > { %1973 = vmatprep.mubr.msk.f32.mxu1 %vm951_vm1, %v937_v10  ;;  %1490 = vst.msk [vmem:[%s2580_s21 + $0xc0] sm:$0xff] %vm250_vm0, %v2132_v23  ;;  %1491 = vst.msk [vmem:[%s2580_s21 + $0xc8] sm:$0xff] %vm250_vm0, %v2132_v23 }
  0x73   : > { %1886 = vmatmul.mubr.msk.f32.gmra.mxu0 %vm250_vm0, %v333_v17  ;;  %1493 = vst.msk [vmem:[%s2580_s21 + $0xd8] sm:$0xff] %vm250_vm0, %v2132_v23  ;;  %1494 = vst.msk [vmem:[%s2580_s21 + $0xe0] sm:$0xff] %vm250_vm0, %v2132_v23 }
  0x74   : > { %1888 = vmatprep.mubr.msk.f32.mxu0 %vm250_vm0, %v334_v21  ;;  %1495 = vst.msk [vmem:[%s2580_s21 + $0xe8] sm:$0x3] %vm1467_vm2, %v2132_v23  ;;  %1498 = vst.msk [vmem:[%s2580_s21 + $0x100] sm:$0x3] %vm1467_vm2, %v2132_v23 }
  0x75   : > { %1974 = vmatmul.mubr.msk.f32.gmra.mxu1 %vm951_vm1, %v938_v12  ;;  %1496 = vst.msk [vmem:[%s2580_s21 + $0xf0] sm:$0xff] %vm250_vm0, %v2132_v23  ;;  %1497 = vst.msk [vmem:[%s2580_s21 + $0xf8] sm:$0xff] %vm250_vm0, %v2132_v23 }
  0x76   : > { %1976 = vmatprep.mubr.msk.f32.mxu1 %vm951_vm1, %v939_v14  ;;  %1499 = vst.msk [vmem:[%s2580_s21 + $0x108] sm:$0xff] %vm250_vm0, %v2132_v23  ;;  %1500 = vst.msk [vmem:[%s2580_s21 + $0x110] sm:$0xff] %vm250_vm0, %v2132_v23 }
  0x77   : > { %1889 = vmatmul.mubr.msk.f32.gmra.mxu0 %vm250_vm0, %v335_v25  ;;  %1501 = vst.msk [vmem:[%s2580_s21 + $0x118] sm:$0x3] %vm1467_vm2, %v2132_v23  ;;  %1504 = vst.msk [vmem:[%s2580_s21 + $0x130] sm:$0x3] %vm1467_vm2, %v2132_v23 }
  0x78   : > { %1891 = vmatprep.mubr.msk.f32.mxu0 %vm250_vm0, %v336_v29  ;;  %1502 = vst.msk [vmem:[%s2580_s21 + $0x120] sm:$0xff] %vm250_vm0, %v2132_v23  ;;  %1503 = vst.msk [vmem:[%s2580_s21 + $0x128] sm:$0xff] %vm250_vm0, %v2132_v23 }
  0x79   : > { %1977 = vmatmul.mubr.msk.f32.gmra.mxu1 %vm951_vm1, %v940_v15  ;;  %1505 = vst.msk [vmem:[%s2580_s21 + $0x138] sm:$0xff] %vm250_vm0, %v2132_v23  ;;  %1506 = vst.msk [vmem:[%s2580_s21 + $0x140] sm:$0xff] %vm250_vm0, %v2132_v23 }
  0x7a   : > { %1979 = vmatprep.mubr.msk.f32.mxu1 %vm951_vm1, %v941_v18  ;;  %1507 = vst.msk [vmem:[%s2580_s21 + $0x148] sm:$0x3] %vm1467_vm2, %v2132_v23  ;;  %1510 = vst.msk [vmem:[%s2580_s21 + $0x160] sm:$0x3] %vm1467_vm2, %v2132_v23 }
  0x7b   : > { %1892 = vmatmul.mubr.msk.f32.gmra.mxu0 %vm250_vm0, %v337_v33  ;;  %1508 = vst.msk [vmem:[%s2580_s21 + $0x150] sm:$0xff] %vm250_vm0, %v2132_v23  ;;  %1509 = vst.msk [vmem:[%s2580_s21 + $0x158] sm:$0xff] %vm250_vm0, %v2132_v23 }
  0x7c   : > { %1894 = vmatprep.mubr.msk.f32.mxu0 %vm250_vm0, %v338_v38  ;;  %1511 = vst.msk [vmem:[%s2580_s21 + $0x168] sm:$0xff] %vm250_vm0, %v2132_v23  ;;  %1512 = vst.msk [vmem:[%s2580_s21 + $0x170] sm:$0xff] %vm250_vm0, %v2132_v23 }
  0x7d   : > { %1980 = vmatmul.mubr.msk.f32.gmra.mxu1 %vm951_vm1, %v942_v19  ;;  %1513 = vst.msk [vmem:[%s2580_s21 + $0x178] sm:$0x3] %vm1467_vm2, %v2132_v23  ;;  %1516 = vst.msk [vmem:[%s2580_s21 + $0x190] sm:$0x3] %vm1467_vm2, %v2132_v23 }
  0x7e   : > { %1514 = vst.msk [vmem:[%s2580_s21 + $0x180] sm:$0xff] %vm250_vm0, %v2132_v23  ;;  %1515 = vst.msk [vmem:[%s2580_s21 + $0x188] sm:$0xff] %vm250_vm0, %v2132_v23 }
  0x7f   : > { %1895 = vmatmul.mubr.msk.f32.gmra.mxu0 %vm250_vm0, %v339_v43  ;;  %1517 = vst.msk [vmem:[%s2580_s21 + $0x198] sm:$0xff] %vm250_vm0, %v2132_v23  ;;  %1518 = vst.msk [vmem:[%s2580_s21 + $0x1a0] sm:$0xff] %vm250_vm0, %v2132_v23 }
  0x80   : > { %1897 = vmatprep.mubr.msk.f32.mxu0 %vm250_vm0, %v340_v47 }
  0x83   : > { %1898 = vmatmul.mubr.msk.f32.gmra.mxu0 %vm250_vm0, %v341_v51 }
  0x84   : > { %1900 = vmatprep.mubr.msk.f32.mxu0 %vm250_vm0, %v342_v55 }
  0x87   : > { %1901 = vmatmul.mubr.msk.f32.gmra.mxu0 %vm250_vm0, %v343_v59 }
  0x88   : > { %1903 = vmatprep.mubr.msk.f32.mxu0 %vm250_vm0, %v344_v63 }
  0x8b   : > { %1904 = vmatmul.mubr.msk.f32.gmra.mxu0 %vm250_vm0, %v345_v3 }
  0x8c   : > { %1906 = vmatprep.mubr.msk.f32.mxu0 %vm250_vm0, %v346_v11 }
  0x8f   : > { %1907 = vmatmul.mubr.msk.f32.gmra.mxu0 %vm250_vm0, %v347_v16 }
  0x90   : > { %1909 = vmatprep.mubr.msk.f32.mxu0 %vm250_vm0, %v348_v22 }
  0x93   : > { %1910 = vmatmul.mubr.msk.f32.gmra.mxu0 %vm250_vm0, %v349_v27 }
  0x94   : > { %1912 = vmatprep.mubr.msk.f32.mxu0 %vm250_vm0, %v350_v32 }
  0x97   : > { %1913 = vmatmul.mubr.msk.f32.gmra.mxu0 %vm250_vm0, %v351_v37 }
  0x98   : > { %1915 = vmatprep.mubr.msk.f32.mxu0 %vm250_vm0, %v352_v42 }
  0x9b   : > { %1916 = vmatmul.mubr.msk.f32.gmra.mxu0 %vm250_vm0, %v353_v48 }
 0x11f   : > { %v1872_v24 = vpop.f32.mrf.mxu0 }
 0x120   : > { %v1663_v26 = vmul.f32 -1.442695, %v1872_v24 }
 0x121   : > { %v528_v28 = vpop.f32.mrf.mxu0 }
 0x122   : > { %1995 = vpow2.f32 %v1663_v26  ;;  %v1662_v30 = vmul.f32 -1.442695, %v528_v28 }
 0x123   : > { %v1875_v31 = vpop.f32.mrf.mxu0 }
 0x124   : > { %1997 = vpow2.f32 %v1662_v30  ;;  %v1665_v34 = vmul.f32 -1.442695, %v1875_v31 }
 0x125   : > { %v538_v35 = vpop.f32.mrf.mxu0 }
 0x126   : > { %1999 = vpow2.f32 %v1665_v34  ;;  %v1664_v36 = vmul.f32 -1.442695, %v538_v35 }
 0x127   : > { %v1878_v39 = vpop.f32.mrf.mxu0 }
 0x128   : > { %2001 = vpow2.f32 %v1664_v36  ;;  %v1667_v40 = vmul.f32 -1.442695, %v1878_v39 }
 0x129   : > { %v548_v41 = vpop.f32.mrf.mxu0 }
 0x12a   : > { %2003 = vpow2.f32 %v1667_v40  ;;  %v1666_v44 = vmul.f32 -1.442695, %v548_v41 }
 0x12b   : > { %v1881_v45 = vpop.f32.mrf.mxu0 }
 0x12c   : > { %2005 = vpow2.f32 %v1666_v44  ;;  %v1669_v46 = vmul.f32 -1.442695, %v1881_v45 }
 0x12d   : > { %v558_v49 = vpop.f32.mrf.mxu0 }
 0x12e   : > { %2007 = vpow2.f32 %v1669_v46  ;;  %v1668_v50 = vmul.f32 -1.442695, %v558_v49 }
 0x12f   : > { %v1996_v52 = vpop.eup %1995  ;;  %v1884_v54 = vpop.f32.mrf.mxu0 }
 0x130   : > { %v784_v56 = vadd.f32 1.0, %v1996_v52  ;;  %2009 = vpow2.f32 %v1668_v50  ;;  %v1671_v57 = vmul.f32 -1.442695, %v1884_v54 }
 0x131   : > { %v1998_v60 = vpop.eup %1997  ;;  %v568_v61 = vpop.f32.mrf.mxu0 }
 0x132   : > { %v783_v5 = vadd.f32 1.0, %v1998_v60  ;;  %2011 = vpow2.f32 %v1671_v57  ;;  %v1670_v6 = vmul.f32 -1.442695, %v568_v61 }
 0x133   : > { %v2000_v7 = vpop.eup %1999  ;;  %v1887_v8 = vpop.f32.mrf.mxu0  ;;  %2013 = vrcp.f32 %v784_v56 }
 0x134   : > { %2015 = vrcp.f32 %v783_v5  ;;  %v786_v13 = vadd.f32 1.0, %v2000_v7  ;;  %v1673_v17 = vmul.f32 -1.442695, %v1887_v8 }
 0x135   : > { %v2002_v21 = vpop.eup %2001  ;;  %2017 = vpow2.f32 %v1670_v6  ;;  %v578_v25 = vpop.f32.mrf.mxu0 }
 0x136   : > { %v785_v29 = vadd.f32 1.0, %v2002_v21  ;;  %2019 = vpow2.f32 %v1673_v17  ;;  %v1672_v33 = vmul.f32 -1.442695, %v578_v25 }
 0x137   : > { %v2004_v38 = vpop.eup %2003  ;;  %v1890_v43 = vpop.f32.mrf.mxu0  ;;  %2021 = vrcp.f32 %v786_v13 }
 0x138   : > { %2023 = vrcp.f32 %v785_v29  ;;  %v788_v47 = vadd.f32 1.0, %v2004_v38  ;;  %v1675_v51 = vmul.f32 -1.442695, %v1890_v43 }
 0x139   : > { %v2006_v55 = vpop.eup %2005  ;;  %2025 = vpow2.f32 %v1672_v33  ;;  %v588_v59 = vpop.f32.mrf.mxu0 }
 0x13a   : > { %2027 = vrcp.f32 %v788_v47  ;;  %v787_v63 = vadd.f32 1.0, %v2006_v55  ;;  %v1674_v3 = vmul.f32 -1.442695, %v588_v59 }
 0x13b   : > { %v2008_v11 = vpop.eup %2007  ;;  %2029 = vpow2.f32 %v1675_v51  ;;  %v1893_v16 = vpop.f32.mrf.mxu0 }
 0x13c   : > { %2031 = vrcp.f32 %v787_v63  ;;  %v790_v22 = vadd.f32 1.0, %v2008_v11  ;;  %v1677_v27 = vmul.f32 -1.442695, %v1893_v16 }
 0x13d   : > { %v2010_v32 = vpop.eup %2009  ;;  %2033 = vpow2.f32 %v1674_v3  ;;  %v598_v37 = vpop.f32.mrf.mxu0 }
 0x13e   : > { %2035 = vrcp.f32 %v790_v22  ;;  %v789_v42 = vadd.f32 1.0, %v2010_v32  ;;  %v1676_v48 = vmul.f32 -1.442695, %v598_v37 }
 0x13f   : > { %v2012_v53 = vpop.eup %2011  ;;  %2037 = vpow2.f32 %v1677_v27  ;;  %v1896_v58 = vpop.f32.mrf.mxu0 }
 0x140   : > { %v2014_v62 = vpop.eup %2013  ;;  %2039 = vrcp.f32 %v789_v42  ;;  %v792_v0 = vadd.f32 1.0, %v2012_v53  ;;  %v1679_v1 = vmul.f32 -1.442695, %v1896_v58 }
 0x141   : > { %v2016_v2 = vpop.eup %2015  ;;  %2041 = vpow2.f32 %v1676_v48  ;;  %v608_v4 = vpop.f32.mrf.mxu0  ;;  %v880_v9 = vadd.f32 1.0, %v2014_v62 }
 0x142   : > { %v2018_v10 = vpop.eup %2017  ;;  %2043 = vrcp.f32 %v792_v0  ;;  %v1678_v12 = vmul.f32 -1.442695, %v608_v4  ;;  %v879_v28 = vadd.f32 1.0, %v2016_v2 }
 0x143   : > { %v2020_v14 = vpop.eup %2019  ;;  %v791_v15 = vadd.f32 1.0, %v2018_v10  ;;  %2045 = vpow2.f32 %v1679_v1  ;;  %1280 = vperm.xlu0 %1993, %v880_v9   ;;  %v1899_v18 = vpop.f32.mrf.mxu0 }
 0x144   : > { %v2022_v19 = vpop.eup %2021  ;;  %v794_v20 = vadd.f32 1.0, %v2020_v14  ;;  %2047 = vpow2.f32 %v1678_v12  ;;  %v1681_v23 = vmul.f32 -1.442695, %v1899_v18 }
 0x145   : > { %v2024_v24 = vpop.eup %2023  ;;  %2049 = vrcp.f32 %v791_v15  ;;  %v618_v26 = vpop.f32.mrf.mxu0  ;;  %v882_v30 = vadd.f32 1.0, %v2022_v19 }
 0x146   : > { %v2026_v31 = vpop.eup %2025  ;;  %2051 = vrcp.f32 %v794_v20  ;;  %v1680_v34 = vmul.f32 -1.442695, %v618_v26  ;;  %v881_v49 = vadd.f32 1.0, %v2024_v24 }
 0x147   : > { %v2028_v35 = vpop.eup %2027  ;;  %v793_v36 = vadd.f32 1.0, %v2026_v31  ;;  %2053 = vpow2.f32 %v1681_v23  ;;  %1275 = vperm.xlu0 %1993, %v879_v28   ;;  %1290 = vperm.xlu1 %1994, %v882_v30   ;;  %v1902_v39 = vpop.f32.mrf.mxu0 }
 0x148   : > { %v2030_v40 = vpop.eup %2029  ;;  %2055 = vpow2.f32 %v1680_v34  ;;  %v1683_v41 = vmul.f32 -1.442695, %v1902_v39  ;;  %v884_v13 = vadd.f32 1.0, %v2028_v35 }
 0x149   : > { %v2032_v44 = vpop.eup %2031  ;;  %2057 = vrcp.f32 %v793_v36  ;;  %v796_v45 = vadd.f32 1.0, %v2030_v40  ;;  %v628_v46 = vpop.f32.mrf.mxu0 }
 0x14a   : > { %v2034_v50 = vpop.eup %2033  ;;  %2059 = vpow2.f32 %v1683_v41  ;;  %v1682_v52 = vmul.f32 -1.442695, %v628_v46  ;;  %v883_v54 = vadd.f32 1.0, %v2032_v44 }
 0x14b   : > { %v2036_v56 = vpop.eup %2035  ;;  %2061 = vrcp.f32 %v796_v45  ;;  %v795_v57 = vadd.f32 1.0, %v2034_v50  ;;  %1285 = vperm.xlu1 %1994, %v881_v49   ;;  %v1905_v60 = vpop.f32.mrf.mxu0 }
 0x14c   : > { %v2038_v61 = vpop.eup %2037  ;;  %2063 = vpow2.f32 %v1682_v52  ;;  %v1685_v5 = vmul.f32 -1.442695, %v1905_v60  ;;  %1295 = vperm.xlu0 %1993, %v883_v54   ;;  %v886_v63 = vadd.f32 1.0, %v2036_v56 }
 0x14d   : > { %v2040_v6 = vpop.eup %2039  ;;  %2065 = vrcp.f32 %v795_v57  ;;  %v798_v7 = vadd.f32 1.0, %v2038_v61  ;;  %v638_v8 = vpop.f32.mrf.mxu0 }
 0x14e   : > { %v2042_v17 = vpop.eup %2041  ;;  %2067 = vpow2.f32 %v1685_v5  ;;  %v1684_v21 = vmul.f32 -1.442695, %v638_v8  ;;  %v885_v25 = vadd.f32 1.0, %v2040_v6 }
 0x14f   : > { %v2044_v29 = vpop.eup %2043  ;;  %2069 = vrcp.f32 %v798_v7  ;;  %v797_v33 = vadd.f32 1.0, %v2042_v17  ;;  %1300 = vperm.xlu1 %1994, %v884_v13   ;;  %v1908_v38 = vpop.f32.mrf.mxu0 }
 0x150   : > { %v2046_v43 = vpop.eup %2045  ;;  %2071 = vpow2.f32 %v1684_v21  ;;  %v1687_v47 = vmul.f32 -1.442695, %v1908_v38  ;;  %1305 = vperm.xlu0 %1993, %v885_v25   ;;  %v888_v62 = vadd.f32 1.0, %v2044_v29 }
 0x151   : > { %v2048_v51 = vpop.eup %2047  ;;  %2073 = vrcp.f32 %v797_v33  ;;  %v800_v55 = vadd.f32 1.0, %v2046_v43  ;;  %v648_v59 = vpop.f32.mrf.mxu0 }
 0x152   : > { %v2050_v3 = vpop.eup %2049  ;;  %v799_v11 = vadd.f32 1.0, %v2048_v51  ;;  %2075 = vpow2.f32 %v1687_v47  ;;  %v1686_v16 = vmul.f32 -1.442695, %v648_v59 }
 0x153   : > { %v2052_v22 = vpop.eup %2051  ;;  %2077 = vrcp.f32 %v800_v55  ;;  %1310 = vperm.xlu1 %1994, %v886_v63   ;;  %v1911_v27 = vpop.f32.mrf.mxu0  ;;  %v887_v32 = vadd.f32 1.0, %v2050_v3 }
 0x154   : > { %v2054_v37 = vpop.eup %2053  ;;  %2079 = vrcp.f32 %v799_v11  ;;  %v1689_v42 = vmul.f32 -1.442695, %v1911_v27  ;;  %v890_v20 = vadd.f32 1.0, %v2052_v22 }
 0x155   : > { %v2056_v48 = vpop.eup %2055  ;;  %v802_v53 = vadd.f32 1.0, %v2054_v37  ;;  %2081 = vpow2.f32 %v1686_v16  ;;  %1315 = vperm.xlu0 %1993, %v887_v32   ;;  %v658_v58 = vpop.f32.mrf.mxu0 }
 0x156   : > { %v2058_v0 = vpop.eup %2057  ;;  %v801_v1 = vadd.f32 1.0, %v2056_v48  ;;  %2083 = vpow2.f32 %v1689_v42  ;;  %v1688_v2 = vmul.f32 -1.442695, %v658_v58 }
 0x157   : > { %v2060_v4 = vpop.eup %2059  ;;  %2085 = vrcp.f32 %v802_v53  ;;  %1320 = vperm.xlu1 %1994, %v888_v62   ;;  %v1914_v9 = vpop.f32.mrf.mxu0  ;;  %v889_v10 = vadd.f32 1.0, %v2058_v0 }
 0x158   : > { %v2062_v12 = vpop.eup %2061  ;;  %2087 = vrcp.f32 %v801_v1  ;;  %v804_v14 = vadd.f32 1.0, %v2060_v4  ;;  %v1691_v15 = vmul.f32 -1.442695, %v1914_v9 }
 0x159   : > { %v2064_v18 = vpop.eup %2063  ;;  %2089 = vpow2.f32 %v1688_v2  ;;  %1325 = vperm.xlu0 %1993, %v889_v10   ;;  %v668_v19 = vpop.f32.mrf.mxu0  ;;  %v892_v41 = vadd.f32 1.0, %v2062_v12 }
 0x15a   : > { %v2066_v23 = vpop.eup %2065  ;;  %2091 = vrcp.f32 %v804_v14  ;;  %v803_v24 = vadd.f32 1.0, %v2064_v18  ;;  %v1690_v26 = vmul.f32 -1.442695, %v668_v19  ;;  %v1936_v19 = vpop.f32.mrf.mxu1 }
 0x15b   : > { %v2068_v28 = vpop.eup %2067  ;;  %2093 = vpow2.f32 %v1691_v15  ;;  %1330 = vperm.xlu1 %1994, %v890_v20   ;;  %v1917_v30 = vpop.f32.mrf.mxu0  ;;  %v891_v31 = vadd.f32 1.0, %v2066_v23 }
 0x15c   : > { %v2070_v34 = vpop.eup %2069  ;;  %2095 = vrcp.f32 %v803_v24  ;;  %v806_v35 = vadd.f32 1.0, %v2068_v28  ;;  %v1693_v36 = vmul.f32 -1.442695, %v1917_v30 }
 0x15d   : > { %v2072_v39 = vpop.eup %2071  ;;  %2097 = vpow2.f32 %v1690_v26  ;;  %1335 = vperm.xlu0 %1993, %v891_v31   ;;  %v678_v40 = vpop.f32.mrf.mxu0  ;;  %v894_v57 = vadd.f32 1.0, %v2070_v34 }
 0x15e   : > { %v2074_v44 = vpop.eup %2073  ;;  %2099 = vrcp.f32 %v806_v35  ;;  %v805_v45 = vadd.f32 1.0, %v2072_v39  ;;  %v1692_v46 = vmul.f32 -1.442695, %v678_v40  ;;  %v1114_v26 = vpop.f32.mrf.mxu1 }
 0x15f   : > { %v2076_v49 = vpop.eup %2075  ;;  %2101 = vpow2.f32 %v1693_v36  ;;  %1340 = vperm.xlu1 %1994, %v892_v41   ;;  %v893_v50 = vadd.f32 1.0, %v2074_v44 }
 0x160   : > { %v2078_v52 = vpop.eup %2077  ;;  %2103 = vrcp.f32 %v805_v45  ;;  %v808_v54 = vadd.f32 1.0, %v2076_v49  ;;  %v1939_v28 = vpop.f32.mrf.mxu1 }
 0x161   : > { %v2080_v56 = vpop.eup %2079  ;;  %2105 = vpow2.f32 %v1692_v46  ;;  %1345 = vperm.xlu0 %1993, %v893_v50   ;;  %v896_v17 = vadd.f32 1.0, %v2078_v52 }
 0x162   : > { %v2082_v60 = vpop.eup %2081  ;;  %v895_v61 = vadd.f32 1.0, %v2080_v56  ;;  %2107 = vrcp.f32 %v808_v54  ;;  %v1124_v30 = vpop.f32.mrf.mxu1 }
 0x163   : > { %v2084_v5 = vpop.eup %2083  ;;  %v807_v6 = vadd.f32 1.0, %v2082_v60  ;;  %1350 = vperm.xlu1 %1994, %v894_v57  }
 0x164   : > { %v2086_v7 = vpop.eup %2085  ;;  %v810_v8 = vadd.f32 1.0, %v2084_v5  ;;  %v1942_v31 = vpop.f32.mrf.mxu1 }
 0x165   : > { %v2088_v13 = vpop.eup %2087  ;;  %2109 = vrcp.f32 %v807_v6  ;;  %1355 = vperm.xlu0 %1993, %v895_v61   ;;  %v898_v51 = vadd.f32 1.0, %v2086_v7 }
 0x166   : > { %v2090_v21 = vpop.eup %2089  ;;  %v897_v25 = vadd.f32 1.0, %v2088_v13  ;;  %2111 = vrcp.f32 %v810_v8  ;;  %v1134_v34 = vpop.f32.mrf.mxu1 }
 0x167   : > { %v2092_v29 = vpop.eup %2091  ;;  %v809_v33 = vadd.f32 1.0, %v2090_v21  ;;  %1360 = vperm.xlu1 %1994, %v896_v17  }
 0x168   : > { %v2094_v38 = vpop.eup %2093  ;;  %v900_v27 = vadd.f32 1.0, %v2092_v29  ;;  %v1945_v35 = vpop.f32.mrf.mxu1 }
 0x169   : > { %v2096_v43 = vpop.eup %2095  ;;  %2113 = vrcp.f32 %v809_v33  ;;  %v812_v47 = vadd.f32 1.0, %v2094_v38  ;;  %1365 = vperm.xlu0 %1993, %v897_v25  }
 0x16a   : > { %v2098_v55 = vpop.eup %2097  ;;  %v899_v59 = vadd.f32 1.0, %v2096_v43  ;;  %v1144_v36 = vpop.f32.mrf.mxu1 }
 0x16b   : > { %v2100_v63 = vpop.eup %2099  ;;  %v811_v3 = vadd.f32 1.0, %v2098_v55  ;;  %1370 = vperm.xlu1 %1994, %v898_v51   ;;  %2115 = vrcp.f32 %v812_v47 }
 0x16c   : > { %v2102_v11 = vpop.eup %2101  ;;  %v902_v53 = vadd.f32 1.0, %v2100_v63  ;;  %v1948_v39 = vpop.f32.mrf.mxu1 }
 0x16d   : > { %v2104_v16 = vpop.eup %2103  ;;  %2117 = vrcp.f32 %v811_v3  ;;  %v814_v22 = vadd.f32 1.0, %v2102_v11  ;;  %1375 = vperm.xlu0 %1993, %v899_v59  }
 0x16e   : > { %v2106_v32 = vpop.eup %2105  ;;  %v901_v37 = vadd.f32 1.0, %v2104_v16  ;;  %v1154_v40 = vpop.f32.mrf.mxu1 }
 0x16f   : > { %v813_v42 = vadd.f32 1.0, %v2106_v32  ;;  %1380 = vperm.xlu1 %1994, %v900_v27   ;;  %2119 = vrcp.f32 %v814_v22  ;;  %v2108_v48 = vpop.eup %2107 }
 0x170   : > { %v904_v1 = vadd.f32 1.0, %v2108_v48  ;;  %v1951_v41 = vpop.f32.mrf.mxu1 }
 0x171   : > { %2121 = vrcp.f32 %v813_v42  ;;  %1385 = vperm.xlu0 %1993, %v901_v37  }
 0x172   : > { %v2110_v58 = vpop.eup %2109  ;;  %v1164_v44 = vpop.f32.mrf.mxu1 }
 0x173   : > { %1390 = vperm.xlu1 %1994, %v902_v53   ;;  %v903_v62 = vadd.f32 1.0, %v2110_v58  ;;  %v2112_v0 = vpop.eup %2111 }
 0x174   : > { %v906_v10 = vadd.f32 1.0, %v2112_v0  ;;  %v1954_v45 = vpop.f32.mrf.mxu1 }
 0x175   : > { %1395 = vperm.xlu0 %1993, %v903_v62  }
 0x176   : > { %v2114_v2 = vpop.eup %2113  ;;  %v1174_v46 = vpop.f32.mrf.mxu1 }
 0x177   : > { %1400 = vperm.xlu1 %1994, %v904_v1   ;;  %v905_v4 = vadd.f32 1.0, %v2114_v2 }
 0x178   : > { %v2116_v9 = vpop.eup %2115  ;;  %v1957_v49 = vpop.f32.mrf.mxu1 }
 0x179   : > { %1405 = vperm.xlu0 %1993, %v905_v4   ;;  %v908_v18 = vadd.f32 1.0, %v2116_v9 }
 0x17a   : > { %v2118_v12 = vpop.eup %2117  ;;  %v1184_v50 = vpop.f32.mrf.mxu1 }
 0x17b   : > { %1410 = vperm.xlu1 %1994, %v906_v10   ;;  %v907_v14 = vadd.f32 1.0, %v2118_v12 }
 0x17c   : > { %v2120_v15 = vpop.eup %2119  ;;  %v1960_v52 = vpop.f32.mrf.mxu1 }
 0x17d   : > { %1415 = vperm.xlu0 %1993, %v907_v14   ;;  %v910_v24 = vadd.f32 1.0, %v2120_v15 }
 0x17e   : > { %v2122_v20 = vpop.eup %2121  ;;  %v1194_v57 = vpop.f32.mrf.mxu1 }
 0x17f   : > { %1420 = vperm.xlu1 %1994, %v908_v18   ;;  %v909_v23 = vadd.f32 1.0, %v2122_v20 }
 0x180   : > { %v1963_v8 = vpop.f32.mrf.mxu1 }
 0x181   : > { %1425 = vperm.xlu0 %1993, %v909_v23  }
 0x182   : > { %v1204_v29 = vpop.f32.mrf.mxu1 }
 0x183   : > { %1430 = vperm.xlu1 %1994, %v910_v24  }
 0x184   : > { %v1966_v51 = vpop.f32.mrf.mxu1 }
 0x186   : > { %v1214_v11 = vpop.f32.mrf.mxu1 }
 0x188   : > { %v1969_v37 = vpop.f32.mrf.mxu1 }
 0x18a   : > { %v1224_v62 = vpop.f32.mrf.mxu1 }
 0x18c   : > { %v1972_v9 = vpop.f32.mrf.mxu1 }
 0x18e   : > { %v1234_v18 = vpop.f32.mrf.mxu1 }
 0x1be   : > { %v1281_v54 = vpop.permute.xlu0 %1280 }
 0x1bf   : > { %v1434_v56 = vmul.f32 %v1936_v19, %v1281_v54 }
 0x1c1   : > { %1727 = vst.msk [vmem:[%s2580_s21 + $0x21] sm:$0xff] %vm250_vm0, %v1434_v56 }
 0x1c2   : > { %v1276_v60 = vpop.permute.xlu0 %1275  ;;  %v1291_v61 = vpop.permute.xlu1 %1290 }
 0x1c3   : > { %v1433_v5 = vmul.f32 %v1276_v60, %v1114_v26  ;;  %v1436_v6 = vmul.f32 %v1939_v28, %v1291_v61  ;;  %v1975_v26 = vpop.f32.mrf.mxu1 }
 0x1c5   : > { %1726 = vst.msk [vmem:[%s2580_s21 + $0x19] sm:$0xff] %vm250_vm0, %v1433_v5  ;;  %1729 = vst.msk [vmem:[%s2580_s21 + $0x39] sm:$0xff] %vm250_vm0, %v1436_v6 }
 0x1c6   : > { %v1286_v7 = vpop.permute.xlu1 %1285 }
 0x1c7   : > { %v1435_v13 = vmul.f32 %v1286_v7, %v1124_v30  ;;  %v1296_v17 = vpop.permute.xlu0 %1295 }
 0x1c8   : > { %v1437_v21 = vmul.f32 %v1296_v17, %v1134_v34 }
 0x1c9   : > { %1728 = vst.msk [vmem:[%s2580_s21 + $0x31] sm:$0xff] %vm250_vm0, %v1435_v13 }
 0x1ca   : > { %1730 = vst.msk [vmem:[%s2580_s21 + $0x49] sm:$0xff] %vm250_vm0, %v1437_v21  ;;  %v1301_v25 = vpop.permute.xlu1 %1300 }
 0x1cb   : > { %v1438_v33 = vmul.f32 %v1942_v31, %v1301_v25  ;;  %v1306_v38 = vpop.permute.xlu0 %1305 }
 0x1cc   : > { %v1439_v43 = vmul.f32 %v1306_v38, %v1144_v36 }
 0x1cd   : > { %1731 = vst.msk [vmem:[%s2580_s21 + $0x51] sm:$0xff] %vm250_vm0, %v1438_v33 }
 0x1ce   : > { %1732 = vst.msk [vmem:[%s2580_s21 + $0x61] sm:$0xff] %vm250_vm0, %v1439_v43  ;;  %v1311_v47 = vpop.permute.xlu1 %1310 }
 0x1cf   : > { %v1440_v55 = vmul.f32 %v1945_v35, %v1311_v47  ;;  %v1244_v35 = vpop.f32.mrf.mxu1 }
 0x1d0   : > { %v1316_v59 = vpop.permute.xlu0 %1315 }
 0x1d1   : > { %1733 = vst.msk [vmem:[%s2580_s21 + $0x69] sm:$0xff] %vm250_vm0, %v1440_v55  ;;  %v1441_v63 = vmul.f32 %v1316_v59, %v1154_v40 }
 0x1d2   : > { %v1321_v3 = vpop.permute.xlu1 %1320 }
 0x1d3   : > { %1734 = vst.msk [vmem:[%s2580_s21 + $0x79] sm:$0xff] %vm250_vm0, %v1441_v63  ;;  %v1442_v16 = vmul.f32 %v1948_v39, %v1321_v3 }
 0x1d4   : > { %v1326_v22 = vpop.permute.xlu0 %1325 }
 0x1d5   : > { %1735 = vst.msk [vmem:[%s2580_s21 + $0x81] sm:$0xff] %vm250_vm0, %v1442_v16  ;;  %v1443_v27 = vmul.f32 %v1326_v22, %v1164_v44  ;;  %v1978_v44 = vpop.f32.mrf.mxu1 }
 0x1d6   : > { %v1331_v32 = vpop.permute.xlu1 %1330 }
 0x1d7   : > { %1736 = vst.msk [vmem:[%s2580_s21 + $0x91] sm:$0xff] %vm250_vm0, %v1443_v27  ;;  %v1444_v42 = vmul.f32 %v1951_v41, %v1331_v32 }
 0x1d8   : > { %v1336_v48 = vpop.permute.xlu0 %1335 }
 0x1d9   : > { %1737 = vst.msk [vmem:[%s2580_s21 + $0x99] sm:$0xff] %vm250_vm0, %v1444_v42  ;;  %v1445_v53 = vmul.f32 %v1336_v48, %v1174_v46 }
 0x1da   : > { %v1341_v58 = vpop.permute.xlu1 %1340 }
 0x1db   : > { %1738 = vst.msk [vmem:[%s2580_s21 + $0xa9] sm:$0xff] %vm250_vm0, %v1445_v53  ;;  %v1446_v0 = vmul.f32 %v1954_v45, %v1341_v58 }
 0x1dc   : > { %v1346_v1 = vpop.permute.xlu0 %1345 }
 0x1dd   : > { %1739 = vst.msk [vmem:[%s2580_s21 + $0xb1] sm:$0xff] %vm250_vm0, %v1446_v0  ;;  %v1447_v2 = vmul.f32 %v1346_v1, %v1184_v50 }
 0x1de   : > { %v1351_v4 = vpop.permute.xlu1 %1350 }
 0x1df   : > { %1740 = vst.msk [vmem:[%s2580_s21 + $0xc1] sm:$0xff] %vm250_vm0, %v1447_v2  ;;  %v1448_v10 = vmul.f32 %v1957_v49, %v1351_v4 }
 0x1e0   : > { %v1356_v12 = vpop.permute.xlu0 %1355 }
 0x1e1   : > { %1741 = vst.msk [vmem:[%s2580_s21 + $0xc9] sm:$0xff] %vm250_vm0, %v1448_v10  ;;  %v1449_v14 = vmul.f32 %v1356_v12, %v1194_v57 }
 0x1e2   : > { %v1361_v15 = vpop.permute.xlu1 %1360 }
 0x1e3   : > { %1742 = vst.msk [vmem:[%s2580_s21 + $0xd9] sm:$0xff] %vm250_vm0, %v1449_v14  ;;  %v1450_v19 = vmul.f32 %v1960_v52, %v1361_v15  ;;  %v1254_v52 = vpop.f32.mrf.mxu1 }
 0x1e4   : > { %v1366_v20 = vpop.permute.xlu0 %1365 }
 0x1e5   : > { %1743 = vst.msk [vmem:[%s2580_s21 + $0xe1] sm:$0xff] %vm250_vm0, %v1450_v19  ;;  %v1451_v23 = vmul.f32 %v1366_v20, %v1204_v29  ;;  %v1981_v61 = vpop.f32.mrf.mxu1 }
 0x1e6   : > { %v1371_v24 = vpop.permute.xlu1 %1370 }
 0x1e7   : > { %1744 = vst.msk [vmem:[%s2580_s21 + $0xf1] sm:$0xff] %vm250_vm0, %v1451_v23  ;;  %v1452_v28 = vmul.f32 %v1963_v8, %v1371_v24  ;;  %v1264_v13 = vpop.f32.mrf.mxu1 }
 0x1e8   : > { %v1376_v30 = vpop.permute.xlu0 %1375 }
 0x1e9   : > { %1745 = vst.msk [vmem:[%s2580_s21 + $0xf9] sm:$0xff] %vm250_vm0, %v1452_v28  ;;  %v1453_v31 = vmul.f32 %v1376_v30, %v1214_v11 }
 0x1ea   : > { %v1381_v34 = vpop.permute.xlu1 %1380 }
 0x1eb   : > { %1746 = vst.msk [vmem:[%s2580_s21 + $0x109] sm:$0xff] %vm250_vm0, %v1453_v31  ;;  %v1454_v36 = vmul.f32 %v1966_v51, %v1381_v34 }
 0x1ec   : > { %v1386_v39 = vpop.permute.xlu0 %1385 }
 0x1ed   : > { %1747 = vst.msk [vmem:[%s2580_s21 + $0x111] sm:$0xff] %vm250_vm0, %v1454_v36  ;;  %v1455_v40 = vmul.f32 %v1386_v39, %v1224_v62 }
 0x1ee   : > { %v1391_v41 = vpop.permute.xlu1 %1390 }
 0x1ef   : > { %1748 = vst.msk [vmem:[%s2580_s21 + $0x121] sm:$0xff] %vm250_vm0, %v1455_v40  ;;  %v1456_v45 = vmul.f32 %v1969_v37, %v1391_v41 }
 0x1f0   : > { %v1396_v46 = vpop.permute.xlu0 %1395 }
 0x1f1   : > { %1749 = vst.msk [vmem:[%s2580_s21 + $0x129] sm:$0xff] %vm250_vm0, %v1456_v45  ;;  %v1457_v49 = vmul.f32 %v1396_v46, %v1234_v18 }
 0x1f2   : > { %v1401_v50 = vpop.permute.xlu1 %1400 }
 0x1f3   : > { %1750 = vst.msk [vmem:[%s2580_s21 + $0x139] sm:$0xff] %vm250_vm0, %v1457_v49  ;;  %v1458_v54 = vmul.f32 %v1972_v9, %v1401_v50 }
 0x1f4   : > { %v1406_v56 = vpop.permute.xlu0 %1405 }
 0x1f5   : > { %1751 = vst.msk [vmem:[%s2580_s21 + $0x141] sm:$0xff] %vm250_vm0, %v1458_v54  ;;  %v1459_v57 = vmul.f32 %v1406_v56, %v1244_v35 }
 0x1f6   : > { %v1411_v60 = vpop.permute.xlu1 %1410 }
 0x1f7   : > { %1752 = vst.msk [vmem:[%s2580_s21 + $0x151] sm:$0xff] %vm250_vm0, %v1459_v57  ;;  %v1460_v5 = vmul.f32 %v1975_v26, %v1411_v60 }
 0x1f8   : > { %v1416_v6 = vpop.permute.xlu0 %1415 }
 0x1f9   : > { %1753 = vst.msk [vmem:[%s2580_s21 + $0x159] sm:$0xff] %vm250_vm0, %v1460_v5  ;;  %v1461_v7 = vmul.f32 %v1416_v6, %v1254_v52 }
 0x1fa   : > { %v1421_v8 = vpop.permute.xlu1 %1420 }
 0x1fb   : > { %1754 = vst.msk [vmem:[%s2580_s21 + $0x169] sm:$0xff] %vm250_vm0, %v1461_v7  ;;  %v1462_v17 = vmul.f32 %v1978_v44, %v1421_v8 }
 0x1fc   : > { %v1426_v21 = vpop.permute.xlu0 %1425 }
 0x1fd   : > { %1755 = vst.msk [vmem:[%s2580_s21 + $0x171] sm:$0xff] %vm250_vm0, %v1462_v17  ;;  %v1463_v25 = vmul.f32 %v1426_v21, %v1264_v13 }
 0x1fe   : > { %v1431_v29 = vpop.permute.xlu1 %1430 }
 0x1ff   : > { %1756 = vst.msk [vmem:[%s2580_s21 + $0x181] sm:$0xff] %vm250_vm0, %v1463_v25  ;;  %v1464_v33 = vmul.f32 %v1981_v61, %v1431_v29 }
 0x201   : > { %1757 = vst.msk [vmem:[%s2580_s21 + $0x189] sm:$0xff] %vm250_vm0, %v1464_v33 }
 0x202 PF: > { %s14_s15 = sadd.s32 1, %s2129_s15  }
 0x203   : > { %p11_p4 = scmp.ge.s32.totalorder %s14_s15, 4  }
 0x205   :  { %13 = sbr.rel (!%p11_p4) target bundleno = 1 (0x1), region = 70 }

// kernel: hiformer1_forward.11
= control target key start
LH: loop header
LB: loop body
LE: loop exit
PB: predicated region body
PF: predicated region fallthrough
CT: control target
= control target key end

     0   :  { %8 = vsyncpa [#allocation3], 0  ;;  %s910_s0 = inlined_call_operand.vmem [shape: f32[2,16,16], index: 0, kind: input, shape index: {}]   ;;  %s911_s1 = inlined_call_operand.vmem [shape: f32[64,16], index: 1, kind: input, shape index: {}]   ;;  %s912_s2 = inlined_call_operand.vmem [shape: f32[16,64], index: 2, kind: input, shape index: {}]   ;;  %s913_s3 = inlined_call_operand.hbm [shape: f32[2,64,64], index: 3, kind: output, shape index: {}]  }
   0x1   :  { %10 = vsyncpa [#allocation3 + $0x1], 0  ;;  %s756_s12 = smov 0   ;;  %s758_s13 = smov 0  }
   0x2   :  { %s760_s14 = smov 0   ;;  %s762_s15 = smov 0  }
   0x3 LB: > { %s777_s16 = sadd.s32 4294967295, %s731_s15   ;;  %s525_s17 = sadd.s32 4294967294, %s731_s15   ;;  %s731_s15 = sphi %s762_s15, %s919_s15   ;;  %s727_s14 = sphi %s760_s14, %s918_s14   ;;  %s723_s13 = sphi %s758_s13, %s917_s13   ;;  %s719_s12 = sphi %s756_s12, %s916_s12  }
   0x4   : > { %s781_s18 = sadd.s32 1, %s731_s15   ;;  %s91_s19 = sadd.s32 1, %s727_s14 }
   0x5   : > { %s88_s20 = ssub.s32 %s731_s15, %s781_s18  ;;  %p101_p0 = scmp.ne.s32.totalorder %s727_s14, %s723_s13 }
   0x6   : > { %p89_p1 = scmp.eq.s32.totalorder %s88_s20, 0  ;;  %p102_p2 = scmp.eq.s32.totalorder %s777_s16, 1 }
   0x7   : > { %p107_p3 = scmp.ne.s32.totalorder %s723_s13, %s719_s12  ;;  %p108_p4 = scmp.eq.s32.totalorder %s525_s17, 1 }
   0x8   : > { %s792_s21 = scalar_select %p89_p1, %s727_s14, %s91_s19  }
   0x9   : > { %p794_p5 = por %p102_p2, %p101_p0  ;;  %p798_p6 = por %p108_p4, %p107_p3 }
   0xa   : > { %p528_p7 = scmp.ge.s32.totalorder %s731_s15, 1  ;;  %p140_p8 = scmp.lt.s32.totalorder %s731_s15, 3 }
   0xc   : > { %p141_p9 = pnand %p528_p7, %p140_p8 }
   0xd   : > { %p164_p10 = scmp.lt.s32.totalorder (!%p141_p9), %s777_s16, 1  ;;  %s161_s4 = sand.u32 (!%p141_p9), 1, %s723_s13  }
   0xe   : > { %144 = sbr.rel (%p141_p9) target bundleno = 471 (0x1d7), region = 32  ;;  %s556_s7 = sshll.u32 (!%p141_p9), %s777_s16, 10 }
   0xf   : > { %s862_s11 = scalar_lea.hbm (!%p141_p9), %s913_s3, %s556_s7  ;;  %s733_s19 = smov (!%p141_p9), [#allocation2]  }
  0x10   : > { %s675_s20 = sshll.u32 (!%p141_p9), %s733_s19, 4  ;;  %s676_s20 = int_to_ptr.vmem [resolvable:$false] %s675_s20 }
  0x11   : > { %s677_s24 = scalar_lea.vmem (!%p141_p9), %s676_s20, 2048 }
  0x13   : > { %v172_v0 = vld [vmem:[%s912_s2 + $0x8] sm:$0xff]  ;;  %v171_v1 = vld [vmem:[%s912_s2] sm:$0xff]  ;;  %s165_s28 = scalar_select %p164_p10, %s777_s16, 1  ;;  %vm173_vm0 = vcmask 130048   ;;  %v257_v4 = vld [vmem:[%s911_s1 + $0x10] sm:$0xff]  ;;  %vm440_vm1 = vcmask 523264  }
  0x14   : > { %571 = vmatprep.subr.mxu0 %v172_v0  ;;  %585 = vmatprep.mubr.msk.f32.mxu1 %vm173_vm0, %v257_v4  ;;  %v255_v5 = vld [vmem:[%s911_s1] sm:$0xff]  ;;  %v258_v8 = vld [vmem:[%s911_s1 + $0x18] sm:$0xff]  ;;  %v256_v9 = vld [vmem:[%s911_s1 + $0x8] sm:$0xff]  ;;  %s870_s16 = scalar_lea.sflag [#allocation3], %s161_s4 }
  0x15   : > { %572 = vmatpush3.msra.mxu0 %v172_v0  ;;  %s555_s29 = sshll.u32 %s165_s28, 4  ;;  %v259_v10 = vld [vmem:[%s911_s1 + $0x20] sm:$0xff]  ;;  %v260_v11 = vld [vmem:[%s911_s1 + $0x28] sm:$0xff]  ;;  %v261_v12 = vld [vmem:[%s911_s1 + $0x30] sm:$0xff] }
  0x16   : > { %573 = vmatprep.subr.mxu0 %v171_v1  ;;  %s168_s5 = scalar_lea.vmem %s910_s0, %s555_s29  ;;  %v262_v13 = vld [vmem:[%s911_s1 + $0x38] sm:$0xff] }
  0x17   : > { %574 = vmatpush3.msra.mxu0 %v171_v1  ;;  %v169_v2 = vld [vmem:[%s168_s5] sm:$0xff]  ;;  %v170_v3 = vld [vmem:[%s168_s5 + $0x8] sm:$0xff]  ;;  %s529_s5 = sshll.u32 %s161_s4, 6 }
  0x18   : > { %575 = vmatprep.mubr.msk.f32.mxu0 %vm173_vm0, %v169_v2  ;;  %s163_s6 = scalar_lea.vmem [#allocation2], %s529_s5 }
  0x19   : > { %576 = vmatmul.mubr.msk.f32.vlgmr.msra.gmra.mxu0 %vm173_vm0, %v170_v3  ;;  %s463_s8 = sshll.u32 %s163_s6, 4  ;;  %s864_s8 = int_to_ptr.vmem [resolvable:$true] %s463_s8 }
  0x1a   : > { %582 = vmatprep.mubr.msk.f32.mxu0 %vm173_vm0, %v255_v5  ;;  %s671_s17 = scalar_lea.vmem %s864_s8, 1024  ;;  %p678_p0 = scmp.lt.s32.totalorder %s864_s8, %s676_s20 }
  0x1b   : > { %p672_p11 = scmp.ne.s32.totalorder %s864_s8, %s671_s17  ;;  %p679_p1 = scmp.lt.s32.totalorder %s677_s24, %s671_s17 }
  0x1d   : > { %p673_p12 = pnand %p672_p11, %p794_p5  ;;  %p680_p2 = por %p679_p1, %p678_p0 }
  0x1f   : > { %p674_p13 = pneg %p673_p12 }
  0x21   : > { %p681_p3 = pnand %p680_p2, %p674_p13 }
  0xd9   : > { %v577_v6 = vpop.f32.mrf.mxu0 }
  0xda   : > { %578 = vmatprep.subr.mxu0 %v577_v6  ;;  %594 = vmatprep.subr.mxu1 %v577_v6 }
  0xdb   : > { %v246_v7 = vpop.f32.mrf.mxu0  ;;  %579 = vmatpush3.msra.mxu0 %v577_v6  ;;  %596 = vmatpush3.msra.mxu1 %v577_v6 }
  0xdc   : > { %580 = vmatprep.subr.mxu0 %v246_v7  ;;  %595 = vmatprep.subr.mxu1 %v246_v7 }
  0xdd   : > { %581 = vmatpush3.msra.mxu0 %v246_v7  ;;  %597 = vmatpush3.msra.mxu1 %v246_v7 }
  0xde   : > { %586 = vmatmul.mubr.msk.f32.vlgmr.msra.gmra.mxu1 %vm173_vm0, %v258_v8  ;;  %583 = vmatmul.mubr.msk.f32.vlgmr.msra.gmra.mxu0 %vm173_vm0, %v256_v9 }
  0xdf   : > { %588 = vmatprep.mubr.msk.f32.mxu1 %vm173_vm0, %v259_v10 }
  0xe2   : > { %589 = vmatmul.mubr.msk.f32.gmra.mxu1 %vm173_vm0, %v260_v11 }
  0xe3   : > { %591 = vmatprep.mubr.msk.f32.mxu1 %vm173_vm0, %v261_v12 }
  0xe6   : > { %592 = vmatmul.mubr.msk.f32.gmra.mxu1 %vm173_vm0, %v262_v13 }
 0x19e   : > { %v587_v14 = vpop.f32.mrf.mxu1  ;;  %v584_v15 = vpop.f32.mrf.mxu0 }
 0x19f   : > { %v545_v16 = vmul.f32 -1.442695, %v587_v14  ;;  %v543_v17 = vmul.f32 -1.442695, %v584_v15 }
 0x1a0   : > { %v363_v18 = vpop.f32.mrf.mxu1  ;;  %v353_v19 = vpop.f32.mrf.mxu0 }
 0x1a1   : > { %639 = vpow2.f32 %v545_v16  ;;  %v544_v20 = vmul.f32 -1.442695, %v363_v18  ;;  %v542_v21 = vmul.f32 -1.442695, %v353_v19 }
 0x1a2   : > { %v590_v22 = vpop.f32.mrf.mxu1  ;;  %641 = vpow2.f32 %v543_v17 }
 0x1a3   : > { %643 = vpow2.f32 %v544_v20  ;;  %v547_v23 = vmul.f32 -1.442695, %v590_v22 }
 0x1a4   : > { %v373_v24 = vpop.f32.mrf.mxu1  ;;  %645 = vpow2.f32 %v542_v21 }
 0x1a5   : > { %647 = vpow2.f32 %v547_v23  ;;  %v546_v25 = vmul.f32 -1.442695, %v373_v24 }
 0x1a6   : > { %v593_v26 = vpop.f32.mrf.mxu1 }
 0x1a7   : > { %649 = vpow2.f32 %v546_v25  ;;  %v549_v27 = vmul.f32 -1.442695, %v593_v26 }
 0x1a8   : > { %v383_v28 = vpop.f32.mrf.mxu1 }
 0x1a9   : > { %651 = vpow2.f32 %v549_v27  ;;  %v548_v29 = vmul.f32 -1.442695, %v383_v28 }
 0x1ab   : > { %653 = vpow2.f32 %v548_v29 }
 0x1ae   : > { %v640_v30 = vpop.eup %639 }
 0x1af   : > { %v642_v31 = vpop.eup %641  ;;  %v419_v32 = vadd.f32 1.0, %v640_v30 }
 0x1b0   : > { %v644_v33 = vpop.eup %643  ;;  %v417_v34 = vadd.f32 1.0, %v642_v31 }
 0x1b1   : > { %v646_v35 = vpop.eup %645  ;;  %655 = vrcp.f32 %v419_v32  ;;  %v418_v36 = vadd.f32 1.0, %v644_v33 }
 0x1b2   : > { %v648_v37 = vpop.eup %647  ;;  %657 = vrcp.f32 %v417_v34  ;;  %v416_v38 = vadd.f32 1.0, %v646_v35 }
 0x1b3   : > { %659 = vrcp.f32 %v418_v36  ;;  %v421_v39 = vadd.f32 1.0, %v648_v37 }
 0x1b4   : > { %v650_v40 = vpop.eup %649  ;;  %661 = vrcp.f32 %v416_v38 }
 0x1b5   : > { %663 = vrcp.f32 %v421_v39  ;;  %v420_v41 = vadd.f32 1.0, %v650_v40 }
 0x1b6   : > { %v652_v42 = vpop.eup %651 }
 0x1b7   : > { %665 = vrcp.f32 %v420_v41  ;;  %v423_v43 = vadd.f32 1.0, %v652_v42 }
 0x1b8   : > { %v654_v44 = vpop.eup %653 }
 0x1b9   : > { %667 = vrcp.f32 %v423_v43  ;;  %v422_v45 = vadd.f32 1.0, %v654_v44 }
 0x1bb   : > { %669 = vrcp.f32 %v422_v45 }
 0x1be   : > { %v656_v46 = vpop.eup %655 }
 0x1bf   : > { %v658_v47 = vpop.eup %657  ;;  %444 = vst.msk [vmem:[%s163_s6 + $0x18] sm:$0xff] %vm440_vm1, %v656_v46 }
 0x1c0   : > { %v660_v48 = vpop.eup %659  ;;  %442 = vst.msk [vmem:[%s163_s6 + $0x8] sm:$0xff] %vm440_vm1, %v658_v47 }
 0x1c1   : > { %v662_v49 = vpop.eup %661  ;;  %443 = vst.msk [vmem:[%s163_s6 + $0x10] sm:$0xff] %vm440_vm1, %v660_v48 }
 0x1c2   : > { %v664_v50 = vpop.eup %663  ;;  %441 = vst.msk [vmem:[%s163_s6] sm:$0xff] %vm440_vm1, %v662_v49 }
 0x1c3   : > { %446 = vst.msk [vmem:[%s163_s6 + $0x28] sm:$0xff] %vm440_vm1, %v664_v50 }
 0x1c4   : > { %v666_v51 = vpop.eup %665 }
 0x1c5   : > { %445 = vst.msk [vmem:[%s163_s6 + $0x20] sm:$0xff] %vm440_vm1, %v666_v51 }
 0x1c6   : > { %v668_v52 = vpop.eup %667 }
 0x1c7   : > { %448 = vst.msk [vmem:[%s163_s6 + $0x38] sm:$0xff] %vm440_vm1, %v668_v52 }
 0x1c8   : > { %v670_v53 = vpop.eup %669 }
 0x1c9   : > { %447 = vst.msk [vmem:[%s163_s6 + $0x30] sm:$0xff] %vm440_vm1, %v670_v53 }
 0x1ca   : > { %684 = shalt.err (!%p681_p3)
}
 0x1cb   : > { %s685_s25 = scalar_lea.hbm %s862_s11, 1024  ;;  %s689_s28 = scalar_lea.hbm %s913_s3, 2048 }
 0x1cc   : > { %p686_p4 = scmp.ne.s32.totalorder %s862_s11, %s685_s25  ;;  %p690_p9 = scmp.lt.s32.totalorder %s862_s11, %s913_s3 }
 0x1cd   : > { %p691_p10 = scmp.lt.s32.totalorder %s689_s28, %s685_s25 }
 0x1ce   : > { %p687_p7 = pnand %p686_p4, %p794_p5 }
 0x1cf   : > { %p692_p11 = por %p691_p10, %p690_p9 }
 0x1d0   : > { %p688_p8 = pneg %p687_p7 }
 0x1d2   : > { %p693_p12 = pnand %p692_p11, %p688_p8 }
 0x1d4   : > { %696 = shalt.err (!%p693_p12)
}
 0x1d5   : > { %s734_s4 = smov 128   ;;  %s735_s5 = smov 8  }
 0x1d6   : > { %598 = dma.vmem_to_hbm [thread:$0]  (%p794_p5), %s864_s8, 1024, %s862_s11, %s870_s16, %s734_s4, %s734_s4, %s735_s5  }
 0x1d7 PF: > { %p604_p13 = scmp.ge.s32.totalorder %s731_s15, 2  ;;  %s478_s6 = sand.u32 1, %s719_s12  }
 0x1d8   : > { %s479_s7 = scalar_lea.sflag [#allocation3], %s478_s6 }
 0x1d9   : > { %p601_p0 = pnand %p604_p13, %p798_p6 }
 0x1db   : > { %p602_p1 = pneg %p601_p0 }
 0x1dd   : > { %714 = dma.done.wait (%p602_p1), %s479_s7, 1024  }
 0x1de   : > { %716 = vsyncadd (%p602_p1), %s479_s7, 4294966272  ;;  %p13_p2 = scmp.ge.s32.totalorder %s781_s18, 4   ;;  %s916_s12 = smov %s723_s13 }
 0x1df   : > { %s917_s13 = smov %s727_s14  ;;  %s918_s14 = smov %s792_s21 }
 0x1e0   : > { %s919_s15 = smov %s781_s18  ;;  %15 = sbr.rel (!%p13_p2) target bundleno = 3 (0x3), region = 67 }
 0x1e5   :  { %484 = vsyncpa [#allocation3], 1 }
 0x1e6   :  { %486 = vsyncpa [#allocation3 + $0x1], 1 }

// kernel: hiformer1_forward.10
= control target key start
LH: loop header
LB: loop body
LE: loop exit
PB: predicated region body
PF: predicated region fallthrough
CT: control target
= control target key end

     0   :  { %s4533_s20 = smov 0   ;;  %s6221_s0 = inlined_call_operand.vmem [shape: f32[2,18,18,96], index: 0, kind: input, shape index: {}]   ;;  %s6222_s1 = inlined_call_operand.vmem [shape: bf16[9,96,16], index: 1, kind: input, shape index: {}]   ;;  %s6223_s2 = inlined_call_operand.vmem [shape: f32[1,16], index: 2, kind: input, shape index: {}]   ;;  %s6224_s3 = inlined_call_operand.vmem [shape: f32[16,1], index: 3, kind: input, shape index: {}]   ;;  %s6225_s4 = inlined_call_operand.<no memory space> [shape: f32[1,1], index: 4, kind: input, shape index: {}]   ;;  %s6226_s5 = inlined_call_operand.vmem [shape: f32[2,256,1], index: 5, kind: output, shape index: {}]  }
   0x1   :  { %v10_v0 = vstv %s6225_s4 }
   0x2   :  { %11 = vst [vmem:[#allocation2] sm:$0x1] %v10_v0 }
   0x3 LB: > { %s3410_s21 = sadd.s32 4294967295, %s4498_s20   ;;  %p3414_p0 = scmp.ge.s32.totalorder %s4498_s20, 1  ;;  %s4498_s20 = sphi %s4533_s20, %s17_s20  }
   0x4   : > { %p189_p1 = scmp.lt.s32.totalorder %s4498_s20, 3 }
   0x6   : > { %p190_p2 = pnand %p3414_p0, %p189_p1 }
   0x8   : > { %193 = sbr.rel (%p190_p2) target bundleno = 757 (0x2f5), region = 40 }
   0xd   : > { %v4438_v1 = vld [vmem:[%s6222_s1 + $0x58] sm:$0xff]   ;;  %p217_p3 = scmp.lt.s32.totalorder %s3410_s21, 1  ;;  %v4439_v2 = vld [vmem:[%s6222_s1 + $0x28] sm:$0xff]   ;;  %v4440_v3 = vld [vmem:[%s6222_s1 + $0x50] sm:$0xff]   ;;  %vm358_vm0 = vcmask 1046528   ;;  %vm536_vm1 = vcmask 785408  }
   0xe   : > { %3981 = vmatprep.subr.bf16.mxu0 %v4438_v1  ;;  %4025 = vmatprep.subr.bf16.mxu1 %v4439_v2  ;;  %v4441_v4 = vld [vmem:[%s6222_s1 + $0x20] sm:$0xff]   ;;  %v4442_v5 = vld [vmem:[%s6222_s1 + $0x48] sm:$0xff]   ;;  %v4443_v6 = vld [vmem:[%s6222_s1 + $0x18] sm:$0xff]   ;;  %vm991_vm2 = vcmask 1045504   ;;  %vm3000_vm3 = vcmask 130048   ;;  %vm3322_vm4 = vcmask 7168  }
   0xf   : > { %s6369_s21 = smov (!%p217_p3, %s3410_s21), 1  ;;  %3982 = vmatpush3.bf16.msra.mxu0 %v4438_v1  ;;  %4026 = vmatpush3.bf16.msra.mxu1 %v4439_v2  ;;  %v4444_v7 = vld [vmem:[%s6222_s1 + $0x40] sm:$0xff]   ;;  %v4445_v8 = vld [vmem:[%s6222_s1 + $0x10] sm:$0xff]   ;;  %v4446_v9 = vld [vmem:[%s6222_s1 + $0x38] sm:$0xff]  }
  0x10   : > { %3983 = vmatprep.subr.bf16.mxu0 %v4440_v3  ;;  %4027 = vmatprep.subr.bf16.mxu1 %v4441_v4  ;;  %s4429_s8 = smul.u32 432, %s6369_s21  ;;  %v4447_v13 = vld [vmem:[%s6222_s1 + $0x8] sm:$0xff]   ;;  %v4448_v19 = vld [vmem:[%s6222_s1 + $0x30] sm:$0xff]   ;;  %v4449_v23 = vld [vmem:[%s6222_s1] sm:$0xff]   ;;  %s3748_s23 = sshll.u32 %s6369_s21, 8 }
  0x11   : > { %v4450_v45 = vld [vmem:[%s6222_s1 + $0x88] sm:$0xff]   ;;  %v4451_v61 = vld [vmem:[%s6222_s1 + $0x80] sm:$0xff]   ;;  %v4454_v59 = vld [vmem:[%s6222_s1 + $0xb8] sm:$0xff]   ;;  %s6120_s25 = scalar_lea.vmem %s6226_s5, %s3748_s23 }
  0x12   : > { %s4571_s15 = scalar_lea.vmem %s6221_s0, %s4429_s8  ;;  %v4453_v38 = vld [vmem:[%s6222_s1 + $0x70] sm:$0xff]  }
  0x13   : > { %3984 = vmatpush3.bf16.msra.mxu0 %v4440_v3  ;;  %4028 = vmatpush3.bf16.msra.mxu1 %v4441_v4  ;;  %v4577_v10 = vld [vmem:[%s4571_s15] sm:$0xff]  ;;  %v4580_v11 = vld [vmem:[%s4571_s15 + $0x8] sm:$0xff]  ;;  %v4583_v12 = vld [vmem:[%s4571_s15 + $0x10] sm:$0x3] }
  0x14   : > { %3985 = vmatprep.subr.bf16.mxu0 %v4442_v5  ;;  %4029 = vmatprep.subr.bf16.mxu1 %v4443_v6  ;;  %v359_v14 = vrot.slane %v4577_v10, 1  ;;  %v360_v15 = vrot.slane %v4580_v11, 1  ;;  %v362_v16 = vrot.slane %v4583_v12, 1  ;;  %v4592_v17 = vld [vmem:[%s4571_s15 + $0x18] sm:$0xff]  ;;  %v4595_v18 = vld [vmem:[%s4571_s15 + $0x20] sm:$0xff]  ;;  %v282_v20 = vpack.c.bf16 %v4580_v11, %v4577_v10  ;;  %v4614_v29 = vld [vmem:[%s4571_s15 + $0x30] sm:$0xff] }
  0x15   : > { %v4603_v21 = vld [vmem:[%s4571_s15 + $0x28] sm:$0x3]  ;;  %v364_v22 = vrot.slane %v4592_v17, 1  ;;  %v365_v26 = vrot.slane %v4595_v18, 1  ;;  %v4617_v30 = vld [vmem:[%s4571_s15 + $0x38] sm:$0xff]  ;;  %v369_v33 = vrot.slane %v4614_v29, 1  ;;  %v4675_v60 = vpack.c.bf16 %v4595_v18, %v4592_v17 }
  0x16   : > { %v361_v24 = vsel %vm358_vm0, %v359_v14, %v360_v15  ;;  %v363_v25 = vsel %vm358_vm0, %v360_v15, %v362_v16  ;;  %v367_v27 = vrot.slane %v4603_v21, 1  ;;  %v4620_v31 = vld [vmem:[%s4571_s15 + $0x48] sm:$0xff]  ;;  %4037 = vmatprep.mubr.msk.bf16.mxu1 %vm536_vm1, %v282_v20  ;;  %v4624_v32 = vld [vmem:[%s4571_s15 + $0x40] sm:$0x3]  ;;  %v4628_v34 = vld [vmem:[%s4571_s15 + $0x50] sm:$0xff]  ;;  %v370_v36 = vrot.slane %v4617_v30, 1 }
  0x17   : > { %3986 = vmatpush3.bf16.msra.mxu0 %v4442_v5  ;;  %4030 = vmatpush3.bf16.msra.mxu1 %v4443_v6  ;;  %v471_v28 = vpack.c.bf16 %v363_v25, %v361_v24  ;;  %v4631_v35 = vld [vmem:[%s4571_s15 + $0x58] sm:$0x3]  ;;  %v372_v37 = vrot.slane %v4624_v32, 1  ;;  %v366_v40 = vsel %vm358_vm0, %v364_v22, %v365_v26  ;;  %v4641_v42 = vld [vmem:[%s4571_s15 + $0x60] sm:$0xff]  ;;  %v4644_v43 = vld [vmem:[%s4571_s15 + $0x68] sm:$0xff]  ;;  %v374_v46 = vrot.slane %v4620_v31, 1 }
  0x18   : > { %3987 = vmatprep.subr.bf16.mxu0 %v4444_v7  ;;  %4031 = vmatprep.subr.bf16.mxu1 %v4445_v8  ;;  %v368_v41 = vsel %vm358_vm0, %v365_v26, %v367_v27  ;;  %v375_v47 = vrot.slane %v4628_v34, 1  ;;  %v4653_v48 = vld [vmem:[%s4571_s15 + $0x70] sm:$0x3]  ;;  %v371_v49 = vsel %vm358_vm0, %v369_v33, %v370_v36  ;;  %v377_v51 = vrot.slane %v4631_v35, 1  ;;  %v4660_v53 = vld [vmem:[%s4571_s15 + $0x78] sm:$0xff]  ;;  %v4666_v56 = vld [vmem:[%s4571_s15 + $0x80] sm:$0xff] }
  0x19   : > { %3993 = vmatprep.mubr.msk.bf16.mxu0 %vm536_vm1, %v471_v28  ;;  %v373_v50 = vsel %vm358_vm0, %v370_v36, %v372_v37  ;;  %v379_v52 = vrot.slane %v4641_v42, 1  ;;  %v4662_v54 = vpack.c.bf16 %v368_v41, %v366_v40  ;;  %v380_v55 = vrot.slane %v4644_v43, 1  ;;  %v4669_v57 = vld [vmem:[%s4571_s15 + $0x88] sm:$0x3]  ;;  %6257 = vst [vmem:[#allocation4_spill] sm:$0xff] %v4675_v60  ;;  %v4682_v63 = vld [vmem:[%s4571_s15 + $0x90] sm:$0xff] }
  0x1a   : > { %v382_v62 = vrot.slane %v4653_v48, 1  ;;  %v4685_v1 = vpack.c.bf16 %v373_v50, %v371_v49  ;;  %v4689_v2 = vpack.c.bf16 %v4617_v30, %v4614_v29  ;;  %v384_v3 = vrot.slane %v4660_v53, 1  ;;  %v4693_v4 = vld [vmem:[%s4571_s15 + $0x98] sm:$0xff]  ;;  %v4696_v5 = vld [vmem:[%s4571_s15 + $0xa0] sm:$0x3]  ;;  %v4699_v6 = vld [vmem:[%s4571_s15 + $0xa8] sm:$0xff] }
  0x1b   : > { %3988 = vmatpush3.bf16.msra.mxu0 %v4444_v7  ;;  %4032 = vmatpush3.bf16.msra.mxu1 %v4445_v8  ;;  %6256 = vst [vmem:[#allocation3_spill] sm:$0xff] %v4662_v54  ;;  %v385_v7 = vrot.slane %v4666_v56, 1  ;;  %v387_v8 = vrot.slane %v4669_v57, 1  ;;  %v4710_v14 = vld [vmem:[%s4571_s15 + $0xc0] sm:$0xff]  ;;  %v376_v15 = vsel %vm358_vm0, %v374_v46, %v375_v47  ;;  %v378_v16 = vsel %vm358_vm0, %v375_v47, %v377_v51  ;;  %v4720_v20 = vld [vmem:[%s6222_s1 + $0x78] sm:$0xff]   ;;  %v4760_v51 = vld [vmem:[%s4571_s15 + $0xf0] sm:$0xff] }
  0x1c   : > { %3989 = vmatprep.subr.bf16.mxu0 %v4446_v9  ;;  %4033 = vmatprep.subr.bf16.mxu1 %v4447_v13  ;;  %6258 = vst [vmem:[#allocation5_spill] sm:$0xff] %v4685_v1  ;;  %6259 = vst [vmem:[#allocation6_spill] sm:$0xff] %v4689_v2  ;;  %v389_v22 = vrot.slane %v4682_v63, 1  ;;  %v4727_v24 = vld [vmem:[%s4571_s15 + $0xd0] sm:$0x3]  ;;  %v383_v25 = vsel %vm358_vm0, %v380_v55, %v382_v62  ;;  %v390_v26 = vrot.slane %v4693_v4, 1 }
  0x1d   : > { %6262 = vst [vmem:[#allocation9_spill] sm:$0xff] %v4727_v24  ;;  %v392_v27 = vrot.slane %v4696_v5, 1  ;;  %v394_v28 = vrot.slane %v4699_v6, 1  ;;  %v4736_v33 = vld [vmem:[%s4571_s15 + $0xd8] sm:$0xff]  ;;  %v399_v40 = vrot.slane %v4710_v14, 1  ;;  %v4746_v41 = vld [vmem:[%s4571_s15 + $0xe0] sm:$0xff]  ;;  %v4751_v46 = vpack.c.bf16 %v378_v16, %v376_v15 }
  0x1e   : > { %6263 = vst [vmem:[#allocation10_spill] sm:$0xff] %v4736_v33  ;;  %6264 = vst [vmem:[#allocation11_spill] sm:$0xff] %v4746_v41  ;;  %v4755_v47 = vpack.c.bf16 %v4628_v34, %v4620_v31  ;;  %v402_v50 = vrot.slane %v4727_v24, 1  ;;  %v4769_v62 = vld [vmem:[%s4571_s15 + $0x108] sm:$0xff]  ;;  %v4775_v16 = vpack.c.bf16 %v4644_v43, %v4641_v42  ;;  %v386_v0 = vsel %vm358_vm0, %v384_v3, %v385_v7  ;;  %v4796_v39 = vld [vmem:[%s4571_s15 + $0x110] sm:$0xff] }
  0x1f   : > { %3990 = vmatpush3.bf16.msra.mxu0 %v4446_v9  ;;  %4034 = vmatpush3.bf16.msra.mxu1 %v4447_v13  ;;  %v4704_v9 = vld [vmem:[%s4571_s15 + $0xb0] sm:$0xff]  ;;  %v4707_v13 = vld [vmem:[%s4571_s15 + $0xb8] sm:$0x3]  ;;  %6266 = vst [vmem:[#allocation13_spill] sm:$0xff] %v4751_v46  ;;  %v4780_v58 = vpack.c.bf16 %v4666_v56, %v4660_v53  ;;  %v388_v44 = vsel %vm358_vm0, %v385_v7, %v387_v8  ;;  %v404_v3 = vrot.slane %v4736_v33, 1 }
  0x20   : > { %3991 = vmatprep.subr.bf16.mxu0 %v4448_v19  ;;  %4035 = vmatprep.subr.bf16.mxu1 %v4449_v23  ;;  %6260 = vst [vmem:[#allocation7_spill] sm:$0xff] %v4707_v13  ;;  %v395_v36 = vrot.slane %v4704_v9, 1  ;;  %v397_v37 = vrot.slane %v4707_v13, 1  ;;  %6267 = vst [vmem:[#allocation14_spill] sm:$0xff] %v4755_v47 }
  0x21   : > { %6270 = vst [vmem:[#allocation17_spill] sm:$0xff] %v4775_v16 }
  0x22   : > { %v396_v7 = vsel %vm358_vm0, %v394_v28, %v395_v36  ;;  %v398_v8 = vsel %vm358_vm0, %v395_v36, %v397_v37  ;;  %v4816_v28 = vld [vmem:[%s4571_s15 + $0x128] sm:$0xff]  ;;  %v409_v36 = vrot.slane %v4760_v51, 1 }
  0x23   : > { %3992 = vmatpush3.bf16.msra.mxu0 %v4448_v19  ;;  %4036 = vmatpush3.bf16.msra.mxu1 %v4449_v23  ;;  %v381_v19 = vsel %vm358_vm0, %v379_v52, %v380_v55  ;;  %v4724_v23 = vld [vmem:[%s4571_s15 + $0xc8] sm:$0xff]  ;;  %v4763_v52 = vld [vmem:[%s4571_s15 + $0xf8] sm:$0xff]  ;;  %v4766_v55 = vld [vmem:[%s4571_s15 + $0x100] sm:$0x3]  ;;  %6273 = vst [vmem:[#allocation20_spill] sm:$0xff] %v4816_v28  ;;  %v4859_v13 = vpack.c.bf16 %v398_v8, %v396_v7  ;;  %v6279_v8 = vrot.slane %v4583_v12, 2 }
  0x24   : > { %4069 = vmatprep.subr.bf16.mxu0 %v4450_v45  ;;  %6261 = vst [vmem:[#allocation8_spill] sm:$0xff] %v4724_v23  ;;  %v400_v49 = vrot.slane %v4724_v23, 1  ;;  %6268 = vst [vmem:[#allocation15_spill] sm:$0xff] %v4766_v55  ;;  %v4771_v15 = vpack.c.bf16 %v383_v25, %v381_v19  ;;  %v391_v19 = vsel %vm358_vm0, %v389_v22, %v390_v26  ;;  %v4803_v22 = vld [vmem:[%s4571_s15 + $0x118] sm:$0x3]  ;;  %4113 = vmatprep.subr.bf16.mxu1 %v4454_v59 }
  0x25   : > { %v4789_v25 = vpack.c.bf16 %v4693_v4, %v4682_v63  ;;  %6271 = vst [vmem:[#allocation18_spill] sm:$0xff] %v4803_v22  ;;  %v410_v37 = vrot.slane %v4763_v52, 1 }
  0x26   : > { %3994 = vmatmul.mubr.msk.bf16.vlgmr.msra.gmra.mxu0 %vm536_vm1, %v4662_v54  ;;  %4038 = vmatmul.mubr.msk.bf16.vlgmr.msra.gmra.mxu1 %vm536_vm1, %v4675_v60  ;;  %6269 = vst [vmem:[#allocation16_spill] sm:$0xff] %v4771_v15  ;;  %v403_v54 = vsel %vm358_vm0, %v400_v49, %v402_v50  ;;  %v4831_v50 = vpack.c.bf16 %v388_v44, %v386_v0 }
  0x27   : > { %4070 = vmatpush3.bf16.msra.mxu0 %v4450_v45  ;;  %3997 = vmatprep.mubr.msk.bf16.mxu0 %vm536_vm1, %v4685_v1  ;;  %v4749_v45 = vld [vmem:[%s4571_s15 + $0xe8] sm:$0x3]  ;;  %v401_v1 = vsel %vm358_vm0, %v399_v40, %v400_v49  ;;  %v412_v40 = vrot.slane %v4766_v55, 1  ;;  %v414_v49 = vrot.slane %v4769_v62, 1  ;;  %v4849_v0 = vpack.c.bf16 %v4704_v9, %v4699_v6 }
  0x28   : > { %4041 = vmatprep.mubr.msk.bf16.mxu1 %vm536_vm1, %v4689_v2  ;;  %6265 = vst [vmem:[#allocation12_spill] sm:$0xff] %v4749_v45  ;;  %4071 = vmatprep.subr.bf16.mxu0 %v4451_v61  ;;  %v405_v2 = vrot.slane %v4746_v41, 1  ;;  %v407_v60 = vrot.slane %v4749_v45, 1  ;;  %v417_v45 = vrot.slane %v4803_v22, 1  ;;  %v4455_v55 = vld [vmem:[%s6222_s1 + $0x68] sm:$0xff]   ;;  %v4857_v22 = vld [vmem:[%s4571_s15 + $0x138] sm:$0xff] }
  0x29   : > { %4114 = vmatpush3.bf16.msra.mxu1 %v4454_v59  ;;  %v4825_v59 = vld [vmem:[%s4571_s15 + $0x130] sm:$0x3] }
  0x2a   : > { %6274 = vst [vmem:[#allocation21_spill] sm:$0xff] %v4825_v59 }
  0x2b   : > { %4072 = vmatpush3.bf16.msra.mxu0 %v4451_v61  ;;  %v393_v61 = vsel %vm358_vm0, %v390_v26, %v392_v27  ;;  %v4456_v26 = vld [vmem:[%s6222_s1 + $0xb0] sm:$0xff]   ;;  %v4813_v27 = vld [vmem:[%s4571_s15 + $0x120] sm:$0xff] }
  0x2c   : > { %4073 = vmatprep.subr.bf16.mxu0 %v4720_v20  ;;  %6272 = vst [vmem:[#allocation19_spill] sm:$0xff] %v4813_v27  ;;  %v419_v24 = vrot.slane %v4813_v27, 1  ;;  %v4844_v44 = vpack.c.bf16 %v393_v61, %v391_v19  ;;  %v420_v27 = vrot.slane %v4816_v28, 1  ;;  %v4865_v19 = vpack.c.bf16 %v4746_v41, %v4736_v33  ;;  %4115 = vmatprep.subr.bf16.mxu1 %v4456_v26  ;;  %v4869_v61 = vld [vmem:[%s4571_s15 + $0x140] sm:$0xff]  ;;  %v4873_v28 = vld [vmem:[%s4571_s15 + $0x148] sm:$0x3] }
  0x2d   : > { %4116 = vmatpush3.bf16.msra.mxu1 %v4456_v26  ;;  %v6282_v26 = vrot.slane %v4592_v17, 2  ;;  %v408_v33 = vsel %vm358_vm0, %v405_v2, %v407_v60  ;;  %v424_v17 = vrot.slane %v4857_v22, 1  ;;  %v4458_v60 = vld [vmem:[%s6222_s1 + $0x60] sm:$0xff]  }
  0x2e   : > { %3998 = vmatmul.mubr.msk.bf16.gmra.mxu0 %vm536_vm1, %v4751_v46  ;;  %4042 = vmatmul.mubr.msk.bf16.gmra.mxu1 %vm536_vm1, %v4755_v47  ;;  %v415_v46 = vrot.slane %v4796_v39, 1  ;;  %v4457_v47 = vld [vmem:[%s6222_s1 + $0xa8] sm:$0xff]   ;;  %6276 = vst [vmem:[#allocation23_spill] sm:$0xff] %v4865_v19 }
  0x2f   : > { %4001 = vmatprep.mubr.msk.bf16.mxu0 %vm536_vm1, %v4771_v15  ;;  %4045 = vmatprep.mubr.msk.bf16.mxu1 %vm536_vm1, %v4775_v16  ;;  %v4853_v15 = vpack.c.bf16 %v4724_v23, %v4710_v14  ;;  %v4861_v16 = vpack.c.bf16 %v403_v54, %v401_v1  ;;  %v406_v23 = vsel %vm358_vm0, %v404_v3, %v405_v2  ;;  %v6277_v54 = vrot.slane %v4580_v11, 2 }
  0x30   : > { %4074 = vmatpush3.bf16.msra.mxu0 %v4720_v20  ;;  %v422_v20 = vrot.slane %v4825_v59, 1  ;;  %v6278_v1 = vrot.slane %v4577_v10, 2  ;;  %v6281_v3 = vrot.slane %v4595_v18, 2  ;;  %v411_v10 = vsel %vm358_vm0, %v409_v36, %v410_v37  ;;  %4117 = vmatprep.subr.bf16.mxu1 %v4457_v47  ;;  %v4460_v18 = vld [vmem:[%s6222_s1 + $0x98] sm:$0xff]  }
  0x31   : > { %6275 = vst [vmem:[#allocation22_spill] sm:$0xff] %v4853_v15  ;;  %4075 = vmatprep.subr.bf16.mxu0 %v4453_v38  ;;  %v4876_v15 = vld [vmem:[%s4571_s15 + $0x150] sm:$0xff]  ;;  %v6280_v59 = vmov %v6277_v54  ;;  %v416_v11 = vsel %vm358_vm0, %v414_v49, %v415_v46  ;;  %v425_v36 = vrot.slane %v4869_v61, 1  ;;  %4118 = vmatpush3.bf16.msra.mxu1 %v4457_v47 }
  0x32   : > { %v4883_v7 = vsel %vm991_vm2, %v6278_v1, %v6277_v54  ;;  %v4890_v19 = vsel %vm991_vm2, %v6280_v59, %v6279_v8  ;;  %v999_v41 = vsel %vm991_vm2, %v6282_v26, %v6281_v3  ;;  %v413_v54 = vsel %vm358_vm0, %v410_v37, %v412_v40 }
  0x33   : > { %v418_v59 = vsel %vm358_vm0, %v415_v46, %v417_v45  ;;  %v421_v1 = vsel %vm358_vm0, %v419_v24, %v420_v27  ;;  %v423_v2 = vsel %vm358_vm0, %v420_v27, %v422_v20  ;;  %v427_v37 = vrot.slane %v4873_v28, 1 }
  0x34   : > { %4076 = vmatpush3.bf16.msra.mxu0 %v4453_v38  ;;  %v4459_v38 = vld [vmem:[%s6222_s1 + $0xa0] sm:$0xff]   ;;  %v4918_v24 = vpack.c.bf16 %v408_v33, %v406_v23  ;;  %v4922_v46 = vpack.c.bf16 %v4763_v52, %v4760_v51  ;;  %v6283_v27 = vrot.slane %v4603_v21, 2  ;;  %v6284_v40 = vmov %v6281_v3 }
  0x35   : > { %4077 = vmatprep.subr.bf16.mxu0 %v4455_v55  ;;  %v4933_v20 = vpack.c.bf16 %v413_v54, %v411_v10  ;;  %v4935_v23 = vpack.c.bf16 %v418_v59, %v416_v11  ;;  %v4939_v33 = vpack.c.bf16 %v4796_v39, %v4769_v62  ;;  %v1002_v21 = vrot.slane %v4614_v29, 2  ;;  %4119 = vmatprep.subr.bf16.mxu1 %v4459_v38  ;;  %v4956_v10 = vld [vmem:[%s6222_s1 + $0xe8] sm:$0xff]  }
  0x36   : > { %4002 = vmatmul.mubr.msk.bf16.gmra.mxu0 %vm536_vm1, %v4831_v50  ;;  %v1001_v49 = vsel %vm991_vm2, %v6284_v40, %v6283_v27  ;;  %4046 = vmatmul.mubr.msk.bf16.gmra.mxu1 %vm536_vm1, %v4780_v58  ;;  %v4947_v47 = vpack.c.bf16 %v423_v2, %v421_v1  ;;  %v1003_v3 = vrot.slane %v4617_v30, 2  ;;  %v1005_v26 = vrot.slane %v4624_v32, 2 }
  0x37   : > { %4005 = vmatprep.mubr.msk.bf16.mxu0 %vm536_vm1, %v4844_v44  ;;  %4049 = vmatprep.mubr.msk.bf16.mxu1 %vm536_vm1, %v4789_v25  ;;  %v4949_v8 = vpack.c.bf16 %v1001_v49, %v999_v41  ;;  %v1007_v29 = vrot.slane %v4620_v31, 2  ;;  %v1008_v54 = vrot.slane %v4628_v34, 2  ;;  %v1012_v41 = vrot.slane %v4641_v42, 2  ;;  %v4461_v42 = vld [vmem:[%s6222_s1 + $0x90] sm:$0xff]  }
  0x38   : > { %4078 = vmatpush3.bf16.msra.mxu0 %v4455_v55  ;;  %v1010_v55 = vrot.slane %v4631_v35, 2  ;;  %4120 = vmatpush3.bf16.msra.mxu1 %v4459_v38  ;;  %v1004_v30 = vsel %vm991_vm2, %v1002_v21, %v1003_v3  ;;  %v1006_v32 = vsel %vm991_vm2, %v1003_v3, %v1005_v26  ;;  %v1013_v11 = vrot.slane %v4644_v43, 2 }
  0x39   : > { %4079 = vmatprep.subr.bf16.mxu0 %v4458_v60  ;;  %v1015_v59 = vrot.slane %v4653_v48, 2  ;;  %4121 = vmatprep.subr.bf16.mxu1 %v4460_v18  ;;  %v4966_v1 = vpack.c.bf16 %v1006_v32, %v1004_v30  ;;  %v1009_v31 = vsel %vm991_vm2, %v1007_v29, %v1008_v54  ;;  %v1017_v35 = vrot.slane %v4660_v53, 2 }
  0x3a   : > { %v1011_v34 = vsel %vm991_vm2, %v1008_v54, %v1010_v55  ;;  %v1014_v43 = vsel %vm991_vm2, %v1012_v41, %v1013_v11  ;;  %v1018_v38 = vrot.slane %v4666_v56, 2  ;;  %v1020_v40 = vrot.slane %v4669_v57, 2  ;;  %v4994_v57 = vld [vmem:[%s6222_s1 + $0x118] sm:$0xff]   ;;  %v6287_v55 = vld [vmem:[#allocation8_spill] sm:$0xff] }
  0x3b   : > { %v4974_v2 = vpack.c.bf16 %v1011_v34, %v1009_v31  ;;  %v1016_v48 = vsel %vm991_vm2, %v1013_v11, %v1015_v59  ;;  %v1022_v53 = vrot.slane %v4682_v63, 2  ;;  %v1025_v21 = vrot.slane %v4696_v5, 2  ;;  %v6285_v5 = vld [vmem:[#allocation7_spill] sm:$0xff]  ;;  %v6288_v11 = vld [vmem:[#allocation9_spill] sm:$0xff]  ;;  %v6289_v31 = vld [vmem:[#allocation10_spill] sm:$0xff] }
  0x3c   : > { %4080 = vmatpush3.bf16.msra.mxu0 %v4458_v60  ;;  %v4980_v27 = vpack.c.bf16 %v1016_v48, %v1014_v43  ;;  %v1023_v60 = vrot.slane %v4693_v4, 2  ;;  %4122 = vmatpush3.bf16.msra.mxu1 %v4460_v18  ;;  %v1019_v49 = vsel %vm991_vm2, %v1017_v35, %v1018_v38  ;;  %v1027_v56 = vrot.slane %v4699_v6, 2  ;;  %v6290_v43 = vld [vmem:[#allocation11_spill] sm:$0xff] }
  0x3d   : > { %4157 = vmatprep.subr.bf16.mxu0 %v4956_v10  ;;  %v1028_v3 = vrot.slane %v4704_v9, 2  ;;  %v1021_v63 = vsel %vm991_vm2, %v1018_v38, %v1020_v40  ;;  %v1030_v18 = vrot.slane %v6285_v5, 2  ;;  %v1032_v6 = vrot.slane %v4710_v14, 2  ;;  %v6286_v9 = vld [vmem:[#allocation22_spill] sm:$0xff]  ;;  %4123 = vmatprep.subr.bf16.mxu1 %v4461_v42  ;;  %v6291_v38 = vld [vmem:[#allocation12_spill] sm:$0xff] }
  0x3e   : > { %4006 = vmatmul.mubr.msk.bf16.gmra.mxu0 %vm536_vm1, %v4859_v13  ;;  %4050 = vmatmul.mubr.msk.bf16.gmra.mxu1 %vm536_vm1, %v4849_v0  ;;  %v1024_v4 = vsel %vm991_vm2, %v1022_v53, %v1023_v60  ;;  %v5006_v26 = vpack.c.bf16 %v1021_v63, %v1019_v49  ;;  %v1026_v29 = vsel %vm991_vm2, %v1023_v60, %v1025_v21  ;;  %v1033_v41 = vrot.slane %v6287_v55, 2  ;;  %v6292_v21 = vld [vmem:[#allocation15_spill] sm:$0xff] }
  0x3f   : > { %4009 = vmatprep.mubr.msk.bf16.mxu0 %vm536_vm1, %v4861_v16  ;;  %4053 = vmatprep.mubr.msk.bf16.mxu1 %vm536_vm1, %v6286_v9  ;;  %v1029_v54 = vsel %vm991_vm2, %v1027_v56, %v1028_v3  ;;  %v5011_v30 = vpack.c.bf16 %v1026_v29, %v1024_v4  ;;  %v1031_v32 = vsel %vm991_vm2, %v1028_v3, %v1030_v18  ;;  %v1035_v59 = vrot.slane %v6288_v11, 2 }
  0x40   : > { %v1037_v14 = vrot.slane %v6289_v31, 2  ;;  %4124 = vmatpush3.bf16.msra.mxu1 %v4461_v42  ;;  %v5016_v34 = vpack.c.bf16 %v1031_v32, %v1029_v54  ;;  %v1034_v35 = vsel %vm991_vm2, %v1032_v6, %v1033_v41  ;;  %v1038_v48 = vrot.slane %v6290_v43, 2  ;;  %v271_v6 = vld [vmem:[%s4571_s15 + $0x158] sm:$0xff]  ;;  %v273_v31 = vld [vmem:[%s4571_s15 + $0x168] sm:$0xff] }
  0x41   : > { %v1040_v40 = vrot.slane %v6291_v38, 2  ;;  %v1036_v53 = vsel %vm991_vm2, %v1033_v41, %v1035_v59  ;;  %v1042_v60 = vrot.slane %v4760_v51, 2  ;;  %v1043_v49 = vrot.slane %v4763_v52, 2  ;;  %4201 = vmatprep.subr.bf16.mxu1 %v4994_v57  ;;  %v6293_v54 = vld [vmem:[#allocation18_spill] sm:$0xff]  ;;  %v6294_v41 = vld [vmem:[#allocation19_spill] sm:$0xff] }
  0x42   : > { %v1045_v56 = vrot.slane %v6292_v21, 2  ;;  %v5026_v42 = vpack.c.bf16 %v1036_v53, %v1034_v35  ;;  %v1039_v3 = vsel %vm991_vm2, %v1037_v14, %v1038_v48  ;;  %v1047_v4 = vrot.slane %v4769_v62, 2  ;;  %v6295_v62 = vld [vmem:[#allocation20_spill] sm:$0xff]  ;;  %v6296_v59 = vld [vmem:[#allocation23_spill] sm:$0xff]  ;;  %v6297_v35 = vld [vmem:[#allocation21_spill] sm:$0xff] }
  0x43   : > { %v1041_v63 = vsel %vm991_vm2, %v1038_v48, %v1040_v40  ;;  %v1044_v51 = vsel %vm991_vm2, %v1042_v60, %v1043_v49  ;;  %v1048_v18 = vrot.slane %v4796_v39, 2  ;;  %v1050_v55 = vrot.slane %v6293_v54, 2  ;;  %v272_v39 = vld [vmem:[%s4571_s15 + $0x160] sm:$0x3]  ;;  %v274_v21 = vld [vmem:[%s4571_s15 + $0x170] sm:$0xff] }
  0x44   : > { %v5031_v5 = vpack.c.bf16 %v1041_v63, %v1039_v3  ;;  %v1046_v52 = vsel %vm991_vm2, %v1043_v49, %v1045_v56  ;;  %v1052_v32 = vrot.slane %v6294_v41, 2  ;;  %v1053_v11 = vrot.slane %v6295_v62, 2 }
  0x45   : > { %v5039_v29 = vpack.c.bf16 %v1046_v52, %v1044_v51  ;;  %v1049_v14 = vsel %vm991_vm2, %v1047_v4, %v1048_v18  ;;  %v1055_v43 = vrot.slane %v6297_v35, 2  ;;  %v1057_v48 = vrot.slane %v4857_v22, 2  ;;  %v275_v51 = vld [vmem:[%s4571_s15 + $0x178] sm:$0x3] }
  0x46   : > { %4010 = vmatmul.mubr.msk.bf16.gmra.mxu0 %vm536_vm1, %v4918_v24  ;;  %4054 = vmatmul.mubr.msk.bf16.gmra.mxu1 %vm536_vm1, %v6296_v59  ;;  %v1058_v38 = vrot.slane %v4869_v61, 2  ;;  %v1051_v40 = vsel %vm991_vm2, %v1048_v18, %v1050_v55  ;;  %v1054_v53 = vsel %vm991_vm2, %v1052_v32, %v1053_v11  ;;  %v1060_v60 = vrot.slane %v4873_v28, 2 }
  0x47   : > { %4013 = vmatprep.mubr.msk.bf16.mxu0 %vm536_vm1, %v4933_v20  ;;  %4057 = vmatprep.mubr.msk.bf16.mxu1 %vm536_vm1, %v4922_v46  ;;  %v1062_v49 = vrot.slane %v4876_v15, 2  ;;  %v5061_v56 = vpack.c.bf16 %v1051_v40, %v1049_v14  ;;  %v1056_v3 = vsel %vm991_vm2, %v1053_v11, %v1055_v43  ;;  %v1063_v4 = vrot.slane %v271_v6, 2 }
  0x48   : > { %v1059_v63 = vsel %vm991_vm2, %v1057_v48, %v1058_v38  ;;  %v5066_v52 = vpack.c.bf16 %v1056_v3, %v1054_v53  ;;  %v1061_v54 = vsel %vm991_vm2, %v1058_v38, %v1060_v60  ;;  %v1065_v18 = vrot.slane %v272_v39, 2 }
  0x49   : > { %v1067_v55 = vrot.slane %v273_v31, 2  ;;  %v5069_v32 = vpack.c.bf16 %v1061_v54, %v1059_v63  ;;  %v1064_v35 = vsel %vm991_vm2, %v1062_v49, %v1063_v4  ;;  %v1068_v12 = vrot.slane %v274_v21, 2  ;;  %v4463_v54 = vld [vmem:[%s6222_s1 + $0xe0] sm:$0xff]  }
  0x4a   : > { %v1070_v45 = vrot.slane %v275_v51, 2  ;;  %v5074_v14 = vpack.c.bf16 %v6295_v62, %v6294_v41  ;;  %v430_v11 = vrot.slane %v271_v6, 1  ;;  %v432_v43 = vrot.slane %v272_v39, 1 }
  0x4b   : > { %v1066_v48 = vsel %vm991_vm2, %v1063_v4, %v1065_v18  ;;  %v1069_v38 = vsel %vm991_vm2, %v1067_v55, %v1068_v12  ;;  %v426_v41 = vsel %vm358_vm0, %v424_v17, %v425_v36  ;;  %v435_v39 = vrot.slane %v274_v21, 1  ;;  %v4465_v18 = vld [vmem:[%s6222_s1 + $0xd0] sm:$0xff]  }
  0x4c   : > { %v5077_v40 = vpack.c.bf16 %v1066_v48, %v1064_v35  ;;  %v1071_v53 = vsel %vm991_vm2, %v1068_v12, %v1070_v45  ;;  %v428_v12 = vsel %vm358_vm0, %v425_v36, %v427_v37  ;;  %v434_v45 = vrot.slane %v273_v31, 1  ;;  %v6303_v55 = vld [vmem:[#allocation17_spill] sm:$0xff]  ;;  %v4467_v35 = vld [vmem:[%s6222_s1 + $0xc8] sm:$0xff]  }
  0x4d   : > { %v5088_v62 = vpack.c.bf16 %v1071_v53, %v1069_v38  ;;  %v437_v60 = vrot.slane %v275_v51, 1  ;;  %v6298_v17 = vrot.slane %v4876_v15, 1  ;;  %v433_v3 = vsel %vm358_vm0, %v430_v11, %v432_v43  ;;  %v4470_v43 = vld [vmem:[%s6222_s1 + $0xc0] sm:$0xff]   ;;  %v4473_v48 = vld [vmem:[%s6222_s1 + $0xf0] sm:$0xff]   ;;  %v4474_v38 = vld [vmem:[%s6222_s1 + $0x148] sm:$0xff]  }
  0x4e   : > { %4014 = vmatmul.mubr.msk.bf16.gmra.mxu0 %vm536_vm1, %v4935_v23  ;;  %4058 = vmatmul.mubr.msk.bf16.gmra.mxu1 %vm536_vm1, %v4939_v33  ;;  %v5105_v63 = vpack.c.bf16 %v428_v12, %v426_v41  ;;  %v5109_v28 = vpack.c.bf16 %v4869_v61, %v4857_v22  ;;  %v5114_v36 = vpack.c.bf16 %v271_v6, %v4876_v15  ;;  %v6300_v6 = vld [vmem:[#allocation4_spill] sm:$0xff]  ;;  %v4478_v53 = vld [vmem:[%s6222_s1 + $0x178] sm:$0xff]   ;;  %v5235_v41 = vld [vmem:[%s4571_s15 + $0x180] sm:$0xff] }
  0x4f   : > { %4017 = vmatprep.mubr.msk.bf16.mxu0 %vm536_vm1, %v4947_v47  ;;  %4061 = vmatprep.mubr.msk.bf16.mxu1 %vm536_vm1, %v5074_v14  ;;  %v431_v49 = vsel %vm358_vm0, %v6298_v17, %v430_v11  ;;  %v436_v37 = vsel %vm358_vm0, %v434_v45, %v435_v39  ;;  %v438_v51 = vsel %vm358_vm0, %v435_v39, %v437_v60  ;;  %v4472_v11 = vld [vmem:[%s6222_s1 + $0xf8] sm:$0xff]   ;;  %v5238_v12 = vld [vmem:[%s4571_s15 + $0x188] sm:$0xff]  ;;  %v4475_v60 = vld [vmem:[%s6222_s1 + $0x140] sm:$0xff]  }
  0x50   : > { %v5111_v4 = vpack.c.bf16 %v433_v3, %v431_v49  ;;  %v5126_v22 = vpack.c.bf16 %v438_v51, %v436_v37  ;;  %v5128_v15 = vpack.c.bf16 %v274_v21, %v273_v31  ;;  %v6299_v61 = vpack.c.bf16 %v4890_v19, %v4883_v7  ;;  %v4468_v31 = vld [vmem:[%s6222_s1 + $0x110] sm:$0xff]   ;;  %v6301_v21 = vld [vmem:[#allocation6_spill] sm:$0xff]  ;;  %v6304_v39 = vld [vmem:[#allocation3_spill] sm:$0xff] }
  0x51   : > { %v6302_v19 = vld [vmem:[#allocation14_spill] sm:$0xff]  ;;  %v5242_v45 = vpack.c.bf16 %v5238_v12, %v5235_v41  ;;  %v6305_v17 = vld [vmem:[#allocation5_spill] sm:$0xff]  ;;  %v4481_v37 = vld [vmem:[%s6222_s1 + $0x168] sm:$0xff]  }
  0x52   : > { %v4464_v7 = vld [vmem:[%s6222_s1 + $0xd8] sm:$0xff]   ;;  %v4480_v49 = vld [vmem:[%s6222_s1 + $0x170] sm:$0xff]  }
  0x53   : > { %v6306_v3 = vld [vmem:[#allocation13_spill] sm:$0xff] }
  0x54   : > { %v4477_v51 = vld [vmem:[%s6222_s1 + $0x130] sm:$0xff]  }
  0x56   : > { %4018 = vmatmul.mubr.msk.bf16.gmra.mxu0 %vm536_vm1, %v5105_v63  ;;  %4062 = vmatmul.mubr.msk.bf16.gmra.mxu1 %vm536_vm1, %v5109_v28 }
  0x57   : > { %4021 = vmatprep.mubr.msk.bf16.mxu0 %vm536_vm1, %v5111_v4  ;;  %4065 = vmatprep.mubr.msk.bf16.mxu1 %vm536_vm1, %v5114_v36 }
  0x5e   : > { %4022 = vmatmul.mubr.msk.bf16.gmra.mxu0 %vm536_vm1, %v5126_v22  ;;  %4066 = vmatmul.mubr.msk.bf16.gmra.mxu1 %vm536_vm1, %v5128_v15 }
  0x5f   : > { %4081 = vmatprep.mubr.msk.bf16.mxu0 %vm536_vm1, %v6299_v61  ;;  %4125 = vmatprep.mubr.msk.bf16.mxu1 %vm536_vm1, %v6300_v6  ;;  %v6307_v61 = vld [vmem:[#allocation16_spill] sm:$0xff]  ;;  %v4483_v6 = vld [vmem:[%s6222_s1 + $0x160] sm:$0xff]  }
  0x66   : > { %4082 = vmatmul.mubr.msk.bf16.vlgmr.msra.gmra.mxu0 %vm536_vm1, %v4949_v8  ;;  %4126 = vmatmul.mubr.msk.bf16.vlgmr.msra.gmra.mxu1 %vm536_vm1, %v6301_v21 }
  0x67   : > { %4158 = vmatpush3.bf16.msra.mxu0 %v4956_v10  ;;  %4085 = vmatprep.mubr.msk.bf16.mxu0 %vm536_vm1, %v4966_v1  ;;  %v4469_v10 = vld [vmem:[%s6222_s1 + $0x108] sm:$0xff]  }
  0x68   : > { %4129 = vmatprep.mubr.msk.bf16.mxu1 %vm536_vm1, %v6302_v19  ;;  %4159 = vmatprep.subr.bf16.mxu0 %v4463_v54 }
  0x69   : > { %4202 = vmatpush3.bf16.msra.mxu1 %v4994_v57  ;;  %v4471_v57 = vld [vmem:[%s6222_s1 + $0x100] sm:$0xff]  }
  0x6a   : > { %4203 = vmatprep.subr.bf16.mxu1 %v4468_v31 }
  0x6b   : > { %4160 = vmatpush3.bf16.msra.mxu0 %v4463_v54  ;;  %v4479_v54 = vld [vmem:[%s6222_s1 + $0x128] sm:$0xff]  }
  0x6c   : > { %4161 = vmatprep.subr.bf16.mxu0 %v4464_v7 }
  0x6d   : > { %4204 = vmatpush3.bf16.msra.mxu1 %v4468_v31  ;;  %v4484_v31 = vld [vmem:[%s6222_s1 + $0x158] sm:$0xff]  }
  0x6e   : > { %4086 = vmatmul.mubr.msk.bf16.gmra.mxu0 %vm536_vm1, %v4974_v2  ;;  %4205 = vmatprep.subr.bf16.mxu1 %v4469_v10 }
  0x6f   : > { %4130 = vmatmul.mubr.msk.bf16.gmra.mxu1 %vm536_vm1, %v6303_v55  ;;  %4089 = vmatprep.mubr.msk.bf16.mxu0 %vm536_vm1, %v4980_v27 }
  0x70   : > { %4133 = vmatprep.mubr.msk.bf16.mxu1 %vm536_vm1, %v4780_v58  ;;  %4162 = vmatpush3.bf16.msra.mxu0 %v4464_v7  ;;  %v4482_v7 = vld [vmem:[%s6222_s1 + $0x120] sm:$0xff]  }
  0x71   : > { %4163 = vmatprep.subr.bf16.mxu0 %v4465_v18  ;;  %4206 = vmatpush3.bf16.msra.mxu1 %v4469_v10  ;;  %v4485_v10 = vld [vmem:[%s6222_s1 + $0x150] sm:$0xff]  }
  0x72   : > { %4207 = vmatprep.subr.bf16.mxu1 %v4471_v57 }
  0x74   : > { %4164 = vmatpush3.bf16.msra.mxu0 %v4465_v18  ;;  %v4486_v18 = vld [vmem:[%s6222_s1 + $0x1a8] sm:$0xff]  }
  0x75   : > { %4165 = vmatprep.subr.bf16.mxu0 %v4467_v35  ;;  %4208 = vmatpush3.bf16.msra.mxu1 %v4471_v57  ;;  %v278_v57 = vld [vmem:[%s4571_s15 + $0x190] sm:$0x3] }
  0x76   : > { %4090 = vmatmul.mubr.msk.bf16.gmra.mxu0 %vm536_vm1, %v5006_v26  ;;  %4209 = vmatprep.subr.bf16.mxu1 %v4472_v11 }
  0x77   : > { %4134 = vmatmul.mubr.msk.bf16.gmra.mxu1 %vm536_vm1, %v4789_v25  ;;  %4093 = vmatprep.mubr.msk.bf16.mxu0 %vm536_vm1, %v5011_v30 }
  0x78   : > { %4137 = vmatprep.mubr.msk.bf16.mxu1 %vm536_vm1, %v4849_v0  ;;  %4166 = vmatpush3.bf16.msra.mxu0 %v4467_v35  ;;  %v1659_v35 = vrot.slane %v5235_v41, 1 }
  0x79   : > { %4167 = vmatprep.subr.bf16.mxu0 %v4470_v43  ;;  %4210 = vmatpush3.bf16.msra.mxu1 %v4472_v11  ;;  %v1660_v11 = vrot.slane %v5238_v12, 1 }
  0x7a   : > { %4211 = vmatprep.subr.bf16.mxu1 %v4473_v48 }
  0x7c   : > { %4168 = vmatpush3.bf16.msra.mxu0 %v4470_v43  ;;  %v1662_v43 = vrot.slane %v278_v57, 1 }
  0x7d   : > { %4212 = vmatpush3.bf16.msra.mxu1 %v4473_v48  ;;  %4245 = vmatprep.subr.bf16.mxu0 %v4474_v38  ;;  %v1912_v48 = vrot.slane %v5235_v41, 2 }
  0x7e   : > { %4094 = vmatmul.mubr.msk.bf16.gmra.mxu0 %vm536_vm1, %v5016_v34  ;;  %4289 = vmatprep.subr.bf16.mxu1 %v4478_v53 }
  0x7f   : > { %4138 = vmatmul.mubr.msk.bf16.gmra.mxu1 %vm536_vm1, %v6286_v9  ;;  %4097 = vmatprep.mubr.msk.bf16.mxu0 %vm536_vm1, %v5026_v42 }
  0x80   : > { %4141 = vmatprep.mubr.msk.bf16.mxu1 %vm536_vm1, %v6296_v59 }
  0x86   : > { %4098 = vmatmul.mubr.msk.bf16.gmra.mxu0 %vm536_vm1, %v5031_v5 }
  0x87   : > { %4142 = vmatmul.mubr.msk.bf16.gmra.mxu1 %vm536_vm1, %v4922_v46  ;;  %4101 = vmatprep.mubr.msk.bf16.mxu0 %vm536_vm1, %v5039_v29 }
  0x88   : > { %4145 = vmatprep.mubr.msk.bf16.mxu1 %vm536_vm1, %v4939_v33 }
  0x8e   : > { %4102 = vmatmul.mubr.msk.bf16.gmra.mxu0 %vm536_vm1, %v5061_v56 }
  0x8f   : > { %4146 = vmatmul.mubr.msk.bf16.gmra.mxu1 %vm536_vm1, %v5074_v14  ;;  %4105 = vmatprep.mubr.msk.bf16.mxu0 %vm536_vm1, %v5066_v52 }
  0x90   : > { %4149 = vmatprep.mubr.msk.bf16.mxu1 %vm536_vm1, %v5109_v28 }
  0x96   : > { %4106 = vmatmul.mubr.msk.bf16.gmra.mxu0 %vm536_vm1, %v5069_v32 }
  0x97   : > { %4150 = vmatmul.mubr.msk.bf16.gmra.mxu1 %vm536_vm1, %v5114_v36  ;;  %4109 = vmatprep.mubr.msk.bf16.mxu0 %vm536_vm1, %v5077_v40 }
  0x98   : > { %4153 = vmatprep.mubr.msk.bf16.mxu1 %vm536_vm1, %v5128_v15 }
  0x9e   : > { %4110 = vmatmul.mubr.msk.bf16.gmra.mxu0 %vm536_vm1, %v5088_v62 }
  0x9f   : > { %4154 = vmatmul.mubr.msk.bf16.gmra.mxu1 %vm536_vm1, %v5242_v45  ;;  %4169 = vmatprep.mubr.msk.bf16.mxu0 %vm536_vm1, %v6304_v39  ;;  %v1661_v39 = vsel %vm358_vm0, %v1659_v35, %v1660_v11 }
  0xa0   : > { %4213 = vmatprep.mubr.msk.bf16.mxu1 %vm536_vm1, %v4949_v8  ;;  %v4476_v8 = vld [vmem:[%s6222_s1 + $0x138] sm:$0xff]  }
  0xa6   : > { %4170 = vmatmul.mubr.msk.bf16.vlgmr.msra.gmra.mxu0 %vm536_vm1, %v6305_v17 }
  0xa7   : > { %4246 = vmatpush3.bf16.msra.mxu0 %v4474_v38  ;;  %4214 = vmatmul.mubr.msk.bf16.vlgmr.msra.gmra.mxu1 %vm536_vm1, %v4966_v1  ;;  %v1913_v38 = vrot.slane %v5238_v12, 2 }
  0xa8   : > { %4173 = vmatprep.mubr.msk.bf16.mxu0 %vm536_vm1, %v6306_v3  ;;  %4217 = vmatprep.mubr.msk.bf16.mxu1 %vm536_vm1, %v4974_v2 }
  0xa9   : > { %4247 = vmatprep.subr.bf16.mxu0 %v4475_v60  ;;  %4290 = vmatpush3.bf16.msra.mxu1 %v4478_v53  ;;  %v1915_v53 = vrot.slane %v278_v57, 2  ;;  %v1914_v41 = vsel %vm991_vm2, %v1912_v48, %v1913_v38 }
  0xaa   : > { %4291 = vmatprep.subr.bf16.mxu1 %v4480_v49 }
  0xab   : > { %4248 = vmatpush3.bf16.msra.mxu0 %v4475_v60  ;;  %v1663_v60 = vsel %vm358_vm0, %v1660_v11, %v1662_v43  ;;  %v1916_v12 = vsel %vm991_vm2, %v1913_v38, %v1915_v53 }
  0xac   : > { %4249 = vmatprep.subr.bf16.mxu0 %v4476_v8 }
  0xad   : > { %4292 = vmatpush3.bf16.msra.mxu1 %v4480_v49  ;;  %v5350_v49 = vpack.c.bf16 %v1663_v60, %v1661_v39 }
  0xae   : > { %4174 = vmatmul.mubr.msk.bf16.gmra.mxu0 %vm536_vm1, %v6307_v61  ;;  %4293 = vmatprep.subr.bf16.mxu1 %v4481_v37 }
  0xaf   : > { %4218 = vmatmul.mubr.msk.bf16.gmra.mxu1 %vm536_vm1, %v4980_v27  ;;  %4177 = vmatprep.mubr.msk.bf16.mxu0 %vm536_vm1, %v4831_v50 }
  0xb0   : > { %4221 = vmatprep.mubr.msk.bf16.mxu1 %vm536_vm1, %v5006_v26  ;;  %4250 = vmatpush3.bf16.msra.mxu0 %v4476_v8  ;;  %v5352_v8 = vpack.c.bf16 %v1916_v12, %v1914_v41 }
  0xb1   : > { %4251 = vmatprep.subr.bf16.mxu0 %v4477_v51  ;;  %4294 = vmatpush3.bf16.msra.mxu1 %v4481_v37  ;;  %v4487_v37 = vld [vmem:[%s6222_s1 + $0x1a0] sm:$0xff]  }
  0xb2   : > { %4295 = vmatprep.subr.bf16.mxu1 %v4483_v6 }
  0xb4   : > { %4252 = vmatpush3.bf16.msra.mxu0 %v4477_v51 }
  0xb5   : > { %4253 = vmatprep.subr.bf16.mxu0 %v4479_v54  ;;  %4296 = vmatpush3.bf16.msra.mxu1 %v4483_v6 }
  0xb6   : > { %4178 = vmatmul.mubr.msk.bf16.gmra.mxu0 %vm536_vm1, %v4844_v44  ;;  %4297 = vmatprep.subr.bf16.mxu1 %v4484_v31 }
  0xb7   : > { %4222 = vmatmul.mubr.msk.bf16.gmra.mxu1 %vm536_vm1, %v5011_v30  ;;  %4181 = vmatprep.mubr.msk.bf16.mxu0 %vm536_vm1, %v4859_v13 }
  0xb8   : > { %4225 = vmatprep.mubr.msk.bf16.mxu1 %vm536_vm1, %v5016_v34  ;;  %4254 = vmatpush3.bf16.msra.mxu0 %v4479_v54 }
  0xb9   : > { %4255 = vmatprep.subr.bf16.mxu0 %v4482_v7  ;;  %4298 = vmatpush3.bf16.msra.mxu1 %v4484_v31 }
  0xba   : > { %4299 = vmatprep.subr.bf16.mxu1 %v4485_v10 }
  0xbc   : > { %4256 = vmatpush3.bf16.msra.mxu0 %v4482_v7 }
  0xbd   : > { %4300 = vmatpush3.bf16.msra.mxu1 %v4485_v10  ;;  %4333 = vmatprep.subr.bf16.mxu0 %v4486_v18 }
  0xbe   : > { %4182 = vmatmul.mubr.msk.bf16.gmra.mxu0 %vm536_vm1, %v4861_v16 }
  0xbf   : > { %4226 = vmatmul.mubr.msk.bf16.gmra.mxu1 %vm536_vm1, %v5026_v42  ;;  %4185 = vmatprep.mubr.msk.bf16.mxu0 %vm536_vm1, %v4918_v24 }
  0xc0   : > { %4229 = vmatprep.mubr.msk.bf16.mxu1 %vm536_vm1, %v5031_v5 }
  0xc6   : > { %4186 = vmatmul.mubr.msk.bf16.gmra.mxu0 %vm536_vm1, %v4933_v20 }
  0xc7   : > { %4230 = vmatmul.mubr.msk.bf16.gmra.mxu1 %vm536_vm1, %v5039_v29  ;;  %4189 = vmatprep.mubr.msk.bf16.mxu0 %vm536_vm1, %v4935_v23 }
  0xc8   : > { %4233 = vmatprep.mubr.msk.bf16.mxu1 %vm536_vm1, %v5061_v56 }
  0xce   : > { %4190 = vmatmul.mubr.msk.bf16.gmra.mxu0 %vm536_vm1, %v4947_v47 }
  0xcf   : > { %4234 = vmatmul.mubr.msk.bf16.gmra.mxu1 %vm536_vm1, %v5066_v52  ;;  %4193 = vmatprep.mubr.msk.bf16.mxu0 %vm536_vm1, %v5105_v63 }
  0xd0   : > { %4237 = vmatprep.mubr.msk.bf16.mxu1 %vm536_vm1, %v5069_v32 }
  0xd6   : > { %4194 = vmatmul.mubr.msk.bf16.gmra.mxu0 %vm536_vm1, %v5111_v4 }
  0xd7   : > { %4238 = vmatmul.mubr.msk.bf16.gmra.mxu1 %vm536_vm1, %v5077_v40  ;;  %4197 = vmatprep.mubr.msk.bf16.mxu0 %vm536_vm1, %v5126_v22 }
  0xd8   : > { %4241 = vmatprep.mubr.msk.bf16.mxu1 %vm536_vm1, %v5088_v62 }
  0xde   : > { %4198 = vmatmul.mubr.msk.bf16.gmra.mxu0 %vm536_vm1, %v5350_v49 }
  0xdf   : > { %4242 = vmatmul.mubr.msk.bf16.gmra.mxu1 %vm536_vm1, %v5352_v8  ;;  %4257 = vmatprep.mubr.msk.bf16.mxu0 %vm536_vm1, %v6301_v21  ;;  %v4488_v21 = vld [vmem:[%s6222_s1 + $0x198] sm:$0xff]  }
  0xe0   : > { %4301 = vmatprep.mubr.msk.bf16.mxu1 %vm536_vm1, %v6305_v17 }
  0xe6   : > { %v3995_v51 = vpop.f32.mrf.mxu0  ;;  %4258 = vmatmul.mubr.msk.bf16.vlgmr.msra.gmra.mxu0 %vm536_vm1, %v6302_v19  ;;  %v4039_v6 = vpop.f32.mrf.mxu1 }
  0xe7   : > { %4334 = vmatpush3.bf16.msra.mxu0 %v4486_v18  ;;  %4302 = vmatmul.mubr.msk.bf16.vlgmr.msra.gmra.mxu1 %vm536_vm1, %v6306_v3  ;;  %v5369_v54 = vadd.f32 %v4039_v6, %v3995_v51 }
  0xe8   : > { %v619_v31 = vpop.f32.mrf.mxu0  ;;  %4261 = vmatprep.mubr.msk.bf16.mxu0 %vm536_vm1, %v6303_v55  ;;  %4305 = vmatprep.mubr.msk.bf16.mxu1 %vm536_vm1, %v6307_v61  ;;  %v864_v17 = vpop.f32.mrf.mxu1  ;;  %v4489_v55 = vld [vmem:[%s6222_s1 + $0x190] sm:$0xff]  }
  0xe9   : > { %4335 = vmatprep.subr.bf16.mxu0 %v4487_v37  ;;  %v5378_v19 = vadd.f32 %v864_v17, %v619_v31 }
  0xea   : > { %v3996_v7 = vpop.f32.mrf.mxu0  ;;  %v4040_v10 = vpop.f32.mrf.mxu1 }
  0xeb   : > { %4336 = vmatpush3.bf16.msra.mxu0 %v4487_v37  ;;  %v5380_v3 = vadd.f32 %v4040_v10, %v3996_v7 }
  0xec   : > { %v622_v18 = vpop.f32.mrf.mxu0  ;;  %4337 = vmatprep.subr.bf16.mxu0 %v4488_v21  ;;  %v867_v57 = vpop.f32.mrf.mxu1 }
  0xed   : > { %v5385_v61 = vadd.f32 %v867_v57, %v622_v18 }
  0xee   : > { %v3999_v35 = vpop.f32.mrf.mxu0  ;;  %4262 = vmatmul.mubr.msk.bf16.gmra.mxu0 %vm536_vm1, %v4780_v58  ;;  %v4043_v11 = vpop.f32.mrf.mxu1  ;;  %v4490_v58 = vld [vmem:[%s6222_s1 + $0x188] sm:$0xff]  }
  0xef   : > { %4306 = vmatmul.mubr.msk.bf16.gmra.mxu1 %vm536_vm1, %v4831_v50  ;;  %4265 = vmatprep.mubr.msk.bf16.mxu0 %vm536_vm1, %v4789_v25  ;;  %v5393_v43 = vadd.f32 %v4043_v11, %v3999_v35 }
  0xf0   : > { %v635_v48 = vpop.f32.mrf.mxu0  ;;  %4309 = vmatprep.mubr.msk.bf16.mxu1 %vm536_vm1, %v4844_v44  ;;  %4338 = vmatpush3.bf16.msra.mxu0 %v4488_v21  ;;  %v880_v38 = vpop.f32.mrf.mxu1  ;;  %v4491_v44 = vld [vmem:[%s6222_s1 + $0x180] sm:$0xff]  }
  0xf1   : > { %4339 = vmatprep.subr.bf16.mxu0 %v4489_v55  ;;  %v5400_v53 = vadd.f32 %v880_v38, %v635_v48 }
  0xf2   : > { %v4000_v39 = vpop.f32.mrf.mxu0  ;;  %v4044_v50 = vpop.f32.mrf.mxu1 }
  0xf3   : > { %v5402_v60 = vadd.f32 %v4044_v50, %v4000_v39 }
  0xf4   : > { %v638_v25 = vpop.f32.mrf.mxu0  ;;  %4340 = vmatpush3.bf16.msra.mxu0 %v4489_v55  ;;  %v883_v41 = vpop.f32.mrf.mxu1 }
  0xf5   : > { %4341 = vmatprep.subr.bf16.mxu0 %v4490_v58  ;;  %v5407_v12 = vadd.f32 %v883_v41, %v638_v25 }
  0xf6   : > { %v4003_v37 = vpop.f32.mrf.mxu0  ;;  %4266 = vmatmul.mubr.msk.bf16.gmra.mxu0 %vm536_vm1, %v4849_v0  ;;  %v4047_v51 = vpop.f32.mrf.mxu1 }
  0xf7   : > { %4310 = vmatmul.mubr.msk.bf16.gmra.mxu1 %vm536_vm1, %v4859_v13  ;;  %4269 = vmatprep.mubr.msk.bf16.mxu0 %vm536_vm1, %v6286_v9  ;;  %v5415_v6 = vadd.f32 %v4047_v51, %v4003_v37 }
  0xf8   : > { %v651_v31 = vpop.f32.mrf.mxu0  ;;  %4313 = vmatprep.mubr.msk.bf16.mxu1 %vm536_vm1, %v4861_v16  ;;  %4342 = vmatpush3.bf16.msra.mxu0 %v4490_v58  ;;  %v896_v21 = vpop.f32.mrf.mxu1 }
  0xf9   : > { %4343 = vmatprep.subr.bf16.mxu0 %v4491_v44  ;;  %v5419_v17 = vadd.f32 %v896_v21, %v651_v31 }
  0xfa   : > { %v4004_v7 = vpop.f32.mrf.mxu0  ;;  %v4048_v0 = vpop.f32.mrf.mxu1 }
  0xfb   : > { %v5421_v10 = vadd.f32 %v4048_v0, %v4004_v7 }
  0xfc   : > { %v654_v18 = vpop.f32.mrf.mxu0  ;;  %4344 = vmatpush3.bf16.msra.mxu0 %v4491_v44  ;;  %v899_v13 = vpop.f32.mrf.mxu1 }
  0xfd   : > { %v5423_v57 = vadd.f32 %v899_v13, %v654_v18  ;;  %v5476_v18 = vld [vmem:[%s4571_s15 + $0x198] sm:$0xff]  ;;  %v5479_v13 = vld [vmem:[%s4571_s15 + $0x1a0] sm:$0xff] }
  0xfe   : > { %v4007_v9 = vpop.f32.mrf.mxu0  ;;  %4270 = vmatmul.mubr.msk.bf16.gmra.mxu0 %vm536_vm1, %v6296_v59  ;;  %v4051_v55 = vpop.f32.mrf.mxu1 }
  0xff   : > { %4314 = vmatmul.mubr.msk.bf16.gmra.mxu1 %vm536_vm1, %v4918_v24  ;;  %4273 = vmatprep.mubr.msk.bf16.mxu0 %vm536_vm1, %v4922_v46  ;;  %v5431_v16 = vadd.f32 %v4051_v55, %v4007_v9 }
 0x100   : > { %v667_v35 = vpop.f32.mrf.mxu0  ;;  %4317 = vmatprep.mubr.msk.bf16.mxu1 %vm536_vm1, %v4933_v20  ;;  %v912_v11 = vpop.f32.mrf.mxu1 }
 0x101   : > { %v5435_v48 = vadd.f32 %v912_v11, %v667_v35  ;;  %v2414_v35 = vrot.slane %v5476_v18, 1  ;;  %v2415_v11 = vrot.slane %v5479_v13, 1 }
 0x102   : > { %v4008_v38 = vpop.f32.mrf.mxu0  ;;  %v4052_v58 = vpop.f32.mrf.mxu1 }
 0x103   : > { %v5437_v39 = vadd.f32 %v4052_v58, %v4008_v38 }
 0x104   : > { %v670_v59 = vpop.f32.mrf.mxu0  ;;  %v915_v50 = vpop.f32.mrf.mxu1 }
 0x105   : > { %v5439_v25 = vadd.f32 %v915_v50, %v670_v59 }
 0x106   : > { %v4011_v24 = vpop.f32.mrf.mxu0  ;;  %4274 = vmatmul.mubr.msk.bf16.gmra.mxu0 %vm536_vm1, %v4939_v33  ;;  %v4055_v46 = vpop.f32.mrf.mxu1 }
 0x107   : > { %4318 = vmatmul.mubr.msk.bf16.gmra.mxu1 %vm536_vm1, %v4935_v23  ;;  %4277 = vmatprep.mubr.msk.bf16.mxu0 %vm536_vm1, %v5074_v14  ;;  %v5447_v20 = vadd.f32 %v4055_v46, %v4011_v24  ;;  %v2416_v46 = vsel %vm358_vm0, %v2414_v35, %v2415_v11 }
 0x108   : > { %v5449_v41 = vpop.f32.mrf.mxu0  ;;  %4321 = vmatprep.mubr.msk.bf16.mxu1 %vm536_vm1, %v4947_v47  ;;  %v5453_v44 = vpop.f32.mrf.mxu1 }
 0x10a   : > { %v4012_v37 = vpop.f32.mrf.mxu0  ;;  %v4056_v33 = vpop.f32.mrf.mxu1 }
 0x10b   : > { %v5455_v51 = vadd.f32 %v4056_v33, %v4012_v37 }
 0x10c   : > { %v5457_v23 = vpop.f32.mrf.mxu0  ;;  %v5459_v31 = vpop.f32.mrf.mxu1 }
 0x10e   : > { %v4015_v14 = vpop.f32.mrf.mxu0  ;;  %4278 = vmatmul.mubr.msk.bf16.gmra.mxu0 %vm536_vm1, %v5109_v28  ;;  %v4059_v21 = vpop.f32.mrf.mxu1  ;;  %v5482_v28 = vld [vmem:[%s4571_s15 + $0x1a8] sm:$0x3] }
 0x10f   : > { %4322 = vmatmul.mubr.msk.bf16.gmra.mxu1 %vm536_vm1, %v5105_v63  ;;  %4281 = vmatprep.mubr.msk.bf16.mxu0 %vm536_vm1, %v5114_v36  ;;  %v5467_v47 = vadd.f32 %v4059_v21, %v4015_v14 }
 0x110   : > { %v5469_v7 = vpop.f32.mrf.mxu0  ;;  %4325 = vmatprep.mubr.msk.bf16.mxu1 %vm536_vm1, %v5111_v4  ;;  %v5473_v0 = vpop.f32.mrf.mxu1  ;;  %v2417_v4 = vrot.slane %v5482_v28, 1 }
 0x112   : > { %v4016_v9 = vpop.f32.mrf.mxu0  ;;  %v4060_v63 = vpop.f32.mrf.mxu1  ;;  %v2418_v37 = vsel %vm358_vm0, %v2415_v11, %v2417_v4 }
 0x113   : > { %v5484_v55 = vadd.f32 %v4060_v63, %v4016_v9  ;;  %v2421_v21 = vpack.c.bf16 %v2418_v37, %v2416_v46 }
 0x114   : > { %v5486_v36 = vpop.f32.mrf.mxu0  ;;  %v5491_v38 = vpop.f32.mrf.mxu1 }
 0x116   : > { %v4019_v58 = vpop.f32.mrf.mxu0  ;;  %4282 = vmatmul.mubr.msk.bf16.gmra.mxu0 %vm536_vm1, %v5128_v15  ;;  %v4063_v59 = vpop.f32.mrf.mxu1 }
 0x117   : > { %4326 = vmatmul.mubr.msk.bf16.gmra.mxu1 %vm536_vm1, %v5126_v22  ;;  %4285 = vmatprep.mubr.msk.bf16.mxu0 %vm536_vm1, %v5242_v45  ;;  %v5499_v50 = vadd.f32 %v4063_v59, %v4019_v58  ;;  %v2165_v22 = vpack.c.bf16 %v5479_v13, %v5476_v18 }
 0x118   : > { %v5501_v24 = vpop.f32.mrf.mxu0  ;;  %4329 = vmatprep.mubr.msk.bf16.mxu1 %vm536_vm1, %v5350_v49  ;;  %v5507_v33 = vpop.f32.mrf.mxu1 }
 0x11a   : > { %v4020_v15 = vpop.f32.mrf.mxu0  ;;  %v4064_v14 = vpop.f32.mrf.mxu1 }
 0x11b   : > { %v5511_v45 = vadd.f32 %v4064_v14, %v4020_v15 }
 0x11c   : > { %v5513_v9 = vpop.f32.mrf.mxu0  ;;  %v5515_v63 = vpop.f32.mrf.mxu1 }
 0x11e   : > { %v4023_v58 = vpop.f32.mrf.mxu0  ;;  %4286 = vmatmul.mubr.msk.bf16.gmra.mxu0 %vm536_vm1, %v2165_v22  ;;  %v4067_v49 = vpop.f32.mrf.mxu1 }
 0x11f   : > { %4330 = vmatmul.mubr.msk.bf16.gmra.mxu1 %vm536_vm1, %v2421_v21  ;;  %4345 = vmatprep.mubr.msk.bf16.mxu0 %vm536_vm1, %v4966_v1  ;;  %v5521_v35 = vadd.f32 %v4067_v49, %v4023_v58 }
 0x120   : > { %v5523_v11 = vpop.f32.mrf.mxu0  ;;  %v5525_v4 = vpop.f32.mrf.mxu1 }
 0x121   : > { %6308 = vst [vmem:[#allocation7_spill] sm:$0xff] %v5521_v35 }
 0x122   : > { %v4024_v59 = vpop.f32.mrf.mxu0  ;;  %v4068_v46 = vpop.f32.mrf.mxu1 }
 0x123   : > { %v5527_v37 = vadd.f32 %v4068_v46, %v4024_v59 }
 0x124   : > { %v5529_v15 = vpop.f32.mrf.mxu0  ;;  %v5531_v14 = vpop.f32.mrf.mxu1 }
 0x125   : > { %6309 = vst [vmem:[#allocation22_spill] sm:$0xff] %v5527_v37  ;;  %6310 = vst [vmem:[#allocation8_spill] sm:$0xff] %v5529_v15 }
 0x126   : > { %6311 = vst [vmem:[#allocation9_spill] sm:$0xff] %v5531_v14  ;;  %v4083_v22 = vpop.f32.mrf.mxu0  ;;  %4346 = vmatmul.mubr.msk.bf16.vlgmr.msra.gmra.mxu0 %vm536_vm1, %v4974_v2  ;;  %v4127_v21 = vpop.f32.mrf.mxu1 }
 0x127   : > { %v1380_v1 = vadd.f32 %v4083_v22, %v5369_v54  ;;  %4349 = vmatprep.mubr.msk.bf16.mxu0 %vm536_vm1, %v4980_v27 }
 0x128   : > { %v1251_v58 = vpop.f32.mrf.mxu0  ;;  %v5543_v46 = vpop.f32.mrf.mxu1 }
 0x129   : > { %v5539_v49 = vadd.f32 %v1251_v58, %v5378_v19  ;;  %v5541_v59 = vadd.f32 %v4127_v21, %v1380_v1 }
 0x12a   : > { %v4084_v37 = vpop.f32.mrf.mxu0  ;;  %v4128_v15 = vpop.f32.mrf.mxu1 }
 0x12b   : > { %v1381_v14 = vadd.f32 %v4084_v37, %v5380_v3 }
 0x12c   : > { %v1254_v35 = vpop.f32.mrf.mxu0  ;;  %v5551_v22 = vpop.f32.mrf.mxu1 }
 0x12d   : > { %v5547_v2 = vadd.f32 %v1254_v35, %v5385_v61  ;;  %v5549_v54 = vadd.f32 %v4128_v15, %v1381_v14 }
 0x12e   : > { %v4087_v27 = vpop.f32.mrf.mxu0  ;;  %4350 = vmatmul.mubr.msk.bf16.gmra.mxu0 %vm536_vm1, %v5006_v26  ;;  %v2992_v26 = vld [vmem:[%s6224_s3 + $0x8] sm:$0xff] }
 0x12f   : > { %v1384_v19 = vadd.f32 %v4087_v27, %v5393_v43  ;;  %v4131_v1 = vpop.f32.mrf.mxu1  ;;  %4353 = vmatprep.mubr.msk.bf16.mxu0 %vm536_vm1, %v5011_v30  ;;  %4377 = vmatprep.subr.mxu1 %v2992_v26 }
 0x130   : > { %v1267_v3 = vpop.f32.mrf.mxu0  ;;  %4378 = vmatpush3.msra.mxu1 %v2992_v26 }
 0x131   : > { %v5559_v37 = vadd.f32 %v1267_v3, %v5400_v53  ;;  %v5561_v61 = vadd.f32 %v4131_v1, %v1384_v19  ;;  %v5563_v35 = vpop.f32.mrf.mxu1 }
 0x132   : > { %v4088_v15 = vpop.f32.mrf.mxu0 }
 0x133   : > { %v1385_v14 = vadd.f32 %v4088_v15, %v5402_v60  ;;  %v4132_v21 = vpop.f32.mrf.mxu1 }
 0x134   : > { %v1270_v43 = vpop.f32.mrf.mxu0 }
 0x135   : > { %v5570_v30 = vadd.f32 %v1270_v43, %v5407_v12  ;;  %v5572_v58 = vadd.f32 %v4132_v21, %v1385_v14  ;;  %v5574_v53 = vpop.f32.mrf.mxu1 }
 0x136   : > { %v4091_v27 = vpop.f32.mrf.mxu0  ;;  %4354 = vmatmul.mubr.msk.bf16.gmra.mxu0 %vm536_vm1, %v5016_v34 }
 0x137   : > { %v1388_v60 = vadd.f32 %v4091_v27, %v5415_v6  ;;  %v4135_v19 = vpop.f32.mrf.mxu1  ;;  %4357 = vmatprep.mubr.msk.bf16.mxu0 %vm536_vm1, %v5026_v42 }
 0x138   : > { %v1283_v1 = vpop.f32.mrf.mxu0 }
 0x139   : > { %v5582_v3 = vadd.f32 %v1283_v1, %v5419_v17  ;;  %v5584_v12 = vadd.f32 %v4135_v19, %v1388_v60  ;;  %v5586_v15 = vpop.f32.mrf.mxu1 }
 0x13a   : > { %v4092_v14 = vpop.f32.mrf.mxu0 }
 0x13b   : > { %v1389_v21 = vadd.f32 %v4092_v14, %v5421_v10  ;;  %v4136_v26 = vpop.f32.mrf.mxu1 }
 0x13c   : > { %v1286_v43 = vpop.f32.mrf.mxu0 }
 0x13d   : > { %v5590_v34 = vadd.f32 %v1286_v43, %v5423_v57  ;;  %v5592_v6 = vadd.f32 %v4136_v26, %v1389_v21  ;;  %v5594_v27 = vpop.f32.mrf.mxu1 }
 0x13e   : > { %v4095_v42 = vpop.f32.mrf.mxu0  ;;  %4358 = vmatmul.mubr.msk.bf16.gmra.mxu0 %vm536_vm1, %v5031_v5 }
 0x13f   : > { %v1392_v17 = vadd.f32 %v4095_v42, %v5431_v16  ;;  %v4139_v60 = vpop.f32.mrf.mxu1  ;;  %4361 = vmatprep.mubr.msk.bf16.mxu0 %vm536_vm1, %v5039_v29 }
 0x140   : > { %v1299_v10 = vpop.f32.mrf.mxu0 }
 0x141   : > { %v5602_v19 = vadd.f32 %v1299_v10, %v5435_v48  ;;  %v5604_v57 = vadd.f32 %v4139_v60, %v1392_v17  ;;  %v5606_v1 = vpop.f32.mrf.mxu1  ;;  %v929_v48 = vadd.f32 %v5453_v44, %v5449_v41 }
 0x142   : > { %v4096_v14 = vpop.f32.mrf.mxu0 }
 0x143   : > { %v1393_v21 = vadd.f32 %v4096_v14, %v5437_v39  ;;  %v4140_v26 = vpop.f32.mrf.mxu1 }
 0x144   : > { %v1302_v43 = vpop.f32.mrf.mxu0 }
 0x145   : > { %v5610_v5 = vadd.f32 %v1302_v43, %v5439_v25  ;;  %v5612_v16 = vadd.f32 %v4140_v26, %v1393_v21  ;;  %v5614_v42 = vpop.f32.mrf.mxu1  ;;  %v932_v26 = vadd.f32 %v5459_v31, %v5457_v23 }
 0x146   : > { %v4099_v29 = vpop.f32.mrf.mxu0  ;;  %4362 = vmatmul.mubr.msk.bf16.gmra.mxu0 %vm536_vm1, %v5061_v56 }
 0x147   : > { %6312 = vst [vmem:[#allocation10_spill] sm:$0xff] %v5612_v16  ;;  %v1396_v17 = vadd.f32 %v4099_v29, %v5447_v20  ;;  %v4143_v60 = vpop.f32.mrf.mxu1  ;;  %4365 = vmatprep.mubr.msk.bf16.mxu0 %vm536_vm1, %v5066_v52 }
 0x148   : > { %v1315_v39 = vpop.f32.mrf.mxu0 }
 0x149   : > { %v1394_v25 = vadd.f32 %v1315_v39, %v929_v48  ;;  %v5623_v10 = vadd.f32 %v4143_v60, %v1396_v17  ;;  %v1561_v14 = vpop.f32.mrf.mxu1  ;;  %v945_v48 = vadd.f32 %v5473_v0, %v5469_v7  ;;  %v948_v7 = vadd.f32 %v5491_v38, %v5486_v36 }
 0x14a   : > { %v4100_v21 = vpop.f32.mrf.mxu0 }
 0x14b   : > { %v1397_v56 = vadd.f32 %v4100_v21, %v5455_v51  ;;  %v5628_v43 = vadd.f32 %v1561_v14, %v1394_v25  ;;  %v4144_v41 = vpop.f32.mrf.mxu1  ;;  %v2667_v14 = vrot.slane %v5476_v18, 2 }
 0x14c   : > { %v1318_v44 = vpop.f32.mrf.mxu0 }
 0x14d   : > { %v1395_v20 = vadd.f32 %v1318_v44, %v932_v26  ;;  %v5630_v29 = vadd.f32 %v4144_v41, %v1397_v56  ;;  %v1564_v16 = vpop.f32.mrf.mxu1  ;;  %v2991_v26 = vld [vmem:[%s6224_s3] sm:$0xff] }
 0x14e   : > { %v4103_v52 = vpop.f32.mrf.mxu0  ;;  %4366 = vmatmul.mubr.msk.bf16.gmra.mxu0 %vm536_vm1, %v5069_v32  ;;  %v2668_v32 = vrot.slane %v5479_v13, 2  ;;  %4379 = vmatprep.subr.mxu1 %v2991_v26 }
 0x14f   : > { %v1400_v17 = vadd.f32 %v4103_v52, %v5467_v47  ;;  %v5637_v23 = vadd.f32 %v1564_v16, %v1395_v20  ;;  %v4147_v51 = vpop.f32.mrf.mxu1  ;;  %4369 = vmatprep.mubr.msk.bf16.mxu0 %vm536_vm1, %v5077_v40  ;;  %v2670_v40 = vrot.slane %v5482_v28, 2  ;;  %4380 = vmatpush3.msra.mxu1 %v2991_v26  ;;  %v961_v28 = vadd.f32 %v5507_v33, %v5501_v24 }
 0x150   : > { %v1331_v31 = vpop.f32.mrf.mxu0  ;;  %v964_v24 = vadd.f32 %v5515_v63, %v5513_v9 }
 0x151   : > { %v1398_v60 = vadd.f32 %v1331_v31, %v945_v48  ;;  %v5641_v39 = vadd.f32 %v4147_v51, %v1400_v17  ;;  %v1577_v25 = vpop.f32.mrf.mxu1  ;;  %v2671_v52 = vsel %vm991_vm2, %v2668_v32, %v2670_v40 }
 0x152   : > { %v4104_v21 = vpop.f32.mrf.mxu0 }
 0x153   : > { %v1401_v47 = vadd.f32 %v4104_v21, %v5484_v55  ;;  %v5648_v0 = vadd.f32 %v1577_v25, %v1398_v60  ;;  %v4148_v16 = vpop.f32.mrf.mxu1  ;;  %v2669_v55 = vsel %vm991_vm2, %v2667_v14, %v2668_v32 }
 0x154   : > { %v1334_v56 = vpop.f32.mrf.mxu0  ;;  %v2674_v60 = vpack.c.bf16 %v2671_v52, %v2669_v55  ;;  %v6315_v55 = vld [vmem:[#allocation9_spill] sm:$0xff] }
 0x155   : > { %v1399_v18 = vadd.f32 %v1334_v56, %v948_v7  ;;  %v5654_v41 = vadd.f32 %v4148_v16, %v1401_v47  ;;  %v1580_v13 = vpop.f32.mrf.mxu1  ;;  %v977_v47 = vadd.f32 %v5525_v4, %v5523_v11  ;;  %v6313_v16 = vld [vmem:[#allocation7_spill] sm:$0xff] }
 0x156   : > { %v4107_v44 = vpop.f32.mrf.mxu0  ;;  %4370 = vmatmul.mubr.msk.bf16.gmra.mxu0 %vm536_vm1, %v5088_v62 }
 0x157   : > { %v1404_v36 = vadd.f32 %v4107_v44, %v5499_v50  ;;  %v5662_v38 = vadd.f32 %v1580_v13, %v1399_v18  ;;  %v4151_v20 = vpop.f32.mrf.mxu1  ;;  %4373 = vmatprep.mubr.msk.bf16.mxu0 %vm536_vm1, %v5352_v8  ;;  %v6314_v44 = vld [vmem:[#allocation8_spill] sm:$0xff] }
 0x158   : > { %v1347_v48 = vpop.f32.mrf.mxu0 }
 0x159   : > { %v1402_v17 = vadd.f32 %v1347_v48, %v961_v28  ;;  %v5667_v51 = vadd.f32 %v4151_v20, %v1404_v36  ;;  %v1593_v62 = vpop.f32.mrf.mxu1  ;;  %v980_v28 = vadd.f32 %v6315_v55, %v6314_v44  ;;  %v6316_v36 = vld [vmem:[#allocation22_spill] sm:$0xff] }
 0x15a   : > { %v4108_v31 = vpop.f32.mrf.mxu0 }
 0x15b   : > { %v1405_v50 = vadd.f32 %v4108_v31, %v5511_v45  ;;  %v5672_v33 = vadd.f32 %v1593_v62, %v1402_v17  ;;  %v4152_v25 = vpop.f32.mrf.mxu1 }
 0x15c   : > { %v1350_v14 = vpop.f32.mrf.mxu0 }
 0x15d   : > { %v1403_v21 = vadd.f32 %v1350_v14, %v964_v24  ;;  %v5674_v8 = vadd.f32 %v4152_v25, %v1405_v50  ;;  %v1596_v32 = vpop.f32.mrf.mxu1 }
 0x15e   : > { %v4111_v7 = vpop.f32.mrf.mxu0  ;;  %4374 = vmatmul.mubr.msk.bf16.gmra.mxu0 %vm536_vm1, %v2674_v60  ;;  %v1624_v60 = vadd.f32 %v5543_v46, %v5539_v49 }
 0x15f   : > { %v1408_v40 = vadd.f32 %v4111_v7, %v6313_v16  ;;  %v5680_v26 = vadd.f32 %v1596_v32, %v1403_v21  ;;  %v4155_v9 = vpop.f32.mrf.mxu1  ;;  %v1625_v16 = vadd.f32 %v5551_v22, %v5547_v2 }
 0x160   : > { %v1363_v45 = vpop.f32.mrf.mxu0 }
 0x161   : > { %v1406_v63 = vadd.f32 %v1363_v45, %v977_v47  ;;  %v5682_v56 = vadd.f32 %v4155_v9, %v1408_v40  ;;  %v1609_v18 = vpop.f32.mrf.mxu1 }
 0x162   : > { %v4112_v13 = vpop.f32.mrf.mxu0 }
 0x163   : > { %v1409_v20 = vadd.f32 %v4112_v13, %v6316_v36  ;;  %v5687_v52 = vadd.f32 %v1609_v18, %v1406_v63  ;;  %v4156_v48 = vpop.f32.mrf.mxu1  ;;  %v1628_v18 = vadd.f32 %v5563_v35, %v5559_v37  ;;  %v1629_v36 = vadd.f32 %v5574_v53, %v5570_v30 }
 0x164   : > { %v1366_v11 = vpop.f32.mrf.mxu0 }
 0x165   : > { %v1407_v4 = vadd.f32 %v1366_v11, %v980_v28  ;;  %v5689_v17 = vadd.f32 %v4156_v48, %v1409_v20  ;;  %v1612_v62 = vpop.f32.mrf.mxu1 }
 0x166   : > { %v4171_v31 = vpop.f32.mrf.mxu0 }
 0x167   : > { %v5693_v24 = vadd.f32 %v1612_v62, %v1407_v4  ;;  %v1882_v50 = vadd.f32 %v4171_v31, %v5541_v59  ;;  %v4215_v25 = vpop.f32.mrf.mxu1  ;;  %v1632_v62 = vadd.f32 %v5586_v15, %v5582_v3 }
 0x168   : > { %v1753_v14 = vpop.f32.mrf.mxu0 }
 0x169   : > { %v5696_v21 = vadd.f32 %v1753_v14, %v1624_v60  ;;  %v5698_v32 = vadd.f32 %v4215_v25, %v1882_v50  ;;  %v5700_v7 = vpop.f32.mrf.mxu1  ;;  %v1633_v14 = vadd.f32 %v5594_v27, %v5590_v34 }
 0x16a   : > { %v4172_v47 = vpop.f32.mrf.mxu0 }
 0x16b   : > { %v1883_v40 = vadd.f32 %v4172_v47, %v5549_v54  ;;  %v4216_v9 = vpop.f32.mrf.mxu1 }
 0x16c   : > { %v1756_v49 = vpop.f32.mrf.mxu0 }
 0x16d   : > { %v5705_v46 = vadd.f32 %v1756_v49, %v1625_v16  ;;  %v5707_v45 = vadd.f32 %v4216_v9, %v1883_v40  ;;  %v5709_v59 = vpop.f32.mrf.mxu1  ;;  %v1636_v49 = vadd.f32 %v5606_v1, %v5602_v19 }
 0x16e   : > { %v4175_v63 = vpop.f32.mrf.mxu0 }
 0x16f   : > { %v1886_v13 = vadd.f32 %v4175_v63, %v5561_v61  ;;  %v4219_v44 = vpop.f32.mrf.mxu1 }
 0x170   : > { %v1769_v55 = vpop.f32.mrf.mxu0 }
 0x171   : > { %v5714_v28 = vadd.f32 %v1769_v55, %v1628_v18  ;;  %v5716_v2 = vadd.f32 %v4219_v44, %v1886_v13  ;;  %v5718_v54 = vpop.f32.mrf.mxu1  ;;  %v1637_v55 = vadd.f32 %v5614_v42, %v5610_v5 }
 0x172   : > { %v4176_v22 = vpop.f32.mrf.mxu0 }
 0x173   : > { %v1887_v20 = vadd.f32 %v4176_v22, %v5572_v58  ;;  %v4220_v48 = vpop.f32.mrf.mxu1  ;;  %v6317_v22 = vld [vmem:[#allocation10_spill] sm:$0xff] }
 0x174   : > { %v1772_v11 = vpop.f32.mrf.mxu0 }
 0x175   : > { %v5723_v4 = vadd.f32 %v1772_v11, %v1629_v36  ;;  %v5725_v37 = vadd.f32 %v4220_v48, %v1887_v20  ;;  %v5727_v61 = vpop.f32.mrf.mxu1 }
 0x176   : > { %v4179_v35 = vpop.f32.mrf.mxu0 }
 0x177   : > { %v1890_v31 = vadd.f32 %v4179_v35, %v5584_v12  ;;  %v4223_v60 = vpop.f32.mrf.mxu1 }
 0x178   : > { %v1785_v50 = vpop.f32.mrf.mxu0 }
 0x179   : > { %v5732_v25 = vadd.f32 %v1785_v50, %v1632_v62  ;;  %v5734_v30 = vadd.f32 %v4223_v60, %v1890_v31  ;;  %v5736_v58 = vpop.f32.mrf.mxu1 }
 0x17a   : > { %v4180_v53 = vpop.f32.mrf.mxu0 }
 0x17b   : > { %v1891_v47 = vadd.f32 %v4180_v53, %v5592_v6  ;;  %v4224_v16 = vpop.f32.mrf.mxu1 }
 0x17c   : > { %v1788_v40 = vpop.f32.mrf.mxu0 }
 0x17d   : > { %v5741_v9 = vadd.f32 %v1788_v40, %v1633_v14  ;;  %v5743_v3 = vadd.f32 %v4224_v16, %v1891_v47  ;;  %v5745_v12 = vpop.f32.mrf.mxu1 }
 0x17e   : > { %v4183_v15 = vpop.f32.mrf.mxu0 }
 0x17f   : > { %v1894_v63 = vadd.f32 %v4183_v15, %v5604_v57  ;;  %v4227_v18 = vpop.f32.mrf.mxu1 }
 0x180   : > { %v1801_v13 = vpop.f32.mrf.mxu0 }
 0x181   : > { %v5750_v44 = vadd.f32 %v1801_v13, %v1636_v49  ;;  %v5752_v34 = vadd.f32 %v4227_v18, %v1894_v63  ;;  %v5754_v6 = vpop.f32.mrf.mxu1 }
 0x182   : > { %v4184_v27 = vpop.f32.mrf.mxu0 }
 0x183   : > { %v1895_v36 = vadd.f32 %v4184_v27, %v6317_v22  ;;  %v4228_v20 = vpop.f32.mrf.mxu1 }
 0x184   : > { %v1804_v48 = vpop.f32.mrf.mxu0 }
 0x185   : > { %v5759_v11 = vadd.f32 %v1804_v48, %v1637_v55  ;;  %v5761_v19 = vadd.f32 %v4228_v20, %v1895_v36  ;;  %v5763_v57 = vpop.f32.mrf.mxu1 }
 0x186   : > { %v4187_v1 = vpop.f32.mrf.mxu0 }
 0x187   : > { %v1898_v35 = vadd.f32 %v4187_v1, %v5623_v10  ;;  %v4231_v62 = vpop.f32.mrf.mxu1 }
 0x188   : > { %v1817_v31 = vpop.f32.mrf.mxu0 }
 0x189   : > { %v5767_v60 = vadd.f32 %v1817_v31, %v5628_v43  ;;  %v5769_v50 = vadd.f32 %v4231_v62, %v1898_v35  ;;  %v5771_v5 = vpop.f32.mrf.mxu1 }
 0x18a   : > { %v4188_v42 = vpop.f32.mrf.mxu0 }
 0x18b   : > { %v1899_v53 = vadd.f32 %v4188_v42, %v5630_v29  ;;  %v4232_v14 = vpop.f32.mrf.mxu1 }
 0x18c   : > { %v1820_v47 = vpop.f32.mrf.mxu0 }
 0x18d   : > { %v5775_v16 = vadd.f32 %v1820_v47, %v5637_v23  ;;  %v5777_v40 = vadd.f32 %v4232_v14, %v1899_v53  ;;  %v5779_v10 = vpop.f32.mrf.mxu1 }
 0x18e   : > { %6318 = vst [vmem:[#allocation11_spill] sm:$0xff] %v5779_v10  ;;  %v4191_v15 = vpop.f32.mrf.mxu0 }
 0x18f   : > { %v1902_v43 = vadd.f32 %v4191_v15, %v5641_v39  ;;  %v4235_v49 = vpop.f32.mrf.mxu1 }
 0x190   : > { %v1833_v63 = vpop.f32.mrf.mxu0 }
 0x191   : > { %v5783_v18 = vadd.f32 %v1833_v63, %v5648_v0  ;;  %v5785_v13 = vadd.f32 %v4235_v49, %v1902_v43  ;;  %v5787_v29 = vpop.f32.mrf.mxu1 }
 0x192   : > { %6320 = vst [vmem:[#allocation15_spill] sm:$0xff] %v5787_v29  ;;  %v4192_v27 = vpop.f32.mrf.mxu0 }
 0x193   : > { %6319 = vst [vmem:[#allocation12_spill] sm:$0xff] %v5783_v18  ;;  %v1903_v23 = vadd.f32 %v4192_v27, %v5654_v41  ;;  %v4236_v55 = vpop.f32.mrf.mxu1 }
 0x194   : > { %v1836_v22 = vpop.f32.mrf.mxu0 }
 0x195   : > { %v5791_v36 = vadd.f32 %v1836_v22, %v5662_v38  ;;  %v5793_v20 = vadd.f32 %v4236_v55, %v1903_v23  ;;  %v5795_v39 = vpop.f32.mrf.mxu1 }
 0x196   : > { %6322 = vst [vmem:[#allocation19_spill] sm:$0xff] %v5795_v39  ;;  %v4195_v48 = vpop.f32.mrf.mxu0 }
 0x197   : > { %6321 = vst [vmem:[#allocation18_spill] sm:$0xff] %v5791_v36  ;;  %v1906_v0 = vadd.f32 %v4195_v48, %v5667_v51  ;;  %v4239_v1 = vpop.f32.mrf.mxu1 }
 0x198   : > { %v1849_v35 = vpop.f32.mrf.mxu0 }
 0x199   : > { %v5799_v62 = vadd.f32 %v1849_v35, %v5672_v33  ;;  %v5801_v31 = vadd.f32 %v4239_v1, %v1906_v0  ;;  %v5803_v41 = vpop.f32.mrf.mxu1 }
 0x19a   : > { %6324 = vst [vmem:[#allocation23_spill] sm:$0xff] %v5803_v41  ;;  %v4196_v42 = vpop.f32.mrf.mxu0 }
 0x19b   : > { %6323 = vst [vmem:[#allocation20_spill] sm:$0xff] %v5799_v62  ;;  %v1907_v38 = vadd.f32 %v4196_v42, %v5674_v8  ;;  %v4240_v53 = vpop.f32.mrf.mxu1 }
 0x19c   : > { %v1852_v14 = vpop.f32.mrf.mxu0 }
 0x19d   : > { %v5807_v47 = vadd.f32 %v1852_v14, %v5680_v26  ;;  %v5809_v15 = vadd.f32 %v4240_v53, %v1907_v38  ;;  %v5811_v51 = vpop.f32.mrf.mxu1 }
 0x19e   : > { %6326 = vst [vmem:[#allocation4_spill] sm:$0xff] %v5811_v51  ;;  %v4199_v43 = vpop.f32.mrf.mxu0 }
 0x19f   : > { %6325 = vst [vmem:[#allocation21_spill] sm:$0xff] %v5807_v47  ;;  %v1910_v33 = vadd.f32 %v4199_v43, %v5682_v56  ;;  %v4243_v49 = vpop.f32.mrf.mxu1 }
 0x1a0   : > { %v1865_v63 = vpop.f32.mrf.mxu0 }
 0x1a1   : > { %v5815_v27 = vadd.f32 %v1865_v63, %v5687_v52  ;;  %v5817_v23 = vadd.f32 %v4243_v49, %v1910_v33  ;;  %v5819_v8 = vpop.f32.mrf.mxu1 }
 0x1a2   : > { %6328 = vst [vmem:[#allocation14_spill] sm:$0xff] %v5819_v8  ;;  %v4200_v55 = vpop.f32.mrf.mxu0 }
 0x1a3   : > { %6327 = vst [vmem:[#allocation6_spill] sm:$0xff] %v5815_v27  ;;  %v1911_v26 = vadd.f32 %v4200_v55, %v5689_v17  ;;  %v4244_v22 = vpop.f32.mrf.mxu1 }
 0x1a4   : > { %v1868_v48 = vpop.f32.mrf.mxu0 }
 0x1a5   : > { %v5823_v0 = vadd.f32 %v1868_v48, %v5693_v24  ;;  %v5825_v1 = vadd.f32 %v4244_v22, %v1911_v26  ;;  %v5827_v56 = vpop.f32.mrf.mxu1 }
 0x1a6   : > { %6330 = vst [vmem:[#allocation3_spill] sm:$0xff] %v5827_v56  ;;  %v4259_v35 = vpop.f32.mrf.mxu0 }
 0x1a7   : > { %6329 = vst [vmem:[#allocation17_spill] sm:$0xff] %v5823_v0  ;;  %v5830_v52 = vadd.f32 %v4259_v35, %v5698_v32  ;;  %v5832_v42 = vpop.f32.mrf.mxu1 }
 0x1a8   : > { %v2252_v38 = vpop.f32.mrf.mxu0 }
 0x1a9   : > { %v5834_v53 = vpop.f32.mrf.mxu1 }
 0x1aa   : > { %v4260_v14 = vpop.f32.mrf.mxu0 }
 0x1ab   : > { %v5837_v17 = vadd.f32 %v4260_v14, %v5707_v45  ;;  %v5841_v24 = vpop.f32.mrf.mxu1 }
 0x1ac   : > { %v5839_v43 = vpop.f32.mrf.mxu0 }
 0x1ad   : > { %v5846_v63 = vpop.f32.mrf.mxu1 }
 0x1ae   : > { %v4263_v33 = vpop.f32.mrf.mxu0 }
 0x1af   : > { %v5844_v49 = vadd.f32 %v4263_v33, %v5716_v2  ;;  %v5853_v22 = vpop.f32.mrf.mxu1 }
 0x1b0   : > { %v5848_v32 = vpop.f32.mrf.mxu0 }
 0x1b1   : > { %v5860_v14 = vpop.f32.mrf.mxu1 }
 0x1b2   : > { %v4264_v55 = vpop.f32.mrf.mxu0 }
 0x1b3   : > { %v5851_v26 = vadd.f32 %v4264_v55, %v5725_v37  ;;  %v5867_v0 = vpop.f32.mrf.mxu1 }
 0x1b4   : > { %v5855_v45 = vpop.f32.mrf.mxu0 }
 0x1b5   : > { %v5874_v27 = vpop.f32.mrf.mxu1 }
 0x1b6   : > { %v4267_v48 = vpop.f32.mrf.mxu0 }
 0x1b7   : > { %v5858_v35 = vadd.f32 %v4267_v48, %v5734_v30  ;;  %v5881_v47 = vpop.f32.mrf.mxu1 }
 0x1b8   : > { %v5862_v2 = vpop.f32.mrf.mxu0 }
 0x1b9   : > { %v5888_v62 = vpop.f32.mrf.mxu1 }
 0x1ba   : > { %v4268_v33 = vpop.f32.mrf.mxu0 }
 0x1bb   : > { %v5865_v56 = vadd.f32 %v4268_v33, %v5743_v3  ;;  %v5895_v36 = vpop.f32.mrf.mxu1 }
 0x1bc   : > { %v5869_v37 = vpop.f32.mrf.mxu0 }
 0x1bd   : > { %v5902_v18 = vpop.f32.mrf.mxu1 }
 0x1be   : > { %v4271_v55 = vpop.f32.mrf.mxu0 }
 0x1bf   : > { %v5872_v8 = vadd.f32 %v4271_v55, %v5752_v34  ;;  %v5909_v10 = vpop.f32.mrf.mxu1 }
 0x1c0   : > { %v5876_v30 = vpop.f32.mrf.mxu0 }
 0x1c2   : > { %v4272_v48 = vpop.f32.mrf.mxu0 }
 0x1c3   : > { %v5879_v51 = vadd.f32 %v4272_v48, %v5761_v19 }
 0x1c4   : > { %v5883_v3 = vpop.f32.mrf.mxu0 }
 0x1c6   : > { %v4275_v33 = vpop.f32.mrf.mxu0 }
 0x1c7   : > { %v5886_v41 = vadd.f32 %v4275_v33, %v5769_v50 }
 0x1c8   : > { %v5890_v34 = vpop.f32.mrf.mxu0 }
 0x1c9   : > { %6331 = vst [vmem:[#allocation5_spill] sm:$0xff] %v5886_v41 }
 0x1ca   : > { %v4276_v55 = vpop.f32.mrf.mxu0 }
 0x1cb   : > { %v5893_v39 = vadd.f32 %v4276_v55, %v5777_v40 }
 0x1cc   : > { %v5897_v19 = vpop.f32.mrf.mxu0 }
 0x1cd   : > { %6332 = vst [vmem:[#allocation13_spill] sm:$0xff] %v5893_v39  ;;  %6333 = vst [vmem:[#allocation16_spill] sm:$0xff] %v5897_v19  ;;  %v5916_v19 = vpop.f32.mrf.mxu1 }
 0x1ce   : > { %v4279_v48 = vpop.f32.mrf.mxu0 }
 0x1cf   : > { %v5900_v29 = vadd.f32 %v4279_v48, %v5785_v13 }
 0x1d0   : > { %v5904_v50 = vpop.f32.mrf.mxu0 }
 0x1d1   : > { %6334 = vst [vmem:[#allocation7_spill] sm:$0xff] %v5900_v29  ;;  %6335 = vst [vmem:[#allocation8_spill] sm:$0xff] %v5904_v50  ;;  %v5923_v50 = vpop.f32.mrf.mxu1 }
 0x1d2   : > { %v4280_v33 = vpop.f32.mrf.mxu0 }
 0x1d3   : > { %v5907_v41 = vadd.f32 %v4280_v33, %v5793_v20 }
 0x1d4   : > { %v5911_v40 = vpop.f32.mrf.mxu0 }
 0x1d5   : > { %6336 = vst [vmem:[#allocation9_spill] sm:$0xff] %v5907_v41  ;;  %6337 = vst [vmem:[#allocation22_spill] sm:$0xff] %v5911_v40  ;;  %v5930_v40 = vpop.f32.mrf.mxu1 }
 0x1d6   : > { %v4283_v55 = vpop.f32.mrf.mxu0 }
 0x1d7   : > { %v5914_v39 = vadd.f32 %v4283_v55, %v5801_v31  ;;  %v2133_v55 = vadd.f32 %v5700_v7, %v5696_v21  ;;  %v2637_v21 = vadd.f32 %v5832_v42, %v5830_v52 }
 0x1d8   : > { %v5918_v13 = vpop.f32.mrf.mxu0 }
 0x1d9   : > { %6338 = vst [vmem:[#allocation10_spill] sm:$0xff] %v5914_v39  ;;  %6339 = vst [vmem:[#allocation24_spill] sm:$0xff] %v5918_v13  ;;  %v2379_v13 = vadd.f32 %v2252_v38, %v2133_v55 }
 0x1da   : > { %v4284_v48 = vpop.f32.mrf.mxu0 }
 0x1db   : > { %v5921_v29 = vadd.f32 %v4284_v48, %v5809_v15  ;;  %v5939_v48 = vpop.f32.mrf.mxu1 }
 0x1dc   : > { %v5925_v20 = vpop.f32.mrf.mxu0 }
 0x1dd   : > { %6340 = vst [vmem:[#allocation25_spill] sm:$0xff] %v5921_v29  ;;  %v5949_v7 = vpop.f32.mrf.mxu1 }
 0x1de   : > { %v4287_v33 = vpop.f32.mrf.mxu0 }
 0x1df   : > { %v5928_v41 = vadd.f32 %v4287_v33, %v5817_v23  ;;  %v2134_v23 = vadd.f32 %v5709_v59, %v5705_v46  ;;  %v5956_v46 = vld [vmem:[%s6223_s2] ss:$0 sm:$0xff] }
 0x1e0   : > { %v5932_v31 = vpop.f32.mrf.mxu0 }
 0x1e1   : > { %6341 = vst [vmem:[#allocation26_spill] sm:$0xff] %v5928_v41  ;;  %6342 = vst [vmem:[#allocation27_spill] sm:$0xff] %v5932_v31  ;;  %v2635_v41 = vadd.f32 %v5834_v53, %v2379_v13  ;;  %v2380_v31 = vadd.f32 %v5839_v43, %v2134_v23  ;;  %v2638_v53 = vadd.f32 %v5841_v24, %v5837_v17  ;;  %v5963_v13 = vpop.f32.mrf.mxu1 }
 0x1e2   : > { %v4288_v39 = vpop.f32.mrf.mxu0 }
 0x1e3   : > { %v5937_v15 = vadd.f32 %v4288_v39, %v5825_v1  ;;  %v2137_v39 = vadd.f32 %v5718_v54, %v5714_v28  ;;  %v2636_v43 = vadd.f32 %v5846_v63, %v2380_v31  ;;  %v2138_v54 = vadd.f32 %v5727_v61, %v5723_v4  ;;  %v5974_v31 = vpop.f32.mrf.mxu1 }
 0x1e4   : > { %v5941_v29 = vpop.f32.mrf.mxu0  ;;  %v2141_v61 = vadd.f32 %v5736_v58, %v5732_v25  ;;  %v2142_v25 = vadd.f32 %v5745_v12, %v5741_v9  ;;  %v2645_v9 = vadd.f32 %v5881_v47, %v5858_v35 }
 0x1e5   : > { %v2383_v52 = vadd.f32 %v5848_v32, %v2137_v39  ;;  %v2384_v24 = vadd.f32 %v5855_v45, %v2138_v54  ;;  %v2641_v32 = vadd.f32 %v5853_v22, %v5844_v49  ;;  %v5987_v58 = vpop.f32.mrf.mxu1 }
 0x1e6   : > { %v4347_v33 = vpop.f32.mrf.mxu0  ;;  %v2387_v49 = vadd.f32 %v5862_v2, %v2141_v61 }
 0x1e7   : > { %v2890_v55 = vadd.f32 %v4347_v33, %v2637_v21  ;;  %v2639_v17 = vadd.f32 %v5860_v14, %v2383_v52  ;;  %v5997_v12 = vpop.f32.mrf.mxu1 }
 0x1e8   : > { %v2761_v38 = vpop.f32.mrf.mxu0  ;;  %v2643_v2 = vadd.f32 %v5888_v62, %v2387_v49 }
 0x1e9   : > { %v2888_v1 = vadd.f32 %v2761_v38, %v2635_v41  ;;  %v2929_v21 = vadd.f32 %v5956_v46, %v2890_v55 }
 0x1ea   : > { %v4348_v59 = vpop.f32.mrf.mxu0 }
 0x1eb   : > { %v2927_v42 = vadd.f32 %v5956_v46, %v2888_v1  ;;  %v2891_v23 = vadd.f32 %v4348_v59, %v2638_v53  ;;  %v2961_v14 = vmax.f32 %v2929_v21, 0.0  ;;  %v2642_v53 = vadd.f32 %v5867_v0, %v5851_v26 }
 0x1ec   : > { %v2764_v28 = vpop.f32.mrf.mxu0  ;;  %v2145_v21 = vadd.f32 %v5754_v6, %v5750_v44  ;;  %v2146_v44 = vadd.f32 %v5763_v57, %v5759_v11  ;;  %v6011_v6 = vpop.f32.mrf.mxu1  ;;  %v2649_v11 = vadd.f32 %v5909_v10, %v5872_v8 }
 0x1ed   : > { %v2959_v41 = vmax.f32 %v2927_v42, 0.0  ;;  %v2889_v33 = vadd.f32 %v2764_v28, %v2636_v43  ;;  %v2930_v39 = vadd.f32 %v5956_v46, %v2891_v23  ;;  %v2640_v43 = vadd.f32 %v5874_v27, %v2384_v24 }
 0x1ee   : > { %v4351_v38 = vpop.f32.mrf.mxu0  ;;  %v2391_v35 = vadd.f32 %v5876_v30, %v2145_v21  ;;  %v6021_v57 = vpop.f32.mrf.mxu1 }
 0x1ef   : > { %v2928_v63 = vadd.f32 %v5956_v46, %v2889_v33  ;;  %4381 = vmatprep.mubr.msk.f32.mxu1 %vm3000_vm3, %v2959_v41  ;;  %v2894_v59 = vadd.f32 %v4351_v38, %v2641_v32  ;;  %v2962_v42 = vmax.f32 %v2930_v39, 0.0  ;;  %v2388_v41 = vadd.f32 %v5869_v37, %v2142_v25 }
 0x1f0   : > { %v2777_v4 = vpop.f32.mrf.mxu0  ;;  %v2646_v32 = vadd.f32 %v5895_v36, %v5865_v56  ;;  %v2647_v30 = vadd.f32 %v5916_v19, %v2391_v35  ;;  %v6348_v35 = vld [vmem:[#allocation13_spill] sm:$0xff] }
 0x1f1   : > { %v2960_v1 = vmax.f32 %v2928_v63, 0.0  ;;  %v2892_v55 = vadd.f32 %v2777_v4, %v2639_v17  ;;  %v2933_v27 = vadd.f32 %v5956_v46, %v2894_v59  ;;  %v2644_v47 = vadd.f32 %v5902_v18, %v2388_v41 }
 0x1f2   : > { %v4352_v45 = vpop.f32.mrf.mxu0 }
 0x1f3   : > { %v2931_v22 = vadd.f32 %v5956_v46, %v2892_v55  ;;  %4382 = vmatmul.mubr.msk.f32.vlgmr.msra.gmra.mxu1 %vm3000_vm3, %v2960_v1  ;;  %v2895_v54 = vadd.f32 %v4352_v45, %v2642_v53  ;;  %v2965_v37 = vmax.f32 %v2933_v27, 0.0  ;;  %v2149_v53 = vadd.f32 %v5771_v5, %v5767_v60  ;;  %v6343_v60 = vld [vmem:[#allocation11_spill] sm:$0xff] }
 0x1f4   : > { %v2780_v52 = vpop.f32.mrf.mxu0  ;;  %4384 = vmatprep.mubr.msk.f32.mxu1 %vm3000_vm3, %v2961_v14  ;;  %v2392_v14 = vadd.f32 %v5883_v3, %v2146_v44  ;;  %v2150_v5 = vadd.f32 %v6343_v60, %v5775_v16  ;;  %v6345_v16 = vld [vmem:[#allocation5_spill] sm:$0xff] }
 0x1f5   : > { %v2963_v28 = vmax.f32 %v2931_v22, 0.0  ;;  %v2893_v0 = vadd.f32 %v2780_v52, %v2640_v43  ;;  %v2934_v38 = vadd.f32 %v5956_v46, %v2895_v54  ;;  %v2650_v52 = vadd.f32 %v5923_v50, %v5879_v51 }
 0x1f6   : > { %v4355_v26 = vpop.f32.mrf.mxu0  ;;  %v2648_v10 = vadd.f32 %v5930_v40, %v2392_v14  ;;  %v2395_v8 = vadd.f32 %v5890_v34, %v2149_v53  ;;  %v6352_v53 = vld [vmem:[#allocation22_spill] sm:$0xff] }
 0x1f7   : > { %v2932_v23 = vadd.f32 %v5956_v46, %v2893_v0  ;;  %4385 = vmatmul.mubr.msk.f32.gmra.mxu1 %vm3000_vm3, %v2962_v42  ;;  %v2898_v24 = vadd.f32 %v4355_v26, %v2645_v9  ;;  %v2966_v39 = vmax.f32 %v2934_v38, 0.0  ;;  %v2653_v9 = vadd.f32 %v5939_v48, %v6345_v16  ;;  %v6346_v38 = vld [vmem:[#allocation12_spill] sm:$0xff] }
 0x1f8   : > { %v2793_v33 = vpop.f32.mrf.mxu0  ;;  %4387 = vmatprep.mubr.msk.f32.mxu1 %vm3000_vm3, %v2963_v28  ;;  %v6035_v28 = vpop.f32.mrf.mxu1  ;;  %v2651_v34 = vadd.f32 %v5949_v7, %v2395_v8  ;;  %v6349_v48 = vld [vmem:[#allocation8_spill] sm:$0xff] }
 0x1f9   : > { %v2964_v62 = vmax.f32 %v2932_v23, 0.0  ;;  %v2896_v17 = vadd.f32 %v2793_v33, %v2643_v2  ;;  %v2937_v18 = vadd.f32 %v5956_v46, %v2898_v24  ;;  %v6344_v2 = vld [vmem:[#allocation16_spill] sm:$0xff] }
 0x1fa   : > { %v4356_v63 = vpop.f32.mrf.mxu0  ;;  %v2396_v41 = vadd.f32 %v6344_v2, %v2150_v5  ;;  %v2604_v33 = vpop.f32.mrf.mxu1  ;;  %v6359_v2 = vld [vmem:[#allocation4_spill] sm:$0xff] }
 0x1fb   : > { %v2935_v4 = vadd.f32 %v5956_v46, %v2896_v17  ;;  %4388 = vmatmul.mubr.msk.f32.gmra.mxu1 %vm3000_vm3, %v2964_v62  ;;  %v2899_v55 = vadd.f32 %v4356_v63, %v2646_v32  ;;  %v2969_v3 = vmax.f32 %v2937_v18, 0.0  ;;  %v6347_v62 = vld [vmem:[#allocation15_spill] sm:$0xff] }
 0x1fc   : > { %v2796_v61 = vpop.f32.mrf.mxu0  ;;  %4390 = vmatprep.mubr.msk.f32.mxu1 %vm3000_vm3, %v2965_v37  ;;  %v2153_v17 = vadd.f32 %v6347_v62, %v6346_v38  ;;  %v2652_v44 = vadd.f32 %v5974_v31, %v2396_v41  ;;  %v4328_v18 = vpop.f32.mrf.mxu1 }
 0x1fd   : > { %v2967_v1 = vmax.f32 %v2935_v4, 0.0  ;;  %v2897_v36 = vadd.f32 %v2796_v61, %v2644_v47  ;;  %v2938_v43 = vadd.f32 %v5956_v46, %v2899_v55  ;;  %v2654_v4 = vadd.f32 %v5963_v13, %v6348_v35  ;;  %v6351_v55 = vld [vmem:[#allocation19_spill] sm:$0xff]  ;;  %v6361_v35 = vld [vmem:[#allocation6_spill] sm:$0xff] }
 0x1fe   : > { %v4359_v56 = vpop.f32.mrf.mxu0  ;;  %v2399_v61 = vadd.f32 %v6349_v48, %v2153_v17 }
 0x1ff   : > { %v2936_v59 = vadd.f32 %v5956_v46, %v2897_v36  ;;  %4391 = vmatmul.mubr.msk.f32.gmra.mxu1 %vm3000_vm3, %v2966_v39  ;;  %v2902_v22 = vadd.f32 %v4359_v56, %v2649_v11  ;;  %v2970_v0 = vmax.f32 %v2938_v43, 0.0 }
 0x200   : > { %v2809_v45 = vpop.f32.mrf.mxu0  ;;  %4393 = vmatprep.mubr.msk.f32.mxu1 %vm3000_vm3, %v2967_v1  ;;  %v6350_v1 = vld [vmem:[#allocation18_spill] sm:$0xff] }
 0x201   : > { %v2968_v19 = vmax.f32 %v2936_v59, 0.0  ;;  %v2900_v49 = vadd.f32 %v2809_v45, %v2647_v30  ;;  %v2941_v50 = vadd.f32 %v5956_v46, %v2902_v22  ;;  %v2154_v36 = vadd.f32 %v6351_v55, %v6350_v1  ;;  %v2607_v22 = vpop.f32.mrf.mxu1  ;;  %v6363_v55 = vld [vmem:[#allocation25_spill] sm:$0xff] }
 0x202   : > { %v4360_v25 = vpop.f32.mrf.mxu0  ;;  %v2655_v45 = vadd.f32 %v5997_v12, %v2399_v61 }
 0x203   : > { %v2939_v42 = vadd.f32 %v5956_v46, %v2900_v49  ;;  %4394 = vmatmul.mubr.msk.f32.gmra.mxu1 %vm3000_vm3, %v2968_v19  ;;  %v2903_v26 = vadd.f32 %v4360_v25, %v2650_v52  ;;  %v2973_v63 = vmax.f32 %v2941_v50, 0.0  ;;  %v2400_v43 = vadd.f32 %v6352_v53, %v2154_v36  ;;  %v6353_v49 = vld [vmem:[#allocation7_spill] sm:$0xff]  ;;  %v6354_v52 = vld [vmem:[#allocation20_spill] sm:$0xff] }
 0x204   : > { %v2812_v54 = vpop.f32.mrf.mxu0  ;;  %4396 = vmatprep.mubr.msk.f32.mxu1 %vm3000_vm3, %v2969_v3  ;;  %v2657_v3 = vadd.f32 %v5987_v58, %v6353_v49  ;;  %v6357_v58 = vld [vmem:[#allocation24_spill] sm:$0xff]  ;;  %v2662_v36 = vadd.f32 %v4328_v18, %v6363_v55 }
 0x205   : > { %v2971_v27 = vmax.f32 %v2939_v42, 0.0  ;;  %v2901_v51 = vadd.f32 %v2812_v54, %v2648_v10  ;;  %v2942_v37 = vadd.f32 %v5956_v46, %v2903_v26  ;;  %v6355_v10 = vld [vmem:[#allocation23_spill] sm:$0xff] }
 0x206   : > { %v4363_v40 = vpop.f32.mrf.mxu0  ;;  %v2157_v8 = vadd.f32 %v6355_v10, %v6354_v52  ;;  %v6367_v10 = vld [vmem:[#allocation26_spill] sm:$0xff] }
 0x207   : > { %v2940_v23 = vadd.f32 %v5956_v46, %v2901_v51  ;;  %4397 = vmatmul.mubr.msk.f32.gmra.mxu1 %vm3000_vm3, %v2970_v0  ;;  %v2906_v32 = vadd.f32 %v4363_v40, %v2653_v9  ;;  %v2974_v30 = vmax.f32 %v2942_v37, 0.0  ;;  %v2656_v51 = vadd.f32 %v6021_v57, %v2400_v43 }
 0x208   : > { %v2825_v21 = vpop.f32.mrf.mxu0  ;;  %4399 = vmatprep.mubr.msk.f32.mxu1 %vm3000_vm3, %v2971_v27  ;;  %v6356_v27 = vld [vmem:[#allocation9_spill] sm:$0xff]  ;;  %v2403_v50 = vadd.f32 %v6357_v58, %v2157_v8 }
 0x209   : > { %v2972_v24 = vmax.f32 %v2940_v23, 0.0  ;;  %v2904_v7 = vadd.f32 %v2825_v21, %v2651_v34  ;;  %v2945_v13 = vadd.f32 %v5956_v46, %v2906_v32  ;;  %v2658_v26 = vadd.f32 %v6011_v6, %v6356_v27  ;;  %v6358_v34 = vld [vmem:[#allocation21_spill] sm:$0xff]  ;;  %v4331_v23 = vpop.f32.mrf.mxu1 }
 0x20a   : > { %v4364_v47 = vpop.f32.mrf.mxu0  ;;  %v2158_v41 = vadd.f32 %v6359_v2, %v6358_v34  ;;  %v2659_v17 = vadd.f32 %v2604_v33, %v2403_v50  ;;  %v2665_v8 = vadd.f32 %v4331_v23, %v6367_v10 }
 0x20b   : > { %v2943_v39 = vadd.f32 %v5956_v46, %v2904_v7  ;;  %4400 = vmatmul.mubr.msk.f32.gmra.mxu1 %vm3000_vm3, %v2972_v24  ;;  %v2907_v59 = vadd.f32 %v4364_v47, %v2654_v4  ;;  %v2977_v5 = vmax.f32 %v2945_v13, 0.0  ;;  %v6360_v7 = vld [vmem:[#allocation10_spill] sm:$0xff]  ;;  %v2620_v32 = vpop.f32.mrf.mxu1 }
 0x20c   : > { %v2828_v56 = vpop.f32.mrf.mxu0  ;;  %4402 = vmatprep.mubr.msk.f32.mxu1 %vm3000_vm3, %v2973_v63  ;;  %v2404_v37 = vadd.f32 %v5925_v20, %v2158_v41  ;;  %v2661_v63 = vadd.f32 %v6035_v28, %v6360_v7  ;;  %v6362_v4 = vld [vmem:[#allocation14_spill] sm:$0xff] }
 0x20d   : > { %v2975_v14 = vmax.f32 %v2943_v39, 0.0  ;;  %v2905_v11 = vadd.f32 %v2828_v56, %v2652_v44  ;;  %v2946_v42 = vadd.f32 %v5956_v46, %v2907_v59  ;;  %v2161_v44 = vadd.f32 %v6362_v4, %v6361_v35  ;;  %v6365_v59 = vld [vmem:[#allocation17_spill] sm:$0xff] }
 0x20e   : > { %v4367_v31 = vpop.f32.mrf.mxu0  ;;  %v2660_v56 = vadd.f32 %v2607_v22, %v2404_v37 }
 0x20f   : > { %v2944_v19 = vadd.f32 %v5956_v46, %v2905_v11  ;;  %4403 = vmatmul.mubr.msk.f32.gmra.mxu1 %vm3000_vm3, %v2974_v30  ;;  %v2910_v54 = vadd.f32 %v4367_v31, %v2657_v3  ;;  %v2978_v9 = vmax.f32 %v2946_v42, 0.0  ;;  %v6364_v30 = vld [vmem:[#allocation27_spill] sm:$0xff]  ;;  %v4332_v31 = vpop.f32.mrf.mxu1 }
 0x210   : > { %v2841_v25 = vpop.f32.mrf.mxu0  ;;  %4405 = vmatprep.mubr.msk.f32.mxu1 %vm3000_vm3, %v2975_v14  ;;  %v2407_v14 = vadd.f32 %v6364_v30, %v2161_v44  ;;  %v6366_v11 = vld [vmem:[#allocation3_spill] sm:$0xff] }
 0x211   : > { %v2976_v60 = vmax.f32 %v2944_v19, 0.0  ;;  %v2908_v12 = vadd.f32 %v2841_v25, %v2655_v45  ;;  %v2949_v6 = vadd.f32 %v5956_v46, %v2910_v54  ;;  %v2162_v13 = vadd.f32 %v6366_v11, %v6365_v59  ;;  %v2623_v42 = vpop.f32.mrf.mxu1 }
 0x212   : > { %v4368_v0 = vpop.f32.mrf.mxu0  ;;  %v2663_v22 = vadd.f32 %v2620_v32, %v2407_v14 }
 0x213   : > { %v2947_v40 = vadd.f32 %v5956_v46, %v2908_v12  ;;  %4406 = vmatmul.mubr.msk.f32.gmra.mxu1 %vm3000_vm3, %v2976_v60  ;;  %v2911_v38 = vadd.f32 %v4368_v0, %v2658_v26  ;;  %v2981_v39 = vmax.f32 %v2949_v6, 0.0  ;;  %v2408_v25 = vadd.f32 %v5941_v29, %v2162_v13 }
 0x214   : > { %v2844_v16 = vpop.f32.mrf.mxu0  ;;  %4408 = vmatprep.mubr.msk.f32.mxu1 %vm3000_vm3, %v2977_v5  ;;  %v2666_v12 = vadd.f32 %v4332_v31, %v5937_v15 }
 0x215   : > { %v2979_v21 = vmax.f32 %v2947_v40, 0.0  ;;  %v2909_v62 = vadd.f32 %v2844_v16, %v2656_v51  ;;  %v2950_v48 = vadd.f32 %v5956_v46, %v2911_v38  ;;  %v2664_v29 = vadd.f32 %v2623_v42, %v2408_v25 }
 0x216   : > { %v4371_v57 = vpop.f32.mrf.mxu0 }
 0x217   : > { %v2948_v24 = vadd.f32 %v5956_v46, %v2909_v62  ;;  %4409 = vmatmul.mubr.msk.f32.gmra.mxu1 %vm3000_vm3, %v2978_v9  ;;  %v2914_v20 = vadd.f32 %v4371_v57, %v2661_v63  ;;  %v2982_v53 = vmax.f32 %v2950_v48, 0.0  ;;  %v6115_v62 = vld [vmem:[#allocation2] ss:$0 sm:$0xff] }
 0x218   : > { %v2857_v47 = vpop.f32.mrf.mxu0  ;;  %4411 = vmatprep.mubr.msk.f32.mxu1 %vm3000_vm3, %v2979_v21 }
 0x219   : > { %v2980_v61 = vmax.f32 %v2948_v24, 0.0  ;;  %v2912_v33 = vadd.f32 %v2857_v47, %v2659_v17  ;;  %v2953_v18 = vadd.f32 %v5956_v46, %v2914_v20 }
 0x21a   : > { %v4372_v1 = vpop.f32.mrf.mxu0 }
 0x21b   : > { %v2951_v28 = vadd.f32 %v5956_v46, %v2912_v33  ;;  %4412 = vmatmul.mubr.msk.f32.gmra.mxu1 %vm3000_vm3, %v2980_v61  ;;  %v2915_v19 = vadd.f32 %v4372_v1, %v2662_v36  ;;  %v2985_v27 = vmax.f32 %v2953_v18, 0.0 }
 0x21c   : > { %v2860_v45 = vpop.f32.mrf.mxu0  ;;  %4414 = vmatprep.mubr.msk.f32.mxu1 %vm3000_vm3, %v2981_v39 }
 0x21d   : > { %v2983_v43 = vmax.f32 %v2951_v28, 0.0  ;;  %v2913_v49 = vadd.f32 %v2860_v45, %v2660_v56  ;;  %v2954_v5 = vadd.f32 %v5956_v46, %v2915_v19 }
 0x21e   : > { %v4375_v3 = vpop.f32.mrf.mxu0 }
 0x21f   : > { %v2952_v52 = vadd.f32 %v5956_v46, %v2913_v49  ;;  %4415 = vmatmul.mubr.msk.f32.gmra.mxu1 %vm3000_vm3, %v2982_v53  ;;  %v2918_v26 = vadd.f32 %v4375_v3, %v2665_v8  ;;  %v2986_v34 = vmax.f32 %v2954_v5, 0.0 }
 0x220   : > { %v2873_v60 = vpop.f32.mrf.mxu0  ;;  %4417 = vmatprep.mubr.msk.f32.mxu1 %vm3000_vm3, %v2983_v43 }
 0x221   : > { %v2984_v54 = vmax.f32 %v2952_v52, 0.0  ;;  %v2916_v0 = vadd.f32 %v2873_v60, %v2663_v22  ;;  %v2957_v23 = vadd.f32 %v5956_v46, %v2918_v26 }
 0x222   : > { %v4376_v51 = vpop.f32.mrf.mxu0 }
 0x223   : > { %v2955_v58 = vadd.f32 %v5956_v46, %v2916_v0  ;;  %v2919_v50 = vadd.f32 %v4376_v51, %v2666_v12  ;;  %4418 = vmatmul.mubr.msk.f32.gmra.mxu1 %vm3000_vm3, %v2984_v54  ;;  %v2989_v21 = vmax.f32 %v2957_v23, 0.0 }
 0x224   : > { %v2876_v40 = vpop.f32.mrf.mxu0  ;;  %4420 = vmatprep.mubr.msk.f32.mxu1 %vm3000_vm3, %v2985_v27 }
 0x225   : > { %v2987_v2 = vmax.f32 %v2955_v58, 0.0  ;;  %v2958_v15 = vadd.f32 %v5956_v46, %v2919_v50  ;;  %v2917_v41 = vadd.f32 %v2876_v40, %v2664_v29 }
 0x227   : > { %v2956_v16 = vadd.f32 %v5956_v46, %v2917_v41  ;;  %4421 = vmatmul.mubr.msk.f32.gmra.mxu1 %vm3000_vm3, %v2986_v34  ;;  %v2990_v38 = vmax.f32 %v2958_v15, 0.0 }
 0x228   : > { %4423 = vmatprep.mubr.msk.f32.mxu1 %vm3000_vm3, %v2987_v2 }
 0x229   : > { %v2988_v9 = vmax.f32 %v2956_v16, 0.0 }
 0x22b   : > { %4424 = vmatmul.mubr.msk.f32.gmra.mxu1 %vm3000_vm3, %v2988_v9 }
 0x22c   : > { %4426 = vmatprep.mubr.msk.f32.mxu1 %vm3000_vm3, %v2989_v21 }
 0x22f   : > { %4427 = vmatmul.mubr.msk.f32.gmra.mxu1 %vm3000_vm3, %v2990_v38 }
 0x2b3   : > { %v4383_v46 = vpop.f32.mrf.mxu1 }
 0x2b4   : > { %v3169_v6 = vadd.f32 %v4383_v46, %v6115_v62 }
 0x2b5   : > { %v3163_v57 = vpop.f32.mrf.mxu1 }
 0x2b6   : > { %3324 = vst.msk [vmem:[%s6120_s25 + $0x8] sm:$0xff] %vm3322_vm4, %v3169_v6  ;;  %v3164_v17 = vadd.f32 %v6115_v62, %v3163_v57 }
 0x2b7   : > { %v4386_v37 = vpop.f32.mrf.mxu1 }
 0x2b8   : > { %3323 = vst.msk [vmem:[%s6120_s25] sm:$0xff] %vm3322_vm4, %v3164_v17  ;;  %v3179_v24 = vadd.f32 %v4386_v37, %v6115_v62 }
 0x2b9   : > { %v3173_v7 = vpop.f32.mrf.mxu1 }
 0x2ba   : > { %3326 = vst.msk [vmem:[%s6120_s25 + $0x18] sm:$0xff] %vm3322_vm4, %v3179_v24  ;;  %v3174_v63 = vadd.f32 %v6115_v62, %v3173_v7 }
 0x2bb   : > { %v4389_v32 = vpop.f32.mrf.mxu1 }
 0x2bc   : > { %3325 = vst.msk [vmem:[%s6120_s25 + $0x10] sm:$0xff] %vm3322_vm4, %v3174_v63  ;;  %v3189_v47 = vadd.f32 %v4389_v32, %v6115_v62 }
 0x2bd   : > { %v3183_v35 = vpop.f32.mrf.mxu1 }
 0x2be   : > { %3328 = vst.msk [vmem:[%s6120_s25 + $0x28] sm:$0xff] %vm3322_vm4, %v3189_v47  ;;  %v3184_v4 = vadd.f32 %v6115_v62, %v3183_v35 }
 0x2bf   : > { %v4392_v44 = vpop.f32.mrf.mxu1 }
 0x2c0   : > { %3327 = vst.msk [vmem:[%s6120_s25 + $0x20] sm:$0xff] %vm3322_vm4, %v3184_v4  ;;  %v3199_v48 = vadd.f32 %v4392_v44, %v6115_v62 }
 0x2c1   : > { %v3193_v61 = vpop.f32.mrf.mxu1 }
 0x2c2   : > { %3330 = vst.msk [vmem:[%s6120_s25 + $0x38] sm:$0xff] %vm3322_vm4, %v3199_v48  ;;  %v3194_v33 = vadd.f32 %v6115_v62, %v3193_v61 }
 0x2c3   : > { %v4395_v39 = vpop.f32.mrf.mxu1 }
 0x2c4   : > { %3329 = vst.msk [vmem:[%s6120_s25 + $0x30] sm:$0xff] %vm3322_vm4, %v3194_v33  ;;  %v3209_v20 = vadd.f32 %v4395_v39, %v6115_v62 }
 0x2c5   : > { %v3203_v1 = vpop.f32.mrf.mxu1 }
 0x2c6   : > { %3332 = vst.msk [vmem:[%s6120_s25 + $0x48] sm:$0xff] %vm3322_vm4, %v3209_v20  ;;  %v3204_v55 = vadd.f32 %v6115_v62, %v3203_v1 }
 0x2c7   : > { %v4398_v36 = vpop.f32.mrf.mxu1 }
 0x2c8   : > { %3331 = vst.msk [vmem:[%s6120_s25 + $0x40] sm:$0xff] %vm3322_vm4, %v3204_v55  ;;  %v3219_v56 = vadd.f32 %v4398_v36, %v6115_v62 }
 0x2c9   : > { %v3213_v30 = vpop.f32.mrf.mxu1 }
 0x2ca   : > { %3334 = vst.msk [vmem:[%s6120_s25 + $0x58] sm:$0xff] %vm3322_vm4, %v3219_v56  ;;  %v3214_v14 = vadd.f32 %v6115_v62, %v3213_v30 }
 0x2cb   : > { %v4401_v28 = vpop.f32.mrf.mxu1 }
 0x2cc   : > { %3333 = vst.msk [vmem:[%s6120_s25 + $0x50] sm:$0xff] %vm3322_vm4, %v3214_v14  ;;  %v3229_v59 = vadd.f32 %v4401_v28, %v6115_v62 }
 0x2cd   : > { %v3223_v11 = vpop.f32.mrf.mxu1 }
 0x2ce   : > { %3336 = vst.msk [vmem:[%s6120_s25 + $0x68] sm:$0xff] %vm3322_vm4, %v3229_v59  ;;  %v3224_v13 = vadd.f32 %v6115_v62, %v3223_v11 }
 0x2cf   : > { %v4404_v31 = vpop.f32.mrf.mxu1 }
 0x2d0   : > { %3335 = vst.msk [vmem:[%s6120_s25 + $0x60] sm:$0xff] %vm3322_vm4, %v3224_v13  ;;  %v3239_v45 = vadd.f32 %v4404_v31, %v6115_v62 }
 0x2d1   : > { %v3233_v53 = vpop.f32.mrf.mxu1 }
 0x2d2   : > { %3338 = vst.msk [vmem:[%s6120_s25 + $0x78] sm:$0xff] %vm3322_vm4, %v3239_v45  ;;  %v3234_v43 = vadd.f32 %v6115_v62, %v3233_v53 }
 0x2d3   : > { %v4407_v19 = vpop.f32.mrf.mxu1 }
 0x2d4   : > { %3337 = vst.msk [vmem:[%s6120_s25 + $0x70] sm:$0xff] %vm3322_vm4, %v3234_v43  ;;  %v3249_v49 = vadd.f32 %v4407_v19, %v6115_v62 }
 0x2d5   : > { %v3243_v18 = vpop.f32.mrf.mxu1 }
 0x2d6   : > { %3340 = vst.msk [vmem:[%s6120_s25 + $0x88] sm:$0xff] %vm3322_vm4, %v3249_v49  ;;  %v3244_v3 = vadd.f32 %v6115_v62, %v3243_v18 }
 0x2d7   : > { %v4410_v22 = vpop.f32.mrf.mxu1 }
 0x2d8   : > { %3339 = vst.msk [vmem:[%s6120_s25 + $0x80] sm:$0xff] %vm3322_vm4, %v3244_v3  ;;  %v3259_v25 = vadd.f32 %v4410_v22, %v6115_v62 }
 0x2d9   : > { %v3253_v52 = vpop.f32.mrf.mxu1 }
 0x2da   : > { %3342 = vst.msk [vmem:[%s6120_s25 + $0x98] sm:$0xff] %vm3322_vm4, %v3259_v25  ;;  %v3254_v10 = vadd.f32 %v6115_v62, %v3253_v52 }
 0x2db   : > { %v4413_v8 = vpop.f32.mrf.mxu1 }
 0x2dc   : > { %3341 = vst.msk [vmem:[%s6120_s25 + $0x90] sm:$0xff] %vm3322_vm4, %v3254_v10  ;;  %v3269_v42 = vadd.f32 %v4413_v8, %v6115_v62 }
 0x2dd   : > { %v3263_v60 = vpop.f32.mrf.mxu1 }
 0x2de   : > { %3344 = vst.msk [vmem:[%s6120_s25 + $0xa8] sm:$0xff] %vm3322_vm4, %v3269_v42  ;;  %v3264_v12 = vadd.f32 %v6115_v62, %v3263_v60 }
 0x2df   : > { %v4416_v5 = vpop.f32.mrf.mxu1 }
 0x2e0   : > { %3343 = vst.msk [vmem:[%s6120_s25 + $0xa0] sm:$0xff] %vm3322_vm4, %v3264_v12  ;;  %v3279_v54 = vadd.f32 %v4416_v5, %v6115_v62 }
 0x2e1   : > { %v3273_v0 = vpop.f32.mrf.mxu1 }
 0x2e2   : > { %3346 = vst.msk [vmem:[%s6120_s25 + $0xb8] sm:$0xff] %vm3322_vm4, %v3279_v54  ;;  %v3274_v27 = vadd.f32 %v6115_v62, %v3273_v0 }
 0x2e3   : > { %v4419_v26 = vpop.f32.mrf.mxu1 }
 0x2e4   : > { %3345 = vst.msk [vmem:[%s6120_s25 + $0xb0] sm:$0xff] %vm3322_vm4, %v3274_v27  ;;  %v3289_v51 = vadd.f32 %v4419_v26, %v6115_v62 }
 0x2e5   : > { %v3283_v29 = vpop.f32.mrf.mxu1 }
 0x2e6   : > { %3348 = vst.msk [vmem:[%s6120_s25 + $0xc8] sm:$0xff] %vm3322_vm4, %v3289_v51  ;;  %v3284_v58 = vadd.f32 %v6115_v62, %v3283_v29 }
 0x2e7   : > { %v4422_v50 = vpop.f32.mrf.mxu1 }
 0x2e8   : > { %3347 = vst.msk [vmem:[%s6120_s25 + $0xc0] sm:$0xff] %vm3322_vm4, %v3284_v58  ;;  %v3299_v40 = vadd.f32 %v4422_v50, %v6115_v62 }
 0x2e9   : > { %v3293_v34 = vpop.f32.mrf.mxu1 }
 0x2ea   : > { %3350 = vst.msk [vmem:[%s6120_s25 + $0xd8] sm:$0xff] %vm3322_vm4, %v3299_v40  ;;  %v3294_v2 = vadd.f32 %v6115_v62, %v3293_v34 }
 0x2eb   : > { %v4425_v15 = vpop.f32.mrf.mxu1 }
 0x2ec   : > { %3349 = vst.msk [vmem:[%s6120_s25 + $0xd0] sm:$0xff] %vm3322_vm4, %v3294_v2  ;;  %v3309_v41 = vadd.f32 %v4425_v15, %v6115_v62 }
 0x2ed   : > { %v3303_v23 = vpop.f32.mrf.mxu1 }
 0x2ee   : > { %3352 = vst.msk [vmem:[%s6120_s25 + $0xe8] sm:$0xff] %vm3322_vm4, %v3309_v41  ;;  %v3304_v16 = vadd.f32 %v6115_v62, %v3303_v23 }
 0x2ef   : > { %v4428_v9 = vpop.f32.mrf.mxu1 }
 0x2f0   : > { %3351 = vst.msk [vmem:[%s6120_s25 + $0xe0] sm:$0xff] %vm3322_vm4, %v3304_v16  ;;  %v3319_v21 = vadd.f32 %v4428_v9, %v6115_v62 }
 0x2f1   : > { %v3313_v38 = vpop.f32.mrf.mxu1 }
 0x2f2   : > { %3354 = vst.msk [vmem:[%s6120_s25 + $0xf8] sm:$0xff] %vm3322_vm4, %v3319_v21  ;;  %v3314_v46 = vadd.f32 %v6115_v62, %v3313_v38 }
 0x2f4   : > { %3353 = vst.msk [vmem:[%s6120_s25 + $0xf0] sm:$0xff] %vm3322_vm4, %v3314_v46 }
 0x2f5 PF: > { %s17_s20 = sadd.s32 1, %s4498_s20  }
 0x2f6   : > { %p14_p4 = scmp.ge.s32.totalorder %s17_s20, 4  }
 0x2f8   :  { %16 = sbr.rel (!%p14_p4) target bundleno = 3 (0x3), region = 78 }

</bundles_post_ra>
